<compile_context>
chip_gen: v6e
topology: v6e:2x2x1
jax: 0.10.0
libtpu: 0.0.40
codegen_flags: <defaults>
</compile_context>

<pallas_src>
import functools

import jax
import jax.numpy as jnp
from jax.experimental import pallas as pl
from jax.experimental.pallas import tpu as pltpu


# ----------------------------------------------------------------------------
# Small helpers (glue)
# ----------------------------------------------------------------------------
def _round_up(x, m):
    return (x + m - 1) // m * m


def _pick_row_tile(m, row_bytes, budget=2 * 1024 * 1024):
    """Largest row-tile (multiple of 8) that divides m and fits the budget."""
    for t in (2048, 1024, 512, 256, 128, 64, 32, 16, 8):
        if m % t == 0 and t * row_bytes <= budget:
            return t
    return m  # single full block (always layout-legal)


def _extract_patches(x, kh, kw, stride, pad, pad_val):
    """x: NHWC -> (N, Ho, Wo, kh*kw, C) window extraction (XLA glue).

    Only used for the one-off stem conv (7x7/s2) and stem max-pool.
    """
    n, h, w, c = x.shape
    xp = jnp.pad(x, ((0, 0), (pad, pad), (pad, pad), (0, 0)),
                 constant_values=pad_val)
    ho = (h + 2 * pad - kh) // stride + 1
    wo = (w + 2 * pad - kw) // stride + 1
    cols = []
    for i in range(kh):
        for j in range(kw):
            cols.append(xp[:, i:i + ho * stride:stride,
                           j:j + wo * stride:stride, :])
    patches = jnp.stack(cols, axis=3)  # (N, Ho, Wo, kh*kw, C)
    return patches, ho, wo


# ----------------------------------------------------------------------------
# Kernel 1: tiled matmul + bias (stem im2col conv and final FC).
# ----------------------------------------------------------------------------
def _matmul_bias_kernel(x_ref, w_ref, b_ref, o_ref):
    xb = x_ref[...].astype(jnp.bfloat16)
    acc = jnp.dot(xb, w_ref[...], preferred_element_type=jnp.float32)
    o_ref[...] = acc + b_ref[...]


def matmul_bias(x, w, b):
    """x:(M,K) f32 @ w:(K,N) + b:(N,) -> (M,N) f32."""
    m, k = x.shape
    n = w.shape[1]
    tm = _pick_row_tile(m, k * 4)
    wb = w.astype(jnp.bfloat16)
    bb = b.reshape(1, n).astype(jnp.float32)
    return pl.pallas_call(
        _matmul_bias_kernel,
        out_shape=jax.ShapeDtypeStruct((m, n), jnp.float32),
        grid_spec=pltpu.PrefetchScalarGridSpec(
            num_scalar_prefetch=0,
            grid=(m // tm,),
            in_specs=[
                pl.BlockSpec((tm, k), lambda i: (i, 0)),
                pl.BlockSpec((k, n), lambda i: (0, 0)),
                pl.BlockSpec((1, n), lambda i: (0, 0)),
            ],
            out_specs=pl.BlockSpec((tm, n), lambda i: (i, 0)),
        ),
        compiler_params=pltpu.CompilerParams(
            dimension_semantics=("parallel",),
            vmem_limit_bytes=48 * 1024 * 1024),
    )(x, wb, bb)


def conv2d_im2col(x, w_hwio, b, *, stride, pad):
    """Stem conv only (7x7/s2): XLA im2col + Pallas matmul."""
    kh, kw, cin, cout = w_hwio.shape
    patches, ho, wo = _extract_patches(x, kh, kw, stride, pad, 0.0)
    n = x.shape[0]
    m = n * ho * wo
    xmat = patches.reshape(m, kh * kw * cin)
    wmat = w_hwio.reshape(kh * kw * cin, cout)
    return matmul_bias(xmat, wmat, b).reshape(n, ho, wo, cout)


# ----------------------------------------------------------------------------
# Kernel 2: per-channel sum / sum-of-squares reduction (BN batch stats).
# Resident (1,C) accumulators, reduction axis "arbitrary".
# ----------------------------------------------------------------------------
def _stats_kernel(x_ref, s1_ref, s2_ref):
    @pl.when(pl.program_id(0) == 0)
    def _():
        s1_ref[...] = jnp.zeros_like(s1_ref)
        s2_ref[...] = jnp.zeros_like(s2_ref)

    x = x_ref[...]
    s1_ref[...] += jnp.sum(x, axis=0, keepdims=True)
    s2_ref[...] += jnp.sum(x * x, axis=0, keepdims=True)


def channel_stats(x):
    """x: (..., C) -> per-channel (sum, sum^2), each shaped (1, C) f32."""
    c = x.shape[-1]
    x2 = x.reshape(-1, c)
    m = x2.shape[0]
    tm = _pick_row_tile(m, c * 4)
    s1, s2 = pl.pallas_call(
        _stats_kernel,
        out_shape=(jax.ShapeDtypeStruct((1, c), jnp.float32),
                   jax.ShapeDtypeStruct((1, c), jnp.float32)),
        grid_spec=pltpu.PrefetchScalarGridSpec(
            num_scalar_prefetch=0,
            grid=(m // tm,),
            in_specs=[pl.BlockSpec((tm, c), lambda i: (i, 0))],
            out_specs=(pl.BlockSpec((1, c), lambda i: (0, 0)),
                       pl.BlockSpec((1, c), lambda i: (0, 0))),
        ),
        compiler_params=pltpu.CompilerParams(
            dimension_semantics=("arbitrary",)),
    )(x2)
    return s1, s2


def bn_scale_shift(s1, s2, count, gamma, beta, eps=1e-5):
    """Fold batch stats + affine params into per-channel scale/shift (1,C)."""
    mean = s1 / float(count)
    var = jnp.maximum(s2 / float(count) - mean * mean, 0.0)  # clamp >= 0
    scale = gamma.reshape(1, -1) * jax.lax.rsqrt(var + eps)
    shift = beta.reshape(1, -1) - mean * scale
    return scale, shift


# ----------------------------------------------------------------------------
# Kernel 3: standalone BN-apply + ReLU (stem only; elsewhere it is fused).
# ----------------------------------------------------------------------------
def _apply_relu_kernel(x_ref, sc_ref, sh_ref, o_ref):
    o_ref[...] = jnp.maximum(x_ref[...] * sc_ref[...] + sh_ref[...], 0.0)


def bn_apply_relu(x, scale, shift):
    n, h, w, c = x.shape
    m = n * h * w
    x2 = x.reshape(m, c)
    tm = _pick_row_tile(m, c * 4)
    y = pl.pallas_call(
        _apply_relu_kernel,
        out_shape=jax.ShapeDtypeStruct((m, c), jnp.float32),
        grid_spec=pltpu.PrefetchScalarGridSpec(
            num_scalar_prefetch=0,
            grid=(m // tm,),
            in_specs=[
                pl.BlockSpec((tm, c), lambda i: (i, 0)),
                pl.BlockSpec((1, c), lambda i: (0, 0)),
                pl.BlockSpec((1, c), lambda i: (0, 0)),
            ],
            out_specs=pl.BlockSpec((tm, c), lambda i: (i, 0)),
        ),
        compiler_params=pltpu.CompilerParams(
            dimension_semantics=("parallel",)),
    )(x2, scale, shift)
    return y.reshape(n, h, w, c)


# ----------------------------------------------------------------------------
# Kernel 4: fused BN + ReLU + 3x3/s1/p1 conv (dense-block conv_block).
# One grid step per sample.  The normalized activation is built in a
# zero-initialized padded VMEM scratch and consumed by 9 shifted-view bf16
# MXU matmuls -- it never reaches HBM.
# ----------------------------------------------------------------------------
def _bn_relu_conv3x3_kernel(x_ref, sc_ref, sh_ref, w_ref, b_ref, o_ref,
                            pad_ref, *, h, w, wp, l_out):
    # Zero the padded scratch (border stays zero == conv zero-padding).
    pad_ref[...] = jnp.zeros_like(pad_ref)

    # BN apply + ReLU on the raw flattened sample.
    y = jnp.maximum(x_ref[0] * sc_ref[...] + sh_ref[...], 0.0)

    # Scatter valid rows into the interior of the padded flat map.
    for i in range(h):
        dst = (i + 1) * wp + 1
        pad_ref[dst:dst + w, :] = y[i * w:(i + 1) * w, :]

    # 9 accumulated matmuls over row-offset views of the padded map.
    cout = o_ref.shape[-1]
    acc = jnp.zeros((l_out, cout), jnp.float32)
    t = 0
    for di in range(3):
        for dj in range(3):
            off = di * wp + dj
            lhs = pad_ref[off:off + l_out, :].astype(jnp.bfloat16)
            acc = acc + jnp.dot(lhs, w_ref[t],
                                preferred_element_type=jnp.float32)
            t += 1
    o_ref[0] = acc + b_ref[...]


def bn_relu_conv3x3(x, scale, shift, w_hwio, b):
    """relu(x*scale+shift) -> conv 3x3, stride 1, pad 1.  x: NHWC f32."""
    n, h, w, cin = x.shape
    cout = w_hwio.shape[-1]
    wp, hp = w + 2, h + 2
    r = hp * wp
    o_max = 2 * wp + 2
    l_out = _round_up(h * wp, 8)
    r_pad = _round_up(max(r, l_out + o_max), 8)
    m8 = _round_up(h * w, 8)

    xf = x.reshape(n, h * w, cin)
    if m8 > h * w:
        xf = jnp.pad(xf, ((0, 0), (0, m8 - h * w), (0, 0)))

    wt = w_hwio.reshape(9, cin, cout).astype(jnp.bfloat16)
    bt = b.reshape(1, cout).astype(jnp.float32)
    kernel = functools.partial(_bn_relu_conv3x3_kernel,
                               h=h, w=w, wp=wp, l_out=l_out)

    out = pl.pallas_call(
        kernel,
        out_shape=jax.ShapeDtypeStruct((n, l_out, cout), jnp.float32),
        grid_spec=pltpu.PrefetchScalarGridSpec(
            num_scalar_prefetch=0,
            grid=(n,),
            in_specs=[
                pl.BlockSpec((1, m8, cin), lambda i: (i, 0, 0)),
                pl.BlockSpec((1, cin), lambda i: (0, 0)),
                pl.BlockSpec((1, cin), lambda i: (0, 0)),
                pl.BlockSpec((9, cin, cout), lambda i: (0, 0, 0)),
                pl.BlockSpec((1, cout), lambda i: (0, 0)),
            ],
            out_specs=pl.BlockSpec((1, l_out, cout), lambda i: (i, 0, 0)),
            scratch_shapes=[pltpu.VMEM((r_pad, cin), jnp.float32)],
        ),
        compiler_params=pltpu.CompilerParams(
            dimension_semantics=("parallel",),
            vmem_limit_bytes=64 * 1024 * 1024),
    )(xf, scale, shift, wt, bt)

    # Valid outputs: flat index oh*wp + ow for oh < h, ow < w.
    out = out[:, :h * wp, :].reshape(n, h, wp, cout)[:, :, :w, :]
    return out


# ----------------------------------------------------------------------------
# Kernel 5: fused BN + ReLU + 1x1 conv (transition block).
# ----------------------------------------------------------------------------
def _bn_relu_conv1x1_kernel(x_ref, sc_ref, sh_ref, w_ref, b_ref, o_ref):
    y = jnp.maximum(x_ref[...] * sc_ref[...] + sh_ref[...], 0.0)
    yb = y.astype(jnp.bfloat16)
    o_ref[...] = jnp.dot(yb, w_ref[...],
                         preferred_element_type=jnp.float32) + b_ref[...]


def bn_relu_conv1x1(x, scale, shift, w_hwio, b):
    n, h, w, cin = x.shape
    cout = w_hwio.shape[-1]
    m = n * h * w
    x2 = x.reshape(m, cin)
    tm = _pick_row_tile(m, cin * 4)
    wt = w_hwio.reshape(cin, cout).astype(jnp.bfloat16)
    bt = b.reshape(1, cout).astype(jnp.float32)
    out = pl.pallas_call(
        _bn_relu_conv1x1_kernel,
        out_shape=jax.ShapeDtypeStruct((m, cout), jnp.float32),
        grid_spec=pltpu.PrefetchScalarGridSpec(
            num_scalar_prefetch=0,
            grid=(m // tm,),
            in_specs=[
                pl.BlockSpec((tm, cin), lambda i: (i, 0)),
                pl.BlockSpec((1, cin), lambda i: (0, 0)),
                pl.BlockSpec((1, cin), lambda i: (0, 0)),
                pl.BlockSpec((cin, cout), lambda i: (0, 0)),
                pl.BlockSpec((1, cout), lambda i: (0, 0)),
            ],
            out_specs=pl.BlockSpec((tm, cout), lambda i: (i, 0)),
        ),
        compiler_params=pltpu.CompilerParams(
            dimension_semantics=("parallel",),
            vmem_limit_bytes=48 * 1024 * 1024),
    )(x2, scale, shift, wt, bt)
    return out.reshape(n, h, w, cout)


# ----------------------------------------------------------------------------
# Kernel 6: fused BN + ReLU + global average pool ("last" block head).
# ----------------------------------------------------------------------------
def _bn_relu_gap_kernel(x_ref, sc_ref, sh_ref, o_ref):
    y = jnp.maximum(x_ref[0] * sc_ref[...] + sh_ref[...], 0.0)
    o_ref[0] = jnp.mean(y, axis=0, keepdims=True)


def bn_relu_global_avg(x, scale, shift):
    n, h, w, c = x.shape
    x3 = x.reshape(n, h * w, c)
    out = pl.pallas_call(
        _bn_relu_gap_kernel,
        out_shape=jax.ShapeDtypeStruct((n, 1, c), jnp.float32),
        grid_spec=pltpu.PrefetchScalarGridSpec(
            num_scalar_prefetch=0,
            grid=(n,),
            in_specs=[
                pl.BlockSpec((1, h * w, c), lambda i: (i, 0, 0)),
                pl.BlockSpec((1, c), lambda i: (0, 0)),
                pl.BlockSpec((1, c), lambda i: (0, 0)),
            ],
            out_specs=pl.BlockSpec((1, 1, c), lambda i: (i, 0, 0)),
        ),
        compiler_params=pltpu.CompilerParams(
            dimension_semantics=("parallel",)),
    )(x3, scale, shift)
    return out.reshape(n, c)


# ----------------------------------------------------------------------------
# Kernels 7-8: pooling
# ----------------------------------------------------------------------------
def _max_pool_kernel(x_ref, o_ref):
    o_ref[...] = jnp.max(x_ref[...], axis=1)


def max_pool_3x3_s2_p1(x):
    n, h, w, c = x.shape
    patches, ho, wo = _extract_patches(x, 3, 3, 2, 1, -1e30)
    m = n * ho * wo
    pr = patches.reshape(m, 9, c)
    tm = _pick_row_tile(m, 9 * c * 4)
    out = pl.pallas_call(
        _max_pool_kernel,
        out_shape=jax.ShapeDtypeStruct((m, c), jnp.float32),
        grid_spec=pltpu.PrefetchScalarGridSpec(
            num_scalar_prefetch=0,
            grid=(m // tm,),
            in_specs=[pl.BlockSpec((tm, 9, c), lambda i: (i, 0, 0))],
            out_specs=pl.BlockSpec((tm, c), lambda i: (i, 0)),
        ),
        compiler_params=pltpu.CompilerParams(
            dimension_semantics=("parallel",)),
    )(pr)
    return out.reshape(n, ho, wo, c)


def _avg_pool_kernel(x_ref, o_ref):
    # x block: (1, 2, W2, 2, C) -- row/col parity split via free reshape.
    s = x_ref[0, 0] + x_ref[0, 1]            # (W2, 2, C) vertical pair sum
    o_ref[0] = jnp.sum(s, axis=1) * 0.25     # horizontal pair sum -> (W2, C)


def avg_pool_2x2_s2(x):
    n, h, w, c = x.shape
    h2, w2 = h // 2, w // 2
    x5 = x.reshape(n * h2, 2, w2, 2, c)      # free row-major reshape
    out = pl.pallas_call(
        _avg_pool_kernel,
        out_shape=jax.ShapeDtypeStruct((n * h2, w2, c), jnp.float32),
        grid_spec=pltpu.PrefetchScalarGridSpec(
            num_scalar_prefetch=0,
            grid=(n * h2,),
            in_specs=[pl.BlockSpec((1, 2, w2, 2, c),
                                   lambda i: (i, 0, 0, 0, 0))],
            out_specs=pl.BlockSpec((1, w2, c), lambda i: (i, 0, 0)),
        ),
        compiler_params=pltpu.CompilerParams(
            dimension_semantics=("parallel",)),
    )(x5)
    return out.reshape(n, h2, w2, c)


# ----------------------------------------------------------------------------
# Parameter init (deterministic, mirrors the PyTorch module's shapes)
# ----------------------------------------------------------------------------
def init_params(key, arch, growth_rate, num_classes, in_ch=3):
    params = {}
    ctr = [0]

    def nk():
        ctr[0] += 1
        return jax.random.fold_in(key, ctr[0])

    def conv_init(kh, kw, cin, cout):
        fan_in = kh * kw * cin
        w = jax.random.normal(nk(), (kh, kw, cin, cout),
                              jnp.float32) / jnp.sqrt(fan_in)
        b = jax.random.normal(nk(), (cout,), jnp.float32) * 0.01
        return w, b

    # b1: Conv2d(3 -> 64, k=7, s=2, p=3) + BN + ReLU + MaxPool(3, s=2, p=1)
    params["b1_conv"] = conv_init(7, 7, in_ch, 64)
    params["b1_bn"] = (jnp.ones(64, jnp.float32), jnp.zeros(64, jnp.float32))

    c = 64
    for i, num_conv in enumerate(arch):
        for j in range(num_conv):
            params[f"db{i}_{j}_bn"] = (jnp.ones(c, jnp.float32),
                                       jnp.zeros(c, jnp.float32))
            params[f"db{i}_{j}_conv"] = conv_init(3, 3, c, growth_rate)
            c += growth_rate
        if i != len(arch) - 1:
            out_c = c // 2
            params[f"tr{i}_bn"] = (jnp.ones(c, jnp.float32),
                                   jnp.zeros(c, jnp.float32))
            params[f"tr{i}_conv"] = conv_init(1, 1, c, out_c)
            c = out_c

    params["last_bn"] = (jnp.ones(c, jnp.float32), jnp.zeros(c, jnp.float32))
    wfc = jax.random.normal(nk(), (c, num_classes), jnp.float32) / jnp.sqrt(c)
    bfc = jax.random.normal(nk(), (num_classes,), jnp.float32) * 0.01
    params["fc"] = (wfc, bfc)
    return params


# ----------------------------------------------------------------------------
# DenseNet forward
# ----------------------------------------------------------------------------
def densenet_forward(x_nchw, params, arch, growth_rate):
    x = jnp.transpose(x_nchw, (0, 2, 3, 1)).astype(jnp.float32)  # NCHW -> NHWC

    # b1: Conv(7x7,s2,p3) + BN + ReLU + MaxPool(3x3,s2,p1)
    w, b = params["b1_conv"]
    x = conv2d_im2col(x, w, b, stride=2, pad=3)
    gm, bt = params["b1_bn"]
    s1, s2 = channel_stats(x)
    cnt = x.shape[0] * x.shape[1] * x.shape[2]
    scale, shift = bn_scale_shift(s1, s2, cnt, gm, bt)
    x = bn_apply_relu(x, scale, shift)
    x = max_pool_3x3_s2_p1(x)

    # Cached per-channel BN batch stats of the current feature map.  Within a
    # dense block existing channels never change, so stats only have to be
    # computed for newly produced channel groups.
    s1, s2 = channel_stats(x)
    cnt = x.shape[0] * x.shape[1] * x.shape[2]

    for i, num_conv in enumerate(arch):
        for j in range(num_conv):
            gm, bt = params[f"db{i}_{j}_bn"]
            scale, shift = bn_scale_shift(s1, s2, cnt, gm, bt)
            w, b = params[f"db{i}_{j}_conv"]
            y = bn_relu_conv3x3(x, scale, shift, w, b)   # fused BN+ReLU+conv
            ys1, ys2 = channel_stats(y)                  # stats of new chans
            x = jnp.concatenate([x, y], axis=-1)         # TODO(synk): slab
            s1 = jnp.concatenate([s1, ys1], axis=-1)
            s2 = jnp.concatenate([s2, ys2], axis=-1)
        if i != len(arch) - 1:
            gm, bt = params[f"tr{i}_bn"]
            scale, shift = bn_scale_shift(s1, s2, cnt, gm, bt)
            w, b = params[f"tr{i}_conv"]
            x = bn_relu_conv1x1(x, scale, shift, w, b)   # fused BN+ReLU+1x1
            x = avg_pool_2x2_s2(x)
            s1, s2 = channel_stats(x)                    # fresh map -> fresh stats
            cnt = x.shape[0] * x.shape[1] * x.shape[2]

    # last: BN + ReLU + AdaptiveAvgPool(1,1) + Flatten + Linear
    gm, bt = params["last_bn"]
    scale, shift = bn_scale_shift(s1, s2, cnt, gm, bt)
    feat = bn_relu_global_avg(x, scale, shift)           # (N, C)
    wfc, bfc = params["fc"]
    logits = matmul_bias(feat, wfc, bfc)                 # (N, num_classes)
    return logits


# ----------------------------------------------------------------------------
if __name__ == "__main__":
    # Small configuration consistent with the module's constructor args.
    arch = (2, 2)
    growth_rate = 16
    num_classes = 10

    key = jax.random.PRNGKey(0)
    x = jax.random.normal(jax.random.fold_in(key, 123), (2, 3, 32, 32),
                          jnp.float32)
    params = init_params(jax.random.fold_in(key, 7), arch, growth_rate,
                         num_classes)

    fwd = jax.jit(functools.partial(densenet_forward, arch=arch,
                                    growth_rate=growth_rate))
    logits = fwd(x, params)
    logits = jax.block_until_ready(logits)

    assert logits.shape == (2, num_classes), logits.shape
    assert bool(jnp.all(jnp.isfinite(logits)))
    print("KERNEL_OK")
</pallas_src>

<mosaic_0001>
module attributes {stable_mosaic.version = 11 : i64} {
  func.func @_matmul_bias_kernel(%arg0: i32, %arg1: memref<512x147xf32, #tpu.memory_space<vmem>>, %arg2: memref<147x64xbf16, #tpu.memory_space<vmem>>, %arg3: memref<1x64xf32, #tpu.memory_space<vmem>>, %arg4: memref<512x64xf32, #tpu.memory_space<vmem>>) attributes {dimension_semantics = [#tpu.dimension_semantics<parallel>], iteration_bounds = array<i64: 1>, scalar_prefetch = 0 : i64, scratch_operands = 0 : i64, tpu.core_type = #tpu.core_type<tc>, window_params = [{transform_indices = @transform_0, window_bounds = array<i64: 512, 147>}, {pipeline_mode = #tpu.pipeline_mode<synchronous>, transform_indices = @transform_1, window_bounds = array<i64: 147, 64>}, {pipeline_mode = #tpu.pipeline_mode<synchronous>, transform_indices = @transform_2, window_bounds = array<i64: 1, 64>}, {transform_indices = @transform_3, window_bounds = array<i64: 512, 64>}]} {
    %c0 = arith.constant 0 : index
    %c0_0 = arith.constant 0 : index
    %0 = vector.load %arg1[%c0, %c0_0] : memref<512x147xf32, #tpu.memory_space<vmem>>, vector<512x147xf32>
    %1 = arith.truncf %0 : vector<512x147xf32> to vector<512x147xbf16>
    %c0_1 = arith.constant 0 : index
    %c0_2 = arith.constant 0 : index
    %2 = vector.load %arg2[%c0_1, %c0_2] : memref<147x64xbf16, #tpu.memory_space<vmem>>, vector<147x64xbf16>
    %cst = arith.constant dense<0.000000e+00> : vector<512x64xf32>
    %3 = tpu.matmul %1, %2, %cst {dimension_numbers = #tpu.dot_dimension_numbers<[1], [0], [0], [1], [0, 0, 1, 1], [], []>} : vector<512x147xbf16>, vector<147x64xbf16>, vector<512x64xf32> -> vector<512x64xf32>
    %c0_3 = arith.constant 0 : index
    %c0_4 = arith.constant 0 : index
    %4 = vector.load %arg3[%c0_3, %c0_4] : memref<1x64xf32, #tpu.memory_space<vmem>>, vector<1x64xf32>
    %5 = vector.broadcast %4 : vector<1x64xf32> to vector<512x64xf32>
    %6 = arith.addf %3, %5 : vector<512x64xf32>
    %c0_5 = arith.constant 0 : index
    %c0_6 = arith.constant 0 : index
    %7 = vector.load %arg4[%c0_5, %c0_6] : memref<512x64xf32, #tpu.memory_space<vmem>>, vector<512x64xf32>
    tpu.vector_store %arg4[%c0_5, %c0_6], %6 {strides = array<i32>} : memref<512x64xf32, #tpu.memory_space<vmem>>, vector<512x64xf32>,
    return
  }
  func.func @transform_0(%arg0: i32) -> (i32, i32) {
    %c0_i32 = arith.constant 0 : i32
    %c0_i32_0 = arith.constant 0 : i32
    return %arg0, %c0_i32 : i32, i32
  }
  func.func @transform_1(%arg0: i32) -> (i32, i32) {
    %c0_i32 = arith.constant 0 : i32
    %c0_i32_0 = arith.constant 0 : i32
    %c0_i32_1 = arith.constant 0 : i32
    return %c0_i32, %c0_i32_0 : i32, i32
  }
  func.func @transform_2(%arg0: i32) -> (i32, i32) {
    %c0_i32 = arith.constant 0 : i32
    %c0_i32_0 = arith.constant 0 : i32
    %c0_i32_1 = arith.constant 0 : i32
    return %c0_i32, %c0_i32_0 : i32, i32
  }
  func.func @transform_3(%arg0: i32) -> (i32, i32) {
    %c0_i32 = arith.constant 0 : i32
    %c0_i32_0 = arith.constant 0 : i32
    return %arg0, %c0_i32 : i32, i32
  }
}

module attributes {stable_mosaic.version = 11 : i64} {
  func.func @_stats_kernel(%arg0: i32, %arg1: memref<512x64xf32, #tpu.memory_space<vmem>>, %arg2: memref<1x64xf32, #tpu.memory_space<vmem>>, %arg3: memref<1x64xf32, #tpu.memory_space<vmem>>) attributes {dimension_semantics = [#tpu.dimension_semantics<arbitrary>], iteration_bounds = array<i64: 1>, scalar_prefetch = 0 : i64, scratch_operands = 0 : i64, tpu.core_type = #tpu.core_type<tc>, window_params = [{transform_indices = @transform_0, window_bounds = array<i64: 512, 64>}, {pipeline_mode = #tpu.pipeline_mode<synchronous>, transform_indices = @transform_1, window_bounds = array<i64: 1, 64>}, {pipeline_mode = #tpu.pipeline_mode<synchronous>, transform_indices = @transform_2, window_bounds = array<i64: 1, 64>}]} {
    %c0_i32 = arith.constant 0 : i32
    %0 = arith.cmpi eq, %arg0, %c0_i32 : i32
    %1 = arith.extui %0 : i1 to i32
    %c0_i32_0 = arith.constant 0 : i32
    %2 = arith.cmpi ne, %1, %c0_i32_0 : i32
    scf.if %2 {
      %cst_11 = arith.constant 0.000000e+00 : f32
      %15 = vector.broadcast %cst_11 : f32 to vector<1x64xf32>
      %c0_12 = arith.constant 0 : index
      %c0_13 = arith.constant 0 : index
      %16 = vector.load %arg2[%c0_12, %c0_13] : memref<1x64xf32, #tpu.memory_space<vmem>>, vector<1x64xf32>
      tpu.vector_store %arg2[%c0_12, %c0_13], %15 {strides = array<i32>} : memref<1x64xf32, #tpu.memory_space<vmem>>, vector<1x64xf32>,
      %cst_14 = arith.constant 0.000000e+00 : f32
      %17 = vector.broadcast %cst_14 : f32 to vector<1x64xf32>
      %c0_15 = arith.constant 0 : index
      %c0_16 = arith.constant 0 : index
      %18 = vector.load %arg3[%c0_15, %c0_16] : memref<1x64xf32, #tpu.memory_space<vmem>>, vector<1x64xf32>
      tpu.vector_store %arg3[%c0_15, %c0_16], %17 {strides = array<i32>} : memref<1x64xf32, #tpu.memory_space<vmem>>, vector<1x64xf32>,
    } else {
    }
    %c0 = arith.constant 0 : index
    %c0_1 = arith.constant 0 : index
    %3 = vector.load %arg1[%c0, %c0_1] : memref<512x64xf32, #tpu.memory_space<vmem>>, vector<512x64xf32>
    %c0_2 = arith.constant 0 : index
    %c0_3 = arith.constant 0 : index
    %4 = vector.load %arg2[%c0_2, %c0_3] : memref<1x64xf32, #tpu.memory_space<vmem>>, vector<1x64xf32>
    %cst = arith.constant dense<0.000000e+00> : vector<64xf32>
    %5 = vector.multi_reduction <add>, %3, %cst [0] : vector<512x64xf32> to vector<64xf32>
    %6 = vector.shape_cast %5 : vector<64xf32> to vector<1x64xf32>
    %7 = arith.addf %4, %6 : vector<1x64xf32>
    %c0_4 = arith.constant 0 : index
    %c0_5 = arith.constant 0 : index
    %8 = vector.load %arg2[%c0_4, %c0_5] : memref<1x64xf32, #tpu.memory_space<vmem>>, vector<1x64xf32>
    tpu.vector_store %arg2[%c0_4, %c0_5], %7 {strides = array<i32>} : memref<1x64xf32, #tpu.memory_space<vmem>>, vector<1x64xf32>,
    %c0_6 = arith.constant 0 : index
    %c0_7 = arith.constant 0 : index
    %9 = vector.load %arg3[%c0_6, %c0_7] : memref<1x64xf32, #tpu.memory_space<vmem>>, vector<1x64xf32>
    %10 = arith.mulf %3, %3 : vector<512x64xf32>
    %cst_8 = arith.constant dense<0.000000e+00> : vector<64xf32>
    %11 = vector.multi_reduction <add>, %10, %cst_8 [0] : vector<512x64xf32> to vector<64xf32>
    %12 = vector.shape_cast %11 : vector<64xf32> to vector<1x64xf32>
    %13 = arith.addf %9, %12 : vector<1x64xf32>
    %c0_9 = arith.constant 0 : index
    %c0_10 = arith.constant 0 : index
    %14 = vector.load %arg3[%c0_9, %c0_10] : memref<1x64xf32, #tpu.memory_space<vmem>>, vector<1x64xf32>
    tpu.vector_store %arg3[%c0_9, %c0_10], %13 {strides = array<i32>} : memref<1x64xf32, #tpu.memory_space<vmem>>, vector<1x64xf32>,
    return
  }
  func.func @transform_0(%arg0: i32) -> (i32, i32) {
    %c0_i32 = arith.constant 0 : i32
    %c0_i32_0 = arith.constant 0 : i32
    return %arg0, %c0_i32 : i32, i32
  }
  func.func @transform_1(%arg0: i32) -> (i32, i32) {
    %c0_i32 = arith.constant 0 : i32
    %c0_i32_0 = arith.constant 0 : i32
    %c0_i32_1 = arith.constant 0 : i32
    return %c0_i32, %c0_i32_0 : i32, i32
  }
  func.func @transform_2(%arg0: i32) -> (i32, i32) {
    %c0_i32 = arith.constant 0 : i32
    %c0_i32_0 = arith.constant 0 : i32
    %c0_i32_1 = arith.constant 0 : i32
    return %c0_i32, %c0_i32_0 : i32, i32
  }
}

module attributes {stable_mosaic.version = 11 : i64} {
  func.func @_apply_relu_kernel(%arg0: i32, %arg1: memref<512x64xf32, #tpu.memory_space<vmem>>, %arg2: memref<1x64xf32, #tpu.memory_space<vmem>>, %arg3: memref<1x64xf32, #tpu.memory_space<vmem>>, %arg4: memref<512x64xf32, #tpu.memory_space<vmem>>) attributes {dimension_semantics = [#tpu.dimension_semantics<parallel>], iteration_bounds = array<i64: 1>, scalar_prefetch = 0 : i64, scratch_operands = 0 : i64, tpu.core_type = #tpu.core_type<tc>, window_params = [{transform_indices = @transform_0, window_bounds = array<i64: 512, 64>}, {pipeline_mode = #tpu.pipeline_mode<synchronous>, transform_indices = @transform_1, window_bounds = array<i64: 1, 64>}, {pipeline_mode = #tpu.pipeline_mode<synchronous>, transform_indices = @transform_2, window_bounds = array<i64: 1, 64>}, {transform_indices = @transform_3, window_bounds = array<i64: 512, 64>}]} {
    %c0 = arith.constant 0 : index
    %c0_0 = arith.constant 0 : index
    %0 = vector.load %arg1[%c0, %c0_0] : memref<512x64xf32, #tpu.memory_space<vmem>>, vector<512x64xf32>
    %c0_1 = arith.constant 0 : index
    %c0_2 = arith.constant 0 : index
    %1 = vector.load %arg2[%c0_1, %c0_2] : memref<1x64xf32, #tpu.memory_space<vmem>>, vector<1x64xf32>
    %2 = vector.broadcast %1 : vector<1x64xf32> to vector<512x64xf32>
    %3 = arith.mulf %0, %2 : vector<512x64xf32>
    %c0_3 = arith.constant 0 : index
    %c0_4 = arith.constant 0 : index
    %4 = vector.load %arg3[%c0_3, %c0_4] : memref<1x64xf32, #tpu.memory_space<vmem>>, vector<1x64xf32>
    %5 = vector.broadcast %4 : vector<1x64xf32> to vector<512x64xf32>
    %6 = arith.addf %3, %5 : vector<512x64xf32>
    %cst = arith.constant 0.000000e+00 : f32
    %7 = vector.broadcast %cst : f32 to vector<512x64xf32>
    %8 = arith.maximumf %6, %7 : vector<512x64xf32>
    %c0_5 = arith.constant 0 : index
    %c0_6 = arith.constant 0 : index
    %9 = vector.load %arg4[%c0_5, %c0_6] : memref<512x64xf32, #tpu.memory_space<vmem>>, vector<512x64xf32>
    tpu.vector_store %arg4[%c0_5, %c0_6], %8 {strides = array<i32>} : memref<512x64xf32, #tpu.memory_space<vmem>>, vector<512x64xf32>,
    return
  }
  func.func @transform_0(%arg0: i32) -> (i32, i32) {
    %c0_i32 = arith.constant 0 : i32
    %c0_i32_0 = arith.constant 0 : i32
    return %arg0, %c0_i32 : i32, i32
  }
  func.func @transform_1(%arg0: i32) -> (i32, i32) {
    %c0_i32 = arith.constant 0 : i32
    %c0_i32_0 = arith.constant 0 : i32
    %c0_i32_1 = arith.constant 0 : i32
    return %c0_i32, %c0_i32_0 : i32, i32
  }
  func.func @transform_2(%arg0: i32) -> (i32, i32) {
    %c0_i32 = arith.constant 0 : i32
    %c0_i32_0 = arith.constant 0 : i32
    %c0_i32_1 = arith.constant 0 : i32
    return %c0_i32, %c0_i32_0 : i32, i32
  }
  func.func @transform_3(%arg0: i32) -> (i32, i32) {
    %c0_i32 = arith.constant 0 : i32
    %c0_i32_0 = arith.constant 0 : i32
    return %arg0, %c0_i32 : i32, i32
  }
}

module attributes {stable_mosaic.version = 11 : i64} {
  func.func @_max_pool_kernel(%arg0: i32, %arg1: memref<128x9x64xf32, #tpu.memory_space<vmem>>, %arg2: memref<128x64xf32, #tpu.memory_space<vmem>>) attributes {dimension_semantics = [#tpu.dimension_semantics<parallel>], iteration_bounds = array<i64: 1>, scalar_prefetch = 0 : i64, scratch_operands = 0 : i64, tpu.core_type = #tpu.core_type<tc>, window_params = [{transform_indices = @transform_0, window_bounds = array<i64: 128, 9, 64>}, {transform_indices = @transform_1, window_bounds = array<i64: 128, 64>}]} {
    %c0 = arith.constant 0 : index
    %c0_0 = arith.constant 0 : index
    %c0_1 = arith.constant 0 : index
    %0 = vector.load %arg1[%c0, %c0_0, %c0_1] : memref<128x9x64xf32, #tpu.memory_space<vmem>>, vector<128x9x64xf32>
    %cst = arith.constant dense<0xFF800000> : vector<128x64xf32>
    %1 = vector.multi_reduction <maximumf>, %0, %cst [1] : vector<128x9x64xf32> to vector<128x64xf32>
    %c0_2 = arith.constant 0 : index
    %c0_3 = arith.constant 0 : index
    %2 = vector.load %arg2[%c0_2, %c0_3] : memref<128x64xf32, #tpu.memory_space<vmem>>, vector<128x64xf32>
    tpu.vector_store %arg2[%c0_2, %c0_3], %1 {strides = array<i32>} : memref<128x64xf32, #tpu.memory_space<vmem>>, vector<128x64xf32>,
    return
  }
  func.func @transform_0(%arg0: i32) -> (i32, i32, i32) {
    %c0_i32 = arith.constant 0 : i32
    %c0_i32_0 = arith.constant 0 : i32
    %c0_i32_1 = arith.constant 0 : i32
    return %arg0, %c0_i32, %c0_i32_0 : i32, i32, i32
  }
  func.func @transform_1(%arg0: i32) -> (i32, i32) {
    %c0_i32 = arith.constant 0 : i32
    %c0_i32_0 = arith.constant 0 : i32
    return %arg0, %c0_i32 : i32, i32
  }
}

module attributes {stable_mosaic.version = 11 : i64} {
  func.func @_stats_kernel(%arg0: i32, %arg1: memref<128x64xf32, #tpu.memory_space<vmem>>, %arg2: memref<1x64xf32, #tpu.memory_space<vmem>>, %arg3: memref<1x64xf32, #tpu.memory_space<vmem>>) attributes {dimension_semantics = [#tpu.dimension_semantics<arbitrary>], iteration_bounds = array<i64: 1>, scalar_prefetch = 0 : i64, scratch_operands = 0 : i64, tpu.core_type = #tpu.core_type<tc>, window_params = [{transform_indices = @transform_0, window_bounds = array<i64: 128, 64>}, {pipeline_mode = #tpu.pipeline_mode<synchronous>, transform_indices = @transform_1, window_bounds = array<i64: 1, 64>}, {pipeline_mode = #tpu.pipeline_mode<synchronous>, transform_indices = @transform_2, window_bounds = array<i64: 1, 64>}]} {
    %c0_i32 = arith.constant 0 : i32
    %0 = arith.cmpi eq, %arg0, %c0_i32 : i32
    %1 = arith.extui %0 : i1 to i32
    %c0_i32_0 = arith.constant 0 : i32
    %2 = arith.cmpi ne, %1, %c0_i32_0 : i32
    scf.if %2 {
      %cst_11 = arith.constant 0.000000e+00 : f32
      %15 = vector.broadcast %cst_11 : f32 to vector<1x64xf32>
      %c0_12 = arith.constant 0 : index
      %c0_13 = arith.constant 0 : index
      %16 = vector.load %arg2[%c0_12, %c0_13] : memref<1x64xf32, #tpu.memory_space<vmem>>, vector<1x64xf32>
      tpu.vector_store %arg2[%c0_12, %c0_13], %15 {strides = array<i32>} : memref<1x64xf32, #tpu.memory_space<vmem>>, vector<1x64xf32>,
      %cst_14 = arith.constant 0.000000e+00 : f32
      %17 = vector.broadcast %cst_14 : f32 to vector<1x64xf32>
      %c0_15 = arith.constant 0 : index
      %c0_16 = arith.constant 0 : index
      %18 = vector.load %arg3[%c0_15, %c0_16] : memref<1x64xf32, #tpu.memory_space<vmem>>, vector<1x64xf32>
      tpu.vector_store %arg3[%c0_15, %c0_16], %17 {strides = array<i32>} : memref<1x64xf32, #tpu.memory_space<vmem>>, vector<1x64xf32>,
    } else {
    }
    %c0 = arith.constant 0 : index
    %c0_1 = arith.constant 0 : index
    %3 = vector.load %arg1[%c0, %c0_1] : memref<128x64xf32, #tpu.memory_space<vmem>>, vector<128x64xf32>
    %c0_2 = arith.constant 0 : index
    %c0_3 = arith.constant 0 : index
    %4 = vector.load %arg2[%c0_2, %c0_3] : memref<1x64xf32, #tpu.memory_space<vmem>>, vector<1x64xf32>
    %cst = arith.constant dense<0.000000e+00> : vector<64xf32>
    %5 = vector.multi_reduction <add>, %3, %cst [0] : vector<128x64xf32> to vector<64xf32>
    %6 = vector.shape_cast %5 : vector<64xf32> to vector<1x64xf32>
    %7 = arith.addf %4, %6 : vector<1x64xf32>
    %c0_4 = arith.constant 0 : index
    %c0_5 = arith.constant 0 : index
    %8 = vector.load %arg2[%c0_4, %c0_5] : memref<1x64xf32, #tpu.memory_space<vmem>>, vector<1x64xf32>
    tpu.vector_store %arg2[%c0_4, %c0_5], %7 {strides = array<i32>} : memref<1x64xf32, #tpu.memory_space<vmem>>, vector<1x64xf32>,
    %c0_6 = arith.constant 0 : index
    %c0_7 = arith.constant 0 : index
    %9 = vector.load %arg3[%c0_6, %c0_7] : memref<1x64xf32, #tpu.memory_space<vmem>>, vector<1x64xf32>
    %10 = arith.mulf %3, %3 : vector<128x64xf32>
    %cst_8 = arith.constant dense<0.000000e+00> : vector<64xf32>
    %11 = vector.multi_reduction <add>, %10, %cst_8 [0] : vector<128x64xf32> to vector<64xf32>
    %12 = vector.shape_cast %11 : vector<64xf32> to vector<1x64xf32>
    %13 = arith.addf %9, %12 : vector<1x64xf32>
    %c0_9 = arith.constant 0 : index
    %c0_10 = arith.constant 0 : index
    %14 = vector.load %arg3[%c0_9, %c0_10] : memref<1x64xf32, #tpu.memory_space<vmem>>, vector<1x64xf32>
    tpu.vector_store %arg3[%c0_9, %c0_10], %13 {strides = array<i32>} : memref<1x64xf32, #tpu.memory_space<vmem>>, vector<1x64xf32>,
    return
  }
  func.func @transform_0(%arg0: i32) -> (i32, i32) {
    %c0_i32 = arith.constant 0 : i32
    %c0_i32_0 = arith.constant 0 : i32
    return %arg0, %c0_i32 : i32, i32
  }
  func.func @transform_1(%arg0: i32) -> (i32, i32) {
    %c0_i32 = arith.constant 0 : i32
    %c0_i32_0 = arith.constant 0 : i32
    %c0_i32_1 = arith.constant 0 : i32
    return %c0_i32, %c0_i32_0 : i32, i32
  }
  func.func @transform_2(%arg0: i32) -> (i32, i32) {
    %c0_i32 = arith.constant 0 : i32
    %c0_i32_0 = arith.constant 0 : i32
    %c0_i32_1 = arith.constant 0 : i32
    return %c0_i32, %c0_i32_0 : i32, i32
  }
}

module attributes {stable_mosaic.version = 11 : i64} {
  func.func @_bn_relu_conv3x3_kernel(%arg0: i32, %arg1: memref<1x64x64xf32, #tpu.memory_space<vmem>>, %arg2: memref<1x64xf32, #tpu.memory_space<vmem>>, %arg3: memref<1x64xf32, #tpu.memory_space<vmem>>, %arg4: memref<9x64x16xbf16, #tpu.memory_space<vmem>>, %arg5: memref<1x16xf32, #tpu.memory_space<vmem>>, %arg6: memref<1x80x16xf32, #tpu.memory_space<vmem>>, %arg7: memref<104x64xf32, #tpu.memory_space<vmem>>) attributes {dimension_semantics = [#tpu.dimension_semantics<parallel>], iteration_bounds = array<i64: 2>, scalar_prefetch = 0 : i64, scratch_operands = 1 : i64, tpu.core_type = #tpu.core_type<tc>, window_params = [{transform_indices = @transform_0, window_bounds = array<i64: 1, 64, 64>}, {pipeline_mode = #tpu.pipeline_mode<synchronous>, transform_indices = @transform_1, window_bounds = array<i64: 1, 64>}, {pipeline_mode = #tpu.pipeline_mode<synchronous>, transform_indices = @transform_2, window_bounds = array<i64: 1, 64>}, {pipeline_mode = #tpu.pipeline_mode<synchronous>, transform_indices = @transform_3, window_bounds = array<i64: 9, 64, 16>}, {pipeline_mode = #tpu.pipeline_mode<synchronous>, transform_indices = @transform_4, window_bounds = array<i64: 1, 16>}, {transform_indices = @transform_5, window_bounds = array<i64: 1, 80, 16>}]} {
    %cst = arith.constant 0.000000e+00 : f32
    %0 = vector.broadcast %cst : f32 to vector<104x64xf32>
    %c0 = arith.constant 0 : index
    %c0_0 = arith.constant 0 : index
    %1 = vector.load %arg7[%c0, %c0_0] : memref<104x64xf32, #tpu.memory_space<vmem>>, vector<104x64xf32>
    tpu.vector_store %arg7[%c0, %c0_0], %0 {strides = array<i32>} : memref<104x64xf32, #tpu.memory_space<vmem>>, vector<104x64xf32>,
    %c0_1 = arith.constant 0 : index
    %c0_2 = arith.constant 0 : index
    %c0_3 = arith.constant 0 : index
    %2 = vector.load %arg1[%c0_1, %c0_2, %c0_3] : memref<1x64x64xf32, #tpu.memory_space<vmem>>, vector<1x64x64xf32>
    %3 = vector.shape_cast %2 : vector<1x64x64xf32> to vector<64x64xf32>
    %c0_4 = arith.constant 0 : index
    %c0_5 = arith.constant 0 : index
    %4 = vector.load %arg2[%c0_4, %c0_5] : memref<1x64xf32, #tpu.memory_space<vmem>>, vector<1x64xf32>
    %5 = vector.broadcast %4 : vector<1x64xf32> to vector<64x64xf32>
    %6 = arith.mulf %3, %5 : vector<64x64xf32>
    %c0_6 = arith.constant 0 : index
    %c0_7 = arith.constant 0 : index
    %7 = vector.load %arg3[%c0_6, %c0_7] : memref<1x64xf32, #tpu.memory_space<vmem>>, vector<1x64xf32>
    %8 = vector.broadcast %7 : vector<1x64xf32> to vector<64x64xf32>
    %9 = arith.addf %6, %8 : vector<64x64xf32>
    %cst_8 = arith.constant 0.000000e+00 : f32
    %10 = vector.broadcast %cst_8 : f32 to vector<64x64xf32>
    %11 = arith.maximumf %9, %10 : vector<64x64xf32>
    %12 = vector.extract_strided_slice %11 {offsets = [0, 0], sizes = [8, 64], strides = [1, 1]} : vector<64x64xf32> to vector<8x64xf32>
    %c11 = arith.constant 11 : index
    %c0_9 = arith.constant 0 : index
    %13 = vector.load %arg7[%c11, %c0_9] : memref<104x64xf32, #tpu.memory_space<vmem>>, vector<8x64xf32>
    tpu.vector_store %arg7[%c11, %c0_9], %12 {strides = array<i32>} : memref<104x64xf32, #tpu.memory_space<vmem>>, vector<8x64xf32>,
    %14 = vector.extract_strided_slice %11 {offsets = [8, 0], sizes = [8, 64], strides = [1, 1]} : vector<64x64xf32> to vector<8x64xf32>
    %c21 = arith.constant 21 : index
    %c0_10 = arith.constant 0 : index
    %15 = vector.load %arg7[%c21, %c0_10] : memref<104x64xf32, #tpu.memory_space<vmem>>, vector<8x64xf32>
    tpu.vector_store %arg7[%c21, %c0_10], %14 {strides = array<i32>} : memref<104x64xf32, #tpu.memory_space<vmem>>, vector<8x64xf32>,
    %16 = vector.extract_strided_slice %11 {offsets = [16, 0], sizes = [8, 64], strides = [1, 1]} : vector<64x64xf32> to vector<8x64xf32>
    %c31 = arith.constant 31 : index
    %c0_11 = arith.constant 0 : index
    %17 = vector.load %arg7[%c31, %c0_11] : memref<104x64xf32, #tpu.memory_space<vmem>>, vector<8x64xf32>
    tpu.vector_store %arg7[%c31, %c0_11], %16 {strides = array<i32>} : memref<104x64xf32, #tpu.memory_space<vmem>>, vector<8x64xf32>,
    %18 = vector.extract_strided_slice %11 {offsets = [24, 0], sizes = [8, 64], strides = [1, 1]} : vector<64x64xf32> to vector<8x64xf32>
    %c41 = arith.constant 41 : index
    %c0_12 = arith.constant 0 : index
    %19 = vector.load %arg7[%c41, %c0_12] : memref<104x64xf32, #tpu.memory_space<vmem>>, vector<8x64xf32>
    tpu.vector_store %arg7[%c41, %c0_12], %18 {strides = array<i32>} : memref<104x64xf32, #tpu.memory_space<vmem>>, vector<8x64xf32>,
    %20 = vector.extract_strided_slice %11 {offsets = [32, 0], sizes = [8, 64], strides = [1, 1]} : vector<64x64xf32> to vector<8x64xf32>
    %c51 = arith.constant 51 : index
    %c0_13 = arith.constant 0 : index
    %21 = vector.load %arg7[%c51, %c0_13] : memref<104x64xf32, #tpu.memory_space<vmem>>, vector<8x64xf32>
    tpu.vector_store %arg7[%c51, %c0_13], %20 {strides = array<i32>} : memref<104x64xf32, #tpu.memory_space<vmem>>, vector<8x64xf32>,
    %22 = vector.extract_strided_slice %11 {offsets = [40, 0], sizes = [8, 64], strides = [1, 1]} : vector<64x64xf32> to vector<8x64xf32>
    %c61 = arith.constant 61 : index
    %c0_14 = arith.constant 0 : index
    %23 = vector.load %arg7[%c61, %c0_14] : memref<104x64xf32, #tpu.memory_space<vmem>>, vector<8x64xf32>
    tpu.vector_store %arg7[%c61, %c0_14], %22 {strides = array<i32>} : memref<104x64xf32, #tpu.memory_space<vmem>>, vector<8x64xf32>,
    %24 = vector.extract_strided_slice %11 {offsets = [48, 0], sizes = [8, 64], strides = [1, 1]} : vector<64x64xf32> to vector<8x64xf32>
    %c71 = arith.constant 71 : index
    %c0_15 = arith.constant 0 : index
    %25 = vector.load %arg7[%c71, %c0_15] : memref<104x64xf32, #tpu.memory_space<vmem>>, vector<8x64xf32>
    tpu.vector_store %arg7[%c71, %c0_15], %24 {strides = array<i32>} : memref<104x64xf32, #tpu.memory_space<vmem>>, vector<8x64xf32>,
    %26 = vector.extract_strided_slice %11 {offsets = [56, 0], sizes = [8, 64], strides = [1, 1]} : vector<64x64xf32> to vector<8x64xf32>
    %c81 = arith.constant 81 : index
    %c0_16 = arith.constant 0 : index
    %27 = vector.load %arg7[%c81, %c0_16] : memref<104x64xf32, #tpu.memory_space<vmem>>, vector<8x64xf32>
    tpu.vector_store %arg7[%c81, %c0_16], %26 {strides = array<i32>} : memref<104x64xf32, #tpu.memory_space<vmem>>, vector<8x64xf32>,
    %cst_17 = arith.constant 0.000000e+00 : f32
    %28 = vector.broadcast %cst_17 : f32 to vector<80x16xf32>
    %c0_18 = arith.constant 0 : index
    %c0_19 = arith.constant 0 : index
    %29 = vector.load %arg7[%c0_18, %c0_19] : memref<104x64xf32, #tpu.memory_space<vmem>>, vector<80x64xf32>
    %30 = arith.truncf %29 : vector<80x64xf32> to vector<80x64xbf16>
    %c0_20 = arith.constant 0 : index
    %c0_21 = arith.constant 0 : index
    %c0_22 = arith.constant 0 : index
    %31 = vector.load %arg4[%c0_20, %c0_21, %c0_22] : memref<9x64x16xbf16, #tpu.memory_space<vmem>>, vector<1x64x16xbf16>
    %32 = vector.shape_cast %31 : vector<1x64x16xbf16> to vector<64x16xbf16>
    %cst_23 = arith.constant dense<0.000000e+00> : vector<80x16xf32>
    %33 = tpu.matmul %30, %32, %cst_23 {dimension_numbers = #tpu.dot_dimension_numbers<[1], [0], [0], [1], [0, 0, 1, 1], [], []>} : vector<80x64xbf16>, vector<64x16xbf16>, vector<80x16xf32> -> vector<80x16xf32>
    %34 = arith.addf %28, %33 : vector<80x16xf32>
    %c1 = arith.constant 1 : index
    %c0_24 = arith.constant 0 : index
    %35 = vector.load %arg7[%c1, %c0_24] : memref<104x64xf32, #tpu.memory_space<vmem>>, vector<80x64xf32>
    %36 = arith.truncf %35 : vector<80x64xf32> to vector<80x64xbf16>
    %c1_25 = arith.constant 1 : index
    %c0_26 = arith.constant 0 : index
    %c0_27 = arith.constant 0 : index
    %37 = vector.load %arg4[%c1_25, %c0_26, %c0_27] : memref<9x64x16xbf16, #tpu.memory_space<vmem>>, vector<1x64x16xbf16>
    %38 = vector.shape_cast %37 : vector<1x64x16xbf16> to vector<64x16xbf16>
    %cst_28 = arith.constant dense<0.000000e+00> : vector<80x16xf32>
    %39 = tpu.matmul %36, %38, %cst_28 {dimension_numbers = #tpu.dot_dimension_numbers<[1], [0], [0], [1], [0, 0, 1, 1], [], []>} : vector<80x64xbf16>, vector<64x16xbf16>, vector<80x16xf32> -> vector<80x16xf32>
    %40 = arith.addf %34, %39 : vector<80x16xf32>
    %c2 = arith.constant 2 : index
    %c0_29 = arith.constant 0 : index
    %41 = vector.load %arg7[%c2, %c0_29] : memref<104x64xf32, #tpu.memory_space<vmem>>, vector<80x64xf32>
    %42 = arith.truncf %41 : vector<80x64xf32> to vector<80x64xbf16>
    %c2_30 = arith.constant 2 : index
    %c0_31 = arith.constant 0 : index
    %c0_32 = arith.constant 0 : index
    %43 = vector.load %arg4[%c2_30, %c0_31, %c0_32] : memref<9x64x16xbf16, #tpu.memory_space<vmem>>, vector<1x64x16xbf16>
    %44 = vector.shape_cast %43 : vector<1x64x16xbf16> to vector<64x16xbf16>
    %cst_33 = arith.constant dense<0.000000e+00> : vector<80x16xf32>
    %45 = tpu.matmul %42, %44, %cst_33 {dimension_numbers = #tpu.dot_dimension_numbers<[1], [0], [0], [1], [0, 0, 1, 1], [], []>} : vector<80x64xbf16>, vector<64x16xbf16>, vector<80x16xf32> -> vector<80x16xf32>
    %46 = arith.addf %40, %45 : vector<80x16xf32>
    %c10 = arith.constant 10 : index
    %c0_34 = arith.constant 0 : index
    %47 = vector.load %arg7[%c10, %c0_34] : memref<104x64xf32, #tpu.memory_space<vmem>>, vector<80x64xf32>
    %48 = arith.truncf %47 : vector<80x64xf32> to vector<80x64xbf16>
    %c3 = arith.constant 3 : index
    %c0_35 = arith.constant 0 : index
    %c0_36 = arith.constant 0 : index
    %49 = vector.load %arg4[%c3, %c0_35, %c0_36] : memref<9x64x16xbf16, #tpu.memory_space<vmem>>, vector<1x64x16xbf16>
    %50 = vector.shape_cast %49 : vector<1x64x16xbf16> to vector<64x16xbf16>
    %cst_37 = arith.constant dense<0.000000e+00> : vector<80x16xf32>
    %51 = tpu.matmul %48, %50, %cst_37 {dimension_numbers = #tpu.dot_dimension_numbers<[1], [0], [0], [1], [0, 0, 1, 1], [], []>} : vector<80x64xbf16>, vector<64x16xbf16>, vector<80x16xf32> -> vector<80x16xf32>
    %52 = arith.addf %46, %51 : vector<80x16xf32>
    %c11_38 = arith.constant 11 : index
    %c0_39 = arith.constant 0 : index
    %53 = vector.load %arg7[%c11_38, %c0_39] : memref<104x64xf32, #tpu.memory_space<vmem>>, vector<80x64xf32>
    %54 = arith.truncf %53 : vector<80x64xf32> to vector<80x64xbf16>
    %c4 = arith.constant 4 : index
    %c0_40 = arith.constant 0 : index
    %c0_41 = arith.constant 0 : index
    %55 = vector.load %arg4[%c4, %c0_40, %c0_41] : memref<9x64x16xbf16, #tpu.memory_space<vmem>>, vector<1x64x16xbf16>
    %56 = vector.shape_cast %55 : vector<1x64x16xbf16> to vector<64x16xbf16>
    %cst_42 = arith.constant dense<0.000000e+00> : vector<80x16xf32>
    %57 = tpu.matmul %54, %56, %cst_42 {dimension_numbers = #tpu.dot_dimension_numbers<[1], [0], [0], [1], [0, 0, 1, 1], [], []>} : vector<80x64xbf16>, vector<64x16xbf16>, vector<80x16xf32> -> vector<80x16xf32>
    %58 = arith.addf %52, %57 : vector<80x16xf32>
    %c12 = arith.constant 12 : index
    %c0_43 = arith.constant 0 : index
    %59 = vector.load %arg7[%c12, %c0_43] : memref<104x64xf32, #tpu.memory_space<vmem>>, vector<80x64xf32>
    %60 = arith.truncf %59 : vector<80x64xf32> to vector<80x64xbf16>
    %c5 = arith.constant 5 : index
    %c0_44 = arith.constant 0 : index
    %c0_45 = arith.constant 0 : index
    %61 = vector.load %arg4[%c5, %c0_44, %c0_45] : memref<9x64x16xbf16, #tpu.memory_space<vmem>>, vector<1x64x16xbf16>
    %62 = vector.shape_cast %61 : vector<1x64x16xbf16> to vector<64x16xbf16>
    %cst_46 = arith.constant dense<0.000000e+00> : vector<80x16xf32>
    %63 = tpu.matmul %60, %62, %cst_46 {dimension_numbers = #tpu.dot_dimension_numbers<[1], [0], [0], [1], [0, 0, 1, 1], [], []>} : vector<80x64xbf16>, vector<64x16xbf16>, vector<80x16xf32> -> vector<80x16xf32>
    %64 = arith.addf %58, %63 : vector<80x16xf32>
    %c20 = arith.constant 20 : index
    %c0_47 = arith.constant 0 : index
    %65 = vector.load %arg7[%c20, %c0_47] : memref<104x64xf32, #tpu.memory_space<vmem>>, vector<80x64xf32>
    %66 = arith.truncf %65 : vector<80x64xf32> to vector<80x64xbf16>
    %c6 = arith.constant 6 : index
    %c0_48 = arith.constant 0 : index
    %c0_49 = arith.constant 0 : index
    %67 = vector.load %arg4[%c6, %c0_48, %c0_49] : memref<9x64x16xbf16, #tpu.memory_space<vmem>>, vector<1x64x16xbf16>
    %68 = vector.shape_cast %67 : vector<1x64x16xbf16> to vector<64x16xbf16>
    %cst_50 = arith.constant dense<0.000000e+00> : vector<80x16xf32>
    %69 = tpu.matmul %66, %68, %cst_50 {dimension_numbers = #tpu.dot_dimension_numbers<[1], [0], [0], [1], [0, 0, 1, 1], [], []>} : vector<80x64xbf16>, vector<64x16xbf16>, vector<80x16xf32> -> vector<80x16xf32>
    %70 = arith.addf %64, %69 : vector<80x16xf32>
    %c21_51 = arith.constant 21 : index
    %c0_52 = arith.constant 0 : index
    %71 = vector.load %arg7[%c21_51, %c0_52] : memref<104x64xf32, #tpu.memory_space<vmem>>, vector<80x64xf32>
    %72 = arith.truncf %71 : vector<80x64xf32> to vector<80x64xbf16>
    %c7 = arith.constant 7 : index
    %c0_53 = arith.constant 0 : index
    %c0_54 = arith.constant 0 : index
    %73 = vector.load %arg4[%c7, %c0_53, %c0_54] : memref<9x64x16xbf16, #tpu.memory_space<vmem>>, vector<1x64x16xbf16>
    %74 = vector.shape_cast %73 : vector<1x64x16xbf16> to vector<64x16xbf16>
    %cst_55 = arith.constant dense<0.000000e+00> : vector<80x16xf32>
    %75 = tpu.matmul %72, %74, %cst_55 {dimension_numbers = #tpu.dot_dimension_numbers<[1], [0], [0], [1], [0, 0, 1, 1], [], []>} : vector<80x64xbf16>, vector<64x16xbf16>, vector<80x16xf32> -> vector<80x16xf32>
    %76 = arith.addf %70, %75 : vector<80x16xf32>
    %c22 = arith.constant 22 : index
    %c0_56 = arith.constant 0 : index
    %77 = vector.load %arg7[%c22, %c0_56] : memref<104x64xf32, #tpu.memory_space<vmem>>, vector<80x64xf32>
    %78 = arith.truncf %77 : vector<80x64xf32> to vector<80x64xbf16>
    %c8 = arith.constant 8 : index
    %c0_57 = arith.constant 0 : index
    %c0_58 = arith.constant 0 : index
    %79 = vector.load %arg4[%c8, %c0_57, %c0_58] : memref<9x64x16xbf16, #tpu.memory_space<vmem>>, vector<1x64x16xbf16>
    %80 = vector.shape_cast %79 : vector<1x64x16xbf16> to vector<64x16xbf16>
    %cst_59 = arith.constant dense<0.000000e+00> : vector<80x16xf32>
    %81 = tpu.matmul %78, %80, %cst_59 {dimension_numbers = #tpu.dot_dimension_numbers<[1], [0], [0], [1], [0, 0, 1, 1], [], []>} : vector<80x64xbf16>, vector<64x16xbf16>, vector<80x16xf32> -> vector<80x16xf32>
    %82 = arith.addf %76, %81 : vector<80x16xf32>
    %c0_60 = arith.constant 0 : index
    %c0_61 = arith.constant 0 : index
    %83 = vector.load %arg5[%c0_60, %c0_61] : memref<1x16xf32, #tpu.memory_space<vmem>>, vector<1x16xf32>
    %84 = vector.broadcast %83 : vector<1x16xf32> to vector<80x16xf32>
    %85 = arith.addf %82, %84 : vector<80x16xf32>
    %c0_62 = arith.constant 0 : index
    %c0_63 = arith.constant 0 : index
    %c0_64 = arith.constant 0 : index
    %86 = vector.load %arg6[%c0_62, %c0_63, %c0_64] : memref<1x80x16xf32, #tpu.memory_space<vmem>>, vector<1x80x16xf32>
    %87 = vector.shape_cast %86 : vector<1x80x16xf32> to vector<80x16xf32>
    %88 = vector.shape_cast %85 : vector<80x16xf32> to vector<1x80x16xf32>
    tpu.vector_store %arg6[%c0_62, %c0_63, %c0_64], %88 {strides = array<i32>} : memref<1x80x16xf32, #tpu.memory_space<vmem>>, vector<1x80x16xf32>,
    return
  }
  func.func @transform_0(%arg0: i32) -> (i32, i32, i32) {
    %c0_i32 = arith.constant 0 : i32
    %c0_i32_0 = arith.constant 0 : i32
    %c0_i32_1 = arith.constant 0 : i32
    return %arg0, %c0_i32, %c0_i32_0 : i32, i32, i32
  }
  func.func @transform_1(%arg0: i32) -> (i32, i32) {
    %c0_i32 = arith.constant 0 : i32
    %c0_i32_0 = arith.constant 0 : i32
    %c0_i32_1 = arith.constant 0 : i32
    return %c0_i32, %c0_i32_0 : i32, i32
  }
  func.func @transform_2(%arg0: i32) -> (i32, i32) {
    %c0_i32 = arith.constant 0 : i32
    %c0_i32_0 = arith.constant 0 : i32
    %c0_i32_1 = arith.constant 0 : i32
    return %c0_i32, %c0_i32_0 : i32, i32
  }
  func.func @transform_3(%arg0: i32) -> (i32, i32, i32) {
    %c0_i32 = arith.constant 0 : i32
    %c0_i32_0 = arith.constant 0 : i32
    %c0_i32_1 = arith.constant 0 : i32
    %c0_i32_2 = arith.constant 0 : i32
    return %c0_i32, %c0_i32_0, %c0_i32_1 : i32, i32, i32
  }
  func.func @transform_4(%arg0: i32) -> (i32, i32) {
    %c0_i32 = arith.constant 0 : i32
    %c0_i32_0 = arith.constant 0 : i32
    %c0_i32_1 = arith.constant 0 : i32
    return %c0_i32, %c0_i32_0 : i32, i32
  }
  func.func @transform_5(%arg0: i32) -> (i32, i32, i32) {
    %c0_i32 = arith.constant 0 : i32
    %c0_i32_0 = arith.constant 0 : i32
    %c0_i32_1 = arith.constant 0 : i32
    return %arg0, %c0_i32, %c0_i32_0 : i32, i32, i32
  }
}

module attributes {stable_mosaic.version = 11 : i64} {
  func.func @_stats_kernel(%arg0: i32, %arg1: memref<128x16xf32, #tpu.memory_space<vmem>>, %arg2: memref<1x16xf32, #tpu.memory_space<vmem>>, %arg3: memref<1x16xf32, #tpu.memory_space<vmem>>) attributes {dimension_semantics = [#tpu.dimension_semantics<arbitrary>], iteration_bounds = array<i64: 1>, scalar_prefetch = 0 : i64, scratch_operands = 0 : i64, tpu.core_type = #tpu.core_type<tc>, window_params = [{transform_indices = @transform_0, window_bounds = array<i64: 128, 16>}, {pipeline_mode = #tpu.pipeline_mode<synchronous>, transform_indices = @transform_1, window_bounds = array<i64: 1, 16>}, {pipeline_mode = #tpu.pipeline_mode<synchronous>, transform_indices = @transform_2, window_bounds = array<i64: 1, 16>}]} {
    %c0_i32 = arith.constant 0 : i32
    %0 = arith.cmpi eq, %arg0, %c0_i32 : i32
    %1 = arith.extui %0 : i1 to i32
    %c0_i32_0 = arith.constant 0 : i32
    %2 = arith.cmpi ne, %1, %c0_i32_0 : i32
    scf.if %2 {
      %cst_11 = arith.constant 0.000000e+00 : f32
      %15 = vector.broadcast %cst_11 : f32 to vector<1x16xf32>
      %c0_12 = arith.constant 0 : index
      %c0_13 = arith.constant 0 : index
      %16 = vector.load %arg2[%c0_12, %c0_13] : memref<1x16xf32, #tpu.memory_space<vmem>>, vector<1x16xf32>
      tpu.vector_store %arg2[%c0_12, %c0_13], %15 {strides = array<i32>} : memref<1x16xf32, #tpu.memory_space<vmem>>, vector<1x16xf32>,
      %cst_14 = arith.constant 0.000000e+00 : f32
      %17 = vector.broadcast %cst_14 : f32 to vector<1x16xf32>
      %c0_15 = arith.constant 0 : index
      %c0_16 = arith.constant 0 : index
      %18 = vector.load %arg3[%c0_15, %c0_16] : memref<1x16xf32, #tpu.memory_space<vmem>>, vector<1x16xf32>
      tpu.vector_store %arg3[%c0_15, %c0_16], %17 {strides = array<i32>} : memref<1x16xf32, #tpu.memory_space<vmem>>, vector<1x16xf32>,
    } else {
    }
    %c0 = arith.constant 0 : index
    %c0_1 = arith.constant 0 : index
    %3 = vector.load %arg1[%c0, %c0_1] : memref<128x16xf32, #tpu.memory_space<vmem>>, vector<128x16xf32>
    %c0_2 = arith.constant 0 : index
    %c0_3 = arith.constant 0 : index
    %4 = vector.load %arg2[%c0_2, %c0_3] : memref<1x16xf32, #tpu.memory_space<vmem>>, vector<1x16xf32>
    %cst = arith.constant dense<0.000000e+00> : vector<16xf32>
    %5 = vector.multi_reduction <add>, %3, %cst [0] : vector<128x16xf32> to vector<16xf32>
    %6 = vector.shape_cast %5 : vector<16xf32> to vector<1x16xf32>
    %7 = arith.addf %4, %6 : vector<1x16xf32>
    %c0_4 = arith.constant 0 : index
    %c0_5 = arith.constant 0 : index
    %8 = vector.load %arg2[%c0_4, %c0_5] : memref<1x16xf32, #tpu.memory_space<vmem>>, vector<1x16xf32>
    tpu.vector_store %arg2[%c0_4, %c0_5], %7 {strides = array<i32>} : memref<1x16xf32, #tpu.memory_space<vmem>>, vector<1x16xf32>,
    %c0_6 = arith.constant 0 : index
    %c0_7 = arith.constant 0 : index
    %9 = vector.load %arg3[%c0_6, %c0_7] : memref<1x16xf32, #tpu.memory_space<vmem>>, vector<1x16xf32>
    %10 = arith.mulf %3, %3 : vector<128x16xf32>
    %cst_8 = arith.constant dense<0.000000e+00> : vector<16xf32>
    %11 = vector.multi_reduction <add>, %10, %cst_8 [0] : vector<128x16xf32> to vector<16xf32>
    %12 = vector.shape_cast %11 : vector<16xf32> to vector<1x16xf32>
    %13 = arith.addf %9, %12 : vector<1x16xf32>
    %c0_9 = arith.constant 0 : index
    %c0_10 = arith.constant 0 : index
    %14 = vector.load %arg3[%c0_9, %c0_10] : memref<1x16xf32, #tpu.memory_space<vmem>>, vector<1x16xf32>
    tpu.vector_store %arg3[%c0_9, %c0_10], %13 {strides = array<i32>} : memref<1x16xf32, #tpu.memory_space<vmem>>, vector<1x16xf32>,
    return
  }
  func.func @transform_0(%arg0: i32) -> (i32, i32) {
    %c0_i32 = arith.constant 0 : i32
    %c0_i32_0 = arith.constant 0 : i32
    return %arg0, %c0_i32 : i32, i32
  }
  func.func @transform_1(%arg0: i32) -> (i32, i32) {
    %c0_i32 = arith.constant 0 : i32
    %c0_i32_0 = arith.constant 0 : i32
    %c0_i32_1 = arith.constant 0 : i32
    return %c0_i32, %c0_i32_0 : i32, i32
  }
  func.func @transform_2(%arg0: i32) -> (i32, i32) {
    %c0_i32 = arith.constant 0 : i32
    %c0_i32_0 = arith.constant 0 : i32
    %c0_i32_1 = arith.constant 0 : i32
    return %c0_i32, %c0_i32_0 : i32, i32
  }
}

module attributes {stable_mosaic.version = 11 : i64} {
  func.func @_bn_relu_conv3x3_kernel(%arg0: i32, %arg1: memref<1x64x80xf32, #tpu.memory_space<vmem>>, %arg2: memref<1x80xf32, #tpu.memory_space<vmem>>, %arg3: memref<1x80xf32, #tpu.memory_space<vmem>>, %arg4: memref<9x80x16xbf16, #tpu.memory_space<vmem>>, %arg5: memref<1x16xf32, #tpu.memory_space<vmem>>, %arg6: memref<1x80x16xf32, #tpu.memory_space<vmem>>, %arg7: memref<104x80xf32, #tpu.memory_space<vmem>>) attributes {dimension_semantics = [#tpu.dimension_semantics<parallel>], iteration_bounds = array<i64: 2>, scalar_prefetch = 0 : i64, scratch_operands = 1 : i64, tpu.core_type = #tpu.core_type<tc>, window_params = [{transform_indices = @transform_0, window_bounds = array<i64: 1, 64, 80>}, {pipeline_mode = #tpu.pipeline_mode<synchronous>, transform_indices = @transform_1, window_bounds = array<i64: 1, 80>}, {pipeline_mode = #tpu.pipeline_mode<synchronous>, transform_indices = @transform_2, window_bounds = array<i64: 1, 80>}, {pipeline_mode = #tpu.pipeline_mode<synchronous>, transform_indices = @transform_3, window_bounds = array<i64: 9, 80, 16>}, {pipeline_mode = #tpu.pipeline_mode<synchronous>, transform_indices = @transform_4, window_bounds = array<i64: 1, 16>}, {transform_indices = @transform_5, window_bounds = array<i64: 1, 80, 16>}]} {
    %cst = arith.constant 0.000000e+00 : f32
    %0 = vector.broadcast %cst : f32 to vector<104x80xf32>
    %c0 = arith.constant 0 : index
    %c0_0 = arith.constant 0 : index
    %1 = vector.load %arg7[%c0, %c0_0] : memref<104x80xf32, #tpu.memory_space<vmem>>, vector<104x80xf32>
    tpu.vector_store %arg7[%c0, %c0_0], %0 {strides = array<i32>} : memref<104x80xf32, #tpu.memory_space<vmem>>, vector<104x80xf32>,
    %c0_1 = arith.constant 0 : index
    %c0_2 = arith.constant 0 : index
    %c0_3 = arith.constant 0 : index
    %2 = vector.load %arg1[%c0_1, %c0_2, %c0_3] : memref<1x64x80xf32, #tpu.memory_space<vmem>>, vector<1x64x80xf32>
    %3 = vector.shape_cast %2 : vector<1x64x80xf32> to vector<64x80xf32>
    %c0_4 = arith.constant 0 : index
    %c0_5 = arith.constant 0 : index
    %4 = vector.load %arg2[%c0_4, %c0_5] : memref<1x80xf32, #tpu.memory_space<vmem>>, vector<1x80xf32>
    %5 = vector.broadcast %4 : vector<1x80xf32> to vector<64x80xf32>
    %6 = arith.mulf %3, %5 : vector<64x80xf32>
    %c0_6 = arith.constant 0 : index
    %c0_7 = arith.constant 0 : index
    %7 = vector.load %arg3[%c0_6, %c0_7] : memref<1x80xf32, #tpu.memory_space<vmem>>, vector<1x80xf32>
    %8 = vector.broadcast %7 : vector<1x80xf32> to vector<64x80xf32>
    %9 = arith.addf %6, %8 : vector<64x80xf32>
    %cst_8 = arith.constant 0.000000e+00 : f32
    %10 = vector.broadcast %cst_8 : f32 to vector<64x80xf32>
    %11 = arith.maximumf %9, %10 : vector<64x80xf32>
    %12 = vector.extract_strided_slice %11 {offsets = [0, 0], sizes = [8, 80], strides = [1, 1]} : vector<64x80xf32> to vector<8x80xf32>
    %c11 = arith.constant 11 : index
    %c0_9 = arith.constant 0 : index
    %13 = vector.load %arg7[%c11, %c0_9] : memref<104x80xf32, #tpu.memory_space<vmem>>, vector<8x80xf32>
    tpu.vector_store %arg7[%c11, %c0_9], %12 {strides = array<i32>} : memref<104x80xf32, #tpu.memory_space<vmem>>, vector<8x80xf32>,
    %14 = vector.extract_strided_slice %11 {offsets = [8, 0], sizes = [8, 80], strides = [1, 1]} : vector<64x80xf32> to vector<8x80xf32>
    %c21 = arith.constant 21 : index
    %c0_10 = arith.constant 0 : index
    %15 = vector.load %arg7[%c21, %c0_10] : memref<104x80xf32, #tpu.memory_space<vmem>>, vector<8x80xf32>
    tpu.vector_store %arg7[%c21, %c0_10], %14 {strides = array<i32>} : memref<104x80xf32, #tpu.memory_space<vmem>>, vector<8x80xf32>,
    %16 = vector.extract_strided_slice %11 {offsets = [16, 0], sizes = [8, 80], strides = [1, 1]} : vector<64x80xf32> to vector<8x80xf32>
    %c31 = arith.constant 31 : index
    %c0_11 = arith.constant 0 : index
    %17 = vector.load %arg7[%c31, %c0_11] : memref<104x80xf32, #tpu.memory_space<vmem>>, vector<8x80xf32>
    tpu.vector_store %arg7[%c31, %c0_11], %16 {strides = array<i32>} : memref<104x80xf32, #tpu.memory_space<vmem>>, vector<8x80xf32>,
    %18 = vector.extract_strided_slice %11 {offsets = [24, 0], sizes = [8, 80], strides = [1, 1]} : vector<64x80xf32> to vector<8x80xf32>
    %c41 = arith.constant 41 : index
    %c0_12 = arith.constant 0 : index
    %19 = vector.load %arg7[%c41, %c0_12] : memref<104x80xf32, #tpu.memory_space<vmem>>, vector<8x80xf32>
    tpu.vector_store %arg7[%c41, %c0_12], %18 {strides = array<i32>} : memref<104x80xf32, #tpu.memory_space<vmem>>, vector<8x80xf32>,
    %20 = vector.extract_strided_slice %11 {offsets = [32, 0], sizes = [8, 80], strides = [1, 1]} : vector<64x80xf32> to vector<8x80xf32>
    %c51 = arith.constant 51 : index
    %c0_13 = arith.constant 0 : index
    %21 = vector.load %arg7[%c51, %c0_13] : memref<104x80xf32, #tpu.memory_space<vmem>>, vector<8x80xf32>
    tpu.vector_store %arg7[%c51, %c0_13], %20 {strides = array<i32>} : memref<104x80xf32, #tpu.memory_space<vmem>>, vector<8x80xf32>,
    %22 = vector.extract_strided_slice %11 {offsets = [40, 0], sizes = [8, 80], strides = [1, 1]} : vector<64x80xf32> to vector<8x80xf32>
    %c61 = arith.constant 61 : index
    %c0_14 = arith.constant 0 : index
    %23 = vector.load %arg7[%c61, %c0_14] : memref<104x80xf32, #tpu.memory_space<vmem>>, vector<8x80xf32>
    tpu.vector_store %arg7[%c61, %c0_14], %22 {strides = array<i32>} : memref<104x80xf32, #tpu.memory_space<vmem>>, vector<8x80xf32>,
    %24 = vector.extract_strided_slice %11 {offsets = [48, 0], sizes = [8, 80], strides = [1, 1]} : vector<64x80xf32> to vector<8x80xf32>
    %c71 = arith.constant 71 : index
    %c0_15 = arith.constant 0 : index
    %25 = vector.load %arg7[%c71, %c0_15] : memref<104x80xf32, #tpu.memory_space<vmem>>, vector<8x80xf32>
    tpu.vector_store %arg7[%c71, %c0_15], %24 {strides = array<i32>} : memref<104x80xf32, #tpu.memory_space<vmem>>, vector<8x80xf32>,
    %26 = vector.extract_strided_slice %11 {offsets = [56, 0], sizes = [8, 80], strides = [1, 1]} : vector<64x80xf32> to vector<8x80xf32>
    %c81 = arith.constant 81 : index
    %c0_16 = arith.constant 0 : index
    %27 = vector.load %arg7[%c81, %c0_16] : memref<104x80xf32, #tpu.memory_space<vmem>>, vector<8x80xf32>
    tpu.vector_store %arg7[%c81, %c0_16], %26 {strides = array<i32>} : memref<104x80xf32, #tpu.memory_space<vmem>>, vector<8x80xf32>,
    %cst_17 = arith.constant 0.000000e+00 : f32
    %28 = vector.broadcast %cst_17 : f32 to vector<80x16xf32>
    %c0_18 = arith.constant 0 : index
    %c0_19 = arith.constant 0 : index
    %29 = vector.load %arg7[%c0_18, %c0_19] : memref<104x80xf32, #tpu.memory_space<vmem>>, vector<80x80xf32>
    %30 = arith.truncf %29 : vector<80x80xf32> to vector<80x80xbf16>
    %c0_20 = arith.constant 0 : index
    %c0_21 = arith.constant 0 : index
    %c0_22 = arith.constant 0 : index
    %31 = vector.load %arg4[%c0_20, %c0_21, %c0_22] : memref<9x80x16xbf16, #tpu.memory_space<vmem>>, vector<1x80x16xbf16>
    %32 = vector.shape_cast %31 : vector<1x80x16xbf16> to vector<80x16xbf16>
    %cst_23 = arith.constant dense<0.000000e+00> : vector<80x16xf32>
    %33 = tpu.matmul %30, %32, %cst_23 {dimension_numbers = #tpu.dot_dimension_numbers<[1], [0], [0], [1], [0, 0, 1, 1], [], []>} : vector<80x80xbf16>, vector<80x16xbf16>, vector<80x16xf32> -> vector<80x16xf32>
    %34 = arith.addf %28, %33 : vector<80x16xf32>
    %c1 = arith.constant 1 : index
    %c0_24 = arith.constant 0 : index
    %35 = vector.load %arg7[%c1, %c0_24] : memref<104x80xf32, #tpu.memory_space<vmem>>, vector<80x80xf32>
    %36 = arith.truncf %35 : vector<80x80xf32> to vector<80x80xbf16>
    %c1_25 = arith.constant 1 : index
    %c0_26 = arith.constant 0 : index
    %c0_27 = arith.constant 0 : index
    %37 = vector.load %arg4[%c1_25, %c0_26, %c0_27] : memref<9x80x16xbf16, #tpu.memory_space<vmem>>, vector<1x80x16xbf16>
    %38 = vector.shape_cast %37 : vector<1x80x16xbf16> to vector<80x16xbf16>
    %cst_28 = arith.constant dense<0.000000e+00> : vector<80x16xf32>
    %39 = tpu.matmul %36, %38, %cst_28 {dimension_numbers = #tpu.dot_dimension_numbers<[1], [0], [0], [1], [0, 0, 1, 1], [], []>} : vector<80x80xbf16>, vector<80x16xbf16>, vector<80x16xf32> -> vector<80x16xf32>
    %40 = arith.addf %34, %39 : vector<80x16xf32>
    %c2 = arith.constant 2 : index
    %c0_29 = arith.constant 0 : index
    %41 = vector.load %arg7[%c2, %c0_29] : memref<104x80xf32, #tpu.memory_space<vmem>>, vector<80x80xf32>
    %42 = arith.truncf %41 : vector<80x80xf32> to vector<80x80xbf16>
    %c2_30 = arith.constant 2 : index
    %c0_31 = arith.constant 0 : index
    %c0_32 = arith.constant 0 : index
    %43 = vector.load %arg4[%c2_30, %c0_31, %c0_32] : memref<9x80x16xbf16, #tpu.memory_space<vmem>>, vector<1x80x16xbf16>
    %44 = vector.shape_cast %43 : vector<1x80x16xbf16> to vector<80x16xbf16>
    %cst_33 = arith.constant dense<0.000000e+00> : vector<80x16xf32>
    %45 = tpu.matmul %42, %44, %cst_33 {dimension_numbers = #tpu.dot_dimension_numbers<[1], [0], [0], [1], [0, 0, 1, 1], [], []>} : vector<80x80xbf16>, vector<80x16xbf16>, vector<80x16xf32> -> vector<80x16xf32>
    %46 = arith.addf %40, %45 : vector<80x16xf32>
    %c10 = arith.constant 10 : index
    %c0_34 = arith.constant 0 : index
    %47 = vector.load %arg7[%c10, %c0_34] : memref<104x80xf32, #tpu.memory_space<vmem>>, vector<80x80xf32>
    %48 = arith.truncf %47 : vector<80x80xf32> to vector<80x80xbf16>
    %c3 = arith.constant 3 : index
    %c0_35 = arith.constant 0 : index
    %c0_36 = arith.constant 0 : index
    %49 = vector.load %arg4[%c3, %c0_35, %c0_36] : memref<9x80x16xbf16, #tpu.memory_space<vmem>>, vector<1x80x16xbf16>
    %50 = vector.shape_cast %49 : vector<1x80x16xbf16> to vector<80x16xbf16>
    %cst_37 = arith.constant dense<0.000000e+00> : vector<80x16xf32>
    %51 = tpu.matmul %48, %50, %cst_37 {dimension_numbers = #tpu.dot_dimension_numbers<[1], [0], [0], [1], [0, 0, 1, 1], [], []>} : vector<80x80xbf16>, vector<80x16xbf16>, vector<80x16xf32> -> vector<80x16xf32>
    %52 = arith.addf %46, %51 : vector<80x16xf32>
    %c11_38 = arith.constant 11 : index
    %c0_39 = arith.constant 0 : index
    %53 = vector.load %arg7[%c11_38, %c0_39] : memref<104x80xf32, #tpu.memory_space<vmem>>, vector<80x80xf32>
    %54 = arith.truncf %53 : vector<80x80xf32> to vector<80x80xbf16>
    %c4 = arith.constant 4 : index
    %c0_40 = arith.constant 0 : index
    %c0_41 = arith.constant 0 : index
    %55 = vector.load %arg4[%c4, %c0_40, %c0_41] : memref<9x80x16xbf16, #tpu.memory_space<vmem>>, vector<1x80x16xbf16>
    %56 = vector.shape_cast %55 : vector<1x80x16xbf16> to vector<80x16xbf16>
    %cst_42 = arith.constant dense<0.000000e+00> : vector<80x16xf32>
    %57 = tpu.matmul %54, %56, %cst_42 {dimension_numbers = #tpu.dot_dimension_numbers<[1], [0], [0], [1], [0, 0, 1, 1], [], []>} : vector<80x80xbf16>, vector<80x16xbf16>, vector<80x16xf32> -> vector<80x16xf32>
    %58 = arith.addf %52, %57 : vector<80x16xf32>
    %c12 = arith.constant 12 : index
    %c0_43 = arith.constant 0 : index
    %59 = vector.load %arg7[%c12, %c0_43] : memref<104x80xf32, #tpu.memory_space<vmem>>, vector<80x80xf32>
    %60 = arith.truncf %59 : vector<80x80xf32> to vector<80x80xbf16>
    %c5 = arith.constant 5 : index
    %c0_44 = arith.constant 0 : index
    %c0_45 = arith.constant 0 : index
    %61 = vector.load %arg4[%c5, %c0_44, %c0_45] : memref<9x80x16xbf16, #tpu.memory_space<vmem>>, vector<1x80x16xbf16>
    %62 = vector.shape_cast %61 : vector<1x80x16xbf16> to vector<80x16xbf16>
    %cst_46 = arith.constant dense<0.000000e+00> : vector<80x16xf32>
    %63 = tpu.matmul %60, %62, %cst_46 {dimension_numbers = #tpu.dot_dimension_numbers<[1], [0], [0], [1], [0, 0, 1, 1], [], []>} : vector<80x80xbf16>, vector<80x16xbf16>, vector<80x16xf32> -> vector<80x16xf32>
    %64 = arith.addf %58, %63 : vector<80x16xf32>
    %c20 = arith.constant 20 : index
    %c0_47 = arith.constant 0 : index
    %65 = vector.load %arg7[%c20, %c0_47] : memref<104x80xf32, #tpu.memory_space<vmem>>, vector<80x80xf32>
    %66 = arith.truncf %65 : vector<80x80xf32> to vector<80x80xbf16>
    %c6 = arith.constant 6 : index
    %c0_48 = arith.constant 0 : index
    %c0_49 = arith.constant 0 : index
    %67 = vector.load %arg4[%c6, %c0_48, %c0_49] : memref<9x80x16xbf16, #tpu.memory_space<vmem>>, vector<1x80x16xbf16>
    %68 = vector.shape_cast %67 : vector<1x80x16xbf16> to vector<80x16xbf16>
    %cst_50 = arith.constant dense<0.000000e+00> : vector<80x16xf32>
    %69 = tpu.matmul %66, %68, %cst_50 {dimension_numbers = #tpu.dot_dimension_numbers<[1], [0], [0], [1], [0, 0, 1, 1], [], []>} : vector<80x80xbf16>, vector<80x16xbf16>, vector<80x16xf32> -> vector<80x16xf32>
    %70 = arith.addf %64, %69 : vector<80x16xf32>
    %c21_51 = arith.constant 21 : index
    %c0_52 = arith.constant 0 : index
    %71 = vector.load %arg7[%c21_51, %c0_52] : memref<104x80xf32, #tpu.memory_space<vmem>>, vector<80x80xf32>
    %72 = arith.truncf %71 : vector<80x80xf32> to vector<80x80xbf16>
    %c7 = arith.constant 7 : index
    %c0_53 = arith.constant 0 : index
    %c0_54 = arith.constant 0 : index
    %73 = vector.load %arg4[%c7, %c0_53, %c0_54] : memref<9x80x16xbf16, #tpu.memory_space<vmem>>, vector<1x80x16xbf16>
    %74 = vector.shape_cast %73 : vector<1x80x16xbf16> to vector<80x16xbf16>
    %cst_55 = arith.constant dense<0.000000e+00> : vector<80x16xf32>
    %75 = tpu.matmul %72, %74, %cst_55 {dimension_numbers = #tpu.dot_dimension_numbers<[1], [0], [0], [1], [0, 0, 1, 1], [], []>} : vector<80x80xbf16>, vector<80x16xbf16>, vector<80x16xf32> -> vector<80x16xf32>
    %76 = arith.addf %70, %75 : vector<80x16xf32>
    %c22 = arith.constant 22 : index
    %c0_56 = arith.constant 0 : index
    %77 = vector.load %arg7[%c22, %c0_56] : memref<104x80xf32, #tpu.memory_space<vmem>>, vector<80x80xf32>
    %78 = arith.truncf %77 : vector<80x80xf32> to vector<80x80xbf16>
    %c8 = arith.constant 8 : index
    %c0_57 = arith.constant 0 : index
    %c0_58 = arith.constant 0 : index
    %79 = vector.load %arg4[%c8, %c0_57, %c0_58] : memref<9x80x16xbf16, #tpu.memory_space<vmem>>, vector<1x80x16xbf16>
    %80 = vector.shape_cast %79 : vector<1x80x16xbf16> to vector<80x16xbf16>
    %cst_59 = arith.constant dense<0.000000e+00> : vector<80x16xf32>
    %81 = tpu.matmul %78, %80, %cst_59 {dimension_numbers = #tpu.dot_dimension_numbers<[1], [0], [0], [1], [0, 0, 1, 1], [], []>} : vector<80x80xbf16>, vector<80x16xbf16>, vector<80x16xf32> -> vector<80x16xf32>
    %82 = arith.addf %76, %81 : vector<80x16xf32>
    %c0_60 = arith.constant 0 : index
    %c0_61 = arith.constant 0 : index
    %83 = vector.load %arg5[%c0_60, %c0_61] : memref<1x16xf32, #tpu.memory_space<vmem>>, vector<1x16xf32>
    %84 = vector.broadcast %83 : vector<1x16xf32> to vector<80x16xf32>
    %85 = arith.addf %82, %84 : vector<80x16xf32>
    %c0_62 = arith.constant 0 : index
    %c0_63 = arith.constant 0 : index
    %c0_64 = arith.constant 0 : index
    %86 = vector.load %arg6[%c0_62, %c0_63, %c0_64] : memref<1x80x16xf32, #tpu.memory_space<vmem>>, vector<1x80x16xf32>
    %87 = vector.shape_cast %86 : vector<1x80x16xf32> to vector<80x16xf32>
    %88 = vector.shape_cast %85 : vector<80x16xf32> to vector<1x80x16xf32>
    tpu.vector_store %arg6[%c0_62, %c0_63, %c0_64], %88 {strides = array<i32>} : memref<1x80x16xf32, #tpu.memory_space<vmem>>, vector<1x80x16xf32>,
    return
  }
  func.func @transform_0(%arg0: i32) -> (i32, i32, i32) {
    %c0_i32 = arith.constant 0 : i32
    %c0_i32_0 = arith.constant 0 : i32
    %c0_i32_1 = arith.constant 0 : i32
    return %arg0, %c0_i32, %c0_i32_0 : i32, i32, i32
  }
  func.func @transform_1(%arg0: i32) -> (i32, i32) {
    %c0_i32 = arith.constant 0 : i32
    %c0_i32_0 = arith.constant 0 : i32
    %c0_i32_1 = arith.constant 0 : i32
    return %c0_i32, %c0_i32_0 : i32, i32
  }
  func.func @transform_2(%arg0: i32) -> (i32, i32) {
    %c0_i32 = arith.constant 0 : i32
    %c0_i32_0 = arith.constant 0 : i32
    %c0_i32_1 = arith.constant 0 : i32
    return %c0_i32, %c0_i32_0 : i32, i32
  }
  func.func @transform_3(%arg0: i32) -> (i32, i32, i32) {
    %c0_i32 = arith.constant 0 : i32
    %c0_i32_0 = arith.constant 0 : i32
    %c0_i32_1 = arith.constant 0 : i32
    %c0_i32_2 = arith.constant 0 : i32
    return %c0_i32, %c0_i32_0, %c0_i32_1 : i32, i32, i32
  }
  func.func @transform_4(%arg0: i32) -> (i32, i32) {
    %c0_i32 = arith.constant 0 : i32
    %c0_i32_0 = arith.constant 0 : i32
    %c0_i32_1 = arith.constant 0 : i32
    return %c0_i32, %c0_i32_0 : i32, i32
  }
  func.func @transform_5(%arg0: i32) -> (i32, i32, i32) {
    %c0_i32 = arith.constant 0 : i32
    %c0_i32_0 = arith.constant 0 : i32
    %c0_i32_1 = arith.constant 0 : i32
    return %arg0, %c0_i32, %c0_i32_0 : i32, i32, i32
  }
}

module attributes {stable_mosaic.version = 11 : i64} {
  func.func @_avg_pool_kernel(%arg0: i32, %arg1: memref<1x2x4x2x48xf32, #tpu.memory_space<vmem>>, %arg2: memref<1x4x48xf32, #tpu.memory_space<vmem>>) attributes {dimension_semantics = [#tpu.dimension_semantics<parallel>], iteration_bounds = array<i64: 8>, scalar_prefetch = 0 : i64, scratch_operands = 0 : i64, tpu.core_type = #tpu.core_type<tc>, window_params = [{transform_indices = @transform_0, window_bounds = array<i64: 1, 2, 4, 2, 48>}, {transform_indices = @transform_1, window_bounds = array<i64: 1, 4, 48>}]} {
    %c0 = arith.constant 0 : index
    %c0_0 = arith.constant 0 : index
    %c0_1 = arith.constant 0 : index
    %c0_2 = arith.constant 0 : index
    %c0_3 = arith.constant 0 : index
    %0 = vector.load %arg1[%c0, %c0_0, %c0_1, %c0_2, %c0_3] : memref<1x2x4x2x48xf32, #tpu.memory_space<vmem>>, vector<1x1x4x2x48xf32>
    %1 = vector.shape_cast %0 : vector<1x1x4x2x48xf32> to vector<4x2x48xf32>
    %c0_4 = arith.constant 0 : index
    %c1 = arith.constant 1 : index
    %c0_5 = arith.constant 0 : index
    %c0_6 = arith.constant 0 : index
    %c0_7 = arith.constant 0 : index
    %2 = vector.load %arg1[%c0_4, %c1, %c0_5, %c0_6, %c0_7] : memref<1x2x4x2x48xf32, #tpu.memory_space<vmem>>, vector<1x1x4x2x48xf32>
    %3 = vector.shape_cast %2 : vector<1x1x4x2x48xf32> to vector<4x2x48xf32>
    %4 = arith.addf %1, %3 : vector<4x2x48xf32>
    %cst = arith.constant dense<0.000000e+00> : vector<4x48xf32>
    %5 = vector.multi_reduction <add>, %4, %cst [1] : vector<4x2x48xf32> to vector<4x48xf32>
    %cst_8 = arith.constant 2.500000e-01 : f32
    %6 = vector.broadcast %cst_8 : f32 to vector<4x48xf32>
    %7 = arith.mulf %5, %6 : vector<4x48xf32>
    %c0_9 = arith.constant 0 : index
    %c0_10 = arith.constant 0 : index
    %c0_11 = arith.constant 0 : index
    %8 = vector.load %arg2[%c0_9, %c0_10, %c0_11] : memref<1x4x48xf32, #tpu.memory_space<vmem>>, vector<1x4x48xf32>
    %9 = vector.shape_cast %8 : vector<1x4x48xf32> to vector<4x48xf32>
    %10 = vector.shape_cast %7 : vector<4x48xf32> to vector<1x4x48xf32>
    tpu.vector_store %arg2[%c0_9, %c0_10, %c0_11], %10 {strides = array<i32>} : memref<1x4x48xf32, #tpu.memory_space<vmem>>, vector<1x4x48xf32>,
    return
  }
  func.func @transform_0(%arg0: i32) -> (i32, i32, i32, i32, i32) {
    %c0_i32 = arith.constant 0 : i32
    %c0_i32_0 = arith.constant 0 : i32
    %c0_i32_1 = arith.constant 0 : i32
    %c0_i32_2 = arith.constant 0 : i32
    %c0_i32_3 = arith.constant 0 : i32
    return %arg0, %c0_i32, %c0_i32_0, %c0_i32_1, %c0_i32_2 : i32, i32, i32, i32, i32
  }
  func.func @transform_1(%arg0: i32) -> (i32, i32, i32) {
    %c0_i32 = arith.constant 0 : i32
    %c0_i32_0 = arith.constant 0 : i32
    %c0_i32_1 = arith.constant 0 : i32
    return %arg0, %c0_i32, %c0_i32_0 : i32, i32, i32
  }
}

module attributes {stable_mosaic.version = 11 : i64} {
  func.func @_bn_relu_conv1x1_kernel(%arg0: i32, %arg1: memref<128x96xf32, #tpu.memory_space<vmem>>, %arg2: memref<1x96xf32, #tpu.memory_space<vmem>>, %arg3: memref<1x96xf32, #tpu.memory_space<vmem>>, %arg4: memref<96x48xbf16, #tpu.memory_space<vmem>>, %arg5: memref<1x48xf32, #tpu.memory_space<vmem>>, %arg6: memref<128x48xf32, #tpu.memory_space<vmem>>) attributes {dimension_semantics = [#tpu.dimension_semantics<parallel>], iteration_bounds = array<i64: 1>, scalar_prefetch = 0 : i64, scratch_operands = 0 : i64, tpu.core_type = #tpu.core_type<tc>, window_params = [{transform_indices = @transform_0, window_bounds = array<i64: 128, 96>}, {pipeline_mode = #tpu.pipeline_mode<synchronous>, transform_indices = @transform_1, window_bounds = array<i64: 1, 96>}, {pipeline_mode = #tpu.pipeline_mode<synchronous>, transform_indices = @transform_2, window_bounds = array<i64: 1, 96>}, {pipeline_mode = #tpu.pipeline_mode<synchronous>, transform_indices = @transform_3, window_bounds = array<i64: 96, 48>}, {pipeline_mode = #tpu.pipeline_mode<synchronous>, transform_indices = @transform_4, window_bounds = array<i64: 1, 48>}, {transform_indices = @transform_5, window_bounds = array<i64: 128, 48>}]} {
    %c0 = arith.constant 0 : index
    %c0_0 = arith.constant 0 : index
    %0 = vector.load %arg1[%c0, %c0_0] : memref<128x96xf32, #tpu.memory_space<vmem>>, vector<128x96xf32>
    %c0_1 = arith.constant 0 : index
    %c0_2 = arith.constant 0 : index
    %1 = vector.load %arg2[%c0_1, %c0_2] : memref<1x96xf32, #tpu.memory_space<vmem>>, vector<1x96xf32>
    %2 = vector.broadcast %1 : vector<1x96xf32> to vector<128x96xf32>
    %3 = arith.mulf %0, %2 : vector<128x96xf32>
    %c0_3 = arith.constant 0 : index
    %c0_4 = arith.constant 0 : index
    %4 = vector.load %arg3[%c0_3, %c0_4] : memref<1x96xf32, #tpu.memory_space<vmem>>, vector<1x96xf32>
    %5 = vector.broadcast %4 : vector<1x96xf32> to vector<128x96xf32>
    %6 = arith.addf %3, %5 : vector<128x96xf32>
    %cst = arith.constant 0.000000e+00 : f32
    %7 = vector.broadcast %cst : f32 to vector<128x96xf32>
    %8 = arith.maximumf %6, %7 : vector<128x96xf32>
    %9 = arith.truncf %8 : vector<128x96xf32> to vector<128x96xbf16>
    %c0_5 = arith.constant 0 : index
    %c0_6 = arith.constant 0 : index
    %10 = vector.load %arg4[%c0_5, %c0_6] : memref<96x48xbf16, #tpu.memory_space<vmem>>, vector<96x48xbf16>
    %cst_7 = arith.constant dense<0.000000e+00> : vector<128x48xf32>
    %11 = tpu.matmul %9, %10, %cst_7 {dimension_numbers = #tpu.dot_dimension_numbers<[1], [0], [0], [1], [0, 0, 1, 1], [], []>} : vector<128x96xbf16>, vector<96x48xbf16>, vector<128x48xf32> -> vector<128x48xf32>
    %c0_8 = arith.constant 0 : index
    %c0_9 = arith.constant 0 : index
    %12 = vector.load %arg5[%c0_8, %c0_9] : memref<1x48xf32, #tpu.memory_space<vmem>>, vector<1x48xf32>
    %13 = vector.broadcast %12 : vector<1x48xf32> to vector<128x48xf32>
    %14 = arith.addf %11, %13 : vector<128x48xf32>
    %c0_10 = arith.constant 0 : index
    %c0_11 = arith.constant 0 : index
    %15 = vector.load %arg6[%c0_10, %c0_11] : memref<128x48xf32, #tpu.memory_space<vmem>>, vector<128x48xf32>
    tpu.vector_store %arg6[%c0_10, %c0_11], %14 {strides = array<i32>} : memref<128x48xf32, #tpu.memory_space<vmem>>, vector<128x48xf32>,
    return
  }
  func.func @transform_0(%arg0: i32) -> (i32, i32) {
    %c0_i32 = arith.constant 0 : i32
    %c0_i32_0 = arith.constant 0 : i32
    return %arg0, %c0_i32 : i32, i32
  }
  func.func @transform_1(%arg0: i32) -> (i32, i32) {
    %c0_i32 = arith.constant 0 : i32
    %c0_i32_0 = arith.constant 0 : i32
    %c0_i32_1 = arith.constant 0 : i32
    return %c0_i32, %c0_i32_0 : i32, i32
  }
  func.func @transform_2(%arg0: i32) -> (i32, i32) {
    %c0_i32 = arith.constant 0 : i32
    %c0_i32_0 = arith.constant 0 : i32
    %c0_i32_1 = arith.constant 0 : i32
    return %c0_i32, %c0_i32_0 : i32, i32
  }
  func.func @transform_3(%arg0: i32) -> (i32, i32) {
    %c0_i32 = arith.constant 0 : i32
    %c0_i32_0 = arith.constant 0 : i32
    %c0_i32_1 = arith.constant 0 : i32
    return %c0_i32, %c0_i32_0 : i32, i32
  }
  func.func @transform_4(%arg0: i32) -> (i32, i32) {
    %c0_i32 = arith.constant 0 : i32
    %c0_i32_0 = arith.constant 0 : i32
    %c0_i32_1 = arith.constant 0 : i32
    return %c0_i32, %c0_i32_0 : i32, i32
  }
  func.func @transform_5(%arg0: i32) -> (i32, i32) {
    %c0_i32 = arith.constant 0 : i32
    %c0_i32_0 = arith.constant 0 : i32
    return %arg0, %c0_i32 : i32, i32
  }
}

module attributes {stable_mosaic.version = 11 : i64} {
  func.func @_stats_kernel(%arg0: i32, %arg1: memref<32x48xf32, #tpu.memory_space<vmem>>, %arg2: memref<1x48xf32, #tpu.memory_space<vmem>>, %arg3: memref<1x48xf32, #tpu.memory_space<vmem>>) attributes {dimension_semantics = [#tpu.dimension_semantics<arbitrary>], iteration_bounds = array<i64: 1>, scalar_prefetch = 0 : i64, scratch_operands = 0 : i64, tpu.core_type = #tpu.core_type<tc>, window_params = [{transform_indices = @transform_0, window_bounds = array<i64: 32, 48>}, {pipeline_mode = #tpu.pipeline_mode<synchronous>, transform_indices = @transform_1, window_bounds = array<i64: 1, 48>}, {pipeline_mode = #tpu.pipeline_mode<synchronous>, transform_indices = @transform_2, window_bounds = array<i64: 1, 48>}]} {
    %c0_i32 = arith.constant 0 : i32
    %0 = arith.cmpi eq, %arg0, %c0_i32 : i32
    %1 = arith.extui %0 : i1 to i32
    %c0_i32_0 = arith.constant 0 : i32
    %2 = arith.cmpi ne, %1, %c0_i32_0 : i32
    scf.if %2 {
      %cst_11 = arith.constant 0.000000e+00 : f32
      %15 = vector.broadcast %cst_11 : f32 to vector<1x48xf32>
      %c0_12 = arith.constant 0 : index
      %c0_13 = arith.constant 0 : index
      %16 = vector.load %arg2[%c0_12, %c0_13] : memref<1x48xf32, #tpu.memory_space<vmem>>, vector<1x48xf32>
      tpu.vector_store %arg2[%c0_12, %c0_13], %15 {strides = array<i32>} : memref<1x48xf32, #tpu.memory_space<vmem>>, vector<1x48xf32>,
      %cst_14 = arith.constant 0.000000e+00 : f32
      %17 = vector.broadcast %cst_14 : f32 to vector<1x48xf32>
      %c0_15 = arith.constant 0 : index
      %c0_16 = arith.constant 0 : index
      %18 = vector.load %arg3[%c0_15, %c0_16] : memref<1x48xf32, #tpu.memory_space<vmem>>, vector<1x48xf32>
      tpu.vector_store %arg3[%c0_15, %c0_16], %17 {strides = array<i32>} : memref<1x48xf32, #tpu.memory_space<vmem>>, vector<1x48xf32>,
    } else {
    }
    %c0 = arith.constant 0 : index
    %c0_1 = arith.constant 0 : index
    %3 = vector.load %arg1[%c0, %c0_1] : memref<32x48xf32, #tpu.memory_space<vmem>>, vector<32x48xf32>
    %c0_2 = arith.constant 0 : index
    %c0_3 = arith.constant 0 : index
    %4 = vector.load %arg2[%c0_2, %c0_3] : memref<1x48xf32, #tpu.memory_space<vmem>>, vector<1x48xf32>
    %cst = arith.constant dense<0.000000e+00> : vector<48xf32>
    %5 = vector.multi_reduction <add>, %3, %cst [0] : vector<32x48xf32> to vector<48xf32>
    %6 = vector.shape_cast %5 : vector<48xf32> to vector<1x48xf32>
    %7 = arith.addf %4, %6 : vector<1x48xf32>
    %c0_4 = arith.constant 0 : index
    %c0_5 = arith.constant 0 : index
    %8 = vector.load %arg2[%c0_4, %c0_5] : memref<1x48xf32, #tpu.memory_space<vmem>>, vector<1x48xf32>
    tpu.vector_store %arg2[%c0_4, %c0_5], %7 {strides = array<i32>} : memref<1x48xf32, #tpu.memory_space<vmem>>, vector<1x48xf32>,
    %c0_6 = arith.constant 0 : index
    %c0_7 = arith.constant 0 : index
    %9 = vector.load %arg3[%c0_6, %c0_7] : memref<1x48xf32, #tpu.memory_space<vmem>>, vector<1x48xf32>
    %10 = arith.mulf %3, %3 : vector<32x48xf32>
    %cst_8 = arith.constant dense<0.000000e+00> : vector<48xf32>
    %11 = vector.multi_reduction <add>, %10, %cst_8 [0] : vector<32x48xf32> to vector<48xf32>
    %12 = vector.shape_cast %11 : vector<48xf32> to vector<1x48xf32>
    %13 = arith.addf %9, %12 : vector<1x48xf32>
    %c0_9 = arith.constant 0 : index
    %c0_10 = arith.constant 0 : index
    %14 = vector.load %arg3[%c0_9, %c0_10] : memref<1x48xf32, #tpu.memory_space<vmem>>, vector<1x48xf32>
    tpu.vector_store %arg3[%c0_9, %c0_10], %13 {strides = array<i32>} : memref<1x48xf32, #tpu.memory_space<vmem>>, vector<1x48xf32>,
    return
  }
  func.func @transform_0(%arg0: i32) -> (i32, i32) {
    %c0_i32 = arith.constant 0 : i32
    %c0_i32_0 = arith.constant 0 : i32
    return %arg0, %c0_i32 : i32, i32
  }
  func.func @transform_1(%arg0: i32) -> (i32, i32) {
    %c0_i32 = arith.constant 0 : i32
    %c0_i32_0 = arith.constant 0 : i32
    %c0_i32_1 = arith.constant 0 : i32
    return %c0_i32, %c0_i32_0 : i32, i32
  }
  func.func @transform_2(%arg0: i32) -> (i32, i32) {
    %c0_i32 = arith.constant 0 : i32
    %c0_i32_0 = arith.constant 0 : i32
    %c0_i32_1 = arith.constant 0 : i32
    return %c0_i32, %c0_i32_0 : i32, i32
  }
}

module attributes {stable_mosaic.version = 11 : i64} {
  func.func @_bn_relu_conv3x3_kernel(%arg0: i32, %arg1: memref<1x16x48xf32, #tpu.memory_space<vmem>>, %arg2: memref<1x48xf32, #tpu.memory_space<vmem>>, %arg3: memref<1x48xf32, #tpu.memory_space<vmem>>, %arg4: memref<9x48x16xbf16, #tpu.memory_space<vmem>>, %arg5: memref<1x16xf32, #tpu.memory_space<vmem>>, %arg6: memref<1x24x16xf32, #tpu.memory_space<vmem>>, %arg7: memref<40x48xf32, #tpu.memory_space<vmem>>) attributes {dimension_semantics = [#tpu.dimension_semantics<parallel>], iteration_bounds = array<i64: 2>, scalar_prefetch = 0 : i64, scratch_operands = 1 : i64, tpu.core_type = #tpu.core_type<tc>, window_params = [{transform_indices = @transform_0, window_bounds = array<i64: 1, 16, 48>}, {pipeline_mode = #tpu.pipeline_mode<synchronous>, transform_indices = @transform_1, window_bounds = array<i64: 1, 48>}, {pipeline_mode = #tpu.pipeline_mode<synchronous>, transform_indices = @transform_2, window_bounds = array<i64: 1, 48>}, {pipeline_mode = #tpu.pipeline_mode<synchronous>, transform_indices = @transform_3, window_bounds = array<i64: 9, 48, 16>}, {pipeline_mode = #tpu.pipeline_mode<synchronous>, transform_indices = @transform_4, window_bounds = array<i64: 1, 16>}, {transform_indices = @transform_5, window_bounds = array<i64: 1, 24, 16>}]} {
    %cst = arith.constant 0.000000e+00 : f32
    %0 = vector.broadcast %cst : f32 to vector<40x48xf32>
    %c0 = arith.constant 0 : index
    %c0_0 = arith.constant 0 : index
    %1 = vector.load %arg7[%c0, %c0_0] : memref<40x48xf32, #tpu.memory_space<vmem>>, vector<40x48xf32>
    tpu.vector_store %arg7[%c0, %c0_0], %0 {strides = array<i32>} : memref<40x48xf32, #tpu.memory_space<vmem>>, vector<40x48xf32>,
    %c0_1 = arith.constant 0 : index
    %c0_2 = arith.constant 0 : index
    %c0_3 = arith.constant 0 : index
    %2 = vector.load %arg1[%c0_1, %c0_2, %c0_3] : memref<1x16x48xf32, #tpu.memory_space<vmem>>, vector<1x16x48xf32>
    %3 = vector.shape_cast %2 : vector<1x16x48xf32> to vector<16x48xf32>
    %c0_4 = arith.constant 0 : index
    %c0_5 = arith.constant 0 : index
    %4 = vector.load %arg2[%c0_4, %c0_5] : memref<1x48xf32, #tpu.memory_space<vmem>>, vector<1x48xf32>
    %5 = vector.broadcast %4 : vector<1x48xf32> to vector<16x48xf32>
    %6 = arith.mulf %3, %5 : vector<16x48xf32>
    %c0_6 = arith.constant 0 : index
    %c0_7 = arith.constant 0 : index
    %7 = vector.load %arg3[%c0_6, %c0_7] : memref<1x48xf32, #tpu.memory_space<vmem>>, vector<1x48xf32>
    %8 = vector.broadcast %7 : vector<1x48xf32> to vector<16x48xf32>
    %9 = arith.addf %6, %8 : vector<16x48xf32>
    %cst_8 = arith.constant 0.000000e+00 : f32
    %10 = vector.broadcast %cst_8 : f32 to vector<16x48xf32>
    %11 = arith.maximumf %9, %10 : vector<16x48xf32>
    %12 = vector.extract_strided_slice %11 {offsets = [0, 0], sizes = [4, 48], strides = [1, 1]} : vector<16x48xf32> to vector<4x48xf32>
    %c7 = arith.constant 7 : index
    %c0_9 = arith.constant 0 : index
    %13 = vector.load %arg7[%c7, %c0_9] : memref<40x48xf32, #tpu.memory_space<vmem>>, vector<4x48xf32>
    tpu.vector_store %arg7[%c7, %c0_9], %12 {strides = array<i32>} : memref<40x48xf32, #tpu.memory_space<vmem>>, vector<4x48xf32>,
    %14 = vector.extract_strided_slice %11 {offsets = [4, 0], sizes = [4, 48], strides = [1, 1]} : vector<16x48xf32> to vector<4x48xf32>
    %c13 = arith.constant 13 : index
    %c0_10 = arith.constant 0 : index
    %15 = vector.load %arg7[%c13, %c0_10] : memref<40x48xf32, #tpu.memory_space<vmem>>, vector<4x48xf32>
    tpu.vector_store %arg7[%c13, %c0_10], %14 {strides = array<i32>} : memref<40x48xf32, #tpu.memory_space<vmem>>, vector<4x48xf32>,
    %16 = vector.extract_strided_slice %11 {offsets = [8, 0], sizes = [4, 48], strides = [1, 1]} : vector<16x48xf32> to vector<4x48xf32>
    %c19 = arith.constant 19 : index
    %c0_11 = arith.constant 0 : index
    %17 = vector.load %arg7[%c19, %c0_11] : memref<40x48xf32, #tpu.memory_space<vmem>>, vector<4x48xf32>
    tpu.vector_store %arg7[%c19, %c0_11], %16 {strides = array<i32>} : memref<40x48xf32, #tpu.memory_space<vmem>>, vector<4x48xf32>,
    %18 = vector.extract_strided_slice %11 {offsets = [12, 0], sizes = [4, 48], strides = [1, 1]} : vector<16x48xf32> to vector<4x48xf32>
    %c25 = arith.constant 25 : index
    %c0_12 = arith.constant 0 : index
    %19 = vector.load %arg7[%c25, %c0_12] : memref<40x48xf32, #tpu.memory_space<vmem>>, vector<4x48xf32>
    tpu.vector_store %arg7[%c25, %c0_12], %18 {strides = array<i32>} : memref<40x48xf32, #tpu.memory_space<vmem>>, vector<4x48xf32>,
    %cst_13 = arith.constant 0.000000e+00 : f32
    %20 = vector.broadcast %cst_13 : f32 to vector<24x16xf32>
    %c0_14 = arith.constant 0 : index
    %c0_15 = arith.constant 0 : index
    %21 = vector.load %arg7[%c0_14, %c0_15] : memref<40x48xf32, #tpu.memory_space<vmem>>, vector<24x48xf32>
    %22 = arith.truncf %21 : vector<24x48xf32> to vector<24x48xbf16>
    %c0_16 = arith.constant 0 : index
    %c0_17 = arith.constant 0 : index
    %c0_18 = arith.constant 0 : index
    %23 = vector.load %arg4[%c0_16, %c0_17, %c0_18] : memref<9x48x16xbf16, #tpu.memory_space<vmem>>, vector<1x48x16xbf16>
    %24 = vector.shape_cast %23 : vector<1x48x16xbf16> to vector<48x16xbf16>
    %cst_19 = arith.constant dense<0.000000e+00> : vector<24x16xf32>
    %25 = tpu.matmul %22, %24, %cst_19 {dimension_numbers = #tpu.dot_dimension_numbers<[1], [0], [0], [1], [0, 0, 1, 1], [], []>} : vector<24x48xbf16>, vector<48x16xbf16>, vector<24x16xf32> -> vector<24x16xf32>
    %26 = arith.addf %20, %25 : vector<24x16xf32>
    %c1 = arith.constant 1 : index
    %c0_20 = arith.constant 0 : index
    %27 = vector.load %arg7[%c1, %c0_20] : memref<40x48xf32, #tpu.memory_space<vmem>>, vector<24x48xf32>
    %28 = arith.truncf %27 : vector<24x48xf32> to vector<24x48xbf16>
    %c1_21 = arith.constant 1 : index
    %c0_22 = arith.constant 0 : index
    %c0_23 = arith.constant 0 : index
    %29 = vector.load %arg4[%c1_21, %c0_22, %c0_23] : memref<9x48x16xbf16, #tpu.memory_space<vmem>>, vector<1x48x16xbf16>
    %30 = vector.shape_cast %29 : vector<1x48x16xbf16> to vector<48x16xbf16>
    %cst_24 = arith.constant dense<0.000000e+00> : vector<24x16xf32>
    %31 = tpu.matmul %28, %30, %cst_24 {dimension_numbers = #tpu.dot_dimension_numbers<[1], [0], [0], [1], [0, 0, 1, 1], [], []>} : vector<24x48xbf16>, vector<48x16xbf16>, vector<24x16xf32> -> vector<24x16xf32>
    %32 = arith.addf %26, %31 : vector<24x16xf32>
    %c2 = arith.constant 2 : index
    %c0_25 = arith.constant 0 : index
    %33 = vector.load %arg7[%c2, %c0_25] : memref<40x48xf32, #tpu.memory_space<vmem>>, vector<24x48xf32>
    %34 = arith.truncf %33 : vector<24x48xf32> to vector<24x48xbf16>
    %c2_26 = arith.constant 2 : index
    %c0_27 = arith.constant 0 : index
    %c0_28 = arith.constant 0 : index
    %35 = vector.load %arg4[%c2_26, %c0_27, %c0_28] : memref<9x48x16xbf16, #tpu.memory_space<vmem>>, vector<1x48x16xbf16>
    %36 = vector.shape_cast %35 : vector<1x48x16xbf16> to vector<48x16xbf16>
    %cst_29 = arith.constant dense<0.000000e+00> : vector<24x16xf32>
    %37 = tpu.matmul %34, %36, %cst_29 {dimension_numbers = #tpu.dot_dimension_numbers<[1], [0], [0], [1], [0, 0, 1, 1], [], []>} : vector<24x48xbf16>, vector<48x16xbf16>, vector<24x16xf32> -> vector<24x16xf32>
    %38 = arith.addf %32, %37 : vector<24x16xf32>
    %c6 = arith.constant 6 : index
    %c0_30 = arith.constant 0 : index
    %39 = vector.load %arg7[%c6, %c0_30] : memref<40x48xf32, #tpu.memory_space<vmem>>, vector<24x48xf32>
    %40 = arith.truncf %39 : vector<24x48xf32> to vector<24x48xbf16>
    %c3 = arith.constant 3 : index
    %c0_31 = arith.constant 0 : index
    %c0_32 = arith.constant 0 : index
    %41 = vector.load %arg4[%c3, %c0_31, %c0_32] : memref<9x48x16xbf16, #tpu.memory_space<vmem>>, vector<1x48x16xbf16>
    %42 = vector.shape_cast %41 : vector<1x48x16xbf16> to vector<48x16xbf16>
    %cst_33 = arith.constant dense<0.000000e+00> : vector<24x16xf32>
    %43 = tpu.matmul %40, %42, %cst_33 {dimension_numbers = #tpu.dot_dimension_numbers<[1], [0], [0], [1], [0, 0, 1, 1], [], []>} : vector<24x48xbf16>, vector<48x16xbf16>, vector<24x16xf32> -> vector<24x16xf32>
    %44 = arith.addf %38, %43 : vector<24x16xf32>
    %c7_34 = arith.constant 7 : index
    %c0_35 = arith.constant 0 : index
    %45 = vector.load %arg7[%c7_34, %c0_35] : memref<40x48xf32, #tpu.memory_space<vmem>>, vector<24x48xf32>
    %46 = arith.truncf %45 : vector<24x48xf32> to vector<24x48xbf16>
    %c4 = arith.constant 4 : index
    %c0_36 = arith.constant 0 : index
    %c0_37 = arith.constant 0 : index
    %47 = vector.load %arg4[%c4, %c0_36, %c0_37] : memref<9x48x16xbf16, #tpu.memory_space<vmem>>, vector<1x48x16xbf16>
    %48 = vector.shape_cast %47 : vector<1x48x16xbf16> to vector<48x16xbf16>
    %cst_38 = arith.constant dense<0.000000e+00> : vector<24x16xf32>
    %49 = tpu.matmul %46, %48, %cst_38 {dimension_numbers = #tpu.dot_dimension_numbers<[1], [0], [0], [1], [0, 0, 1, 1], [], []>} : vector<24x48xbf16>, vector<48x16xbf16>, vector<24x16xf32> -> vector<24x16xf32>
    %50 = arith.addf %44, %49 : vector<24x16xf32>
    %c8 = arith.constant 8 : index
    %c0_39 = arith.constant 0 : index
    %51 = vector.load %arg7[%c8, %c0_39] : memref<40x48xf32, #tpu.memory_space<vmem>>, vector<24x48xf32>
    %52 = arith.truncf %51 : vector<24x48xf32> to vector<24x48xbf16>
    %c5 = arith.constant 5 : index
    %c0_40 = arith.constant 0 : index
    %c0_41 = arith.constant 0 : index
    %53 = vector.load %arg4[%c5, %c0_40, %c0_41] : memref<9x48x16xbf16, #tpu.memory_space<vmem>>, vector<1x48x16xbf16>
    %54 = vector.shape_cast %53 : vector<1x48x16xbf16> to vector<48x16xbf16>
    %cst_42 = arith.constant dense<0.000000e+00> : vector<24x16xf32>
    %55 = tpu.matmul %52, %54, %cst_42 {dimension_numbers = #tpu.dot_dimension_numbers<[1], [0], [0], [1], [0, 0, 1, 1], [], []>} : vector<24x48xbf16>, vector<48x16xbf16>, vector<24x16xf32> -> vector<24x16xf32>
    %56 = arith.addf %50, %55 : vector<24x16xf32>
    %c12 = arith.constant 12 : index
    %c0_43 = arith.constant 0 : index
    %57 = vector.load %arg7[%c12, %c0_43] : memref<40x48xf32, #tpu.memory_space<vmem>>, vector<24x48xf32>
    %58 = arith.truncf %57 : vector<24x48xf32> to vector<24x48xbf16>
    %c6_44 = arith.constant 6 : index
    %c0_45 = arith.constant 0 : index
    %c0_46 = arith.constant 0 : index
    %59 = vector.load %arg4[%c6_44, %c0_45, %c0_46] : memref<9x48x16xbf16, #tpu.memory_space<vmem>>, vector<1x48x16xbf16>
    %60 = vector.shape_cast %59 : vector<1x48x16xbf16> to vector<48x16xbf16>
    %cst_47 = arith.constant dense<0.000000e+00> : vector<24x16xf32>
    %61 = tpu.matmul %58, %60, %cst_47 {dimension_numbers = #tpu.dot_dimension_numbers<[1], [0], [0], [1], [0, 0, 1, 1], [], []>} : vector<24x48xbf16>, vector<48x16xbf16>, vector<24x16xf32> -> vector<24x16xf32>
    %62 = arith.addf %56, %61 : vector<24x16xf32>
    %c13_48 = arith.constant 13 : index
    %c0_49 = arith.constant 0 : index
    %63 = vector.load %arg7[%c13_48, %c0_49] : memref<40x48xf32, #tpu.memory_space<vmem>>, vector<24x48xf32>
    %64 = arith.truncf %63 : vector<24x48xf32> to vector<24x48xbf16>
    %c7_50 = arith.constant 7 : index
    %c0_51 = arith.constant 0 : index
    %c0_52 = arith.constant 0 : index
    %65 = vector.load %arg4[%c7_50, %c0_51, %c0_52] : memref<9x48x16xbf16, #tpu.memory_space<vmem>>, vector<1x48x16xbf16>
    %66 = vector.shape_cast %65 : vector<1x48x16xbf16> to vector<48x16xbf16>
    %cst_53 = arith.constant dense<0.000000e+00> : vector<24x16xf32>
    %67 = tpu.matmul %64, %66, %cst_53 {dimension_numbers = #tpu.dot_dimension_numbers<[1], [0], [0], [1], [0, 0, 1, 1], [], []>} : vector<24x48xbf16>, vector<48x16xbf16>, vector<24x16xf32> -> vector<24x16xf32>
    %68 = arith.addf %62, %67 : vector<24x16xf32>
    %c14 = arith.constant 14 : index
    %c0_54 = arith.constant 0 : index
    %69 = vector.load %arg7[%c14, %c0_54] : memref<40x48xf32, #tpu.memory_space<vmem>>, vector<24x48xf32>
    %70 = arith.truncf %69 : vector<24x48xf32> to vector<24x48xbf16>
    %c8_55 = arith.constant 8 : index
    %c0_56 = arith.constant 0 : index
    %c0_57 = arith.constant 0 : index
    %71 = vector.load %arg4[%c8_55, %c0_56, %c0_57] : memref<9x48x16xbf16, #tpu.memory_space<vmem>>, vector<1x48x16xbf16>
    %72 = vector.shape_cast %71 : vector<1x48x16xbf16> to vector<48x16xbf16>
    %cst_58 = arith.constant dense<0.000000e+00> : vector<24x16xf32>
    %73 = tpu.matmul %70, %72, %cst_58 {dimension_numbers = #tpu.dot_dimension_numbers<[1], [0], [0], [1], [0, 0, 1, 1], [], []>} : vector<24x48xbf16>, vector<48x16xbf16>, vector<24x16xf32> -> vector<24x16xf32>
    %74 = arith.addf %68, %73 : vector<24x16xf32>
    %c0_59 = arith.constant 0 : index
    %c0_60 = arith.constant 0 : index
    %75 = vector.load %arg5[%c0_59, %c0_60] : memref<1x16xf32, #tpu.memory_space<vmem>>, vector<1x16xf32>
    %76 = vector.broadcast %75 : vector<1x16xf32> to vector<24x16xf32>
    %77 = arith.addf %74, %76 : vector<24x16xf32>
    %c0_61 = arith.constant 0 : index
    %c0_62 = arith.constant 0 : index
    %c0_63 = arith.constant 0 : index
    %78 = vector.load %arg6[%c0_61, %c0_62, %c0_63] : memref<1x24x16xf32, #tpu.memory_space<vmem>>, vector<1x24x16xf32>
    %79 = vector.shape_cast %78 : vector<1x24x16xf32> to vector<24x16xf32>
    %80 = vector.shape_cast %77 : vector<24x16xf32> to vector<1x24x16xf32>
    tpu.vector_store %arg6[%c0_61, %c0_62, %c0_63], %80 {strides = array<i32>} : memref<1x24x16xf32, #tpu.memory_space<vmem>>, vector<1x24x16xf32>,
    return
  }
  func.func @transform_0(%arg0: i32) -> (i32, i32, i32) {
    %c0_i32 = arith.constant 0 : i32
    %c0_i32_0 = arith.constant 0 : i32
    %c0_i32_1 = arith.constant 0 : i32
    return %arg0, %c0_i32, %c0_i32_0 : i32, i32, i32
  }
  func.func @transform_1(%arg0: i32) -> (i32, i32) {
    %c0_i32 = arith.constant 0 : i32
    %c0_i32_0 = arith.constant 0 : i32
    %c0_i32_1 = arith.constant 0 : i32
    return %c0_i32, %c0_i32_0 : i32, i32
  }
  func.func @transform_2(%arg0: i32) -> (i32, i32) {
    %c0_i32 = arith.constant 0 : i32
    %c0_i32_0 = arith.constant 0 : i32
    %c0_i32_1 = arith.constant 0 : i32
    return %c0_i32, %c0_i32_0 : i32, i32
  }
  func.func @transform_3(%arg0: i32) -> (i32, i32, i32) {
    %c0_i32 = arith.constant 0 : i32
    %c0_i32_0 = arith.constant 0 : i32
    %c0_i32_1 = arith.constant 0 : i32
    %c0_i32_2 = arith.constant 0 : i32
    return %c0_i32, %c0_i32_0, %c0_i32_1 : i32, i32, i32
  }
  func.func @transform_4(%arg0: i32) -> (i32, i32) {
    %c0_i32 = arith.constant 0 : i32
    %c0_i32_0 = arith.constant 0 : i32
    %c0_i32_1 = arith.constant 0 : i32
    return %c0_i32, %c0_i32_0 : i32, i32
  }
  func.func @transform_5(%arg0: i32) -> (i32, i32, i32) {
    %c0_i32 = arith.constant 0 : i32
    %c0_i32_0 = arith.constant 0 : i32
    %c0_i32_1 = arith.constant 0 : i32
    return %arg0, %c0_i32, %c0_i32_0 : i32, i32, i32
  }
}

module attributes {stable_mosaic.version = 11 : i64} {
  func.func @_stats_kernel(%arg0: i32, %arg1: memref<32x16xf32, #tpu.memory_space<vmem>>, %arg2: memref<1x16xf32, #tpu.memory_space<vmem>>, %arg3: memref<1x16xf32, #tpu.memory_space<vmem>>) attributes {dimension_semantics = [#tpu.dimension_semantics<arbitrary>], iteration_bounds = array<i64: 1>, scalar_prefetch = 0 : i64, scratch_operands = 0 : i64, tpu.core_type = #tpu.core_type<tc>, window_params = [{transform_indices = @transform_0, window_bounds = array<i64: 32, 16>}, {pipeline_mode = #tpu.pipeline_mode<synchronous>, transform_indices = @transform_1, window_bounds = array<i64: 1, 16>}, {pipeline_mode = #tpu.pipeline_mode<synchronous>, transform_indices = @transform_2, window_bounds = array<i64: 1, 16>}]} {
    %c0_i32 = arith.constant 0 : i32
    %0 = arith.cmpi eq, %arg0, %c0_i32 : i32
    %1 = arith.extui %0 : i1 to i32
    %c0_i32_0 = arith.constant 0 : i32
    %2 = arith.cmpi ne, %1, %c0_i32_0 : i32
    scf.if %2 {
      %cst_11 = arith.constant 0.000000e+00 : f32
      %15 = vector.broadcast %cst_11 : f32 to vector<1x16xf32>
      %c0_12 = arith.constant 0 : index
      %c0_13 = arith.constant 0 : index
      %16 = vector.load %arg2[%c0_12, %c0_13] : memref<1x16xf32, #tpu.memory_space<vmem>>, vector<1x16xf32>
      tpu.vector_store %arg2[%c0_12, %c0_13], %15 {strides = array<i32>} : memref<1x16xf32, #tpu.memory_space<vmem>>, vector<1x16xf32>,
      %cst_14 = arith.constant 0.000000e+00 : f32
      %17 = vector.broadcast %cst_14 : f32 to vector<1x16xf32>
      %c0_15 = arith.constant 0 : index
      %c0_16 = arith.constant 0 : index
      %18 = vector.load %arg3[%c0_15, %c0_16] : memref<1x16xf32, #tpu.memory_space<vmem>>, vector<1x16xf32>
      tpu.vector_store %arg3[%c0_15, %c0_16], %17 {strides = array<i32>} : memref<1x16xf32, #tpu.memory_space<vmem>>, vector<1x16xf32>,
    } else {
    }
    %c0 = arith.constant 0 : index
    %c0_1 = arith.constant 0 : index
    %3 = vector.load %arg1[%c0, %c0_1] : memref<32x16xf32, #tpu.memory_space<vmem>>, vector<32x16xf32>
    %c0_2 = arith.constant 0 : index
    %c0_3 = arith.constant 0 : index
    %4 = vector.load %arg2[%c0_2, %c0_3] : memref<1x16xf32, #tpu.memory_space<vmem>>, vector<1x16xf32>
    %cst = arith.constant dense<0.000000e+00> : vector<16xf32>
    %5 = vector.multi_reduction <add>, %3, %cst [0] : vector<32x16xf32> to vector<16xf32>
    %6 = vector.shape_cast %5 : vector<16xf32> to vector<1x16xf32>
    %7 = arith.addf %4, %6 : vector<1x16xf32>
    %c0_4 = arith.constant 0 : index
    %c0_5 = arith.constant 0 : index
    %8 = vector.load %arg2[%c0_4, %c0_5] : memref<1x16xf32, #tpu.memory_space<vmem>>, vector<1x16xf32>
    tpu.vector_store %arg2[%c0_4, %c0_5], %7 {strides = array<i32>} : memref<1x16xf32, #tpu.memory_space<vmem>>, vector<1x16xf32>,
    %c0_6 = arith.constant 0 : index
    %c0_7 = arith.constant 0 : index
    %9 = vector.load %arg3[%c0_6, %c0_7] : memref<1x16xf32, #tpu.memory_space<vmem>>, vector<1x16xf32>
    %10 = arith.mulf %3, %3 : vector<32x16xf32>
    %cst_8 = arith.constant dense<0.000000e+00> : vector<16xf32>
    %11 = vector.multi_reduction <add>, %10, %cst_8 [0] : vector<32x16xf32> to vector<16xf32>
    %12 = vector.shape_cast %11 : vector<16xf32> to vector<1x16xf32>
    %13 = arith.addf %9, %12 : vector<1x16xf32>
    %c0_9 = arith.constant 0 : index
    %c0_10 = arith.constant 0 : index
    %14 = vector.load %arg3[%c0_9, %c0_10] : memref<1x16xf32, #tpu.memory_space<vmem>>, vector<1x16xf32>
    tpu.vector_store %arg3[%c0_9, %c0_10], %13 {strides = array<i32>} : memref<1x16xf32, #tpu.memory_space<vmem>>, vector<1x16xf32>,
    return
  }
  func.func @transform_0(%arg0: i32) -> (i32, i32) {
    %c0_i32 = arith.constant 0 : i32
    %c0_i32_0 = arith.constant 0 : i32
    return %arg0, %c0_i32 : i32, i32
  }
  func.func @transform_1(%arg0: i32) -> (i32, i32) {
    %c0_i32 = arith.constant 0 : i32
    %c0_i32_0 = arith.constant 0 : i32
    %c0_i32_1 = arith.constant 0 : i32
    return %c0_i32, %c0_i32_0 : i32, i32
  }
  func.func @transform_2(%arg0: i32) -> (i32, i32) {
    %c0_i32 = arith.constant 0 : i32
    %c0_i32_0 = arith.constant 0 : i32
    %c0_i32_1 = arith.constant 0 : i32
    return %c0_i32, %c0_i32_0 : i32, i32
  }
}

module attributes {stable_mosaic.version = 11 : i64} {
  func.func @_bn_relu_conv3x3_kernel(%arg0: i32, %arg1: memref<1x16x64xf32, #tpu.memory_space<vmem>>, %arg2: memref<1x64xf32, #tpu.memory_space<vmem>>, %arg3: memref<1x64xf32, #tpu.memory_space<vmem>>, %arg4: memref<9x64x16xbf16, #tpu.memory_space<vmem>>, %arg5: memref<1x16xf32, #tpu.memory_space<vmem>>, %arg6: memref<1x24x16xf32, #tpu.memory_space<vmem>>, %arg7: memref<40x64xf32, #tpu.memory_space<vmem>>) attributes {dimension_semantics = [#tpu.dimension_semantics<parallel>], iteration_bounds = array<i64: 2>, scalar_prefetch = 0 : i64, scratch_operands = 1 : i64, tpu.core_type = #tpu.core_type<tc>, window_params = [{transform_indices = @transform_0, window_bounds = array<i64: 1, 16, 64>}, {pipeline_mode = #tpu.pipeline_mode<synchronous>, transform_indices = @transform_1, window_bounds = array<i64: 1, 64>}, {pipeline_mode = #tpu.pipeline_mode<synchronous>, transform_indices = @transform_2, window_bounds = array<i64: 1, 64>}, {pipeline_mode = #tpu.pipeline_mode<synchronous>, transform_indices = @transform_3, window_bounds = array<i64: 9, 64, 16>}, {pipeline_mode = #tpu.pipeline_mode<synchronous>, transform_indices = @transform_4, window_bounds = array<i64: 1, 16>}, {transform_indices = @transform_5, window_bounds = array<i64: 1, 24, 16>}]} {
    %cst = arith.constant 0.000000e+00 : f32
    %0 = vector.broadcast %cst : f32 to vector<40x64xf32>
    %c0 = arith.constant 0 : index
    %c0_0 = arith.constant 0 : index
    %1 = vector.load %arg7[%c0, %c0_0] : memref<40x64xf32, #tpu.memory_space<vmem>>, vector<40x64xf32>
    tpu.vector_store %arg7[%c0, %c0_0], %0 {strides = array<i32>} : memref<40x64xf32, #tpu.memory_space<vmem>>, vector<40x64xf32>,
    %c0_1 = arith.constant 0 : index
    %c0_2 = arith.constant 0 : index
    %c0_3 = arith.constant 0 : index
    %2 = vector.load %arg1[%c0_1, %c0_2, %c0_3] : memref<1x16x64xf32, #tpu.memory_space<vmem>>, vector<1x16x64xf32>
    %3 = vector.shape_cast %2 : vector<1x16x64xf32> to vector<16x64xf32>
    %c0_4 = arith.constant 0 : index
    %c0_5 = arith.constant 0 : index
    %4 = vector.load %arg2[%c0_4, %c0_5] : memref<1x64xf32, #tpu.memory_space<vmem>>, vector<1x64xf32>
    %5 = vector.broadcast %4 : vector<1x64xf32> to vector<16x64xf32>
    %6 = arith.mulf %3, %5 : vector<16x64xf32>
    %c0_6 = arith.constant 0 : index
    %c0_7 = arith.constant 0 : index
    %7 = vector.load %arg3[%c0_6, %c0_7] : memref<1x64xf32, #tpu.memory_space<vmem>>, vector<1x64xf32>
    %8 = vector.broadcast %7 : vector<1x64xf32> to vector<16x64xf32>
    %9 = arith.addf %6, %8 : vector<16x64xf32>
    %cst_8 = arith.constant 0.000000e+00 : f32
    %10 = vector.broadcast %cst_8 : f32 to vector<16x64xf32>
    %11 = arith.maximumf %9, %10 : vector<16x64xf32>
    %12 = vector.extract_strided_slice %11 {offsets = [0, 0], sizes = [4, 64], strides = [1, 1]} : vector<16x64xf32> to vector<4x64xf32>
    %c7 = arith.constant 7 : index
    %c0_9 = arith.constant 0 : index
    %13 = vector.load %arg7[%c7, %c0_9] : memref<40x64xf32, #tpu.memory_space<vmem>>, vector<4x64xf32>
    tpu.vector_store %arg7[%c7, %c0_9], %12 {strides = array<i32>} : memref<40x64xf32, #tpu.memory_space<vmem>>, vector<4x64xf32>,
    %14 = vector.extract_strided_slice %11 {offsets = [4, 0], sizes = [4, 64], strides = [1, 1]} : vector<16x64xf32> to vector<4x64xf32>
    %c13 = arith.constant 13 : index
    %c0_10 = arith.constant 0 : index
    %15 = vector.load %arg7[%c13, %c0_10] : memref<40x64xf32, #tpu.memory_space<vmem>>, vector<4x64xf32>
    tpu.vector_store %arg7[%c13, %c0_10], %14 {strides = array<i32>} : memref<40x64xf32, #tpu.memory_space<vmem>>, vector<4x64xf32>,
    %16 = vector.extract_strided_slice %11 {offsets = [8, 0], sizes = [4, 64], strides = [1, 1]} : vector<16x64xf32> to vector<4x64xf32>
    %c19 = arith.constant 19 : index
    %c0_11 = arith.constant 0 : index
    %17 = vector.load %arg7[%c19, %c0_11] : memref<40x64xf32, #tpu.memory_space<vmem>>, vector<4x64xf32>
    tpu.vector_store %arg7[%c19, %c0_11], %16 {strides = array<i32>} : memref<40x64xf32, #tpu.memory_space<vmem>>, vector<4x64xf32>,
    %18 = vector.extract_strided_slice %11 {offsets = [12, 0], sizes = [4, 64], strides = [1, 1]} : vector<16x64xf32> to vector<4x64xf32>
    %c25 = arith.constant 25 : index
    %c0_12 = arith.constant 0 : index
    %19 = vector.load %arg7[%c25, %c0_12] : memref<40x64xf32, #tpu.memory_space<vmem>>, vector<4x64xf32>
    tpu.vector_store %arg7[%c25, %c0_12], %18 {strides = array<i32>} : memref<40x64xf32, #tpu.memory_space<vmem>>, vector<4x64xf32>,
    %cst_13 = arith.constant 0.000000e+00 : f32
    %20 = vector.broadcast %cst_13 : f32 to vector<24x16xf32>
    %c0_14 = arith.constant 0 : index
    %c0_15 = arith.constant 0 : index
    %21 = vector.load %arg7[%c0_14, %c0_15] : memref<40x64xf32, #tpu.memory_space<vmem>>, vector<24x64xf32>
    %22 = arith.truncf %21 : vector<24x64xf32> to vector<24x64xbf16>
    %c0_16 = arith.constant 0 : index
    %c0_17 = arith.constant 0 : index
    %c0_18 = arith.constant 0 : index
    %23 = vector.load %arg4[%c0_16, %c0_17, %c0_18] : memref<9x64x16xbf16, #tpu.memory_space<vmem>>, vector<1x64x16xbf16>
    %24 = vector.shape_cast %23 : vector<1x64x16xbf16> to vector<64x16xbf16>
    %cst_19 = arith.constant dense<0.000000e+00> : vector<24x16xf32>
    %25 = tpu.matmul %22, %24, %cst_19 {dimension_numbers = #tpu.dot_dimension_numbers<[1], [0], [0], [1], [0, 0, 1, 1], [], []>} : vector<24x64xbf16>, vector<64x16xbf16>, vector<24x16xf32> -> vector<24x16xf32>
    %26 = arith.addf %20, %25 : vector<24x16xf32>
    %c1 = arith.constant 1 : index
    %c0_20 = arith.constant 0 : index
    %27 = vector.load %arg7[%c1, %c0_20] : memref<40x64xf32, #tpu.memory_space<vmem>>, vector<24x64xf32>
    %28 = arith.truncf %27 : vector<24x64xf32> to vector<24x64xbf16>
    %c1_21 = arith.constant 1 : index
    %c0_22 = arith.constant 0 : index
    %c0_23 = arith.constant 0 : index
    %29 = vector.load %arg4[%c1_21, %c0_22, %c0_23] : memref<9x64x16xbf16, #tpu.memory_space<vmem>>, vector<1x64x16xbf16>
    %30 = vector.shape_cast %29 : vector<1x64x16xbf16> to vector<64x16xbf16>
    %cst_24 = arith.constant dense<0.000000e+00> : vector<24x16xf32>
    %31 = tpu.matmul %28, %30, %cst_24 {dimension_numbers = #tpu.dot_dimension_numbers<[1], [0], [0], [1], [0, 0, 1, 1], [], []>} : vector<24x64xbf16>, vector<64x16xbf16>, vector<24x16xf32> -> vector<24x16xf32>
    %32 = arith.addf %26, %31 : vector<24x16xf32>
    %c2 = arith.constant 2 : index
    %c0_25 = arith.constant 0 : index
    %33 = vector.load %arg7[%c2, %c0_25] : memref<40x64xf32, #tpu.memory_space<vmem>>, vector<24x64xf32>
    %34 = arith.truncf %33 : vector<24x64xf32> to vector<24x64xbf16>
    %c2_26 = arith.constant 2 : index
    %c0_27 = arith.constant 0 : index
    %c0_28 = arith.constant 0 : index
    %35 = vector.load %arg4[%c2_26, %c0_27, %c0_28] : memref<9x64x16xbf16, #tpu.memory_space<vmem>>, vector<1x64x16xbf16>
    %36 = vector.shape_cast %35 : vector<1x64x16xbf16> to vector<64x16xbf16>
    %cst_29 = arith.constant dense<0.000000e+00> : vector<24x16xf32>
    %37 = tpu.matmul %34, %36, %cst_29 {dimension_numbers = #tpu.dot_dimension_numbers<[1], [0], [0], [1], [0, 0, 1, 1], [], []>} : vector<24x64xbf16>, vector<64x16xbf16>, vector<24x16xf32> -> vector<24x16xf32>
    %38 = arith.addf %32, %37 : vector<24x16xf32>
    %c6 = arith.constant 6 : index
    %c0_30 = arith.constant 0 : index
    %39 = vector.load %arg7[%c6, %c0_30] : memref<40x64xf32, #tpu.memory_space<vmem>>, vector<24x64xf32>
    %40 = arith.truncf %39 : vector<24x64xf32> to vector<24x64xbf16>
    %c3 = arith.constant 3 : index
    %c0_31 = arith.constant 0 : index
    %c0_32 = arith.constant 0 : index
    %41 = vector.load %arg4[%c3, %c0_31, %c0_32] : memref<9x64x16xbf16, #tpu.memory_space<vmem>>, vector<1x64x16xbf16>
    %42 = vector.shape_cast %41 : vector<1x64x16xbf16> to vector<64x16xbf16>
    %cst_33 = arith.constant dense<0.000000e+00> : vector<24x16xf32>
    %43 = tpu.matmul %40, %42, %cst_33 {dimension_numbers = #tpu.dot_dimension_numbers<[1], [0], [0], [1], [0, 0, 1, 1], [], []>} : vector<24x64xbf16>, vector<64x16xbf16>, vector<24x16xf32> -> vector<24x16xf32>
    %44 = arith.addf %38, %43 : vector<24x16xf32>
    %c7_34 = arith.constant 7 : index
    %c0_35 = arith.constant 0 : index
    %45 = vector.load %arg7[%c7_34, %c0_35] : memref<40x64xf32, #tpu.memory_space<vmem>>, vector<24x64xf32>
    %46 = arith.truncf %45 : vector<24x64xf32> to vector<24x64xbf16>
    %c4 = arith.constant 4 : index
    %c0_36 = arith.constant 0 : index
    %c0_37 = arith.constant 0 : index
    %47 = vector.load %arg4[%c4, %c0_36, %c0_37] : memref<9x64x16xbf16, #tpu.memory_space<vmem>>, vector<1x64x16xbf16>
    %48 = vector.shape_cast %47 : vector<1x64x16xbf16> to vector<64x16xbf16>
    %cst_38 = arith.constant dense<0.000000e+00> : vector<24x16xf32>
    %49 = tpu.matmul %46, %48, %cst_38 {dimension_numbers = #tpu.dot_dimension_numbers<[1], [0], [0], [1], [0, 0, 1, 1], [], []>} : vector<24x64xbf16>, vector<64x16xbf16>, vector<24x16xf32> -> vector<24x16xf32>
    %50 = arith.addf %44, %49 : vector<24x16xf32>
    %c8 = arith.constant 8 : index
    %c0_39 = arith.constant 0 : index
    %51 = vector.load %arg7[%c8, %c0_39] : memref<40x64xf32, #tpu.memory_space<vmem>>, vector<24x64xf32>
    %52 = arith.truncf %51 : vector<24x64xf32> to vector<24x64xbf16>
    %c5 = arith.constant 5 : index
    %c0_40 = arith.constant 0 : index
    %c0_41 = arith.constant 0 : index
    %53 = vector.load %arg4[%c5, %c0_40, %c0_41] : memref<9x64x16xbf16, #tpu.memory_space<vmem>>, vector<1x64x16xbf16>
    %54 = vector.shape_cast %53 : vector<1x64x16xbf16> to vector<64x16xbf16>
    %cst_42 = arith.constant dense<0.000000e+00> : vector<24x16xf32>
    %55 = tpu.matmul %52, %54, %cst_42 {dimension_numbers = #tpu.dot_dimension_numbers<[1], [0], [0], [1], [0, 0, 1, 1], [], []>} : vector<24x64xbf16>, vector<64x16xbf16>, vector<24x16xf32> -> vector<24x16xf32>
    %56 = arith.addf %50, %55 : vector<24x16xf32>
    %c12 = arith.constant 12 : index
    %c0_43 = arith.constant 0 : index
    %57 = vector.load %arg7[%c12, %c0_43] : memref<40x64xf32, #tpu.memory_space<vmem>>, vector<24x64xf32>
    %58 = arith.truncf %57 : vector<24x64xf32> to vector<24x64xbf16>
    %c6_44 = arith.constant 6 : index
    %c0_45 = arith.constant 0 : index
    %c0_46 = arith.constant 0 : index
    %59 = vector.load %arg4[%c6_44, %c0_45, %c0_46] : memref<9x64x16xbf16, #tpu.memory_space<vmem>>, vector<1x64x16xbf16>
    %60 = vector.shape_cast %59 : vector<1x64x16xbf16> to vector<64x16xbf16>
    %cst_47 = arith.constant dense<0.000000e+00> : vector<24x16xf32>
    %61 = tpu.matmul %58, %60, %cst_47 {dimension_numbers = #tpu.dot_dimension_numbers<[1], [0], [0], [1], [0, 0, 1, 1], [], []>} : vector<24x64xbf16>, vector<64x16xbf16>, vector<24x16xf32> -> vector<24x16xf32>
    %62 = arith.addf %56, %61 : vector<24x16xf32>
    %c13_48 = arith.constant 13 : index
    %c0_49 = arith.constant 0 : index
    %63 = vector.load %arg7[%c13_48, %c0_49] : memref<40x64xf32, #tpu.memory_space<vmem>>, vector<24x64xf32>
    %64 = arith.truncf %63 : vector<24x64xf32> to vector<24x64xbf16>
    %c7_50 = arith.constant 7 : index
    %c0_51 = arith.constant 0 : index
    %c0_52 = arith.constant 0 : index
    %65 = vector.load %arg4[%c7_50, %c0_51, %c0_52] : memref<9x64x16xbf16, #tpu.memory_space<vmem>>, vector<1x64x16xbf16>
    %66 = vector.shape_cast %65 : vector<1x64x16xbf16> to vector<64x16xbf16>
    %cst_53 = arith.constant dense<0.000000e+00> : vector<24x16xf32>
    %67 = tpu.matmul %64, %66, %cst_53 {dimension_numbers = #tpu.dot_dimension_numbers<[1], [0], [0], [1], [0, 0, 1, 1], [], []>} : vector<24x64xbf16>, vector<64x16xbf16>, vector<24x16xf32> -> vector<24x16xf32>
    %68 = arith.addf %62, %67 : vector<24x16xf32>
    %c14 = arith.constant 14 : index
    %c0_54 = arith.constant 0 : index
    %69 = vector.load %arg7[%c14, %c0_54] : memref<40x64xf32, #tpu.memory_space<vmem>>, vector<24x64xf32>
    %70 = arith.truncf %69 : vector<24x64xf32> to vector<24x64xbf16>
    %c8_55 = arith.constant 8 : index
    %c0_56 = arith.constant 0 : index
    %c0_57 = arith.constant 0 : index
    %71 = vector.load %arg4[%c8_55, %c0_56, %c0_57] : memref<9x64x16xbf16, #tpu.memory_space<vmem>>, vector<1x64x16xbf16>
    %72 = vector.shape_cast %71 : vector<1x64x16xbf16> to vector<64x16xbf16>
    %cst_58 = arith.constant dense<0.000000e+00> : vector<24x16xf32>
    %73 = tpu.matmul %70, %72, %cst_58 {dimension_numbers = #tpu.dot_dimension_numbers<[1], [0], [0], [1], [0, 0, 1, 1], [], []>} : vector<24x64xbf16>, vector<64x16xbf16>, vector<24x16xf32> -> vector<24x16xf32>
    %74 = arith.addf %68, %73 : vector<24x16xf32>
    %c0_59 = arith.constant 0 : index
    %c0_60 = arith.constant 0 : index
    %75 = vector.load %arg5[%c0_59, %c0_60] : memref<1x16xf32, #tpu.memory_space<vmem>>, vector<1x16xf32>
    %76 = vector.broadcast %75 : vector<1x16xf32> to vector<24x16xf32>
    %77 = arith.addf %74, %76 : vector<24x16xf32>
    %c0_61 = arith.constant 0 : index
    %c0_62 = arith.constant 0 : index
    %c0_63 = arith.constant 0 : index
    %78 = vector.load %arg6[%c0_61, %c0_62, %c0_63] : memref<1x24x16xf32, #tpu.memory_space<vmem>>, vector<1x24x16xf32>
    %79 = vector.shape_cast %78 : vector<1x24x16xf32> to vector<24x16xf32>
    %80 = vector.shape_cast %77 : vector<24x16xf32> to vector<1x24x16xf32>
    tpu.vector_store %arg6[%c0_61, %c0_62, %c0_63], %80 {strides = array<i32>} : memref<1x24x16xf32, #tpu.memory_space<vmem>>, vector<1x24x16xf32>,
    return
  }
  func.func @transform_0(%arg0: i32) -> (i32, i32, i32) {
    %c0_i32 = arith.constant 0 : i32
    %c0_i32_0 = arith.constant 0 : i32
    %c0_i32_1 = arith.constant 0 : i32
    return %arg0, %c0_i32, %c0_i32_0 : i32, i32, i32
  }
  func.func @transform_1(%arg0: i32) -> (i32, i32) {
    %c0_i32 = arith.constant 0 : i32
    %c0_i32_0 = arith.constant 0 : i32
    %c0_i32_1 = arith.constant 0 : i32
    return %c0_i32, %c0_i32_0 : i32, i32
  }
  func.func @transform_2(%arg0: i32) -> (i32, i32) {
    %c0_i32 = arith.constant 0 : i32
    %c0_i32_0 = arith.constant 0 : i32
    %c0_i32_1 = arith.constant 0 : i32
    return %c0_i32, %c0_i32_0 : i32, i32
  }
  func.func @transform_3(%arg0: i32) -> (i32, i32, i32) {
    %c0_i32 = arith.constant 0 : i32
    %c0_i32_0 = arith.constant 0 : i32
    %c0_i32_1 = arith.constant 0 : i32
    %c0_i32_2 = arith.constant 0 : i32
    return %c0_i32, %c0_i32_0, %c0_i32_1 : i32, i32, i32
  }
  func.func @transform_4(%arg0: i32) -> (i32, i32) {
    %c0_i32 = arith.constant 0 : i32
    %c0_i32_0 = arith.constant 0 : i32
    %c0_i32_1 = arith.constant 0 : i32
    return %c0_i32, %c0_i32_0 : i32, i32
  }
  func.func @transform_5(%arg0: i32) -> (i32, i32, i32) {
    %c0_i32 = arith.constant 0 : i32
    %c0_i32_0 = arith.constant 0 : i32
    %c0_i32_1 = arith.constant 0 : i32
    return %arg0, %c0_i32, %c0_i32_0 : i32, i32, i32
  }
}

module attributes {stable_mosaic.version = 11 : i64} {
  func.func @_bn_relu_gap_kernel(%arg0: i32, %arg1: memref<1x16x80xf32, #tpu.memory_space<vmem>>, %arg2: memref<1x80xf32, #tpu.memory_space<vmem>>, %arg3: memref<1x80xf32, #tpu.memory_space<vmem>>, %arg4: memref<1x1x80xf32, #tpu.memory_space<vmem>>) attributes {dimension_semantics = [#tpu.dimension_semantics<parallel>], iteration_bounds = array<i64: 2>, scalar_prefetch = 0 : i64, scratch_operands = 0 : i64, tpu.core_type = #tpu.core_type<tc>, window_params = [{transform_indices = @transform_0, window_bounds = array<i64: 1, 16, 80>}, {pipeline_mode = #tpu.pipeline_mode<synchronous>, transform_indices = @transform_1, window_bounds = array<i64: 1, 80>}, {pipeline_mode = #tpu.pipeline_mode<synchronous>, transform_indices = @transform_2, window_bounds = array<i64: 1, 80>}, {transform_indices = @transform_3, window_bounds = array<i64: 1, 1, 80>}]} {
    %c0 = arith.constant 0 : index
    %c0_0 = arith.constant 0 : index
    %c0_1 = arith.constant 0 : index
    %0 = vector.load %arg1[%c0, %c0_0, %c0_1] : memref<1x16x80xf32, #tpu.memory_space<vmem>>, vector<1x16x80xf32>
    %1 = vector.shape_cast %0 : vector<1x16x80xf32> to vector<16x80xf32>
    %c0_2 = arith.constant 0 : index
    %c0_3 = arith.constant 0 : index
    %2 = vector.load %arg2[%c0_2, %c0_3] : memref<1x80xf32, #tpu.memory_space<vmem>>, vector<1x80xf32>
    %3 = vector.broadcast %2 : vector<1x80xf32> to vector<16x80xf32>
    %4 = arith.mulf %1, %3 : vector<16x80xf32>
    %c0_4 = arith.constant 0 : index
    %c0_5 = arith.constant 0 : index
    %5 = vector.load %arg3[%c0_4, %c0_5] : memref<1x80xf32, #tpu.memory_space<vmem>>, vector<1x80xf32>
    %6 = vector.broadcast %5 : vector<1x80xf32> to vector<16x80xf32>
    %7 = arith.addf %4, %6 : vector<16x80xf32>
    %cst = arith.constant 0.000000e+00 : f32
    %8 = vector.broadcast %cst : f32 to vector<16x80xf32>
    %9 = arith.maximumf %7, %8 : vector<16x80xf32>
    %cst_6 = arith.constant dense<0.000000e+00> : vector<80xf32>
    %10 = vector.multi_reduction <add>, %9, %cst_6 [0] : vector<16x80xf32> to vector<80xf32>
    %11 = vector.shape_cast %10 : vector<80xf32> to vector<1x80xf32>
    %cst_7 = arith.constant 1.600000e+01 : f32
    %12 = vector.broadcast %cst_7 : f32 to vector<1x80xf32>
    %13 = arith.divf %11, %12 : vector<1x80xf32>
    %c0_8 = arith.constant 0 : index
    %c0_9 = arith.constant 0 : index
    %c0_10 = arith.constant 0 : index
    %14 = vector.load %arg4[%c0_8, %c0_9, %c0_10] : memref<1x1x80xf32, #tpu.memory_space<vmem>>, vector<1x1x80xf32>
    %15 = vector.shape_cast %14 : vector<1x1x80xf32> to vector<1x80xf32>
    %16 = vector.shape_cast %13 : vector<1x80xf32> to vector<1x1x80xf32>
    tpu.vector_store %arg4[%c0_8, %c0_9, %c0_10], %16 {strides = array<i32>} : memref<1x1x80xf32, #tpu.memory_space<vmem>>, vector<1x1x80xf32>,
    return
  }
  func.func @transform_0(%arg0: i32) -> (i32, i32, i32) {
    %c0_i32 = arith.constant 0 : i32
    %c0_i32_0 = arith.constant 0 : i32
    %c0_i32_1 = arith.constant 0 : i32
    return %arg0, %c0_i32, %c0_i32_0 : i32, i32, i32
  }
  func.func @transform_1(%arg0: i32) -> (i32, i32) {
    %c0_i32 = arith.constant 0 : i32
    %c0_i32_0 = arith.constant 0 : i32
    %c0_i32_1 = arith.constant 0 : i32
    return %c0_i32, %c0_i32_0 : i32, i32
  }
  func.func @transform_2(%arg0: i32) -> (i32, i32) {
    %c0_i32 = arith.constant 0 : i32
    %c0_i32_0 = arith.constant 0 : i32
    %c0_i32_1 = arith.constant 0 : i32
    return %c0_i32, %c0_i32_0 : i32, i32
  }
  func.func @transform_3(%arg0: i32) -> (i32, i32, i32) {
    %c0_i32 = arith.constant 0 : i32
    %c0_i32_0 = arith.constant 0 : i32
    %c0_i32_1 = arith.constant 0 : i32
    return %arg0, %c0_i32, %c0_i32_0 : i32, i32, i32
  }
}

module attributes {stable_mosaic.version = 11 : i64} {
  func.func @_matmul_bias_kernel(%arg0: i32, %arg1: memref<2x80xf32, #tpu.memory_space<vmem>>, %arg2: memref<80x10xbf16, #tpu.memory_space<vmem>>, %arg3: memref<1x10xf32, #tpu.memory_space<vmem>>, %arg4: memref<2x10xf32, #tpu.memory_space<vmem>>) attributes {dimension_semantics = [#tpu.dimension_semantics<parallel>], iteration_bounds = array<i64: 1>, scalar_prefetch = 0 : i64, scratch_operands = 0 : i64, tpu.core_type = #tpu.core_type<tc>, window_params = [{transform_indices = @transform_0, window_bounds = array<i64: 2, 80>}, {pipeline_mode = #tpu.pipeline_mode<synchronous>, transform_indices = @transform_1, window_bounds = array<i64: 80, 10>}, {pipeline_mode = #tpu.pipeline_mode<synchronous>, transform_indices = @transform_2, window_bounds = array<i64: 1, 10>}, {transform_indices = @transform_3, window_bounds = array<i64: 2, 10>}]} {
    %c0 = arith.constant 0 : index
    %c0_0 = arith.constant 0 : index
    %0 = vector.load %arg1[%c0, %c0_0] : memref<2x80xf32, #tpu.memory_space<vmem>>, vector<2x80xf32>
    %1 = arith.truncf %0 : vector<2x80xf32> to vector<2x80xbf16>
    %c0_1 = arith.constant 0 : index
    %c0_2 = arith.constant 0 : index
    %2 = vector.load %arg2[%c0_1, %c0_2] : memref<80x10xbf16, #tpu.memory_space<vmem>>, vector<80x10xbf16>
    %cst = arith.constant dense<0.000000e+00> : vector<2x10xf32>
    %3 = tpu.matmul %1, %2, %cst {dimension_numbers = #tpu.dot_dimension_numbers<[1], [0], [0], [1], [0, 0, 1, 1], [], []>} : vector<2x80xbf16>, vector<80x10xbf16>, vector<2x10xf32> -> vector<2x10xf32>
    %c0_3 = arith.constant 0 : index
    %c0_4 = arith.constant 0 : index
    %4 = vector.load %arg3[%c0_3, %c0_4] : memref<1x10xf32, #tpu.memory_space<vmem>>, vector<1x10xf32>
    %5 = vector.broadcast %4 : vector<1x10xf32> to vector<2x10xf32>
    %6 = arith.addf %3, %5 : vector<2x10xf32>
    %c0_5 = arith.constant 0 : index
    %c0_6 = arith.constant 0 : index
    %7 = vector.load %arg4[%c0_5, %c0_6] : memref<2x10xf32, #tpu.memory_space<vmem>>, vector<2x10xf32>
    tpu.vector_store %arg4[%c0_5, %c0_6], %6 {strides = array<i32>} : memref<2x10xf32, #tpu.memory_space<vmem>>, vector<2x10xf32>,
    return
  }
  func.func @transform_0(%arg0: i32) -> (i32, i32) {
    %c0_i32 = arith.constant 0 : i32
    %c0_i32_0 = arith.constant 0 : i32
    return %arg0, %c0_i32 : i32, i32
  }
  func.func @transform_1(%arg0: i32) -> (i32, i32) {
    %c0_i32 = arith.constant 0 : i32
    %c0_i32_0 = arith.constant 0 : i32
    %c0_i32_1 = arith.constant 0 : i32
    return %c0_i32, %c0_i32_0 : i32, i32
  }
  func.func @transform_2(%arg0: i32) -> (i32, i32) {
    %c0_i32 = arith.constant 0 : i32
    %c0_i32_0 = arith.constant 0 : i32
    %c0_i32_1 = arith.constant 0 : i32
    return %c0_i32, %c0_i32_0 : i32, i32
  }
  func.func @transform_3(%arg0: i32) -> (i32, i32) {
    %c0_i32 = arith.constant 0 : i32
    %c0_i32_0 = arith.constant 0 : i32
    return %arg0, %c0_i32 : i32, i32
  }
}

</mosaic_0001>

<bundles_post_ra>
// kernel: densenet_forward.19
= control target key start
LH: loop header
LB: loop body
LE: loop exit
PB: predicated region body
PF: predicated region fallthrough
CT: control target
= control target key end

     0   :  { %vm14_vm0 = vcmask 516096   ;;  %vm82_vm1 = vcmask 523264   ;;  %v428_v0 = vmov 0.0   ;;  %s1318_s0 = inlined_call_operand.vmem [shape: f32[512,64], index: 0, kind: input, shape index: {}]   ;;  %s1319_s1 = inlined_call_operand.vmem [shape: f32[1,64], index: 1, kind: output, shape index: {0}]   ;;  %s1320_s2 = inlined_call_operand.vmem [shape: f32[1,64], index: 2, kind: output, shape index: {1}]  }
   0x1   :  { %15 = vst.msk [vmem:[%s1319_s1] sm:$0x1] %vm14_vm0, %v428_v0  ;;  %16 = vst.msk [vmem:[%s1320_s2] sm:$0x1] %vm14_vm0, %v428_v0  ;;  %v455_v1 = vld [vmem:[%s1318_s0] sm:$0xff]  ;;  %v460_v2 = vld [vmem:[%s1318_s0 + $0x8] sm:$0xff] }
   0x2   :  { %v465_v3 = vld [vmem:[%s1318_s0 + $0x10] sm:$0xff]  ;;  %v83_v4 = vsel %vm82_vm1, %v455_v1, 0.0  ;;  %v84_v5 = vsel %vm82_vm1, %v460_v2, 0.0  ;;  %v476_v7 = vld [vmem:[%s1318_s0 + $0x18] sm:$0xff]  ;;  %v483_v10 = vld [vmem:[%s1318_s0 + $0x20] sm:$0xff] }
   0x3   :  { %v86_v6 = vsel %vm82_vm1, %v465_v3, 0.0  ;;  %v85_v8 = vadd.f32 %v84_v5, %v83_v4  ;;  %v88_v9 = vsel %vm82_vm1, %v476_v7, 0.0  ;;  %v90_v12 = vsel %vm82_vm1, %v483_v10, 0.0  ;;  %v490_v13 = vld [vmem:[%s1318_s0 + $0x28] sm:$0xff]  ;;  %v497_v16 = vld [vmem:[%s1318_s0 + $0x30] sm:$0xff]  ;;  %v502_v18 = vld [vmem:[%s1318_s0 + $0x38] sm:$0xff] }
   0x4   :  { %v92_v15 = vsel %vm82_vm1, %v490_v13, 0.0  ;;  %v507_v19 = vld [vmem:[%s1318_s0 + $0x40] sm:$0xff]  ;;  %v94_v20 = vsel %vm82_vm1, %v497_v16, 0.0  ;;  %v514_v21 = vld [vmem:[%s1318_s0 + $0x48] sm:$0xff]  ;;  %v519_v22 = vld [vmem:[%s1318_s0 + $0x50] sm:$0xff]  ;;  %v96_v25 = vsel %vm82_vm1, %v502_v18, 0.0 }
   0x5   :  { %v87_v11 = vadd.f32 %v86_v6, %v85_v8  ;;  %v524_v23 = vld [vmem:[%s1318_s0 + $0x58] sm:$0xff]  ;;  %v98_v26 = vsel %vm82_vm1, %v507_v19, 0.0  ;;  %v533_v27 = vld [vmem:[%s1318_s0 + $0x108] sm:$0xff]  ;;  %v538_v28 = vld [vmem:[%s1318_s0 + $0x110] sm:$0xff]  ;;  %v100_v30 = vsel %vm82_vm1, %v514_v21, 0.0  ;;  %v102_v31 = vsel %vm82_vm1, %v519_v22, 0.0 }
   0x6   :  { %v543_v29 = vld [vmem:[%s1318_s0 + $0x118] sm:$0xff]  ;;  %v551_v32 = vsel %vm82_vm1, %v524_v23, 0.0  ;;  %v556_v33 = vld [vmem:[%s1318_s0 + $0x120] sm:$0xff]  ;;  %v561_v34 = vld [vmem:[%s1318_s0 + $0x128] sm:$0xff]  ;;  %v570_v37 = vsel %vm82_vm1, %v533_v27, 0.0  ;;  %v574_v38 = vsel %vm82_vm1, %v538_v28, 0.0 }
   0x7   :  { %v89_v14 = vadd.f32 %v88_v9, %v87_v11  ;;  %v566_v35 = vld [vmem:[%s1318_s0 + $0x130] sm:$0xff]  ;;  %1339 = vst [vmem:[#allocation2_spill] sm:$0xff] %v570_v37  ;;  %1340 = vst [vmem:[#allocation3_spill] sm:$0xff] %v574_v38  ;;  %v578_v39 = vsel %vm82_vm1, %v543_v29, 0.0  ;;  %v583_v40 = vld [vmem:[%s1318_s0 + $0x138] sm:$0xff]  ;;  %v597_v43 = vsel %vm82_vm1, %v556_v33, 0.0  ;;  %v222_v37 = vmul.f32 %v465_v3, %v465_v3 }
   0x8   :  { %1341 = vst [vmem:[#allocation4_spill] sm:$0xff] %v578_v39  ;;  %v588_v41 = vld [vmem:[%s1318_s0 + $0x140] sm:$0xff]  ;;  %v593_v42 = vld [vmem:[%s1318_s0 + $0x148] sm:$0xff]  ;;  %1342 = vst [vmem:[#allocation5_spill] sm:$0xff] %v597_v43  ;;  %v601_v44 = vsel %vm82_vm1, %v561_v34, 0.0  ;;  %v605_v45 = vsel %vm82_vm1, %v566_v35, 0.0 }
   0x9   :  { %v91_v17 = vadd.f32 %v90_v12, %v89_v14  ;;  %1343 = vst [vmem:[#allocation6_spill] sm:$0xff] %v601_v44  ;;  %1344 = vst [vmem:[#allocation7_spill] sm:$0xff] %v605_v45  ;;  %v610_v46 = vld [vmem:[%s1318_s0 + $0x150] sm:$0xff]  ;;  %v615_v47 = vld [vmem:[%s1318_s0 + $0x158] sm:$0xff]  ;;  %v624_v50 = vsel %vm82_vm1, %v583_v40, 0.0  ;;  %v628_v51 = vsel %vm82_vm1, %v588_v41, 0.0 }
   0xa   :  { %v620_v48 = vld [vmem:[%s1318_s0 + $0x160] sm:$0xff]  ;;  %1345 = vst [vmem:[#allocation8_spill] sm:$0xff] %v624_v50  ;;  %1346 = vst [vmem:[#allocation9_spill] sm:$0xff] %v628_v51  ;;  %v632_v52 = vsel %vm82_vm1, %v593_v42, 0.0  ;;  %v637_v53 = vld [vmem:[%s1318_s0 + $0x168] sm:$0xff]  ;;  %v651_v56 = vsel %vm82_vm1, %v610_v46, 0.0 }
   0xb   :  { %v93_v24 = vadd.f32 %v92_v15, %v91_v17  ;;  %1347 = vst [vmem:[#allocation10_spill] sm:$0xff] %v632_v52  ;;  %v642_v54 = vld [vmem:[%s1318_s0 + $0x170] sm:$0xff]  ;;  %v647_v55 = vld [vmem:[%s1318_s0 + $0x178] sm:$0xff]  ;;  %1348 = vst [vmem:[#allocation11_spill] sm:$0xff] %v651_v56  ;;  %v655_v57 = vsel %vm82_vm1, %v615_v47, 0.0  ;;  %v659_v58 = vsel %vm82_vm1, %v620_v48, 0.0 }
   0xc   :  { %1349 = vst [vmem:[#allocation12_spill] sm:$0xff] %v655_v57  ;;  %1350 = vst [vmem:[#allocation13_spill] sm:$0xff] %v659_v58  ;;  %v664_v59 = vld [vmem:[%s1318_s0 + $0x180] sm:$0xff]  ;;  %v669_v60 = vld [vmem:[%s1318_s0 + $0x188] sm:$0xff]  ;;  %v678_v63 = vsel %vm82_vm1, %v637_v53, 0.0  ;;  %v682_v0 = vsel %vm82_vm1, %v642_v54, 0.0 }
   0xd   :  { %v95_v36 = vadd.f32 %v94_v20, %v93_v24  ;;  %v674_v61 = vld [vmem:[%s1318_s0 + $0x190] sm:$0xff]  ;;  %1351 = vst [vmem:[#allocation14_spill] sm:$0xff] %v678_v63  ;;  %1352 = vst [vmem:[#allocation15_spill] sm:$0xff] %v682_v0  ;;  %v686_v4 = vsel %vm82_vm1, %v647_v55, 0.0  ;;  %v691_v5 = vld [vmem:[%s1318_s0 + $0x198] sm:$0xff]  ;;  %v705_v9 = vsel %vm82_vm1, %v664_v59, 0.0 }
   0xe   :  { %1353 = vst [vmem:[#allocation16_spill] sm:$0xff] %v686_v4  ;;  %v696_v6 = vld [vmem:[%s1318_s0 + $0x1a0] sm:$0xff]  ;;  %v701_v8 = vld [vmem:[%s1318_s0 + $0x1a8] sm:$0xff]  ;;  %1354 = vst [vmem:[#allocation17_spill] sm:$0xff] %v705_v9  ;;  %v709_v11 = vsel %vm82_vm1, %v669_v60, 0.0  ;;  %v713_v12 = vsel %vm82_vm1, %v674_v61, 0.0 }
   0xf   :  { %v97_v49 = vadd.f32 %v96_v25, %v95_v36  ;;  %1355 = vst [vmem:[#allocation18_spill] sm:$0xff] %v709_v11  ;;  %1356 = vst [vmem:[#allocation19_spill] sm:$0xff] %v713_v12  ;;  %v718_v14 = vld [vmem:[%s1318_s0 + $0x60] sm:$0xff]  ;;  %v723_v15 = vld [vmem:[%s1318_s0 + $0x1b0] sm:$0xff]  ;;  %v737_v25 = vsel %vm82_vm1, %v691_v5, 0.0  ;;  %v745_v36 = vsel %vm82_vm1, %v701_v8, 0.0 }
  0x10   :  { %v728_v17 = vld [vmem:[%s1318_s0 + $0x1b8] sm:$0xff]  ;;  %v733_v20 = vld [vmem:[%s1318_s0 + $0x1c0] sm:$0xff]  ;;  %1357 = vst [vmem:[#allocation20_spill] sm:$0xff] %v737_v25  ;;  %1359 = vst [vmem:[#allocation22_spill] sm:$0xff] %v745_v36 }
  0x11   :  { %v99_v62 = vadd.f32 %v98_v26, %v97_v49  ;;  %v741_v26 = vsel %vm82_vm1, %v696_v6, 0.0  ;;  %v750_v49 = vld [vmem:[%s1318_s0 + $0x1c8] sm:$0xff]  ;;  %v768_v36 = vsel %vm82_vm1, %v728_v17, 0.0  ;;  %v772_v25 = vsel %vm82_vm1, %v733_v20, 0.0  ;;  %v777_v12 = vld [vmem:[%s1318_s0 + $0x1e0] sm:$0xff]  ;;  %v804_v0 = vld [vmem:[%s1318_s0 + $0x1f8] sm:$0xff] }
  0x12   :  { %1358 = vst [vmem:[#allocation21_spill] sm:$0xff] %v741_v26  ;;  %v764_v26 = vsel %vm82_vm1, %v723_v15, 0.0  ;;  %1361 = vst [vmem:[#allocation24_spill] sm:$0xff] %v768_v36  ;;  %v782_v11 = vld [vmem:[%s1318_s0 + $0x1e8] sm:$0xff]  ;;  %v791_v9 = vsel %vm82_vm1, %v750_v49, 0.0  ;;  %v826_v58 = vsel %vm82_vm1, %v804_v0, 0.0 }
  0x13   :  { %v101_v24 = vadd.f32 %v100_v30, %v99_v62  ;;  %v755_v30 = vld [vmem:[%s1318_s0 + $0x1d0] sm:$0xff]  ;;  %v760_v62 = vld [vmem:[%s1318_s0 + $0x1d8] sm:$0xff]  ;;  %1360 = vst [vmem:[#allocation23_spill] sm:$0xff] %v764_v26  ;;  %1362 = vst [vmem:[#allocation25_spill] sm:$0xff] %v772_v25 }
  0x14   :  { %v787_v26 = vld [vmem:[%s1318_s0 + $0x1f0] sm:$0xff]  ;;  %1364 = vst [vmem:[#allocation27_spill] sm:$0xff] %v791_v9  ;;  %v795_v25 = vsel %vm82_vm1, %v755_v30, 0.0  ;;  %v799_v4 = vsel %vm82_vm1, %v760_v62, 0.0  ;;  %1367 = vst [vmem:[#allocation30_spill] sm:$0xff] %v804_v0  ;;  %v814_v9 = vsel %vm82_vm1, %v782_v11, 0.0 }
  0x15   :  { %1363 = vst [vmem:[#allocation26_spill] sm:$0xff] %v787_v26  ;;  %v103_v36 = vadd.f32 %v102_v31, %v101_v24  ;;  %1365 = vst [vmem:[#allocation28_spill] sm:$0xff] %v795_v25  ;;  %v106_v31 = vsel %vm82_vm1, %v718_v14, 0.0  ;;  %v810_v24 = vsel %vm82_vm1, %v777_v12, 0.0  ;;  %v818_v25 = vsel %vm82_vm1, %v787_v26, 0.0  ;;  %v855_v56 = vld [vmem:[%s1318_s0 + $0x90] sm:$0xff] }
  0x16   :  { %1366 = vst [vmem:[#allocation29_spill] sm:$0xff] %v799_v4  ;;  %1368 = vst [vmem:[#allocation31_spill] sm:$0xff] %v810_v24  ;;  %v30_v4 = vld [vmem:[%s1318_s0 + $0x68] sm:$0xff]  ;;  %v860_v52 = vld [vmem:[%s1318_s0 + $0x98] sm:$0xff] }
  0x17   :  { %1369 = vst [vmem:[#allocation32_spill] sm:$0xff] %v814_v9  ;;  %1370 = vst [vmem:[#allocation33_spill] sm:$0xff] %v818_v25  ;;  %v105_v63 = vadd.f32 %v551_v32, %v103_v36  ;;  %v108_v24 = vsel %vm82_vm1, %v30_v4, 0.0  ;;  %v31_v9 = vld [vmem:[%s1318_s0 + $0x70] sm:$0xff]  ;;  %v835_v25 = vld [vmem:[%s1318_s0 + $0x78] sm:$0xff]  ;;  %v120_v39 = vsel %vm82_vm1, %v860_v52, 0.0 }
  0x18   :  { %1371 = vst [vmem:[#allocation34_spill] sm:$0xff] %v826_v58  ;;  %1372 = vst [vmem:[#allocation35_spill] sm:$0xff] %v835_v25  ;;  %v840_v32 = vld [vmem:[%s1318_s0 + $0x80] sm:$0xff]  ;;  %v845_v36 = vld [vmem:[%s1318_s0 + $0x88] sm:$0xff]  ;;  %v110_v58 = vsel %vm82_vm1, %v31_v9, 0.0 }
  0x19   :  { %v107_v57 = vadd.f32 %v106_v31, %v105_v63  ;;  %1373 = vst [vmem:[#allocation36_spill] sm:$0xff] %v840_v32  ;;  %1374 = vst [vmem:[#allocation37_spill] sm:$0xff] %v845_v36  ;;  %v220_v63 = vmul.f32 %v455_v1, %v455_v1  ;;  %v221_v31 = vmul.f32 %v460_v2, %v460_v2  ;;  %v865_v51 = vld [vmem:[%s1318_s0 + $0xa0] sm:$0xff]  ;;  %v112_v1 = vsel %vm82_vm1, %v835_v25, 0.0  ;;  %v876_v44 = vld [vmem:[%s1318_s0 + $0xa8] sm:$0xff] }
  0x1a   :  { %1375 = vst [vmem:[#allocation38_spill] sm:$0xff] %v855_v56  ;;  %1376 = vst [vmem:[#allocation39_spill] sm:$0xff] %v860_v52  ;;  %v114_v2 = vsel %vm82_vm1, %v840_v32, 0.0  ;;  %v116_v45 = vsel %vm82_vm1, %v845_v36, 0.0  ;;  %v881_v43 = vld [vmem:[%s1318_s0 + $0xb0] sm:$0xff]  ;;  %v122_v38 = vsel %vm82_vm1, %v865_v51, 0.0  ;;  %v223_v25 = vmul.f32 %v476_v7, %v476_v7 }
  0x1b   :  { %1377 = vst [vmem:[#allocation40_spill] sm:$0xff] %v865_v51  ;;  %v109_v50 = vadd.f32 %v108_v24, %v107_v57  ;;  %1378 = vst [vmem:[#allocation41_spill] sm:$0xff] %v876_v44  ;;  %v886_v57 = vld [vmem:[%s1318_s0 + $0xb8] sm:$0xff]  ;;  %v118_v24 = vsel %vm82_vm1, %v855_v56, 0.0  ;;  %v899_v36 = vld [vmem:[%s1318_s0 + $0xc0] sm:$0xff]  ;;  %v124_v51 = vsel %vm82_vm1, %v876_v44, 0.0 }
  0x1c   :  { %1379 = vst [vmem:[#allocation42_spill] sm:$0xff] %v881_v43  ;;  %1380 = vst [vmem:[#allocation43_spill] sm:$0xff] %v886_v57  ;;  %v904_v32 = vld [vmem:[%s1318_s0 + $0xc8] sm:$0xff]  ;;  %v909_v52 = vld [vmem:[%s1318_s0 + $0xd0] sm:$0xff]  ;;  %v915_v3 = vsel %vm82_vm1, %v881_v43, 0.0 }
  0x1d   :  { %1381 = vst [vmem:[#allocation44_spill] sm:$0xff] %v899_v36  ;;  %1382 = vst [vmem:[#allocation45_spill] sm:$0xff] %v904_v32  ;;  %v111_v56 = vadd.f32 %v110_v58, %v109_v50  ;;  %v922_v0 = vld [vmem:[%s1318_s0 + $0xd8] sm:$0xff]  ;;  %v927_v26 = vld [vmem:[%s1318_s0 + $0xe0] sm:$0xff]  ;;  %v931_v50 = vsel %vm82_vm1, %v886_v57, 0.0  ;;  %v935_v58 = vsel %vm82_vm1, %v899_v36, 0.0 }
  0x1e   :  { %1383 = vst [vmem:[#allocation46_spill] sm:$0xff] %v909_v52  ;;  %1384 = vst [vmem:[#allocation47_spill] sm:$0xff] %v922_v0  ;;  %v939_v7 = vsel %vm82_vm1, %v904_v32, 0.0  ;;  %v943_v43 = vsel %vm82_vm1, %v909_v52, 0.0  ;;  %v948_v44 = vld [vmem:[%s1318_s0 + $0xe8] sm:$0xff]  ;;  %v953_v57 = vld [vmem:[%s1318_s0 + $0xf0] sm:$0xff]  ;;  %v224_v52 = vmul.f32 %v483_v10, %v483_v10  ;;  %v228_v10 = vmul.f32 %v507_v19, %v507_v19 }
  0x1f   :  { %1385 = vst [vmem:[#allocation48_spill] sm:$0xff] %v927_v26  ;;  %1386 = vst [vmem:[#allocation49_spill] sm:$0xff] %v935_v58  ;;  %v113_v36 = vadd.f32 %v112_v1, %v111_v56  ;;  %v957_v58 = vsel %vm82_vm1, %v922_v0, 0.0  ;;  %v961_v32 = vsel %vm82_vm1, %v927_v26, 0.0  ;;  %v225_v56 = vmul.f32 %v490_v13, %v490_v13 }
  0x20   :  { %1387 = vst [vmem:[#allocation50_spill] sm:$0xff] %v939_v7  ;;  %1388 = vst [vmem:[#allocation51_spill] sm:$0xff] %v943_v43  ;;  %v967_v43 = vsel %vm82_vm1, %v948_v44, 0.0  ;;  %v971_v7 = vsel %vm82_vm1, %v953_v57, 0.0  ;;  %v226_v1 = vmul.f32 %v497_v16, %v497_v16  ;;  %v227_v26 = vmul.f32 %v502_v18, %v502_v18 }
  0x21   :  { %1389 = vst [vmem:[#allocation52_spill] sm:$0xff] %v948_v44  ;;  %1390 = vst [vmem:[#allocation53_spill] sm:$0xff] %v953_v57  ;;  %v115_v0 = vadd.f32 %v114_v2, %v113_v36  ;;  %v229_v44 = vmul.f32 %v514_v21, %v514_v21  ;;  %v230_v57 = vmul.f32 %v519_v22, %v519_v22 }
  0x22   :  { %1391 = vst [vmem:[#allocation54_spill] sm:$0xff] %v971_v7  ;;  %v231_v7 = vmul.f32 %v524_v23, %v524_v23  ;;  %v232_v13 = vmul.f32 %v718_v14, %v718_v14  ;;  %v989_v16 = vmul.f32 %v30_v4, %v30_v4  ;;  %v991_v2 = vmul.f32 %v31_v9, %v31_v9 }
  0x23   :  { %v117_v36 = vadd.f32 %v116_v45, %v115_v0  ;;  %v253_v18 = vmul.f32 %v533_v27, %v533_v27  ;;  %v254_v19 = vmul.f32 %v538_v28, %v538_v28  ;;  %v255_v21 = vmul.f32 %v543_v29, %v543_v29 }
  0x24   :  { %v256_v22 = vmul.f32 %v556_v33, %v556_v33  ;;  %v257_v23 = vmul.f32 %v561_v34, %v561_v34  ;;  %v258_v45 = vmul.f32 %v566_v35, %v566_v35  ;;  %v259_v4 = vmul.f32 %v583_v40, %v583_v40 }
  0x25   :  { %v119_v0 = vadd.f32 %v118_v24, %v117_v36  ;;  %v260_v27 = vmul.f32 %v588_v41, %v588_v41  ;;  %v261_v28 = vmul.f32 %v593_v42, %v593_v42  ;;  %v262_v29 = vmul.f32 %v610_v46, %v610_v46 }
  0x26   :  { %v263_v33 = vmul.f32 %v615_v47, %v615_v47  ;;  %v284_v34 = vsel %vm82_vm1, %v220_v63, 0.0  ;;  %v285_v35 = vsel %vm82_vm1, %v221_v31, 0.0  ;;  %v264_v40 = vmul.f32 %v620_v48, %v620_v48 }
  0x27   :  { %v121_v9 = vadd.f32 %v120_v39, %v119_v0  ;;  %v286_v14 = vadd.f32 %v285_v35, %v284_v34  ;;  %v287_v41 = vsel %vm82_vm1, %v222_v37, 0.0  ;;  %v265_v42 = vmul.f32 %v637_v53, %v637_v53  ;;  %v1392_v0 = vld [vmem:[#allocation26_spill] sm:$0xff] }
  0x28   :  { %v266_v46 = vmul.f32 %v642_v54, %v642_v54  ;;  %v267_v47 = vmul.f32 %v647_v55, %v647_v55  ;;  %v289_v63 = vsel %vm82_vm1, %v223_v25, 0.0  ;;  %v268_v39 = vmul.f32 %v664_v59, %v664_v59  ;;  %v1393_v34 = vld [vmem:[#allocation30_spill] sm:$0xff] }
  0x29   :  { %v123_v24 = vadd.f32 %v122_v38, %v121_v9  ;;  %v269_v48 = vmul.f32 %v669_v60, %v669_v60  ;;  %v288_v31 = vadd.f32 %v287_v41, %v286_v14  ;;  %v270_v37 = vmul.f32 %v674_v61, %v674_v61  ;;  %v1394_v41 = vld [vmem:[#allocation49_spill] sm:$0xff] }
  0x2a   :  { %v271_v53 = vmul.f32 %v691_v5, %v691_v5  ;;  %v272_v54 = vmul.f32 %v696_v6, %v696_v6  ;;  %v291_v55 = vsel %vm82_vm1, %v224_v52, 0.0  ;;  %v273_v38 = vmul.f32 %v701_v8, %v701_v8 }
  0x2b   :  { %v125_v25 = vadd.f32 %v124_v51, %v123_v24  ;;  %v274_v59 = vmul.f32 %v723_v15, %v723_v15  ;;  %v290_v60 = vadd.f32 %v289_v63, %v288_v31  ;;  %v275_v36 = vmul.f32 %v728_v17, %v728_v17 }
  0x2c   :  { %v276_v61 = vmul.f32 %v733_v20, %v733_v20  ;;  %v277_v5 = vmul.f32 %v750_v49, %v750_v49  ;;  %v293_v6 = vsel %vm82_vm1, %v225_v56, 0.0  ;;  %v278_v52 = vmul.f32 %v755_v30, %v755_v30 }
  0x2d   :  { %v127_v51 = vadd.f32 %v915_v3, %v125_v25  ;;  %v279_v8 = vmul.f32 %v760_v62, %v760_v62  ;;  %v292_v15 = vadd.f32 %v291_v55, %v290_v60  ;;  %v280_v17 = vmul.f32 %v777_v12, %v777_v12  ;;  %v1396_v25 = vld [vmem:[#allocation51_spill] sm:$0xff] }
  0x2e   :  { %v281_v20 = vmul.f32 %v782_v11, %v782_v11  ;;  %v282_v49 = vmul.f32 %v1392_v0, %v1392_v0  ;;  %v295_v56 = vsel %vm82_vm1, %v226_v1, 0.0  ;;  %v283_v30 = vmul.f32 %v1393_v34, %v1393_v34  ;;  %v1398_v34 = vld [vmem:[#allocation54_spill] sm:$0xff] }
  0x2f   :  { %v129_v3 = vadd.f32 %v931_v50, %v127_v51  ;;  %v294_v35 = vadd.f32 %v293_v6, %v292_v15  ;;  %v297_v62 = vsel %vm82_vm1, %v227_v26, 0.0  ;;  %v299_v9 = vsel %vm82_vm1, %v228_v10, 0.0 }
  0x30   :  { %v301_v12 = vsel %vm82_vm1, %v229_v44, 0.0  ;;  %v303_v14 = vsel %vm82_vm1, %v230_v57, 0.0  ;;  %v305_v11 = vsel %vm82_vm1, %v231_v7, 0.0  ;;  %v307_v1 = vsel %vm82_vm1, %v232_v13, 0.0  ;;  %v1395_v7 = vld [vmem:[#allocation50_spill] sm:$0xff] }
  0x31   :  { %v131_v63 = vadd.f32 %v1394_v41, %v129_v3  ;;  %v296_v24 = vadd.f32 %v295_v56, %v294_v35  ;;  %v1072_v50 = vsel %vm82_vm1, %v253_v18, 0.0  ;;  %v1075_v31 = vsel %vm82_vm1, %v254_v19, 0.0  ;;  %v1397_v56 = vld [vmem:[#allocation35_spill] sm:$0xff] }
  0x32   :  { %v1078_v26 = vsel %vm82_vm1, %v255_v21, 0.0  ;;  %v1081_v44 = vsel %vm82_vm1, %v256_v22, 0.0  ;;  %v1084_v57 = vsel %vm82_vm1, %v257_v23, 0.0  ;;  %v1088_v13 = vsel %vm82_vm1, %v258_v45, 0.0 }
  0x33   :  { %v133_v10 = vadd.f32 %v1395_v7, %v131_v63  ;;  %v298_v55 = vadd.f32 %v297_v62, %v296_v24  ;;  %v1091_v18 = vsel %vm82_vm1, %v259_v4, 0.0  ;;  %v1094_v19 = vsel %vm82_vm1, %v260_v27, 0.0  ;;  %v1399_v62 = vld [vmem:[#allocation36_spill] sm:$0xff] }
  0x34   :  { %v1097_v21 = vsel %vm82_vm1, %v261_v28, 0.0  ;;  %v1100_v22 = vsel %vm82_vm1, %v262_v29, 0.0  ;;  %v1103_v23 = vsel %vm82_vm1, %v263_v33, 0.0  ;;  %v1107_v45 = vsel %vm82_vm1, %v264_v40, 0.0 }
  0x35   :  { %v135_v60 = vadd.f32 %v1396_v25, %v133_v10  ;;  %v300_v6 = vadd.f32 %v299_v9, %v298_v55  ;;  %v1110_v4 = vsel %vm82_vm1, %v265_v42, 0.0  ;;  %v1113_v27 = vsel %vm82_vm1, %v266_v46, 0.0  ;;  %v1401_v10 = vld [vmem:[#allocation38_spill] sm:$0xff] }
  0x36   :  { %v1116_v28 = vsel %vm82_vm1, %v267_v47, 0.0  ;;  %v1119_v29 = vsel %vm82_vm1, %v268_v39, 0.0  ;;  %v1122_v33 = vsel %vm82_vm1, %v269_v48, 0.0  ;;  %v1126_v40 = vsel %vm82_vm1, %v270_v37, 0.0  ;;  %v1402_v25 = vld [vmem:[#allocation2_spill] sm:$0xff] }
  0x37   :  { %v137_v51 = vadd.f32 %v957_v58, %v135_v60  ;;  %v302_v15 = vadd.f32 %v301_v12, %v300_v6  ;;  %v1129_v42 = vsel %vm82_vm1, %v271_v53, 0.0  ;;  %v1132_v46 = vsel %vm82_vm1, %v272_v54, 0.0 }
  0x38   :  { %v1135_v47 = vsel %vm82_vm1, %v273_v38, 0.0  ;;  %v1138_v39 = vsel %vm82_vm1, %v274_v59, 0.0  ;;  %v1141_v48 = vsel %vm82_vm1, %v275_v36, 0.0  ;;  %v1145_v37 = vsel %vm82_vm1, %v276_v61, 0.0 }
  0x39   :  { %v139_v58 = vadd.f32 %v961_v32, %v137_v51  ;;  %v304_v0 = vadd.f32 %v303_v14, %v302_v15  ;;  %v1148_v53 = vsel %vm82_vm1, %v277_v5, 0.0  ;;  %v1151_v54 = vsel %vm82_vm1, %v278_v52, 0.0  ;;  %v1165_v32 = vld [vmem:[%s1318_s0 + $0xf8] sm:$0xff]  ;;  %v1403_v51 = vld [vmem:[#allocation39_spill] sm:$0xff] }
  0x3a   :  { %v1154_v38 = vsel %vm82_vm1, %v279_v8, 0.0  ;;  %v1157_v59 = vsel %vm82_vm1, %v280_v17, 0.0  ;;  %v1160_v36 = vsel %vm82_vm1, %v281_v20, 0.0  ;;  %v1169_v52 = vsel %vm82_vm1, %v282_v49, 0.0 }
  0x3b   :  { %v141_v61 = vadd.f32 %v967_v43, %v139_v58  ;;  %v306_v5 = vadd.f32 %v305_v11, %v304_v0  ;;  %v1172_v8 = vsel %vm82_vm1, %v283_v30, 0.0  ;;  %v144_v17 = vsel %vm82_vm1, %v1165_v32, 0.0  ;;  %v1183_v43 = vld [vmem:[%s1318_s0 + $0x100] sm:$0xff]  ;;  %v1404_v58 = vld [vmem:[#allocation3_spill] sm:$0xff] }
  0x3c   :  { %v235_v20 = vmul.f32 %v1397_v56, %v1397_v56  ;;  %v309_v3 = vsel %vm82_vm1, %v989_v16, 0.0  ;;  %v146_v30 = vsel %vm82_vm1, %v1183_v43, 0.0  ;;  %v236_v9 = vmul.f32 %v1399_v62, %v1399_v62  ;;  %v1400_v16 = vld [vmem:[#allocation37_spill] sm:$0xff] }
  0x3d   :  { %v143_v49 = vadd.f32 %v1398_v34, %v141_v61  ;;  %v308_v35 = vadd.f32 %v307_v1, %v306_v5  ;;  %v311_v12 = vsel %vm82_vm1, %v991_v2, 0.0  ;;  %v237_v41 = vmul.f32 %v1400_v16, %v1400_v16  ;;  %v1405_v5 = vld [vmem:[#allocation40_spill] sm:$0xff]  ;;  %v1408_v62 = vld [vmem:[#allocation5_spill] sm:$0xff] }
  0x3e   :  { %v313_v63 = vsel %vm82_vm1, %v235_v20, 0.0  ;;  %v238_v1 = vmul.f32 %v1401_v10, %v1401_v10  ;;  %v315_v55 = vsel %vm82_vm1, %v236_v9, 0.0  ;;  %v239_v2 = vmul.f32 %v1403_v51, %v1403_v51  ;;  %v1406_v20 = vld [vmem:[#allocation4_spill] sm:$0xff] }
  0x3f   :  { %v145_v14 = vadd.f32 %v144_v17, %v143_v49  ;;  %v310_v11 = vadd.f32 %v309_v3, %v308_v35  ;;  %v317_v15 = vsel %vm82_vm1, %v237_v41, 0.0  ;;  %v240_v17 = vmul.f32 %v1405_v5, %v1405_v5  ;;  %v1407_v49 = vld [vmem:[#allocation41_spill] sm:$0xff]  ;;  %v1410_v41 = vld [vmem:[#allocation6_spill] sm:$0xff] }
  0x40   :  { %v319_v56 = vsel %vm82_vm1, %v238_v1, 0.0  ;;  %v241_v35 = vmul.f32 %v1407_v49, %v1407_v49 }
  0x41   :  { %v147_v24 = vadd.f32 %v146_v30, %v145_v14  ;;  %v312_v7 = vadd.f32 %v311_v12, %v310_v11  ;;  %v321_v30 = vsel %vm82_vm1, %v239_v2, 0.0  ;;  %v1409_v14 = vld [vmem:[#allocation42_spill] sm:$0xff]  ;;  %v323_v16 = vsel %vm82_vm1, %v240_v17, 0.0 }
  0x42   :  { %v242_v11 = vmul.f32 %v1409_v14, %v1409_v14  ;;  %v325_v1 = vsel %vm82_vm1, %v241_v35, 0.0 }
  0x43   :  { %v149_v60 = vadd.f32 %v1402_v25, %v147_v24  ;;  %v314_v6 = vadd.f32 %v313_v63, %v312_v7  ;;  %v1411_v7 = vld [vmem:[#allocation43_spill] sm:$0xff] }
  0x44   :  { %v243_v10 = vmul.f32 %v1411_v7, %v1411_v7  ;;  %v327_v2 = vsel %vm82_vm1, %v242_v11, 0.0 }
  0x45   :  { %v151_v0 = vadd.f32 %v1404_v58, %v149_v60  ;;  %v316_v61 = vadd.f32 %v315_v55, %v314_v6  ;;  %v1412_v55 = vld [vmem:[#allocation7_spill] sm:$0xff]  ;;  %v1413_v6 = vld [vmem:[#allocation44_spill] sm:$0xff] }
  0x46   :  { %v244_v51 = vmul.f32 %v1413_v6, %v1413_v6  ;;  %v329_v17 = vsel %vm82_vm1, %v243_v10, 0.0 }
  0x47   :  { %v153_v3 = vadd.f32 %v1406_v20, %v151_v0  ;;  %v318_v34 = vadd.f32 %v317_v15, %v316_v61  ;;  %v1414_v15 = vld [vmem:[#allocation8_spill] sm:$0xff]  ;;  %v1415_v61 = vld [vmem:[#allocation45_spill] sm:$0xff] }
  0x48   :  { %v245_v5 = vmul.f32 %v1415_v61, %v1415_v61  ;;  %v331_v35 = vsel %vm82_vm1, %v244_v51, 0.0 }
  0x49   :  { %v155_v9 = vadd.f32 %v1408_v62, %v153_v3  ;;  %v320_v12 = vadd.f32 %v319_v56, %v318_v34  ;;  %v1416_v56 = vld [vmem:[#allocation9_spill] sm:$0xff]  ;;  %v1417_v34 = vld [vmem:[#allocation46_spill] sm:$0xff] }
  0x4a   :  { %v246_v49 = vmul.f32 %v1417_v34, %v1417_v34  ;;  %v333_v11 = vsel %vm82_vm1, %v245_v5, 0.0 }
  0x4b   :  { %v157_v63 = vadd.f32 %v1410_v41, %v155_v9  ;;  %v322_v24 = vadd.f32 %v321_v30, %v320_v12  ;;  %v1418_v30 = vld [vmem:[#allocation10_spill] sm:$0xff]  ;;  %v1419_v12 = vld [vmem:[#allocation47_spill] sm:$0xff] }
  0x4c   :  { %v247_v14 = vmul.f32 %v1419_v12, %v1419_v12  ;;  %v335_v10 = vsel %vm82_vm1, %v246_v49, 0.0  ;;  %v1427_v49 = vld [vmem:[#allocation15_spill] sm:$0xff]  ;;  %v1428_v12 = vld [vmem:[#allocation16_spill] sm:$0xff] }
  0x4d   :  { %v159_v25 = vadd.f32 %v1412_v55, %v157_v63  ;;  %v324_v60 = vadd.f32 %v323_v16, %v322_v24  ;;  %v1420_v16 = vld [vmem:[#allocation11_spill] sm:$0xff]  ;;  %v1421_v24 = vld [vmem:[#allocation48_spill] sm:$0xff] }
  0x4e   :  { %v248_v7 = vmul.f32 %v1421_v24, %v1421_v24  ;;  %v337_v51 = vsel %vm82_vm1, %v247_v14, 0.0 }
  0x4f   :  { %v161_v58 = vadd.f32 %v1414_v15, %v159_v25  ;;  %v326_v0 = vadd.f32 %v325_v1, %v324_v60  ;;  %v1422_v1 = vld [vmem:[#allocation12_spill] sm:$0xff] }
  0x50   :  { %v1423_v60 = vld [vmem:[#allocation52_spill] sm:$0xff]  ;;  %v339_v5 = vsel %vm82_vm1, %v248_v7, 0.0  ;;  %v1430_v7 = vld [vmem:[#allocation18_spill] sm:$0xff] }
  0x51   :  { %v163_v20 = vadd.f32 %v1416_v56, %v161_v58  ;;  %v328_v3 = vadd.f32 %v327_v2, %v326_v0  ;;  %v249_v6 = vmul.f32 %v1423_v60, %v1423_v60  ;;  %v1424_v2 = vld [vmem:[#allocation13_spill] sm:$0xff] }
  0x52   :  { %v1425_v0 = vld [vmem:[#allocation53_spill] sm:$0xff] }
  0x53   :  { %v165_v62 = vadd.f32 %v1418_v30, %v163_v20  ;;  %v330_v9 = vadd.f32 %v329_v17, %v328_v3  ;;  %v250_v61 = vmul.f32 %v1425_v0, %v1425_v0  ;;  %v1426_v17 = vld [vmem:[#allocation14_spill] sm:$0xff]  ;;  %v251_v3 = vmul.f32 %v1165_v32, %v1165_v32 }
  0x54   :  { %v341_v34 = vsel %vm82_vm1, %v249_v6, 0.0  ;;  %v1432_v6 = vld [vmem:[#allocation20_spill] sm:$0xff]  ;;  %v1434_v0 = vld [vmem:[#allocation22_spill] sm:$0xff] }
  0x55   :  { %v167_v41 = vadd.f32 %v1420_v16, %v165_v62  ;;  %v332_v63 = vadd.f32 %v331_v35, %v330_v9  ;;  %v252_v62 = vmul.f32 %v1183_v43, %v1183_v43  ;;  %v343_v9 = vsel %vm82_vm1, %v250_v61, 0.0 }
  0x56   :  { %v345_v16 = vsel %vm82_vm1, %v251_v3, 0.0  ;;  %v1436_v3 = vld [vmem:[#allocation24_spill] sm:$0xff] }
  0x57   :  { %v169_v55 = vadd.f32 %v1422_v1, %v167_v41  ;;  %v334_v25 = vadd.f32 %v333_v11, %v332_v63  ;;  %v1429_v41 = vld [vmem:[#allocation17_spill] sm:$0xff]  ;;  %v347_v32 = vsel %vm82_vm1, %v252_v62, 0.0  ;;  %v1438_v62 = vld [vmem:[#allocation27_spill] sm:$0xff] }
  0x59   :  { %v171_v15 = vadd.f32 %v1424_v2, %v169_v55  ;;  %v336_v58 = vadd.f32 %v335_v10, %v334_v25  ;;  %v1431_v55 = vld [vmem:[#allocation19_spill] sm:$0xff]  ;;  %v1433_v2 = vld [vmem:[#allocation21_spill] sm:$0xff] }
  0x5b   :  { %v173_v56 = vadd.f32 %v1426_v17, %v171_v15  ;;  %v338_v20 = vadd.f32 %v337_v51, %v336_v58  ;;  %v1435_v17 = vld [vmem:[#allocation23_spill] sm:$0xff] }
  0x5d   :  { %v175_v35 = vadd.f32 %v1427_v49, %v173_v56  ;;  %v340_v30 = vadd.f32 %v339_v5, %v338_v20 }
  0x5f   :  { %v177_v14 = vadd.f32 %v1428_v12, %v175_v35  ;;  %v342_v11 = vadd.f32 %v341_v34, %v340_v30  ;;  %v1437_v35 = vld [vmem:[#allocation25_spill] sm:$0xff]  ;;  %v1439_v12 = vld [vmem:[#allocation28_spill] sm:$0xff] }
  0x61   :  { %v179_v63 = vadd.f32 %v1429_v41, %v177_v14  ;;  %v344_v24 = vadd.f32 %v343_v9, %v342_v11  ;;  %v1440_v11 = vld [vmem:[#allocation29_spill] sm:$0xff]  ;;  %v1441_v41 = vld [vmem:[#allocation31_spill] sm:$0xff] }
  0x63   :  { %v181_v10 = vadd.f32 %v1430_v7, %v179_v63  ;;  %v346_v1 = vadd.f32 %v345_v16, %v344_v24  ;;  %v1442_v24 = vld [vmem:[#allocation32_spill] sm:$0xff]  ;;  %v1443_v7 = vld [vmem:[#allocation33_spill] sm:$0xff] }
  0x65   :  { %v183_v25 = vadd.f32 %v1431_v55, %v181_v10  ;;  %v348_v60 = vadd.f32 %v347_v32, %v346_v1  ;;  %v1444_v1 = vld [vmem:[#allocation34_spill] sm:$0xff] }
  0x67   :  { %v185_v43 = vadd.f32 %v1432_v6, %v183_v25  ;;  %v350_v51 = vadd.f32 %v1072_v50, %v348_v60 }
  0x69   :  { %v187_v15 = vadd.f32 %v1433_v2, %v185_v43  ;;  %v352_v58 = vadd.f32 %v1075_v31, %v350_v51 }
  0x6b   :  { %v189_v61 = vadd.f32 %v1434_v0, %v187_v15  ;;  %v354_v5 = vadd.f32 %v1078_v26, %v352_v58 }
  0x6d   :  { %v191_v56 = vadd.f32 %v1435_v17, %v189_v61  ;;  %v356_v20 = vadd.f32 %v1081_v44, %v354_v5 }
  0x6f   :  { %v193_v34 = vadd.f32 %v1436_v3, %v191_v56  ;;  %v358_v49 = vadd.f32 %v1084_v57, %v356_v20 }
  0x71   :  { %v195_v30 = vadd.f32 %v1437_v35, %v193_v34  ;;  %v360_v50 = vadd.f32 %v1088_v13, %v358_v49 }
  0x73   :  { %v197_v9 = vadd.f32 %v1438_v62, %v195_v30  ;;  %v362_v31 = vadd.f32 %v1091_v18, %v360_v50 }
  0x75   :  { %v199_v14 = vadd.f32 %v1439_v12, %v197_v9  ;;  %v364_v26 = vadd.f32 %v1094_v19, %v362_v31 }
  0x77   :  { %v201_v16 = vadd.f32 %v1440_v11, %v199_v14  ;;  %v366_v44 = vadd.f32 %v1097_v21, %v364_v26 }
  0x79   :  { %v203_v63 = vadd.f32 %v1441_v41, %v201_v16  ;;  %v368_v57 = vadd.f32 %v1100_v22, %v366_v44 }
  0x7b   :  { %v205_v32 = vadd.f32 %v1442_v24, %v203_v63  ;;  %v370_v13 = vadd.f32 %v1103_v23, %v368_v57 }
  0x7d   :  { %v207_v10 = vadd.f32 %v1443_v7, %v205_v32  ;;  %v372_v18 = vadd.f32 %v1107_v45, %v370_v13  ;;  %v81_v45 = vld [vmem:[%s1319_s1] sm:$0x1] }
  0x7f   :  { %v209_v55 = vadd.f32 %v1444_v1, %v207_v10  ;;  %v374_v19 = vadd.f32 %v1110_v4, %v372_v18 }
  0x81   :  { %v210_v25 = vrot.slane %v209_v55, 4  ;;  %v376_v60 = vadd.f32 %v1113_v27, %v374_v19 }
  0x83   :  { %v211_v21 = vadd.f32 %v210_v25, %v209_v55  ;;  %v378_v6 = vadd.f32 %v1116_v28, %v376_v60 }
  0x85   :  { %v212_v43 = vrot.slane %v211_v21, 2  ;;  %v380_v22 = vadd.f32 %v1119_v29, %v378_v6 }
  0x87   :  { %v213_v51 = vadd.f32 %v212_v43, %v211_v21  ;;  %v382_v23 = vadd.f32 %v1122_v33, %v380_v22 }
  0x89   :  { %v214_v2 = vrot.slane %v213_v51, 1  ;;  %v384_v15 = vadd.f32 %v1126_v40, %v382_v23 }
  0x8b   :  { %v215_v4 = vadd.f32 %v214_v2, %v213_v51  ;;  %v386_v58 = vadd.f32 %v1129_v42, %v384_v15 }
  0x8d   :  { %v216_v27 = vadd.f32 %v215_v4, %v81_v45  ;;  %v388_v0 = vadd.f32 %v1132_v46, %v386_v58 }
  0x8f   :  { %218 = vst.msk [vmem:[%s1319_s1] sm:$0x1] %vm14_vm0, %v216_v27  ;;  %v390_v28 = vadd.f32 %v1135_v47, %v388_v0 }
  0x91   :  { %v392_v29 = vadd.f32 %v1138_v39, %v390_v28 }
  0x93   :  { %v394_v33 = vadd.f32 %v1141_v48, %v392_v29 }
  0x95   :  { %v396_v40 = vadd.f32 %v1145_v37, %v394_v33  ;;  %v219_v37 = vld [vmem:[%s1320_s2] sm:$0x1] }
  0x97   :  { %v398_v61 = vadd.f32 %v1148_v53, %v396_v40 }
  0x99   :  { %v400_v42 = vadd.f32 %v1151_v54, %v398_v61 }
  0x9b   :  { %v402_v5 = vadd.f32 %v1154_v38, %v400_v42 }
  0x9d   :  { %v404_v46 = vadd.f32 %v1157_v59, %v402_v5 }
  0x9f   :  { %v406_v17 = vadd.f32 %v1160_v36, %v404_v46 }
  0xa1   :  { %v408_v56 = vadd.f32 %v1169_v52, %v406_v17 }
  0xa3   :  { %v410_v47 = vadd.f32 %v1172_v8, %v408_v56 }
  0xa5   :  { %v411_v20 = vrot.slane %v410_v47, 4 }
  0xa7   :  { %v412_v39 = vadd.f32 %v411_v20, %v410_v47 }
  0xa9   :  { %v413_v3 = vrot.slane %v412_v39, 2 }
  0xab   :  { %v414_v48 = vadd.f32 %v413_v3, %v412_v39 }
  0xad   :  { %v415_v34 = vrot.slane %v414_v48, 1 }
  0xaf   :  { %v416_v53 = vadd.f32 %v415_v34, %v414_v48 }
  0xb1   :  { %v417_v54 = vadd.f32 %v416_v53, %v219_v37 }
  0xb3   :  { %418 = vst.msk [vmem:[%s1320_s2] sm:$0x1] %vm14_vm0, %v417_v54 }

// kernel: densenet_forward.18
= control target key start
LH: loop header
LB: loop body
LE: loop exit
PB: predicated region body
PF: predicated region fallthrough
CT: control target
= control target key end

     0   :  { %v827_v0 = vmov 0   ;;  %vm290_vm0 = vcmask 154624   ;;  %vm387_vm1 = vcmask 1040384   ;;  %vm388_vm2 = vcmask 1041408   ;;  %s1640_s1 = inlined_call_operand.vmem [shape: bf16[147,64], index: 1, kind: input, shape index: {}]   ;;  %s1641_s0 = inlined_call_operand.vmem [shape: f32[512,147], index: 0, kind: input, shape index: {}]   ;;  %s1642_s2 = inlined_call_operand.vmem [shape: f32[1,64], index: 2, kind: input, shape index: {}]   ;;  %s1643_s3 = inlined_call_operand.vmem [shape: f32[512,64], index: 3, kind: output, shape index: {}]  }
   0x1   :  { %394 = vmatprep.subr.bf16.mxu0 %v827_v0  ;;  %795 = vmatprep.subr.bf16.mxu1 %v827_v0  ;;  %v817_v1 = vld [vmem:[%s1640_s1 + $0x38] sm:$0xff]   ;;  %v818_v2 = vld [vmem:[%s1640_s1 + $0x30] sm:$0xff]   ;;  %v819_v3 = vld [vmem:[%s1640_s1 + $0x28] sm:$0xff]   ;;  %v828_v14 = vmov 65535   ;;  %vm683_vm3 = vcmask 523264  }
   0x2   :  { %395 = vmatpush1.bf16.msra.mxu0 %v817_v1  ;;  %805 = vmatpush1.bf16.msra.mxu1 %v817_v1  ;;  %v820_v4 = vld [vmem:[%s1640_s1 + $0x20] sm:$0xff]   ;;  %v16_v5 = vld [vmem:[%s1641_s0 + $0x8] sm:$0xff]  ;;  %v18_v6 = vld [vmem:[%s1641_s0 + $0x18] sm:$0xff]  ;;  %v389_v15 = vsel %vm387_vm1, 4294967295, %v828_v14 }
   0x3   :  { %396 = vmatprep.subr.bf16.mxu0 %v827_v0  ;;  %796 = vmatprep.subr.bf16.mxu1 %v827_v0  ;;  %v80_v7 = vld [vmem:[%s1641_s0 + $0x208] sm:$0xff]  ;;  %v82_v8 = vld [vmem:[%s1641_s0 + $0x218] sm:$0xff]  ;;  %v144_v9 = vpack.c.bf16 %v18_v6, %v16_v5  ;;  %v822_v12 = vld [vmem:[%s1640_s1 + $0x10] sm:$0xff]   ;;  %v390_v18 = vsel %vm388_vm2, %v389_v15, 0 }
   0x4   :  { %v176_v10 = vpack.c.bf16 %v82_v8, %v80_v7  ;;  %v821_v11 = vld [vmem:[%s1640_s1 + $0x18] sm:$0xff]   ;;  %v823_v13 = vld [vmem:[%s1640_s1 + $0x8] sm:$0xff]   ;;  %v824_v16 = vld [vmem:[%s1640_s1] sm:$0xff]  }
   0x5   :  { %763 = vmatprep.mubr.msk.bf16.mxu0 %vm290_vm0, %v144_v9  ;;  %v825_v17 = vld [vmem:[%s1640_s1 + $0x48] ss:$0 sps:$4 sm:$0x33]   ;;  %v826_v20 = vld [vmem:[%s1640_s1 + $0x40] sm:$0xff]   ;;  %v17_v22 = vld [vmem:[%s1641_s0 + $0x10] sm:$0xff] }
   0x6   :  { %397 = vmatpush1.bf16.msra.mxu0 %v818_v2  ;;  %806 = vmatpush1.bf16.msra.mxu1 %v818_v2  ;;  %v392_v19 = vand.u32 %v825_v17, %v390_v18  ;;  %v15_v21 = vld [vmem:[%s1641_s0] sm:$0xff]  ;;  %v81_v24 = vld [vmem:[%s1641_s0 + $0x210] sm:$0xff]  ;;  %v20_v25 = vld [vmem:[%s1641_s0 + $0x28] sm:$0xff] }
   0x7   :  { %398 = vmatprep.subr.bf16.mxu0 %v827_v0  ;;  %797 = vmatprep.subr.bf16.mxu1 %v827_v0  ;;  %v79_v23 = vld [vmem:[%s1641_s0 + $0x200] sm:$0xff]  ;;  %v22_v26 = vld [vmem:[%s1641_s0 + $0x38] sm:$0xff]  ;;  %v84_v27 = vld [vmem:[%s1641_s0 + $0x228] sm:$0xff]  ;;  %v143_v29 = vpack.c.bf16 %v17_v22, %v15_v21 }
   0x8   :  { %779 = vmatprep.mubr.msk.bf16.mxu1 %vm290_vm0, %v176_v10  ;;  %v86_v28 = vld [vmem:[%s1641_s0 + $0x238] sm:$0xff]  ;;  %v175_v30 = vpack.c.bf16 %v81_v24, %v79_v23  ;;  %v146_v31 = vpack.c.bf16 %v22_v26, %v20_v25  ;;  %v19_v33 = vld [vmem:[%s1641_s0 + $0x20] sm:$0xff]  ;;  %v21_v34 = vld [vmem:[%s1641_s0 + $0x30] sm:$0xff] }
   0x9   :  { %v178_v32 = vpack.c.bf16 %v86_v28, %v84_v27  ;;  %v83_v35 = vld [vmem:[%s1641_s0 + $0x220] sm:$0xff]  ;;  %v85_v36 = vld [vmem:[%s1641_s0 + $0x230] sm:$0xff]  ;;  %v24_v37 = vld [vmem:[%s1641_s0 + $0x48] sm:$0xff]  ;;  %v145_v41 = vpack.c.bf16 %v21_v34, %v19_v33 }
   0xa   :  { %399 = vmatpush1.bf16.msra.mxu0 %v819_v3  ;;  %807 = vmatpush1.bf16.msra.mxu1 %v819_v3  ;;  %v26_v38 = vld [vmem:[%s1641_s0 + $0x58] sm:$0xff]  ;;  %v88_v39 = vld [vmem:[%s1641_s0 + $0x248] sm:$0xff]  ;;  %v177_v42 = vpack.c.bf16 %v85_v36, %v83_v35  ;;  %v23_v45 = vld [vmem:[%s1641_s0 + $0x40] sm:$0xff] }
   0xb   :  { %400 = vmatprep.subr.bf16.mxu0 %v827_v0  ;;  %798 = vmatprep.subr.bf16.mxu1 %v827_v0  ;;  %v90_v40 = vld [vmem:[%s1641_s0 + $0x258] sm:$0xff]  ;;  %v148_v43 = vpack.c.bf16 %v26_v38, %v24_v37  ;;  %v25_v46 = vld [vmem:[%s1641_s0 + $0x50] sm:$0xff]  ;;  %v87_v47 = vld [vmem:[%s1641_s0 + $0x240] sm:$0xff] }
   0xc   :  { %v180_v44 = vpack.c.bf16 %v90_v40, %v88_v39  ;;  %v89_v48 = vld [vmem:[%s1641_s0 + $0x250] sm:$0xff]  ;;  %v28_v49 = vld [vmem:[%s1641_s0 + $0x68] sm:$0xff]  ;;  %v30_v50 = vld [vmem:[%s1641_s0 + $0x78] sm:$0xff]  ;;  %v147_v53 = vpack.c.bf16 %v25_v46, %v23_v45 }
   0xd   :  { %v92_v51 = vld [vmem:[%s1641_s0 + $0x268] sm:$0xff]  ;;  %v94_v52 = vld [vmem:[%s1641_s0 + $0x278] sm:$0xff]  ;;  %v179_v54 = vpack.c.bf16 %v89_v48, %v87_v47  ;;  %v150_v55 = vpack.c.bf16 %v30_v50, %v28_v49  ;;  %v27_v57 = vld [vmem:[%s1641_s0 + $0x60] sm:$0xff] }
   0xe   :  { %401 = vmatpush1.bf16.msra.mxu0 %v820_v4  ;;  %808 = vmatpush1.bf16.msra.mxu1 %v820_v4  ;;  %v182_v56 = vpack.c.bf16 %v94_v52, %v92_v51  ;;  %v29_v58 = vld [vmem:[%s1641_s0 + $0x70] sm:$0xff]  ;;  %v91_v59 = vld [vmem:[%s1641_s0 + $0x260] sm:$0xff]  ;;  %v32_v61 = vld [vmem:[%s1641_s0 + $0x88] sm:$0xff] }
   0xf   :  { %402 = vmatprep.subr.bf16.mxu0 %v827_v0  ;;  %799 = vmatprep.subr.bf16.mxu1 %v827_v0  ;;  %v93_v60 = vld [vmem:[%s1641_s0 + $0x270] sm:$0xff]  ;;  %v34_v62 = vld [vmem:[%s1641_s0 + $0x98] sm:$0xff]  ;;  %v96_v63 = vld [vmem:[%s1641_s0 + $0x288] sm:$0xff]  ;;  %v149_v1 = vpack.c.bf16 %v29_v58, %v27_v57 }
  0x10   :  { %v181_v2 = vpack.c.bf16 %v93_v60, %v91_v59  ;;  %v152_v3 = vpack.c.bf16 %v34_v62, %v32_v61  ;;  %v31_v5 = vld [vmem:[%s1641_s0 + $0x80] sm:$0xff]  ;;  %v33_v6 = vld [vmem:[%s1641_s0 + $0x90] sm:$0xff]  ;;  %v36_v9 = vld [vmem:[%s1641_s0 + $0xa8] sm:$0xff] }
  0x11   :  { %v95_v7 = vld [vmem:[%s1641_s0 + $0x280] sm:$0xff]  ;;  %v97_v8 = vld [vmem:[%s1641_s0 + $0x290] sm:$0xff]  ;;  %v38_v10 = vld [vmem:[%s1641_s0 + $0xb8] sm:$0xff] }
  0x12   :  { %403 = vmatpush1.bf16.msra.mxu0 %v821_v11  ;;  %809 = vmatpush1.bf16.msra.mxu1 %v821_v11  ;;  %v100_v11 = vld [vmem:[%s1641_s0 + $0x2a8] sm:$0xff]  ;;  %v183_v14 = vpack.c.bf16 %v97_v8, %v95_v7  ;;  %v154_v15 = vpack.c.bf16 %v38_v10, %v36_v9  ;;  %v35_v17 = vld [vmem:[%s1641_s0 + $0xa0] sm:$0xff]  ;;  %v37_v18 = vld [vmem:[%s1641_s0 + $0xb0] sm:$0xff] }
  0x13   :  { %404 = vmatprep.subr.bf16.mxu0 %v827_v0  ;;  %800 = vmatprep.subr.bf16.mxu1 %v827_v0  ;;  %v40_v21 = vld [vmem:[%s1641_s0 + $0xc8] sm:$0xff]  ;;  %v42_v22 = vld [vmem:[%s1641_s0 + $0xd8] sm:$0xff]  ;;  %v153_v25 = vpack.c.bf16 %v37_v18, %v35_v17 }
  0x14   :  { %v104_v23 = vld [vmem:[%s1641_s0 + $0x2c8] sm:$0xff]  ;;  %v106_v24 = vld [vmem:[%s1641_s0 + $0x2d8] sm:$0xff]  ;;  %v156_v27 = vpack.c.bf16 %v42_v22, %v40_v21 }
  0x15   :  { %v188_v28 = vpack.c.bf16 %v106_v24, %v104_v23  ;;  %v44_v33 = vld [vmem:[%s1641_s0 + $0xe8] sm:$0xff]  ;;  %v46_v34 = vld [vmem:[%s1641_s0 + $0xf8] sm:$0xff] }
  0x16   :  { %405 = vmatpush1.bf16.msra.mxu0 %v822_v12  ;;  %810 = vmatpush1.bf16.msra.mxu1 %v822_v12  ;;  %v102_v12 = vld [vmem:[%s1641_s0 + $0x2b8] sm:$0xff]  ;;  %v108_v35 = vld [vmem:[%s1641_s0 + $0x2e8] sm:$0xff]  ;;  %v158_v39 = vpack.c.bf16 %v46_v34, %v44_v33 }
  0x17   :  { %406 = vmatprep.subr.bf16.mxu0 %v827_v0  ;;  %801 = vmatprep.subr.bf16.mxu1 %v827_v0  ;;  %v110_v36 = vld [vmem:[%s1641_s0 + $0x2f8] sm:$0xff]  ;;  %v48_v45 = vld [vmem:[%s1641_s0 + $0x108] sm:$0xff] }
  0x18   :  { %v190_v40 = vpack.c.bf16 %v110_v36, %v108_v35  ;;  %v50_v46 = vld [vmem:[%s1641_s0 + $0x118] sm:$0xff]  ;;  %v112_v47 = vld [vmem:[%s1641_s0 + $0x308] sm:$0xff] }
  0x19   :  { %v114_v48 = vld [vmem:[%s1641_s0 + $0x318] sm:$0xff]  ;;  %v160_v51 = vpack.c.bf16 %v50_v46, %v48_v45  ;;  %v52_v57 = vld [vmem:[%s1641_s0 + $0x128] sm:$0xff] }
  0x1a   :  { %407 = vmatpush1.bf16.msra.mxu0 %v823_v13  ;;  %811 = vmatpush1.bf16.msra.mxu1 %v823_v13  ;;  %v151_v13 = vpack.c.bf16 %v33_v6, %v31_v5  ;;  %v192_v52 = vpack.c.bf16 %v114_v48, %v112_v47  ;;  %v54_v58 = vld [vmem:[%s1641_s0 + $0x138] sm:$0xff]  ;;  %v116_v59 = vld [vmem:[%s1641_s0 + $0x328] sm:$0xff] }
  0x1b   :  { %408 = vmatprep.subr.bf16.mxu0 %v827_v0  ;;  %802 = vmatprep.subr.bf16.mxu1 %v827_v0  ;;  %v118_v60 = vld [vmem:[%s1641_s0 + $0x338] sm:$0xff]  ;;  %v56_v5 = vld [vmem:[%s1641_s0 + $0x148] sm:$0xff] }
  0x1c   :  { %v58_v6 = vld [vmem:[%s1641_s0 + $0x158] sm:$0xff]  ;;  %v120_v7 = vld [vmem:[%s1641_s0 + $0x348] sm:$0xff] }
  0x1d   :  { %v122_v8 = vld [vmem:[%s1641_s0 + $0x358] sm:$0xff]  ;;  %v60_v17 = vld [vmem:[%s1641_s0 + $0x168] sm:$0xff] }
  0x1e   :  { %409 = vmatpush1.bf16.msra.mxu0 %v824_v16  ;;  %812 = vmatpush1.bf16.msra.mxu1 %v824_v16  ;;  %v186_v16 = vpack.c.bf16 %v102_v12, %v100_v11  ;;  %v164_v11 = vpack.c.bf16 %v58_v6, %v56_v5  ;;  %v196_v12 = vpack.c.bf16 %v122_v8, %v120_v7  ;;  %v62_v18 = vld [vmem:[%s1641_s0 + $0x178] sm:$0xff] }
  0x1f   :  { %422 = vmatprep.subr.bf16.mxu0 %v827_v0  ;;  %803 = vmatprep.subr.bf16.mxu1 %v827_v0  ;;  %v166_v23 = vpack.c.bf16 %v62_v18, %v60_v17 }
  0x22   :  { %423 = vmatpush2.bf16.msra.mxu0 %v392_v19  ;;  %813 = vmatpush2.bf16.msra.mxu1 %v392_v19  ;;  %v99_v19 = vld [vmem:[%s1641_s0 + $0x2a0] sm:$0xff] }
  0x23   :  { %424 = vmatprep.subr.bf16.mxu0 %v827_v0  ;;  %804 = vmatprep.subr.bf16.mxu1 %v827_v0  ;;  %v98_v0 = vld [vmem:[%s1641_s0 + $0x298] sm:$0xff] }
  0x24   :  { %v184_v4 = vpack.c.bf16 %v98_v0, %v96_v63  ;;  %v162_v63 = vpack.c.bf16 %v54_v58, %v52_v57  ;;  %v194_v0 = vpack.c.bf16 %v118_v60, %v116_v59 }
  0x26   :  { %425 = vmatpush2.bf16.msra.mxu0 %v826_v20  ;;  %814 = vmatpush2.bf16.msra.mxu1 %v826_v20  ;;  %v101_v20 = vld [vmem:[%s1641_s0 + $0x2b0] sm:$0xff] }
  0x27   :  { %v185_v26 = vpack.c.bf16 %v101_v20, %v99_v19  ;;  %v124_v19 = vld [vmem:[%s1641_s0 + $0x368] sm:$0xff]  ;;  %v126_v20 = vld [vmem:[%s1641_s0 + $0x378] sm:$0xff] }
  0x28   :  { %v198_v24 = vpack.c.bf16 %v126_v20, %v124_v19 }
  0x29   :  { %427 = vmatmul.mubr.bf16.vlgmr.msra.gmra.mxu0 %v143_v29  ;;  %555 = vmatmul.mubr.bf16.vlgmr.msra.gmra.mxu1 %v175_v30  ;;  %v39_v29 = vld [vmem:[%s1641_s0 + $0xc0] sm:$0xff]  ;;  %v41_v30 = vld [vmem:[%s1641_s0 + $0xd0] sm:$0xff] }
  0x2a   :  { %764 = vmatprep.mubr.msk.bf16.mxu0 %vm290_vm0, %v146_v31  ;;  %780 = vmatprep.mubr.msk.bf16.mxu1 %vm290_vm0, %v178_v32  ;;  %v103_v31 = vld [vmem:[%s1641_s0 + $0x2c0] sm:$0xff]  ;;  %v105_v32 = vld [vmem:[%s1641_s0 + $0x2d0] sm:$0xff]  ;;  %v155_v37 = vpack.c.bf16 %v41_v30, %v39_v29  ;;  %v64_v29 = vld [vmem:[%s1641_s0 + $0x188] sm:$0xff] }
  0x2b   :  { %v187_v38 = vpack.c.bf16 %v105_v32, %v103_v31  ;;  %v66_v30 = vld [vmem:[%s1641_s0 + $0x198] sm:$0xff]  ;;  %v128_v31 = vld [vmem:[%s1641_s0 + $0x388] sm:$0xff] }
  0x2c   :  { %v130_v32 = vld [vmem:[%s1641_s0 + $0x398] sm:$0xff]  ;;  %v168_v35 = vpack.c.bf16 %v66_v30, %v64_v29 }
  0x2d   :  { %v200_v36 = vpack.c.bf16 %v130_v32, %v128_v31 }
  0x31   :  { %435 = vmatmul.mubr.bf16.gmra.mxu0 %v145_v41  ;;  %563 = vmatmul.mubr.bf16.gmra.mxu1 %v177_v42  ;;  %v43_v41 = vld [vmem:[%s1641_s0 + $0xe0] sm:$0xff]  ;;  %v45_v42 = vld [vmem:[%s1641_s0 + $0xf0] sm:$0xff] }
  0x32   :  { %765 = vmatprep.mubr.msk.bf16.mxu0 %vm290_vm0, %v148_v43  ;;  %781 = vmatprep.mubr.msk.bf16.mxu1 %vm290_vm0, %v180_v44  ;;  %v107_v43 = vld [vmem:[%s1641_s0 + $0x2e0] sm:$0xff]  ;;  %v109_v44 = vld [vmem:[%s1641_s0 + $0x2f0] sm:$0xff]  ;;  %v157_v49 = vpack.c.bf16 %v45_v42, %v43_v41  ;;  %v68_v41 = vld [vmem:[%s1641_s0 + $0x1a8] sm:$0xff] }
  0x33   :  { %v189_v50 = vpack.c.bf16 %v109_v44, %v107_v43  ;;  %v70_v42 = vld [vmem:[%s1641_s0 + $0x1b8] sm:$0xff]  ;;  %v132_v43 = vld [vmem:[%s1641_s0 + $0x3a8] sm:$0xff] }
  0x34   :  { %v134_v44 = vld [vmem:[%s1641_s0 + $0x3b8] sm:$0xff]  ;;  %v170_v47 = vpack.c.bf16 %v70_v42, %v68_v41 }
  0x35   :  { %v202_v48 = vpack.c.bf16 %v134_v44, %v132_v43 }
  0x39   :  { %443 = vmatmul.mubr.bf16.gmra.mxu0 %v147_v53  ;;  %571 = vmatmul.mubr.bf16.gmra.mxu1 %v179_v54  ;;  %v47_v53 = vld [vmem:[%s1641_s0 + $0x100] sm:$0xff]  ;;  %v49_v54 = vld [vmem:[%s1641_s0 + $0x110] sm:$0xff] }
  0x3a   :  { %766 = vmatprep.mubr.msk.bf16.mxu0 %vm290_vm0, %v150_v55  ;;  %782 = vmatprep.mubr.msk.bf16.mxu1 %vm290_vm0, %v182_v56  ;;  %v111_v55 = vld [vmem:[%s1641_s0 + $0x300] sm:$0xff]  ;;  %v113_v56 = vld [vmem:[%s1641_s0 + $0x310] sm:$0xff]  ;;  %v159_v61 = vpack.c.bf16 %v49_v54, %v47_v53  ;;  %v72_v53 = vld [vmem:[%s1641_s0 + $0x1c8] sm:$0xff] }
  0x3b   :  { %v191_v62 = vpack.c.bf16 %v113_v56, %v111_v55  ;;  %v74_v54 = vld [vmem:[%s1641_s0 + $0x1d8] sm:$0xff]  ;;  %v136_v55 = vld [vmem:[%s1641_s0 + $0x3c8] sm:$0xff] }
  0x3c   :  { %v138_v56 = vld [vmem:[%s1641_s0 + $0x3d8] sm:$0xff]  ;;  %v172_v59 = vpack.c.bf16 %v74_v54, %v72_v53 }
  0x3d   :  { %v204_v60 = vpack.c.bf16 %v138_v56, %v136_v55 }
  0x41   :  { %451 = vmatmul.mubr.bf16.gmra.mxu0 %v149_v1  ;;  %579 = vmatmul.mubr.bf16.gmra.mxu1 %v181_v2  ;;  %v51_v1 = vld [vmem:[%s1641_s0 + $0x120] sm:$0xff]  ;;  %v53_v2 = vld [vmem:[%s1641_s0 + $0x130] sm:$0xff] }
  0x42   :  { %767 = vmatprep.mubr.msk.bf16.mxu0 %vm290_vm0, %v152_v3  ;;  %783 = vmatprep.mubr.msk.bf16.mxu1 %vm290_vm0, %v184_v4  ;;  %v115_v3 = vld [vmem:[%s1641_s0 + $0x320] sm:$0xff]  ;;  %v117_v4 = vld [vmem:[%s1641_s0 + $0x330] sm:$0xff]  ;;  %v161_v9 = vpack.c.bf16 %v53_v2, %v51_v1  ;;  %v76_v1 = vld [vmem:[%s1641_s0 + $0x1e8] sm:$0xff] }
  0x43   :  { %v193_v10 = vpack.c.bf16 %v117_v4, %v115_v3  ;;  %v78_v2 = vld [vmem:[%s1641_s0 + $0x1f8] sm:$0xff]  ;;  %v140_v3 = vld [vmem:[%s1641_s0 + $0x3e8] sm:$0xff] }
  0x44   :  { %v142_v4 = vld [vmem:[%s1641_s0 + $0x3f8] sm:$0xff]  ;;  %v174_v7 = vpack.c.bf16 %v78_v2, %v76_v1 }
  0x45   :  { %v206_v8 = vpack.c.bf16 %v142_v4, %v140_v3 }
  0x49   :  { %459 = vmatmul.mubr.bf16.gmra.mxu0 %v151_v13  ;;  %587 = vmatmul.mubr.bf16.gmra.mxu1 %v183_v14  ;;  %v55_v13 = vld [vmem:[%s1641_s0 + $0x140] sm:$0xff]  ;;  %v57_v14 = vld [vmem:[%s1641_s0 + $0x150] sm:$0xff] }
  0x4a   :  { %768 = vmatprep.mubr.msk.bf16.mxu0 %vm290_vm0, %v154_v15  ;;  %784 = vmatprep.mubr.msk.bf16.mxu1 %vm290_vm0, %v186_v16  ;;  %v119_v15 = vld [vmem:[%s1641_s0 + $0x340] sm:$0xff]  ;;  %v121_v16 = vld [vmem:[%s1641_s0 + $0x350] sm:$0xff]  ;;  %v163_v21 = vpack.c.bf16 %v57_v14, %v55_v13 }
  0x4b   :  { %v195_v22 = vpack.c.bf16 %v121_v16, %v119_v15  ;;  %v1318_v15 = vld [vmem:[%s1642_s2] ss:$0 sm:$0xff] }
  0x51   :  { %467 = vmatmul.mubr.bf16.gmra.mxu0 %v153_v25  ;;  %595 = vmatmul.mubr.bf16.gmra.mxu1 %v185_v26  ;;  %v59_v25 = vld [vmem:[%s1641_s0 + $0x160] sm:$0xff]  ;;  %v61_v26 = vld [vmem:[%s1641_s0 + $0x170] sm:$0xff] }
  0x52   :  { %769 = vmatprep.mubr.msk.bf16.mxu0 %vm290_vm0, %v156_v27  ;;  %785 = vmatprep.mubr.msk.bf16.mxu1 %vm290_vm0, %v188_v28  ;;  %v123_v27 = vld [vmem:[%s1641_s0 + $0x360] sm:$0xff]  ;;  %v125_v28 = vld [vmem:[%s1641_s0 + $0x370] sm:$0xff]  ;;  %v165_v33 = vpack.c.bf16 %v61_v26, %v59_v25 }
  0x53   :  { %v197_v34 = vpack.c.bf16 %v125_v28, %v123_v27 }
  0x59   :  { %475 = vmatmul.mubr.bf16.gmra.mxu0 %v155_v37  ;;  %603 = vmatmul.mubr.bf16.gmra.mxu1 %v187_v38  ;;  %v63_v37 = vld [vmem:[%s1641_s0 + $0x180] sm:$0xff]  ;;  %v65_v38 = vld [vmem:[%s1641_s0 + $0x190] sm:$0xff] }
  0x5a   :  { %770 = vmatprep.mubr.msk.bf16.mxu0 %vm290_vm0, %v158_v39  ;;  %786 = vmatprep.mubr.msk.bf16.mxu1 %vm290_vm0, %v190_v40  ;;  %v127_v39 = vld [vmem:[%s1641_s0 + $0x380] sm:$0xff]  ;;  %v129_v40 = vld [vmem:[%s1641_s0 + $0x390] sm:$0xff]  ;;  %v167_v45 = vpack.c.bf16 %v65_v38, %v63_v37 }
  0x5b   :  { %v199_v46 = vpack.c.bf16 %v129_v40, %v127_v39 }
  0x61   :  { %483 = vmatmul.mubr.bf16.gmra.mxu0 %v157_v49  ;;  %611 = vmatmul.mubr.bf16.gmra.mxu1 %v189_v50  ;;  %v67_v49 = vld [vmem:[%s1641_s0 + $0x1a0] sm:$0xff]  ;;  %v69_v50 = vld [vmem:[%s1641_s0 + $0x1b0] sm:$0xff] }
  0x62   :  { %771 = vmatprep.mubr.msk.bf16.mxu0 %vm290_vm0, %v160_v51  ;;  %787 = vmatprep.mubr.msk.bf16.mxu1 %vm290_vm0, %v192_v52  ;;  %v131_v51 = vld [vmem:[%s1641_s0 + $0x3a0] sm:$0xff]  ;;  %v133_v52 = vld [vmem:[%s1641_s0 + $0x3b0] sm:$0xff]  ;;  %v169_v57 = vpack.c.bf16 %v69_v50, %v67_v49 }
  0x63   :  { %v201_v58 = vpack.c.bf16 %v133_v52, %v131_v51 }
  0x69   :  { %491 = vmatmul.mubr.bf16.gmra.mxu0 %v159_v61  ;;  %619 = vmatmul.mubr.bf16.gmra.mxu1 %v191_v62  ;;  %v71_v61 = vld [vmem:[%s1641_s0 + $0x1c0] sm:$0xff]  ;;  %v73_v62 = vld [vmem:[%s1641_s0 + $0x1d0] sm:$0xff] }
  0x6a   :  { %772 = vmatprep.mubr.msk.bf16.mxu0 %vm290_vm0, %v162_v63  ;;  %788 = vmatprep.mubr.msk.bf16.mxu1 %vm290_vm0, %v194_v0  ;;  %v135_v63 = vld [vmem:[%s1641_s0 + $0x3c0] sm:$0xff]  ;;  %v137_v0 = vld [vmem:[%s1641_s0 + $0x3d0] sm:$0xff]  ;;  %v171_v5 = vpack.c.bf16 %v73_v62, %v71_v61 }
  0x6b   :  { %v203_v6 = vpack.c.bf16 %v137_v0, %v135_v63 }
  0x71   :  { %499 = vmatmul.mubr.bf16.gmra.mxu0 %v161_v9  ;;  %627 = vmatmul.mubr.bf16.gmra.mxu1 %v193_v10  ;;  %v75_v9 = vld [vmem:[%s1641_s0 + $0x1e0] sm:$0xff]  ;;  %v77_v10 = vld [vmem:[%s1641_s0 + $0x1f0] sm:$0xff] }
  0x72   :  { %773 = vmatprep.mubr.msk.bf16.mxu0 %vm290_vm0, %v164_v11  ;;  %789 = vmatprep.mubr.msk.bf16.mxu1 %vm290_vm0, %v196_v12  ;;  %v139_v11 = vld [vmem:[%s1641_s0 + $0x3e0] sm:$0xff]  ;;  %v141_v12 = vld [vmem:[%s1641_s0 + $0x3f0] sm:$0xff]  ;;  %v173_v13 = vpack.c.bf16 %v77_v10, %v75_v9 }
  0x73   :  { %v205_v14 = vpack.c.bf16 %v141_v12, %v139_v11 }
  0x79   :  { %507 = vmatmul.mubr.bf16.gmra.mxu0 %v163_v21  ;;  %635 = vmatmul.mubr.bf16.gmra.mxu1 %v195_v22 }
  0x7a   :  { %774 = vmatprep.mubr.msk.bf16.mxu0 %vm290_vm0, %v166_v23  ;;  %790 = vmatprep.mubr.msk.bf16.mxu1 %vm290_vm0, %v198_v24 }
  0x81   :  { %515 = vmatmul.mubr.bf16.gmra.mxu0 %v165_v33  ;;  %643 = vmatmul.mubr.bf16.gmra.mxu1 %v197_v34 }
  0x82   :  { %775 = vmatprep.mubr.msk.bf16.mxu0 %vm290_vm0, %v168_v35  ;;  %791 = vmatprep.mubr.msk.bf16.mxu1 %vm290_vm0, %v200_v36 }
  0x89   :  { %523 = vmatmul.mubr.bf16.gmra.mxu0 %v167_v45  ;;  %651 = vmatmul.mubr.bf16.gmra.mxu1 %v199_v46 }
  0x8a   :  { %776 = vmatprep.mubr.msk.bf16.mxu0 %vm290_vm0, %v170_v47  ;;  %792 = vmatprep.mubr.msk.bf16.mxu1 %vm290_vm0, %v202_v48 }
  0x91   :  { %531 = vmatmul.mubr.bf16.gmra.mxu0 %v169_v57  ;;  %659 = vmatmul.mubr.bf16.gmra.mxu1 %v201_v58 }
  0x92   :  { %777 = vmatprep.mubr.msk.bf16.mxu0 %vm290_vm0, %v172_v59  ;;  %793 = vmatprep.mubr.msk.bf16.mxu1 %vm290_vm0, %v204_v60 }
  0x99   :  { %539 = vmatmul.mubr.bf16.gmra.mxu0 %v171_v5  ;;  %667 = vmatmul.mubr.bf16.gmra.mxu1 %v203_v6 }
  0x9a   :  { %778 = vmatprep.mubr.msk.bf16.mxu0 %vm290_vm0, %v174_v7  ;;  %794 = vmatprep.mubr.msk.bf16.mxu1 %vm290_vm0, %v206_v8 }
  0xa1   :  { %547 = vmatmul.mubr.bf16.gmra.mxu0 %v173_v13  ;;  %675 = vmatmul.mubr.bf16.gmra.mxu1 %v205_v14 }
  0xe9   :  { %v428_v16 = vpop.f32.mrf.mxu0  ;;  %v556_v17 = vpop.f32.mrf.mxu1 }
  0xea   :  { %v429_v18 = vadd.f32 %v1318_v15, %v428_v16  ;;  %v557_v19 = vadd.f32 %v1318_v15, %v556_v17 }
  0xeb   :  { %v430_v20 = vpop.f32.mrf.mxu0  ;;  %v558_v21 = vpop.f32.mrf.mxu1 }
  0xec   :  { %684 = vst.msk [vmem:[%s1643_s3] sm:$0xff] %vm683_vm3, %v429_v18  ;;  %716 = vst.msk [vmem:[%s1643_s3 + $0x100] sm:$0xff] %vm683_vm3, %v557_v19 }
  0xed   :  { %v431_v22 = vpop.f32.mrf.mxu0  ;;  %v559_v23 = vpop.f32.mrf.mxu1 }
  0xee   :  { %v432_v24 = vadd.f32 %v1318_v15, %v431_v22  ;;  %v560_v25 = vadd.f32 %v1318_v15, %v559_v23 }
  0xef   :  { %v433_v26 = vpop.f32.mrf.mxu0  ;;  %v561_v27 = vpop.f32.mrf.mxu1 }
  0xf0   :  { %685 = vst.msk [vmem:[%s1643_s3 + $0x8] sm:$0xff] %vm683_vm3, %v432_v24  ;;  %717 = vst.msk [vmem:[%s1643_s3 + $0x108] sm:$0xff] %vm683_vm3, %v560_v25 }
  0xf1   :  { %v436_v28 = vpop.f32.mrf.mxu0  ;;  %v564_v29 = vpop.f32.mrf.mxu1 }
  0xf2   :  { %v437_v30 = vadd.f32 %v1318_v15, %v436_v28  ;;  %v565_v31 = vadd.f32 %v1318_v15, %v564_v29 }
  0xf3   :  { %v438_v32 = vpop.f32.mrf.mxu0  ;;  %v566_v33 = vpop.f32.mrf.mxu1 }
  0xf4   :  { %686 = vst.msk [vmem:[%s1643_s3 + $0x10] sm:$0xff] %vm683_vm3, %v437_v30  ;;  %718 = vst.msk [vmem:[%s1643_s3 + $0x110] sm:$0xff] %vm683_vm3, %v565_v31 }
  0xf5   :  { %v439_v34 = vpop.f32.mrf.mxu0  ;;  %v567_v35 = vpop.f32.mrf.mxu1 }
  0xf6   :  { %v440_v36 = vadd.f32 %v1318_v15, %v439_v34  ;;  %v568_v37 = vadd.f32 %v1318_v15, %v567_v35 }
  0xf7   :  { %v441_v38 = vpop.f32.mrf.mxu0  ;;  %v569_v39 = vpop.f32.mrf.mxu1 }
  0xf8   :  { %687 = vst.msk [vmem:[%s1643_s3 + $0x18] sm:$0xff] %vm683_vm3, %v440_v36  ;;  %719 = vst.msk [vmem:[%s1643_s3 + $0x118] sm:$0xff] %vm683_vm3, %v568_v37 }
  0xf9   :  { %v444_v40 = vpop.f32.mrf.mxu0  ;;  %v572_v41 = vpop.f32.mrf.mxu1 }
  0xfa   :  { %v445_v42 = vadd.f32 %v1318_v15, %v444_v40  ;;  %v573_v43 = vadd.f32 %v1318_v15, %v572_v41 }
  0xfb   :  { %v446_v44 = vpop.f32.mrf.mxu0  ;;  %v574_v45 = vpop.f32.mrf.mxu1 }
  0xfc   :  { %688 = vst.msk [vmem:[%s1643_s3 + $0x20] sm:$0xff] %vm683_vm3, %v445_v42  ;;  %720 = vst.msk [vmem:[%s1643_s3 + $0x120] sm:$0xff] %vm683_vm3, %v573_v43 }
  0xfd   :  { %v447_v46 = vpop.f32.mrf.mxu0  ;;  %v575_v47 = vpop.f32.mrf.mxu1 }
  0xfe   :  { %v448_v48 = vadd.f32 %v1318_v15, %v447_v46  ;;  %v576_v49 = vadd.f32 %v1318_v15, %v575_v47 }
  0xff   :  { %v449_v50 = vpop.f32.mrf.mxu0  ;;  %v577_v51 = vpop.f32.mrf.mxu1 }
 0x100   :  { %689 = vst.msk [vmem:[%s1643_s3 + $0x28] sm:$0xff] %vm683_vm3, %v448_v48  ;;  %721 = vst.msk [vmem:[%s1643_s3 + $0x128] sm:$0xff] %vm683_vm3, %v576_v49 }
 0x101   :  { %v452_v52 = vpop.f32.mrf.mxu0  ;;  %v580_v53 = vpop.f32.mrf.mxu1 }
 0x102   :  { %v453_v54 = vadd.f32 %v1318_v15, %v452_v52  ;;  %v581_v55 = vadd.f32 %v1318_v15, %v580_v53 }
 0x103   :  { %v454_v56 = vpop.f32.mrf.mxu0  ;;  %v582_v57 = vpop.f32.mrf.mxu1 }
 0x104   :  { %690 = vst.msk [vmem:[%s1643_s3 + $0x30] sm:$0xff] %vm683_vm3, %v453_v54  ;;  %722 = vst.msk [vmem:[%s1643_s3 + $0x130] sm:$0xff] %vm683_vm3, %v581_v55 }
 0x105   :  { %v455_v58 = vpop.f32.mrf.mxu0  ;;  %v583_v59 = vpop.f32.mrf.mxu1 }
 0x106   :  { %v456_v60 = vadd.f32 %v1318_v15, %v455_v58  ;;  %v584_v61 = vadd.f32 %v1318_v15, %v583_v59 }
 0x107   :  { %v457_v62 = vpop.f32.mrf.mxu0  ;;  %v585_v63 = vpop.f32.mrf.mxu1 }
 0x108   :  { %691 = vst.msk [vmem:[%s1643_s3 + $0x38] sm:$0xff] %vm683_vm3, %v456_v60  ;;  %723 = vst.msk [vmem:[%s1643_s3 + $0x138] sm:$0xff] %vm683_vm3, %v584_v61 }
 0x109   :  { %v460_v0 = vpop.f32.mrf.mxu0  ;;  %v588_v1 = vpop.f32.mrf.mxu1 }
 0x10a   :  { %v461_v2 = vadd.f32 %v1318_v15, %v460_v0  ;;  %v589_v3 = vadd.f32 %v1318_v15, %v588_v1 }
 0x10b   :  { %v462_v4 = vpop.f32.mrf.mxu0  ;;  %v590_v5 = vpop.f32.mrf.mxu1 }
 0x10c   :  { %692 = vst.msk [vmem:[%s1643_s3 + $0x40] sm:$0xff] %vm683_vm3, %v461_v2  ;;  %724 = vst.msk [vmem:[%s1643_s3 + $0x140] sm:$0xff] %vm683_vm3, %v589_v3 }
 0x10d   :  { %v463_v6 = vpop.f32.mrf.mxu0  ;;  %v591_v7 = vpop.f32.mrf.mxu1 }
 0x10e   :  { %v464_v8 = vadd.f32 %v1318_v15, %v463_v6  ;;  %v592_v9 = vadd.f32 %v1318_v15, %v591_v7 }
 0x10f   :  { %v465_v10 = vpop.f32.mrf.mxu0  ;;  %v593_v11 = vpop.f32.mrf.mxu1 }
 0x110   :  { %693 = vst.msk [vmem:[%s1643_s3 + $0x48] sm:$0xff] %vm683_vm3, %v464_v8  ;;  %725 = vst.msk [vmem:[%s1643_s3 + $0x148] sm:$0xff] %vm683_vm3, %v592_v9 }
 0x111   :  { %v468_v12 = vpop.f32.mrf.mxu0  ;;  %v596_v13 = vpop.f32.mrf.mxu1 }
 0x112   :  { %v469_v14 = vadd.f32 %v1318_v15, %v468_v12  ;;  %v597_v16 = vadd.f32 %v1318_v15, %v596_v13 }
 0x113   :  { %v470_v17 = vpop.f32.mrf.mxu0  ;;  %v598_v18 = vpop.f32.mrf.mxu1 }
 0x114   :  { %694 = vst.msk [vmem:[%s1643_s3 + $0x50] sm:$0xff] %vm683_vm3, %v469_v14  ;;  %726 = vst.msk [vmem:[%s1643_s3 + $0x150] sm:$0xff] %vm683_vm3, %v597_v16 }
 0x115   :  { %v471_v19 = vpop.f32.mrf.mxu0  ;;  %v599_v20 = vpop.f32.mrf.mxu1 }
 0x116   :  { %v472_v21 = vadd.f32 %v1318_v15, %v471_v19  ;;  %v600_v22 = vadd.f32 %v1318_v15, %v599_v20 }
 0x117   :  { %v473_v23 = vpop.f32.mrf.mxu0  ;;  %v601_v24 = vpop.f32.mrf.mxu1 }
 0x118   :  { %695 = vst.msk [vmem:[%s1643_s3 + $0x58] sm:$0xff] %vm683_vm3, %v472_v21  ;;  %727 = vst.msk [vmem:[%s1643_s3 + $0x158] sm:$0xff] %vm683_vm3, %v600_v22 }
 0x119   :  { %v476_v25 = vpop.f32.mrf.mxu0  ;;  %v604_v26 = vpop.f32.mrf.mxu1 }
 0x11a   :  { %v477_v27 = vadd.f32 %v1318_v15, %v476_v25  ;;  %v605_v28 = vadd.f32 %v1318_v15, %v604_v26 }
 0x11b   :  { %v478_v29 = vpop.f32.mrf.mxu0  ;;  %v606_v30 = vpop.f32.mrf.mxu1 }
 0x11c   :  { %696 = vst.msk [vmem:[%s1643_s3 + $0x60] sm:$0xff] %vm683_vm3, %v477_v27  ;;  %728 = vst.msk [vmem:[%s1643_s3 + $0x160] sm:$0xff] %vm683_vm3, %v605_v28 }
 0x11d   :  { %v479_v31 = vpop.f32.mrf.mxu0  ;;  %v607_v32 = vpop.f32.mrf.mxu1 }
 0x11e   :  { %v480_v33 = vadd.f32 %v1318_v15, %v479_v31  ;;  %v608_v34 = vadd.f32 %v1318_v15, %v607_v32 }
 0x11f   :  { %v481_v35 = vpop.f32.mrf.mxu0  ;;  %v609_v36 = vpop.f32.mrf.mxu1 }
 0x120   :  { %697 = vst.msk [vmem:[%s1643_s3 + $0x68] sm:$0xff] %vm683_vm3, %v480_v33  ;;  %729 = vst.msk [vmem:[%s1643_s3 + $0x168] sm:$0xff] %vm683_vm3, %v608_v34 }
 0x121   :  { %v484_v37 = vpop.f32.mrf.mxu0  ;;  %v612_v38 = vpop.f32.mrf.mxu1 }
 0x122   :  { %v485_v39 = vadd.f32 %v1318_v15, %v484_v37  ;;  %v613_v40 = vadd.f32 %v1318_v15, %v612_v38 }
 0x123   :  { %v486_v41 = vpop.f32.mrf.mxu0  ;;  %v614_v42 = vpop.f32.mrf.mxu1 }
 0x124   :  { %698 = vst.msk [vmem:[%s1643_s3 + $0x70] sm:$0xff] %vm683_vm3, %v485_v39  ;;  %730 = vst.msk [vmem:[%s1643_s3 + $0x170] sm:$0xff] %vm683_vm3, %v613_v40 }
 0x125   :  { %v487_v43 = vpop.f32.mrf.mxu0  ;;  %v615_v44 = vpop.f32.mrf.mxu1 }
 0x126   :  { %v488_v45 = vadd.f32 %v1318_v15, %v487_v43  ;;  %v616_v46 = vadd.f32 %v1318_v15, %v615_v44 }
 0x127   :  { %v489_v47 = vpop.f32.mrf.mxu0  ;;  %v617_v48 = vpop.f32.mrf.mxu1 }
 0x128   :  { %699 = vst.msk [vmem:[%s1643_s3 + $0x78] sm:$0xff] %vm683_vm3, %v488_v45  ;;  %731 = vst.msk [vmem:[%s1643_s3 + $0x178] sm:$0xff] %vm683_vm3, %v616_v46 }
 0x129   :  { %v492_v49 = vpop.f32.mrf.mxu0  ;;  %v620_v50 = vpop.f32.mrf.mxu1 }
 0x12a   :  { %v493_v51 = vadd.f32 %v1318_v15, %v492_v49  ;;  %v621_v52 = vadd.f32 %v1318_v15, %v620_v50 }
 0x12b   :  { %v494_v53 = vpop.f32.mrf.mxu0  ;;  %v622_v54 = vpop.f32.mrf.mxu1 }
 0x12c   :  { %700 = vst.msk [vmem:[%s1643_s3 + $0x80] sm:$0xff] %vm683_vm3, %v493_v51  ;;  %732 = vst.msk [vmem:[%s1643_s3 + $0x180] sm:$0xff] %vm683_vm3, %v621_v52 }
 0x12d   :  { %v495_v55 = vpop.f32.mrf.mxu0  ;;  %v623_v56 = vpop.f32.mrf.mxu1 }
 0x12e   :  { %v496_v57 = vadd.f32 %v1318_v15, %v495_v55  ;;  %v624_v58 = vadd.f32 %v1318_v15, %v623_v56 }
 0x12f   :  { %v497_v59 = vpop.f32.mrf.mxu0  ;;  %v625_v60 = vpop.f32.mrf.mxu1 }
 0x130   :  { %701 = vst.msk [vmem:[%s1643_s3 + $0x88] sm:$0xff] %vm683_vm3, %v496_v57  ;;  %733 = vst.msk [vmem:[%s1643_s3 + $0x188] sm:$0xff] %vm683_vm3, %v624_v58 }
 0x131   :  { %v500_v61 = vpop.f32.mrf.mxu0  ;;  %v628_v62 = vpop.f32.mrf.mxu1 }
 0x132   :  { %v501_v63 = vadd.f32 %v1318_v15, %v500_v61  ;;  %v629_v0 = vadd.f32 %v1318_v15, %v628_v62 }
 0x133   :  { %v502_v1 = vpop.f32.mrf.mxu0  ;;  %v630_v2 = vpop.f32.mrf.mxu1 }
 0x134   :  { %702 = vst.msk [vmem:[%s1643_s3 + $0x90] sm:$0xff] %vm683_vm3, %v501_v63  ;;  %734 = vst.msk [vmem:[%s1643_s3 + $0x190] sm:$0xff] %vm683_vm3, %v629_v0 }
 0x135   :  { %v503_v3 = vpop.f32.mrf.mxu0  ;;  %v631_v4 = vpop.f32.mrf.mxu1 }
 0x136   :  { %v504_v5 = vadd.f32 %v1318_v15, %v503_v3  ;;  %v632_v6 = vadd.f32 %v1318_v15, %v631_v4 }
 0x137   :  { %v505_v7 = vpop.f32.mrf.mxu0  ;;  %v633_v8 = vpop.f32.mrf.mxu1 }
 0x138   :  { %703 = vst.msk [vmem:[%s1643_s3 + $0x98] sm:$0xff] %vm683_vm3, %v504_v5  ;;  %735 = vst.msk [vmem:[%s1643_s3 + $0x198] sm:$0xff] %vm683_vm3, %v632_v6 }
 0x139   :  { %v508_v9 = vpop.f32.mrf.mxu0  ;;  %v636_v10 = vpop.f32.mrf.mxu1 }
 0x13a   :  { %v509_v11 = vadd.f32 %v1318_v15, %v508_v9  ;;  %v637_v12 = vadd.f32 %v1318_v15, %v636_v10 }
 0x13b   :  { %v510_v13 = vpop.f32.mrf.mxu0  ;;  %v638_v14 = vpop.f32.mrf.mxu1 }
 0x13c   :  { %704 = vst.msk [vmem:[%s1643_s3 + $0xa0] sm:$0xff] %vm683_vm3, %v509_v11  ;;  %736 = vst.msk [vmem:[%s1643_s3 + $0x1a0] sm:$0xff] %vm683_vm3, %v637_v12 }
 0x13d   :  { %v511_v16 = vpop.f32.mrf.mxu0  ;;  %v639_v17 = vpop.f32.mrf.mxu1 }
 0x13e   :  { %v512_v18 = vadd.f32 %v1318_v15, %v511_v16  ;;  %v640_v19 = vadd.f32 %v1318_v15, %v639_v17 }
 0x13f   :  { %v513_v20 = vpop.f32.mrf.mxu0  ;;  %v641_v21 = vpop.f32.mrf.mxu1 }
 0x140   :  { %705 = vst.msk [vmem:[%s1643_s3 + $0xa8] sm:$0xff] %vm683_vm3, %v512_v18  ;;  %737 = vst.msk [vmem:[%s1643_s3 + $0x1a8] sm:$0xff] %vm683_vm3, %v640_v19 }
 0x141   :  { %v516_v22 = vpop.f32.mrf.mxu0  ;;  %v644_v23 = vpop.f32.mrf.mxu1 }
 0x142   :  { %v517_v24 = vadd.f32 %v1318_v15, %v516_v22  ;;  %v645_v25 = vadd.f32 %v1318_v15, %v644_v23 }
 0x143   :  { %v518_v26 = vpop.f32.mrf.mxu0  ;;  %v646_v27 = vpop.f32.mrf.mxu1 }
 0x144   :  { %706 = vst.msk [vmem:[%s1643_s3 + $0xb0] sm:$0xff] %vm683_vm3, %v517_v24  ;;  %738 = vst.msk [vmem:[%s1643_s3 + $0x1b0] sm:$0xff] %vm683_vm3, %v645_v25 }
 0x145   :  { %v519_v28 = vpop.f32.mrf.mxu0  ;;  %v647_v29 = vpop.f32.mrf.mxu1 }
 0x146   :  { %v520_v30 = vadd.f32 %v1318_v15, %v519_v28  ;;  %v648_v31 = vadd.f32 %v1318_v15, %v647_v29 }
 0x147   :  { %v521_v32 = vpop.f32.mrf.mxu0  ;;  %v649_v33 = vpop.f32.mrf.mxu1 }
 0x148   :  { %707 = vst.msk [vmem:[%s1643_s3 + $0xb8] sm:$0xff] %vm683_vm3, %v520_v30  ;;  %739 = vst.msk [vmem:[%s1643_s3 + $0x1b8] sm:$0xff] %vm683_vm3, %v648_v31 }
 0x149   :  { %v524_v34 = vpop.f32.mrf.mxu0  ;;  %v652_v35 = vpop.f32.mrf.mxu1 }
 0x14a   :  { %v525_v36 = vadd.f32 %v1318_v15, %v524_v34  ;;  %v653_v37 = vadd.f32 %v1318_v15, %v652_v35 }
 0x14b   :  { %v526_v38 = vpop.f32.mrf.mxu0  ;;  %v654_v39 = vpop.f32.mrf.mxu1 }
 0x14c   :  { %708 = vst.msk [vmem:[%s1643_s3 + $0xc0] sm:$0xff] %vm683_vm3, %v525_v36  ;;  %740 = vst.msk [vmem:[%s1643_s3 + $0x1c0] sm:$0xff] %vm683_vm3, %v653_v37 }
 0x14d   :  { %v527_v40 = vpop.f32.mrf.mxu0  ;;  %v655_v41 = vpop.f32.mrf.mxu1 }
 0x14e   :  { %v528_v42 = vadd.f32 %v1318_v15, %v527_v40  ;;  %v656_v43 = vadd.f32 %v1318_v15, %v655_v41 }
 0x14f   :  { %v529_v44 = vpop.f32.mrf.mxu0  ;;  %v657_v45 = vpop.f32.mrf.mxu1 }
 0x150   :  { %709 = vst.msk [vmem:[%s1643_s3 + $0xc8] sm:$0xff] %vm683_vm3, %v528_v42  ;;  %741 = vst.msk [vmem:[%s1643_s3 + $0x1c8] sm:$0xff] %vm683_vm3, %v656_v43 }
 0x151   :  { %v532_v46 = vpop.f32.mrf.mxu0  ;;  %v660_v47 = vpop.f32.mrf.mxu1 }
 0x152   :  { %v533_v48 = vadd.f32 %v1318_v15, %v532_v46  ;;  %v661_v49 = vadd.f32 %v1318_v15, %v660_v47 }
 0x153   :  { %v534_v50 = vpop.f32.mrf.mxu0  ;;  %v662_v51 = vpop.f32.mrf.mxu1 }
 0x154   :  { %710 = vst.msk [vmem:[%s1643_s3 + $0xd0] sm:$0xff] %vm683_vm3, %v533_v48  ;;  %742 = vst.msk [vmem:[%s1643_s3 + $0x1d0] sm:$0xff] %vm683_vm3, %v661_v49 }
 0x155   :  { %v535_v52 = vpop.f32.mrf.mxu0  ;;  %v663_v53 = vpop.f32.mrf.mxu1 }
 0x156   :  { %v536_v54 = vadd.f32 %v1318_v15, %v535_v52  ;;  %v664_v55 = vadd.f32 %v1318_v15, %v663_v53 }
 0x157   :  { %v537_v56 = vpop.f32.mrf.mxu0  ;;  %v665_v57 = vpop.f32.mrf.mxu1 }
 0x158   :  { %711 = vst.msk [vmem:[%s1643_s3 + $0xd8] sm:$0xff] %vm683_vm3, %v536_v54  ;;  %743 = vst.msk [vmem:[%s1643_s3 + $0x1d8] sm:$0xff] %vm683_vm3, %v664_v55 }
 0x159   :  { %v540_v58 = vpop.f32.mrf.mxu0  ;;  %v668_v59 = vpop.f32.mrf.mxu1 }
 0x15a   :  { %v541_v60 = vadd.f32 %v1318_v15, %v540_v58  ;;  %v669_v61 = vadd.f32 %v1318_v15, %v668_v59 }
 0x15b   :  { %v542_v62 = vpop.f32.mrf.mxu0  ;;  %v670_v63 = vpop.f32.mrf.mxu1 }
 0x15c   :  { %712 = vst.msk [vmem:[%s1643_s3 + $0xe0] sm:$0xff] %vm683_vm3, %v541_v60  ;;  %744 = vst.msk [vmem:[%s1643_s3 + $0x1e0] sm:$0xff] %vm683_vm3, %v669_v61 }
 0x15d   :  { %v543_v0 = vpop.f32.mrf.mxu0  ;;  %v671_v1 = vpop.f32.mrf.mxu1 }
 0x15e   :  { %v544_v2 = vadd.f32 %v1318_v15, %v543_v0  ;;  %v672_v3 = vadd.f32 %v1318_v15, %v671_v1 }
 0x15f   :  { %v545_v4 = vpop.f32.mrf.mxu0  ;;  %v673_v5 = vpop.f32.mrf.mxu1 }
 0x160   :  { %713 = vst.msk [vmem:[%s1643_s3 + $0xe8] sm:$0xff] %vm683_vm3, %v544_v2  ;;  %745 = vst.msk [vmem:[%s1643_s3 + $0x1e8] sm:$0xff] %vm683_vm3, %v672_v3 }
 0x161   :  { %v548_v6 = vpop.f32.mrf.mxu0  ;;  %v676_v7 = vpop.f32.mrf.mxu1 }
 0x162   :  { %v549_v8 = vadd.f32 %v1318_v15, %v548_v6  ;;  %v677_v9 = vadd.f32 %v1318_v15, %v676_v7 }
 0x163   :  { %v550_v10 = vpop.f32.mrf.mxu0  ;;  %v678_v11 = vpop.f32.mrf.mxu1 }
 0x164   :  { %714 = vst.msk [vmem:[%s1643_s3 + $0xf0] sm:$0xff] %vm683_vm3, %v549_v8  ;;  %746 = vst.msk [vmem:[%s1643_s3 + $0x1f0] sm:$0xff] %vm683_vm3, %v677_v9 }
 0x165   :  { %v551_v12 = vpop.f32.mrf.mxu0  ;;  %v679_v13 = vpop.f32.mrf.mxu1 }
 0x166   :  { %v552_v14 = vadd.f32 %v1318_v15, %v551_v12  ;;  %v680_v16 = vadd.f32 %v1318_v15, %v679_v13 }
 0x167   :  { %v553_v17 = vpop.f32.mrf.mxu0  ;;  %v681_v18 = vpop.f32.mrf.mxu1 }
 0x168   :  { %715 = vst.msk [vmem:[%s1643_s3 + $0xf8] sm:$0xff] %vm683_vm3, %v552_v14  ;;  %747 = vst.msk [vmem:[%s1643_s3 + $0x1f8] sm:$0xff] %vm683_vm3, %v680_v16 }

// kernel: densenet_forward.20
= control target key start
LH: loop header
LB: loop body
LE: loop exit
PB: predicated region body
PF: predicated region fallthrough
CT: control target
= control target key end

     0   :  { %vm284_vm0 = vcmask 523264   ;;  %s961_s0 = inlined_call_operand.vmem [shape: f32[512,64], index: 0, kind: input, shape index: {}]   ;;  %s962_s1 = inlined_call_operand.vmem [shape: f32[1,64], index: 1, kind: input, shape index: {}]   ;;  %s963_s2 = inlined_call_operand.vmem [shape: f32[1,64], index: 2, kind: input, shape index: {}]   ;;  %s964_s3 = inlined_call_operand.vmem [shape: f32[512,64], index: 3, kind: output, shape index: {}]  }
   0x1   :  { %v14_v0 = vld [vmem:[%s961_s0] sm:$0xff]  ;;  %v15_v4 = vld [vmem:[%s961_s0 + $0x8] sm:$0xff]  ;;  %v16_v5 = vld [vmem:[%s961_s0 + $0x10] sm:$0xff] }
   0x2   :  { %v381_v1 = vld [vmem:[%s962_s1] ss:$0 sm:$0xff]  ;;  %v17_v6 = vld [vmem:[%s961_s0 + $0x18] sm:$0xff]  ;;  %v19_v11 = vld [vmem:[%s961_s0 + $0x28] sm:$0xff] }
   0x3   :  { %v386_v2 = vld [vmem:[%s963_s2] ss:$0 sm:$0xff]  ;;  %v85_v3 = vmul.f32 %v381_v1, %v14_v0  ;;  %v86_v7 = vmul.f32 %v381_v1, %v15_v4  ;;  %v87_v8 = vmul.f32 %v381_v1, %v16_v5  ;;  %v88_v9 = vmul.f32 %v381_v1, %v17_v6  ;;  %v20_v12 = vld [vmem:[%s961_s0 + $0x30] sm:$0xff]  ;;  %v21_v17 = vld [vmem:[%s961_s0 + $0x38] sm:$0xff] }
   0x4   :  { %v18_v10 = vld [vmem:[%s961_s0 + $0x20] sm:$0xff]  ;;  %v90_v15 = vmul.f32 %v381_v1, %v19_v11  ;;  %v91_v16 = vmul.f32 %v381_v1, %v20_v12  ;;  %v92_v21 = vmul.f32 %v381_v1, %v21_v17  ;;  %v23_v27 = vld [vmem:[%s961_s0 + $0x48] sm:$0xff]  ;;  %v24_v28 = vld [vmem:[%s961_s0 + $0x50] sm:$0xff] }
   0x5   :  { %v156_v13 = vadd.f32 %v386_v2, %v85_v3  ;;  %v89_v14 = vmul.f32 %v381_v1, %v18_v10  ;;  %v157_v18 = vadd.f32 %v386_v2, %v86_v7  ;;  %v158_v19 = vadd.f32 %v386_v2, %v87_v8  ;;  %v22_v22 = vld [vmem:[%s961_s0 + $0x40] sm:$0xff]  ;;  %v25_v29 = vld [vmem:[%s961_s0 + $0x58] sm:$0xff]  ;;  %v27_v35 = vld [vmem:[%s961_s0 + $0x68] sm:$0xff] }
   0x6   :  { %v159_v20 = vadd.f32 %v386_v2, %v88_v9  ;;  %v161_v25 = vadd.f32 %v386_v2, %v90_v15  ;;  %v162_v26 = vadd.f32 %v386_v2, %v91_v16  ;;  %v163_v33 = vadd.f32 %v386_v2, %v92_v21  ;;  %v26_v34 = vld [vmem:[%s961_s0 + $0x60] sm:$0xff]  ;;  %v28_v36 = vld [vmem:[%s961_s0 + $0x70] sm:$0xff]  ;;  %v29_v41 = vld [vmem:[%s961_s0 + $0x78] sm:$0xff] }
   0x7   :  { %v220_v23 = vmax.f32 %v156_v13, 0.0  ;;  %v160_v24 = vadd.f32 %v386_v2, %v89_v14  ;;  %v221_v30 = vmax.f32 %v157_v18, 0.0  ;;  %v222_v31 = vmax.f32 %v158_v19, 0.0  ;;  %v30_v54 = vld [vmem:[%s961_s0 + $0x80] sm:$0xff]  ;;  %v31_v59 = vld [vmem:[%s961_s0 + $0x88] sm:$0xff]  ;;  %v32_v60 = vld [vmem:[%s961_s0 + $0x90] sm:$0xff] }
   0x8   :  { %v223_v32 = vmax.f32 %v159_v20, 0.0  ;;  %v225_v38 = vmax.f32 %v161_v25, 0.0  ;;  %v226_v39 = vmax.f32 %v162_v26, 0.0  ;;  %v93_v40 = vmul.f32 %v381_v1, %v22_v22  ;;  %v33_v61 = vld [vmem:[%s961_s0 + $0x98] sm:$0xff]  ;;  %v34_v4 = vld [vmem:[%s961_s0 + $0xa0] sm:$0xff]  ;;  %v35_v5 = vld [vmem:[%s961_s0 + $0xa8] sm:$0xff] }
   0x9   :  { %285 = vst.msk [vmem:[%s964_s3] sm:$0xff] %vm284_vm0, %v220_v23  ;;  %v224_v37 = vmax.f32 %v160_v24, 0.0  ;;  %286 = vst.msk [vmem:[%s964_s3 + $0x8] sm:$0xff] %vm284_vm0, %v221_v30  ;;  %v227_v42 = vmax.f32 %v163_v33, 0.0  ;;  %v94_v43 = vmul.f32 %v381_v1, %v23_v27  ;;  %v95_v44 = vmul.f32 %v381_v1, %v24_v28  ;;  %v36_v6 = vld [vmem:[%s961_s0 + $0xb0] sm:$0xff]  ;;  %v37_v11 = vld [vmem:[%s961_s0 + $0xb8] sm:$0xff] }
   0xa   :  { %287 = vst.msk [vmem:[%s964_s3 + $0x10] sm:$0xff] %vm284_vm0, %v222_v31  ;;  %288 = vst.msk [vmem:[%s964_s3 + $0x18] sm:$0xff] %vm284_vm0, %v223_v32  ;;  %v96_v45 = vmul.f32 %v381_v1, %v25_v29  ;;  %v164_v46 = vadd.f32 %v386_v2, %v93_v40  ;;  %v97_v47 = vmul.f32 %v381_v1, %v26_v34  ;;  %v38_v24 = vld [vmem:[%s961_s0 + $0xc0] sm:$0xff]  ;;  %v39_v29 = vld [vmem:[%s961_s0 + $0xc8] sm:$0xff] }
   0xb   :  { %289 = vst.msk [vmem:[%s964_s3 + $0x20] sm:$0xff] %vm284_vm0, %v224_v37  ;;  %290 = vst.msk [vmem:[%s964_s3 + $0x28] sm:$0xff] %vm284_vm0, %v225_v38  ;;  %v98_v48 = vmul.f32 %v381_v1, %v27_v35  ;;  %v99_v49 = vmul.f32 %v381_v1, %v28_v36  ;;  %v165_v50 = vadd.f32 %v386_v2, %v94_v43  ;;  %v40_v30 = vld [vmem:[%s961_s0 + $0xd0] sm:$0xff]  ;;  %v41_v31 = vld [vmem:[%s961_s0 + $0xd8] sm:$0xff] }
   0xc   :  { %291 = vst.msk [vmem:[%s964_s3 + $0x30] sm:$0xff] %vm284_vm0, %v226_v39  ;;  %292 = vst.msk [vmem:[%s964_s3 + $0x38] sm:$0xff] %vm284_vm0, %v227_v42  ;;  %v166_v51 = vadd.f32 %v386_v2, %v95_v44  ;;  %v167_v52 = vadd.f32 %v386_v2, %v96_v45  ;;  %v100_v53 = vmul.f32 %v381_v1, %v29_v41  ;;  %v228_v55 = vmax.f32 %v164_v46, 0.0  ;;  %v42_v36 = vld [vmem:[%s961_s0 + $0xe0] sm:$0xff]  ;;  %v43_v37 = vld [vmem:[%s961_s0 + $0xe8] sm:$0xff] }
   0xd   :  { %v168_v56 = vadd.f32 %v386_v2, %v97_v47  ;;  %v169_v57 = vadd.f32 %v386_v2, %v98_v48  ;;  %v170_v58 = vadd.f32 %v386_v2, %v99_v49  ;;  %v229_v62 = vmax.f32 %v165_v50, 0.0  ;;  %v44_v38 = vld [vmem:[%s961_s0 + $0xf0] sm:$0xff]  ;;  %v45_v43 = vld [vmem:[%s961_s0 + $0xf8] sm:$0xff] }
   0xe   :  { %v230_v63 = vmax.f32 %v166_v51, 0.0  ;;  %v231_v0 = vmax.f32 %v167_v52, 0.0  ;;  %v171_v3 = vadd.f32 %v386_v2, %v100_v53  ;;  %293 = vst.msk [vmem:[%s964_s3 + $0x40] sm:$0xff] %vm284_vm0, %v228_v55  ;;  %v101_v10 = vmul.f32 %v381_v1, %v30_v54 }
   0xf   :  { %v232_v7 = vmax.f32 %v168_v56, 0.0  ;;  %v233_v8 = vmax.f32 %v169_v57, 0.0  ;;  %v234_v9 = vmax.f32 %v170_v58, 0.0  ;;  %294 = vst.msk [vmem:[%s964_s3 + $0x48] sm:$0xff] %vm284_vm0, %v229_v62  ;;  %v102_v13 = vmul.f32 %v381_v1, %v31_v59  ;;  %v46_v56 = vld [vmem:[%s961_s0 + $0x100] sm:$0xff]  ;;  %v48_v62 = vld [vmem:[%s961_s0 + $0x110] sm:$0xff] }
  0x10   :  { %295 = vst.msk [vmem:[%s964_s3 + $0x50] sm:$0xff] %vm284_vm0, %v230_v63  ;;  %296 = vst.msk [vmem:[%s964_s3 + $0x58] sm:$0xff] %vm284_vm0, %v231_v0  ;;  %v235_v12 = vmax.f32 %v171_v3, 0.0  ;;  %v103_v14 = vmul.f32 %v381_v1, %v32_v60  ;;  %v104_v15 = vmul.f32 %v381_v1, %v33_v61  ;;  %v172_v16 = vadd.f32 %v386_v2, %v101_v10  ;;  %v47_v61 = vld [vmem:[%s961_s0 + $0x108] sm:$0xff]  ;;  %v49_v63 = vld [vmem:[%s961_s0 + $0x118] sm:$0xff] }
  0x11   :  { %297 = vst.msk [vmem:[%s964_s3 + $0x60] sm:$0xff] %vm284_vm0, %v232_v7  ;;  %298 = vst.msk [vmem:[%s964_s3 + $0x68] sm:$0xff] %vm284_vm0, %v233_v8  ;;  %v105_v17 = vmul.f32 %v381_v1, %v34_v4  ;;  %v106_v18 = vmul.f32 %v381_v1, %v35_v5  ;;  %v107_v19 = vmul.f32 %v381_v1, %v36_v6  ;;  %v50_v6 = vld [vmem:[%s961_s0 + $0x120] sm:$0xff]  ;;  %v51_v7 = vld [vmem:[%s961_s0 + $0x128] sm:$0xff] }
  0x12   :  { %299 = vst.msk [vmem:[%s964_s3 + $0x70] sm:$0xff] %vm284_vm0, %v234_v9  ;;  %300 = vst.msk [vmem:[%s964_s3 + $0x78] sm:$0xff] %vm284_vm0, %v235_v12  ;;  %v173_v20 = vadd.f32 %v386_v2, %v102_v13  ;;  %v174_v21 = vadd.f32 %v386_v2, %v103_v14  ;;  %v175_v22 = vadd.f32 %v386_v2, %v104_v15  ;;  %v236_v25 = vmax.f32 %v172_v16, 0.0  ;;  %v52_v8 = vld [vmem:[%s961_s0 + $0x130] sm:$0xff]  ;;  %v53_v13 = vld [vmem:[%s961_s0 + $0x138] sm:$0xff] }
  0x13   :  { %v108_v23 = vmul.f32 %v381_v1, %v37_v11  ;;  %v176_v26 = vadd.f32 %v386_v2, %v105_v17  ;;  %v177_v27 = vadd.f32 %v386_v2, %v106_v18  ;;  %v178_v28 = vadd.f32 %v386_v2, %v107_v19 }
  0x14   :  { %v237_v32 = vmax.f32 %v173_v20, 0.0  ;;  %v238_v33 = vmax.f32 %v174_v21, 0.0  ;;  %v239_v34 = vmax.f32 %v175_v22, 0.0  ;;  %301 = vst.msk [vmem:[%s964_s3 + $0x80] sm:$0xff] %vm284_vm0, %v236_v25  ;;  %v109_v42 = vmul.f32 %v381_v1, %v38_v24 }
  0x15   :  { %v179_v35 = vadd.f32 %v386_v2, %v108_v23  ;;  %v240_v39 = vmax.f32 %v176_v26, 0.0  ;;  %v241_v40 = vmax.f32 %v177_v27, 0.0  ;;  %v242_v41 = vmax.f32 %v178_v28, 0.0  ;;  %v54_v26 = vld [vmem:[%s961_s0 + $0x140] sm:$0xff] }
  0x16   :  { %302 = vst.msk [vmem:[%s964_s3 + $0x88] sm:$0xff] %vm284_vm0, %v237_v32  ;;  %303 = vst.msk [vmem:[%s964_s3 + $0x90] sm:$0xff] %vm284_vm0, %v238_v33  ;;  %v110_v45 = vmul.f32 %v381_v1, %v39_v29  ;;  %v111_v46 = vmul.f32 %v381_v1, %v40_v30  ;;  %v112_v47 = vmul.f32 %v381_v1, %v41_v31  ;;  %v55_v31 = vld [vmem:[%s961_s0 + $0x148] sm:$0xff]  ;;  %v56_v32 = vld [vmem:[%s961_s0 + $0x150] sm:$0xff] }
  0x17   :  { %304 = vst.msk [vmem:[%s964_s3 + $0x98] sm:$0xff] %vm284_vm0, %v239_v34  ;;  %v243_v44 = vmax.f32 %v179_v35, 0.0  ;;  %305 = vst.msk [vmem:[%s964_s3 + $0xa0] sm:$0xff] %vm284_vm0, %v240_v39  ;;  %v180_v48 = vadd.f32 %v386_v2, %v109_v42  ;;  %v113_v49 = vmul.f32 %v381_v1, %v42_v36  ;;  %v114_v50 = vmul.f32 %v381_v1, %v43_v37  ;;  %v57_v33 = vld [vmem:[%s961_s0 + $0x158] sm:$0xff]  ;;  %v59_v39 = vld [vmem:[%s961_s0 + $0x168] sm:$0xff] }
  0x18   :  { %306 = vst.msk [vmem:[%s964_s3 + $0xa8] sm:$0xff] %vm284_vm0, %v241_v40  ;;  %307 = vst.msk [vmem:[%s964_s3 + $0xb0] sm:$0xff] %vm284_vm0, %v242_v41  ;;  %v115_v51 = vmul.f32 %v381_v1, %v44_v38  ;;  %v181_v52 = vadd.f32 %v386_v2, %v110_v45  ;;  %v182_v53 = vadd.f32 %v386_v2, %v111_v46  ;;  %v58_v38 = vld [vmem:[%s961_s0 + $0x160] sm:$0xff]  ;;  %v60_v40 = vld [vmem:[%s961_s0 + $0x170] sm:$0xff] }
  0x19   :  { %308 = vst.msk [vmem:[%s964_s3 + $0xb8] sm:$0xff] %vm284_vm0, %v243_v44  ;;  %v183_v54 = vadd.f32 %v386_v2, %v112_v47  ;;  %v116_v55 = vmul.f32 %v381_v1, %v45_v43  ;;  %v244_v57 = vmax.f32 %v180_v48, 0.0  ;;  %v184_v58 = vadd.f32 %v386_v2, %v113_v49  ;;  %v61_v45 = vld [vmem:[%s961_s0 + $0x178] sm:$0xff] }
  0x1a   :  { %v185_v59 = vadd.f32 %v386_v2, %v114_v50  ;;  %v186_v60 = vadd.f32 %v386_v2, %v115_v51  ;;  %v245_v0 = vmax.f32 %v181_v52, 0.0  ;;  %v246_v3 = vmax.f32 %v182_v53, 0.0 }
  0x1b   :  { %v247_v4 = vmax.f32 %v183_v54, 0.0  ;;  %v187_v5 = vadd.f32 %v386_v2, %v116_v55  ;;  %309 = vst.msk [vmem:[%s964_s3 + $0xc0] sm:$0xff] %vm284_vm0, %v244_v57  ;;  %v248_v9 = vmax.f32 %v184_v58, 0.0  ;;  %v117_v12 = vmul.f32 %v381_v1, %v46_v56  ;;  %v62_v58 = vld [vmem:[%s961_s0 + $0x180] sm:$0xff] }
  0x1c   :  { %v249_v10 = vmax.f32 %v185_v59, 0.0  ;;  %v250_v11 = vmax.f32 %v186_v60, 0.0  ;;  %310 = vst.msk [vmem:[%s964_s3 + $0xc8] sm:$0xff] %vm284_vm0, %v245_v0  ;;  %311 = vst.msk [vmem:[%s964_s3 + $0xd0] sm:$0xff] %vm284_vm0, %v246_v3  ;;  %v118_v15 = vmul.f32 %v381_v1, %v47_v61  ;;  %v119_v16 = vmul.f32 %v381_v1, %v48_v62  ;;  %v64_v0 = vld [vmem:[%s961_s0 + $0x190] sm:$0xff]  ;;  %v65_v3 = vld [vmem:[%s961_s0 + $0x198] sm:$0xff] }
  0x1d   :  { %312 = vst.msk [vmem:[%s964_s3 + $0xd8] sm:$0xff] %vm284_vm0, %v247_v4  ;;  %v251_v14 = vmax.f32 %v187_v5, 0.0  ;;  %v120_v17 = vmul.f32 %v381_v1, %v49_v63  ;;  %313 = vst.msk [vmem:[%s964_s3 + $0xe0] sm:$0xff] %vm284_vm0, %v248_v9  ;;  %v188_v18 = vadd.f32 %v386_v2, %v117_v12  ;;  %v121_v19 = vmul.f32 %v381_v1, %v50_v6  ;;  %v63_v63 = vld [vmem:[%s961_s0 + $0x188] sm:$0xff] }
  0x1e   :  { %314 = vst.msk [vmem:[%s964_s3 + $0xe8] sm:$0xff] %vm284_vm0, %v249_v10  ;;  %315 = vst.msk [vmem:[%s964_s3 + $0xf0] sm:$0xff] %vm284_vm0, %v250_v11  ;;  %v122_v20 = vmul.f32 %v381_v1, %v51_v7  ;;  %v123_v21 = vmul.f32 %v381_v1, %v52_v8  ;;  %v189_v22 = vadd.f32 %v386_v2, %v118_v15  ;;  %v66_v8 = vld [vmem:[%s961_s0 + $0x1a0] sm:$0xff]  ;;  %v67_v9 = vld [vmem:[%s961_s0 + $0x1a8] sm:$0xff] }
  0x1f   :  { %316 = vst.msk [vmem:[%s964_s3 + $0xf8] sm:$0xff] %vm284_vm0, %v251_v14  ;;  %v190_v23 = vadd.f32 %v386_v2, %v119_v16  ;;  %v191_v24 = vadd.f32 %v386_v2, %v120_v17  ;;  %v124_v25 = vmul.f32 %v381_v1, %v53_v13  ;;  %v252_v27 = vmax.f32 %v188_v18, 0.0  ;;  %v68_v10 = vld [vmem:[%s961_s0 + $0x1b0] sm:$0xff]  ;;  %v69_v15 = vld [vmem:[%s961_s0 + $0x1b8] sm:$0xff] }
  0x20   :  { %v192_v28 = vadd.f32 %v386_v2, %v121_v19  ;;  %v193_v29 = vadd.f32 %v386_v2, %v122_v20  ;;  %v194_v30 = vadd.f32 %v386_v2, %v123_v21  ;;  %v253_v34 = vmax.f32 %v189_v22, 0.0 }
  0x21   :  { %v254_v35 = vmax.f32 %v190_v23, 0.0  ;;  %v255_v36 = vmax.f32 %v191_v24, 0.0  ;;  %v195_v37 = vadd.f32 %v386_v2, %v124_v25  ;;  %317 = vst.msk [vmem:[%s964_s3 + $0x100] sm:$0xff] %vm284_vm0, %v252_v27  ;;  %v125_v44 = vmul.f32 %v381_v1, %v54_v26 }
  0x22   :  { %v256_v41 = vmax.f32 %v192_v28, 0.0  ;;  %v257_v42 = vmax.f32 %v193_v29, 0.0  ;;  %v258_v43 = vmax.f32 %v194_v30, 0.0  ;;  %318 = vst.msk [vmem:[%s964_s3 + $0x108] sm:$0xff] %vm284_vm0, %v253_v34  ;;  %v126_v47 = vmul.f32 %v381_v1, %v55_v31  ;;  %v70_v28 = vld [vmem:[%s961_s0 + $0x1c0] sm:$0xff]  ;;  %v72_v34 = vld [vmem:[%s961_s0 + $0x1d0] sm:$0xff] }
  0x23   :  { %319 = vst.msk [vmem:[%s964_s3 + $0x110] sm:$0xff] %vm284_vm0, %v254_v35  ;;  %320 = vst.msk [vmem:[%s964_s3 + $0x118] sm:$0xff] %vm284_vm0, %v255_v36  ;;  %v259_v46 = vmax.f32 %v195_v37, 0.0  ;;  %v127_v48 = vmul.f32 %v381_v1, %v56_v32  ;;  %v128_v49 = vmul.f32 %v381_v1, %v57_v33  ;;  %v196_v50 = vadd.f32 %v386_v2, %v125_v44  ;;  %v71_v33 = vld [vmem:[%s961_s0 + $0x1c8] sm:$0xff]  ;;  %v73_v35 = vld [vmem:[%s961_s0 + $0x1d8] sm:$0xff] }
  0x24   :  { %321 = vst.msk [vmem:[%s964_s3 + $0x120] sm:$0xff] %vm284_vm0, %v256_v41  ;;  %322 = vst.msk [vmem:[%s964_s3 + $0x128] sm:$0xff] %vm284_vm0, %v257_v42  ;;  %v129_v51 = vmul.f32 %v381_v1, %v58_v38  ;;  %v130_v52 = vmul.f32 %v381_v1, %v59_v39  ;;  %v131_v53 = vmul.f32 %v381_v1, %v60_v40  ;;  %v74_v40 = vld [vmem:[%s961_s0 + $0x1e0] sm:$0xff]  ;;  %v75_v41 = vld [vmem:[%s961_s0 + $0x1e8] sm:$0xff] }
  0x25   :  { %323 = vst.msk [vmem:[%s964_s3 + $0x130] sm:$0xff] %vm284_vm0, %v258_v43  ;;  %324 = vst.msk [vmem:[%s964_s3 + $0x138] sm:$0xff] %vm284_vm0, %v259_v46  ;;  %v197_v54 = vadd.f32 %v386_v2, %v126_v47  ;;  %v198_v55 = vadd.f32 %v386_v2, %v127_v48  ;;  %v199_v56 = vadd.f32 %v386_v2, %v128_v49  ;;  %v260_v59 = vmax.f32 %v196_v50, 0.0  ;;  %v76_v42 = vld [vmem:[%s961_s0 + $0x1f0] sm:$0xff]  ;;  %v77_v47 = vld [vmem:[%s961_s0 + $0x1f8] sm:$0xff] }
  0x26   :  { %v132_v57 = vmul.f32 %v381_v1, %v61_v45  ;;  %v200_v60 = vadd.f32 %v386_v2, %v129_v51  ;;  %v201_v61 = vadd.f32 %v386_v2, %v130_v52  ;;  %v202_v62 = vadd.f32 %v386_v2, %v131_v53 }
  0x27   :  { %v261_v4 = vmax.f32 %v197_v54, 0.0  ;;  %v262_v5 = vmax.f32 %v198_v55, 0.0  ;;  %v263_v6 = vmax.f32 %v199_v56, 0.0  ;;  %325 = vst.msk [vmem:[%s964_s3 + $0x140] sm:$0xff] %vm284_vm0, %v260_v59  ;;  %v133_v14 = vmul.f32 %v381_v1, %v62_v58 }
  0x28   :  { %v203_v7 = vadd.f32 %v386_v2, %v132_v57  ;;  %v264_v11 = vmax.f32 %v200_v60, 0.0  ;;  %v265_v12 = vmax.f32 %v201_v61, 0.0  ;;  %v266_v13 = vmax.f32 %v202_v62, 0.0 }
  0x29   :  { %326 = vst.msk [vmem:[%s964_s3 + $0x148] sm:$0xff] %vm284_vm0, %v261_v4  ;;  %327 = vst.msk [vmem:[%s964_s3 + $0x150] sm:$0xff] %vm284_vm0, %v262_v5  ;;  %v134_v17 = vmul.f32 %v381_v1, %v63_v63  ;;  %v135_v18 = vmul.f32 %v381_v1, %v64_v0  ;;  %v136_v19 = vmul.f32 %v381_v1, %v65_v3 }
  0x2a   :  { %328 = vst.msk [vmem:[%s964_s3 + $0x158] sm:$0xff] %vm284_vm0, %v263_v6  ;;  %v267_v16 = vmax.f32 %v203_v7, 0.0  ;;  %329 = vst.msk [vmem:[%s964_s3 + $0x160] sm:$0xff] %vm284_vm0, %v264_v11  ;;  %v204_v20 = vadd.f32 %v386_v2, %v133_v14  ;;  %v137_v21 = vmul.f32 %v381_v1, %v66_v8  ;;  %v138_v22 = vmul.f32 %v381_v1, %v67_v9 }
  0x2b   :  { %330 = vst.msk [vmem:[%s964_s3 + $0x168] sm:$0xff] %vm284_vm0, %v265_v12  ;;  %331 = vst.msk [vmem:[%s964_s3 + $0x170] sm:$0xff] %vm284_vm0, %v266_v13  ;;  %v139_v23 = vmul.f32 %v381_v1, %v68_v10  ;;  %v205_v24 = vadd.f32 %v386_v2, %v134_v17  ;;  %v206_v25 = vadd.f32 %v386_v2, %v135_v18 }
  0x2c   :  { %332 = vst.msk [vmem:[%s964_s3 + $0x178] sm:$0xff] %vm284_vm0, %v267_v16  ;;  %v207_v26 = vadd.f32 %v386_v2, %v136_v19  ;;  %v140_v27 = vmul.f32 %v381_v1, %v69_v15  ;;  %v268_v29 = vmax.f32 %v204_v20, 0.0  ;;  %v208_v30 = vadd.f32 %v386_v2, %v137_v21 }
  0x2d   :  { %v209_v31 = vadd.f32 %v386_v2, %v138_v22  ;;  %v210_v32 = vadd.f32 %v386_v2, %v139_v23  ;;  %v269_v36 = vmax.f32 %v205_v24, 0.0  ;;  %v270_v37 = vmax.f32 %v206_v25, 0.0 }
  0x2e   :  { %v271_v38 = vmax.f32 %v207_v26, 0.0  ;;  %v211_v39 = vadd.f32 %v386_v2, %v140_v27  ;;  %333 = vst.msk [vmem:[%s964_s3 + $0x180] sm:$0xff] %vm284_vm0, %v268_v29  ;;  %v272_v43 = vmax.f32 %v208_v30, 0.0  ;;  %v141_v46 = vmul.f32 %v381_v1, %v70_v28 }
  0x2f   :  { %v273_v44 = vmax.f32 %v209_v31, 0.0  ;;  %v274_v45 = vmax.f32 %v210_v32, 0.0  ;;  %334 = vst.msk [vmem:[%s964_s3 + $0x188] sm:$0xff] %vm284_vm0, %v269_v36  ;;  %335 = vst.msk [vmem:[%s964_s3 + $0x190] sm:$0xff] %vm284_vm0, %v270_v37  ;;  %v142_v49 = vmul.f32 %v381_v1, %v71_v33  ;;  %v143_v50 = vmul.f32 %v381_v1, %v72_v34 }
  0x30   :  { %336 = vst.msk [vmem:[%s964_s3 + $0x198] sm:$0xff] %vm284_vm0, %v271_v38  ;;  %v275_v48 = vmax.f32 %v211_v39, 0.0  ;;  %v144_v51 = vmul.f32 %v381_v1, %v73_v35  ;;  %337 = vst.msk [vmem:[%s964_s3 + $0x1a0] sm:$0xff] %vm284_vm0, %v272_v43  ;;  %v212_v52 = vadd.f32 %v386_v2, %v141_v46  ;;  %v145_v53 = vmul.f32 %v381_v1, %v74_v40 }
  0x31   :  { %338 = vst.msk [vmem:[%s964_s3 + $0x1a8] sm:$0xff] %vm284_vm0, %v273_v44  ;;  %339 = vst.msk [vmem:[%s964_s3 + $0x1b0] sm:$0xff] %vm284_vm0, %v274_v45  ;;  %v146_v54 = vmul.f32 %v381_v1, %v75_v41  ;;  %v147_v55 = vmul.f32 %v381_v1, %v76_v42  ;;  %v213_v56 = vadd.f32 %v386_v2, %v142_v49 }
  0x32   :  { %340 = vst.msk [vmem:[%s964_s3 + $0x1b8] sm:$0xff] %vm284_vm0, %v275_v48  ;;  %v214_v57 = vadd.f32 %v386_v2, %v143_v50  ;;  %v215_v58 = vadd.f32 %v386_v2, %v144_v51  ;;  %v148_v59 = vmul.f32 %v381_v1, %v77_v47  ;;  %v276_v60 = vmax.f32 %v212_v52, 0.0 }
  0x33   :  { %v216_v61 = vadd.f32 %v386_v2, %v145_v53  ;;  %v217_v62 = vadd.f32 %v386_v2, %v146_v54  ;;  %v218_v63 = vadd.f32 %v386_v2, %v147_v55  ;;  %v277_v0 = vmax.f32 %v213_v56, 0.0 }
  0x34   :  { %v278_v3 = vmax.f32 %v214_v57, 0.0  ;;  %v279_v4 = vmax.f32 %v215_v58, 0.0  ;;  %v219_v5 = vadd.f32 %v386_v2, %v148_v59  ;;  %341 = vst.msk [vmem:[%s964_s3 + $0x1c0] sm:$0xff] %vm284_vm0, %v276_v60 }
  0x35   :  { %v280_v6 = vmax.f32 %v216_v61, 0.0  ;;  %v281_v7 = vmax.f32 %v217_v62, 0.0  ;;  %v282_v1 = vmax.f32 %v218_v63, 0.0  ;;  %342 = vst.msk [vmem:[%s964_s3 + $0x1c8] sm:$0xff] %vm284_vm0, %v277_v0 }
  0x36   :  { %343 = vst.msk [vmem:[%s964_s3 + $0x1d0] sm:$0xff] %vm284_vm0, %v278_v3  ;;  %344 = vst.msk [vmem:[%s964_s3 + $0x1d8] sm:$0xff] %vm284_vm0, %v279_v4  ;;  %v283_v2 = vmax.f32 %v219_v5, 0.0 }
  0x37   :  { %345 = vst.msk [vmem:[%s964_s3 + $0x1e0] sm:$0xff] %vm284_vm0, %v280_v6  ;;  %346 = vst.msk [vmem:[%s964_s3 + $0x1e8] sm:$0xff] %vm284_vm0, %v281_v7 }
  0x38   :  { %347 = vst.msk [vmem:[%s964_s3 + $0x1f0] sm:$0xff] %vm284_vm0, %v282_v1  ;;  %348 = vst.msk [vmem:[%s964_s3 + $0x1f8] sm:$0xff] %vm284_vm0, %v283_v2 }

// kernel: densenet_forward.22
= control target key start
LH: loop header
LB: loop body
LE: loop exit
PB: predicated region body
PF: predicated region fallthrough
CT: control target
= control target key end

     0   :  { %vm14_vm0 = vcmask 516096   ;;  %vm34_vm1 = vcmask 523264   ;;  %v140_v0 = vmov 0.0   ;;  %s258_s0 = inlined_call_operand.vmem [shape: f32[128,64], index: 0, kind: input, shape index: {}]   ;;  %s259_s1 = inlined_call_operand.vmem [shape: f32[1,64], index: 1, kind: output, shape index: {0}]   ;;  %s260_s2 = inlined_call_operand.vmem [shape: f32[1,64], index: 2, kind: output, shape index: {1}]  }
   0x1   :  { %15 = vst.msk [vmem:[%s259_s1] sm:$0x1] %vm14_vm0, %v140_v0  ;;  %v17_v1 = vld [vmem:[%s258_s0] sm:$0xff]  ;;  %v18_v2 = vld [vmem:[%s258_s0 + $0x8] sm:$0xff]  ;;  %v19_v3 = vld [vmem:[%s258_s0 + $0x10] sm:$0xff] }
   0x2   :  { %16 = vst.msk [vmem:[%s260_s2] sm:$0x1] %vm14_vm0, %v140_v0  ;;  %v35_v4 = vsel %vm34_vm1, %v17_v1, 0.0  ;;  %v36_v5 = vsel %vm34_vm1, %v18_v2, 0.0  ;;  %v38_v6 = vsel %vm34_vm1, %v19_v3, 0.0  ;;  %v20_v7 = vld [vmem:[%s258_s0 + $0x18] sm:$0xff]  ;;  %v76_v15 = vmul.f32 %v17_v1, %v17_v1 }
   0x3   :  { %v37_v8 = vadd.f32 %v36_v5, %v35_v4  ;;  %v40_v9 = vsel %vm34_vm1, %v20_v7, 0.0  ;;  %v21_v10 = vld [vmem:[%s258_s0 + $0x20] sm:$0xff]  ;;  %v22_v13 = vld [vmem:[%s258_s0 + $0x28] sm:$0xff]  ;;  %v77_v16 = vmul.f32 %v18_v2, %v18_v2  ;;  %v78_v17 = vmul.f32 %v19_v3, %v19_v3  ;;  %v23_v19 = vld [vmem:[%s258_s0 + $0x30] sm:$0xff] }
   0x4   :  { %v42_v12 = vsel %vm34_vm1, %v21_v10, 0.0  ;;  %v44_v18 = vsel %vm34_vm1, %v22_v13, 0.0  ;;  %v79_v21 = vmul.f32 %v20_v7, %v20_v7  ;;  %v46_v22 = vsel %vm34_vm1, %v23_v19, 0.0  ;;  %v24_v24 = vld [vmem:[%s258_s0 + $0x38] sm:$0xff]  ;;  %v25_v31 = vld [vmem:[%s258_s0 + $0x40] sm:$0xff]  ;;  %v26_v37 = vld [vmem:[%s258_s0 + $0x48] sm:$0xff] }
   0x5   :  { %v39_v11 = vadd.f32 %v38_v6, %v37_v8  ;;  %v80_v23 = vmul.f32 %v21_v10, %v21_v10  ;;  %v92_v26 = vsel %vm34_vm1, %v76_v15, 0.0  ;;  %v93_v27 = vsel %vm34_vm1, %v77_v16, 0.0  ;;  %v27_v43 = vld [vmem:[%s258_s0 + $0x50] sm:$0xff]  ;;  %v28_v49 = vld [vmem:[%s258_s0 + $0x58] sm:$0xff]  ;;  %v29_v55 = vld [vmem:[%s258_s0 + $0x60] sm:$0xff] }
   0x6   :  { %v95_v28 = vsel %vm34_vm1, %v78_v17, 0.0  ;;  %v48_v29 = vsel %vm34_vm1, %v24_v24, 0.0  ;;  %v94_v30 = vadd.f32 %v93_v27, %v92_v26  ;;  %v81_v33 = vmul.f32 %v22_v13, %v22_v13  ;;  %v30_v61 = vld [vmem:[%s258_s0 + $0x68] sm:$0xff]  ;;  %v31_v3 = vld [vmem:[%s258_s0 + $0x70] sm:$0xff] }
   0x7   :  { %v41_v14 = vadd.f32 %v40_v9, %v39_v11  ;;  %v97_v34 = vsel %vm34_vm1, %v79_v21, 0.0  ;;  %v50_v35 = vsel %vm34_vm1, %v25_v31, 0.0  ;;  %v82_v39 = vmul.f32 %v23_v19, %v23_v19  ;;  %v32_v9 = vld [vmem:[%s258_s0 + $0x78] sm:$0xff] }
   0x8   :  { %v96_v36 = vadd.f32 %v95_v28, %v94_v30  ;;  %v99_v40 = vsel %vm34_vm1, %v80_v23, 0.0  ;;  %v52_v41 = vsel %vm34_vm1, %v26_v37, 0.0  ;;  %v83_v45 = vmul.f32 %v24_v24, %v24_v24 }
   0x9   :  { %v43_v20 = vadd.f32 %v42_v12, %v41_v14  ;;  %v101_v46 = vsel %vm34_vm1, %v81_v33, 0.0  ;;  %v54_v47 = vsel %vm34_vm1, %v27_v43, 0.0  ;;  %v84_v51 = vmul.f32 %v25_v31, %v25_v31 }
   0xa   :  { %v98_v42 = vadd.f32 %v97_v34, %v96_v36  ;;  %v103_v52 = vsel %vm34_vm1, %v82_v39, 0.0  ;;  %v56_v53 = vsel %vm34_vm1, %v28_v49, 0.0  ;;  %v85_v57 = vmul.f32 %v26_v37, %v26_v37  ;;  %v33_v36 = vld [vmem:[%s259_s1] sm:$0x1] }
   0xb   :  { %v45_v25 = vadd.f32 %v44_v18, %v43_v20  ;;  %v105_v58 = vsel %vm34_vm1, %v83_v45, 0.0  ;;  %v58_v59 = vsel %vm34_vm1, %v29_v55, 0.0  ;;  %v86_v63 = vmul.f32 %v27_v43, %v27_v43 }
   0xc   :  { %v100_v48 = vadd.f32 %v99_v40, %v98_v42  ;;  %v107_v0 = vsel %vm34_vm1, %v84_v51, 0.0  ;;  %v60_v1 = vsel %vm34_vm1, %v30_v61, 0.0  ;;  %v87_v5 = vmul.f32 %v28_v49, %v28_v49 }
   0xd   :  { %v47_v32 = vadd.f32 %v46_v22, %v45_v25  ;;  %v109_v6 = vsel %vm34_vm1, %v85_v57, 0.0  ;;  %v62_v7 = vsel %vm34_vm1, %v31_v3, 0.0  ;;  %v88_v11 = vmul.f32 %v29_v55, %v29_v55 }
   0xe   :  { %v102_v54 = vadd.f32 %v101_v46, %v100_v48  ;;  %v111_v12 = vsel %vm34_vm1, %v86_v63, 0.0  ;;  %v64_v13 = vsel %vm34_vm1, %v32_v9, 0.0  ;;  %v89_v16 = vmul.f32 %v30_v61, %v30_v61 }
   0xf   :  { %v49_v38 = vadd.f32 %v48_v29, %v47_v32  ;;  %v113_v17 = vsel %vm34_vm1, %v87_v5, 0.0  ;;  %v90_v20 = vmul.f32 %v31_v3, %v31_v3  ;;  %v115_v21 = vsel %vm34_vm1, %v88_v11, 0.0 }
  0x10   :  { %v104_v60 = vadd.f32 %v103_v52, %v102_v54  ;;  %v91_v24 = vmul.f32 %v32_v9, %v32_v9  ;;  %v117_v25 = vsel %vm34_vm1, %v89_v16, 0.0 }
  0x11   :  { %v51_v44 = vadd.f32 %v50_v35, %v49_v38  ;;  %v119_v28 = vsel %vm34_vm1, %v90_v20, 0.0 }
  0x12   :  { %v106_v2 = vadd.f32 %v105_v58, %v104_v60  ;;  %v121_v31 = vsel %vm34_vm1, %v91_v24, 0.0 }
  0x13   :  { %v53_v50 = vadd.f32 %v52_v41, %v51_v44  ;;  %v75_v44 = vld [vmem:[%s260_s2] sm:$0x1] }
  0x14   :  { %v108_v8 = vadd.f32 %v107_v0, %v106_v2 }
  0x15   :  { %v55_v56 = vadd.f32 %v54_v47, %v53_v50 }
  0x16   :  { %v110_v14 = vadd.f32 %v109_v6, %v108_v8 }
  0x17   :  { %v57_v62 = vadd.f32 %v56_v53, %v55_v56 }
  0x18   :  { %v112_v18 = vadd.f32 %v111_v12, %v110_v14 }
  0x19   :  { %v59_v4 = vadd.f32 %v58_v59, %v57_v62 }
  0x1a   :  { %v114_v22 = vadd.f32 %v113_v17, %v112_v18 }
  0x1b   :  { %v61_v10 = vadd.f32 %v60_v1, %v59_v4 }
  0x1c   :  { %v116_v26 = vadd.f32 %v115_v21, %v114_v22 }
  0x1d   :  { %v63_v15 = vadd.f32 %v62_v7, %v61_v10 }
  0x1e   :  { %v118_v29 = vadd.f32 %v117_v25, %v116_v26 }
  0x1f   :  { %v65_v19 = vadd.f32 %v64_v13, %v63_v15 }
  0x20   :  { %v120_v32 = vadd.f32 %v119_v28, %v118_v29 }
  0x21   :  { %v66_v23 = vrot.slane %v65_v19, 4 }
  0x22   :  { %v122_v34 = vadd.f32 %v121_v31, %v120_v32 }
  0x23   :  { %v67_v27 = vadd.f32 %v66_v23, %v65_v19 }
  0x24   :  { %v123_v37 = vrot.slane %v122_v34, 4 }
  0x25   :  { %v68_v30 = vrot.slane %v67_v27, 2 }
  0x26   :  { %v124_v39 = vadd.f32 %v123_v37, %v122_v34 }
  0x27   :  { %v69_v33 = vadd.f32 %v68_v30, %v67_v27 }
  0x28   :  { %v125_v41 = vrot.slane %v124_v39, 2 }
  0x29   :  { %v70_v35 = vrot.slane %v69_v33, 1 }
  0x2a   :  { %v126_v42 = vadd.f32 %v125_v41, %v124_v39 }
  0x2b   :  { %v71_v38 = vadd.f32 %v70_v35, %v69_v33 }
  0x2c   :  { %v127_v43 = vrot.slane %v126_v42, 1 }
  0x2d   :  { %v72_v40 = vadd.f32 %v71_v38, %v33_v36 }
  0x2e   :  { %v128_v45 = vadd.f32 %v127_v43, %v126_v42 }
  0x2f   :  { %74 = vst.msk [vmem:[%s259_s1] sm:$0x1] %vm14_vm0, %v72_v40 }
  0x30   :  { %v129_v46 = vadd.f32 %v128_v45, %v75_v44 }
  0x32   :  { %130 = vst.msk [vmem:[%s260_s2] sm:$0x1] %vm14_vm0, %v129_v46 }

// kernel: densenet_forward.21
= control target key start
LH: loop header
LB: loop body
LE: loop exit
PB: predicated region body
PF: predicated region fallthrough
CT: control target
= control target key end

     0   :  { %vm264_vm0 = vcmask 523264   ;;  %vm266_vm1 = vcmask 516096   ;;  %vm1546_vm2 = vcmask 1041409   ;;  %vm1548_vm3 = vcmask 1042434   ;;  %s3295_s0 = inlined_call_operand.vmem [shape: f32[128,9,64], index: 0, kind: input, shape index: {}]   ;;  %s3296_s1 = inlined_call_operand.vmem [shape: f32[128,64], index: 1, kind: output, shape index: {}]  }
   0x1   :  { %v8_v0 = vld [vmem:[%s3295_s0] sm:$0xff]  ;;  %v9_v1 = vld [vmem:[%s3295_s0 + $0x8] sm:$0x1]  ;;  %v10_v2 = vld [vmem:[%s3295_s0 + $0x10] sm:$0xff]  ;;  %vm1550_vm4 = vcmask 1043459   ;;  %vm1552_vm5 = vcmask 1044484  }
   0x2   :  { %v11_v3 = vld [vmem:[%s3295_s0 + $0x18] sm:$0x1]  ;;  %v12_v4 = vld [vmem:[%s3295_s0 + $0x20] sm:$0xff]  ;;  %v13_v5 = vld [vmem:[%s3295_s0 + $0x28] sm:$0x1]  ;;  %v265_v6 = vsel %vm264_vm0, %v8_v0, -inf }
   0x3   :  { %v267_v7 = vsel %vm266_vm1, %v9_v1, -inf  ;;  %v14_v8 = vld [vmem:[%s3295_s0 + $0x30] sm:$0xff]  ;;  %v275_v9 = vsel %vm264_vm0, %v10_v2, -inf  ;;  %v276_v10 = vsel %vm266_vm1, %v11_v3, -inf  ;;  %v284_v11 = vsel %vm264_vm0, %v12_v4, -inf  ;;  %v16_v14 = vld [vmem:[%s3295_s0 + $0x40] sm:$0xff] }
   0x4   :  { %v285_v12 = vsel %vm266_vm1, %v13_v5, -inf  ;;  %v15_v13 = vld [vmem:[%s3295_s0 + $0x38] sm:$0x1]  ;;  %v17_v15 = vld [vmem:[%s3295_s0 + $0x48] sm:$0x1]  ;;  %v268_v16 = vmax.f32 %v265_v6, %v267_v7  ;;  %v18_v17 = vld [vmem:[%s3295_s0 + $0x50] sm:$0xff]  ;;  %v277_v19 = vmax.f32 %v275_v9, %v276_v10 }
   0x5   :  { %v19_v18 = vld [vmem:[%s3295_s0 + $0x58] sm:$0x1]  ;;  %v286_v20 = vmax.f32 %v284_v11, %v285_v12  ;;  %v293_v21 = vsel %vm264_vm0, %v14_v8, -inf  ;;  %v294_v22 = vsel %vm266_vm1, %v15_v13, -inf  ;;  %v302_v23 = vsel %vm264_vm0, %v16_v14, -inf  ;;  %v20_v28 = vld [vmem:[%s3295_s0 + $0x60] sm:$0xff] }
   0x6   :  { %v303_v24 = vsel %vm266_vm1, %v17_v15, -inf  ;;  %v269_v25 = vrot.slane %v268_v16, 4  ;;  %v311_v26 = vsel %vm264_vm0, %v18_v17, -inf  ;;  %v312_v27 = vsel %vm266_vm1, %v19_v18, -inf  ;;  %v21_v29 = vld [vmem:[%s3295_s0 + $0x68] sm:$0x1] }
   0x7   :  { %v278_v30 = vrot.slane %v277_v19, 4  ;;  %v287_v31 = vrot.slane %v286_v20, 4  ;;  %v295_v32 = vmax.f32 %v293_v21, %v294_v22  ;;  %v304_v33 = vmax.f32 %v302_v23, %v303_v24  ;;  %v22_v38 = vld [vmem:[%s3295_s0 + $0x70] sm:$0xff]  ;;  %v23_v39 = vld [vmem:[%s3295_s0 + $0x78] sm:$0x1]  ;;  %v24_v44 = vld [vmem:[%s3295_s0 + $0x80] sm:$0xff] }
   0x8   :  { %v313_v34 = vmax.f32 %v311_v26, %v312_v27  ;;  %v270_v35 = vmax.f32 %v268_v16, %v269_v25  ;;  %v320_v36 = vsel %vm264_vm0, %v20_v28, -inf  ;;  %v321_v37 = vsel %vm266_vm1, %v21_v29, -inf  ;;  %v25_v45 = vld [vmem:[%s3295_s0 + $0x88] sm:$0x1]  ;;  %v26_v46 = vld [vmem:[%s3295_s0 + $0x90] sm:$0xff]  ;;  %v28_v0 = vld [vmem:[%s3295_s0 + $0xa0] sm:$0xff] }
   0x9   :  { %v279_v40 = vmax.f32 %v277_v19, %v278_v30  ;;  %v288_v41 = vmax.f32 %v286_v20, %v287_v31  ;;  %v296_v42 = vrot.slane %v295_v32, 4  ;;  %v305_v43 = vrot.slane %v304_v33, 4  ;;  %v27_v47 = vld [vmem:[%s3295_s0 + $0x98] sm:$0x1]  ;;  %v29_v1 = vld [vmem:[%s3295_s0 + $0xa8] sm:$0x1] }
   0xa   :  { %v314_v48 = vrot.slane %v313_v34, 4  ;;  %v322_v49 = vmax.f32 %v320_v36, %v321_v37  ;;  %v271_v50 = vrot.slane %v270_v35, 2  ;;  %v329_v51 = vsel %vm264_vm0, %v22_v38, -inf  ;;  %v30_v12 = vld [vmem:[%s3295_s0 + $0xb0] sm:$0xff]  ;;  %v31_v13 = vld [vmem:[%s3295_s0 + $0xb8] sm:$0x1] }
   0xb   :  { %v330_v52 = vsel %vm266_vm1, %v23_v39, -inf  ;;  %v280_v53 = vrot.slane %v279_v40, 2  ;;  %v289_v54 = vrot.slane %v288_v41, 2  ;;  %v297_v55 = vmax.f32 %v295_v32, %v296_v42  ;;  %v32_v16 = vld [vmem:[%s3295_s0 + $0xc0] sm:$0xff]  ;;  %v33_v17 = vld [vmem:[%s3295_s0 + $0xc8] sm:$0x1] }
   0xc   :  { %v306_v56 = vmax.f32 %v304_v33, %v305_v43  ;;  %v338_v57 = vsel %vm264_vm0, %v24_v44, -inf  ;;  %v339_v58 = vsel %vm266_vm1, %v25_v45, -inf  ;;  %v347_v59 = vsel %vm264_vm0, %v26_v46, -inf  ;;  %v34_v21 = vld [vmem:[%s3295_s0 + $0xd0] sm:$0xff]  ;;  %v35_v22 = vld [vmem:[%s3295_s0 + $0xd8] sm:$0x1] }
   0xd   :  { %v348_v60 = vsel %vm266_vm1, %v27_v47, -inf  ;;  %v315_v61 = vmax.f32 %v313_v34, %v314_v48  ;;  %v323_v62 = vrot.slane %v322_v49, 4  ;;  %v331_v63 = vmax.f32 %v329_v51, %v330_v52  ;;  %v36_v39 = vld [vmem:[%s3295_s0 + $0xe0] sm:$0xff]  ;;  %v38_v46 = vld [vmem:[%s3295_s0 + $0xf0] sm:$0xff]  ;;  %v41_v48 = vld [vmem:[%s3295_s0 + $0x108] sm:$0x1] }
   0xe   :  { %v272_v2 = vmax.f32 %v270_v35, %v271_v50  ;;  %v340_v3 = vmax.f32 %v338_v57, %v339_v58  ;;  %v349_v4 = vmax.f32 %v347_v59, %v348_v60  ;;  %v281_v5 = vmax.f32 %v279_v40, %v280_v53  ;;  %v37_v40 = vld [vmem:[%s3295_s0 + $0xe8] sm:$0x1]  ;;  %v40_v47 = vld [vmem:[%s3295_s0 + $0x100] sm:$0xff]  ;;  %v42_v53 = vld [vmem:[%s3295_s0 + $0x110] sm:$0xff] }
   0xf   :  { %v290_v6 = vmax.f32 %v288_v41, %v289_v54  ;;  %v298_v7 = vrot.slane %v297_v55, 2  ;;  %v307_v8 = vrot.slane %v306_v56, 2  ;;  %v316_v9 = vrot.slane %v315_v61, 2  ;;  %v39_v41 = vld [vmem:[%s3295_s0 + $0xf8] sm:$0x1] }
  0x10   :  { %v324_v10 = vmax.f32 %v322_v49, %v323_v62  ;;  %v332_v11 = vrot.slane %v331_v63, 4  ;;  %v356_v14 = vsel %vm264_vm0, %v28_v0, -inf  ;;  %v357_v15 = vsel %vm266_vm1, %v29_v1, -inf  ;;  %v43_v58 = vld [vmem:[%s3295_s0 + $0x118] sm:$0x1] }
  0x11   :  { %v273_v18 = vrot.slane %v272_v2, 1  ;;  %v341_v19 = vrot.slane %v340_v3, 4  ;;  %v350_v20 = vrot.slane %v349_v4, 4  ;;  %v282_v23 = vrot.slane %v281_v5, 1 }
  0x12   :  { %v291_v24 = vrot.slane %v290_v6, 1  ;;  %v299_v25 = vmax.f32 %v297_v55, %v298_v7  ;;  %v308_v26 = vmax.f32 %v306_v56, %v307_v8  ;;  %v317_v27 = vmax.f32 %v315_v61, %v316_v9 }
  0x13   :  { %v325_v28 = vrot.slane %v324_v10, 2  ;;  %v333_v29 = vmax.f32 %v331_v63, %v332_v11  ;;  %v358_v30 = vmax.f32 %v356_v14, %v357_v15  ;;  %v365_v31 = vsel %vm264_vm0, %v30_v12, -inf  ;;  %v44_v11 = vld [vmem:[%s3295_s0 + $0x120] sm:$0xff]  ;;  %v45_v12 = vld [vmem:[%s3295_s0 + $0x128] sm:$0x1] }
  0x14   :  { %v366_v32 = vsel %vm266_vm1, %v31_v13, -inf  ;;  %v374_v33 = vsel %vm264_vm0, %v32_v16, -inf  ;;  %v375_v34 = vsel %vm266_vm1, %v33_v17, -inf  ;;  %v342_v35 = vmax.f32 %v340_v3, %v341_v19 }
  0x15   :  { %v351_v36 = vmax.f32 %v349_v4, %v350_v20  ;;  %v383_v37 = vsel %vm264_vm0, %v34_v21, -inf  ;;  %v384_v38 = vsel %vm266_vm1, %v35_v22, -inf  ;;  %v1832_v42 = vmax.f32 %v272_v2, %v273_v18  ;;  %v46_v21 = vld [vmem:[%s3295_s0 + $0x130] sm:$0xff] }
  0x16   :  { %v1834_v43 = vmax.f32 %v281_v5, %v282_v23  ;;  %v1836_v44 = vmax.f32 %v290_v6, %v291_v24  ;;  %v300_v45 = vrot.slane %v299_v25, 1  ;;  %v309_v49 = vrot.slane %v308_v26, 1 }
  0x17   :  { %v359_v50 = vrot.slane %v358_v30, 4  ;;  %v367_v51 = vmax.f32 %v365_v31, %v366_v32  ;;  %v376_v52 = vmax.f32 %v374_v33, %v375_v34  ;;  %v318_v54 = vrot.slane %v317_v27, 1 }
  0x18   :  { %v326_v55 = vmax.f32 %v324_v10, %v325_v28  ;;  %v334_v56 = vrot.slane %v333_v29, 2  ;;  %v385_v57 = vmax.f32 %v383_v37, %v384_v38  ;;  %v343_v59 = vrot.slane %v342_v35, 2 }
  0x19   :  { %v352_v60 = vrot.slane %v351_v36, 2  ;;  %v392_v61 = vsel %vm264_vm0, %v36_v39, -inf  ;;  %v393_v62 = vsel %vm266_vm1, %v37_v40, -inf  ;;  %v401_v63 = vsel %vm264_vm0, %v38_v46, -inf  ;;  %v49_v40 = vld [vmem:[%s3295_s0 + $0x148] sm:$0x1] }
  0x1a   :  { %v402_v0 = vsel %vm266_vm1, %v39_v41, -inf  ;;  %v410_v1 = vsel %vm264_vm0, %v40_v47, -inf  ;;  %v411_v2 = vsel %vm266_vm1, %v41_v48, -inf  ;;  %v360_v3 = vmax.f32 %v358_v30, %v359_v50 }
  0x1b   :  { %v368_v4 = vrot.slane %v367_v51, 4  ;;  %v377_v5 = vrot.slane %v376_v52, 4  ;;  %v419_v6 = vsel %vm264_vm0, %v42_v53, -inf  ;;  %v1860_v7 = vmax.f32 %v299_v25, %v300_v45 }
  0x1c   :  { %v386_v8 = vrot.slane %v385_v57, 4  ;;  %v394_v9 = vmax.f32 %v392_v61, %v393_v62  ;;  %v420_v10 = vsel %vm266_vm1, %v43_v58, -inf  ;;  %v1869_v13 = vmax.f32 %v308_v26, %v309_v49  ;;  %v51_v61 = vld [vmem:[%s3295_s0 + $0x158] sm:$0x1] }
  0x1d   :  { %v327_v14 = vrot.slane %v326_v55, 1  ;;  %v403_v15 = vmax.f32 %v401_v63, %v402_v0  ;;  %v412_v16 = vmax.f32 %v410_v1, %v411_v2  ;;  %v1871_v17 = vmax.f32 %v317_v27, %v318_v54  ;;  %v47_v27 = vld [vmem:[%s3295_s0 + $0x138] sm:$0x1] }
  0x1e   :  { %v335_v18 = vmax.f32 %v333_v29, %v334_v56  ;;  %v344_v19 = vmax.f32 %v342_v35, %v343_v59  ;;  %v421_v20 = vmax.f32 %v419_v6, %v420_v10  ;;  %v353_v22 = vmax.f32 %v351_v36, %v352_v60  ;;  %v48_v35 = vld [vmem:[%s3295_s0 + $0x140] sm:$0xff]  ;;  %v50_v60 = vld [vmem:[%s3295_s0 + $0x150] sm:$0xff] }
  0x1f   :  { %v361_v23 = vrot.slane %v360_v3, 2  ;;  %v369_v24 = vmax.f32 %v367_v51, %v368_v4  ;;  %v378_v25 = vmax.f32 %v376_v52, %v377_v5  ;;  %v387_v28 = vmax.f32 %v385_v57, %v386_v8  ;;  %v52_v6 = vld [vmem:[%s3295_s0 + $0x160] sm:$0xff] }
  0x20   :  { %v395_v30 = vrot.slane %v394_v9, 4  ;;  %v428_v26 = vsel %vm264_vm0, %v44_v11, -inf  ;;  %v429_v31 = vsel %vm266_vm1, %v45_v12, -inf  ;;  %v1881_v29 = vmax.f32 %v326_v55, %v327_v14 }
  0x21   :  { %v404_v32 = vrot.slane %v403_v15, 4  ;;  %v413_v33 = vrot.slane %v412_v16, 4  ;;  %v430_v34 = vmax.f32 %v428_v26, %v429_v31  ;;  %v336_v36 = vrot.slane %v335_v18, 1  ;;  %v55_v26 = vld [vmem:[%s3295_s0 + $0x178] sm:$0x1] }
  0x22   :  { %v345_v37 = vrot.slane %v344_v19, 1  ;;  %v422_v38 = vrot.slane %v421_v20, 4  ;;  %v437_v39 = vsel %vm264_vm0, %v46_v21, -inf  ;;  %v354_v41 = vrot.slane %v353_v22, 1 }
  0x23   :  { %v362_v45 = vmax.f32 %v360_v3, %v361_v23  ;;  %v370_v46 = vrot.slane %v369_v24, 2  ;;  %v379_v47 = vrot.slane %v378_v25, 2  ;;  %v388_v48 = vrot.slane %v387_v28, 2  ;;  %v54_v23 = vld [vmem:[%s3295_s0 + $0x170] sm:$0xff] }
  0x24   :  { %v396_v49 = vmax.f32 %v394_v9, %v395_v30  ;;  %v431_v50 = vrot.slane %v430_v34, 4  ;;  %v438_v51 = vsel %vm266_vm1, %v47_v27, -inf  ;;  %v405_v52 = vmax.f32 %v403_v15, %v404_v32 }
  0x25   :  { %v414_v53 = vmax.f32 %v412_v16, %v413_v33  ;;  %v439_v54 = vmax.f32 %v437_v39, %v438_v51  ;;  %v446_v55 = vsel %vm264_vm0, %v48_v35, -inf  ;;  %v1892_v56 = vmax.f32 %v335_v18, %v336_v36  ;;  %v53_v18 = vld [vmem:[%s3295_s0 + $0x168] sm:$0x1] }
  0x26   :  { %v1894_v57 = vmax.f32 %v344_v19, %v345_v37  ;;  %v423_v58 = vmax.f32 %v421_v20, %v422_v38  ;;  %v447_v59 = vsel %vm266_vm1, %v49_v40, -inf  ;;  %v1903_v62 = vmax.f32 %v353_v22, %v354_v41 }
  0x27   :  { %v371_v63 = vmax.f32 %v369_v24, %v370_v46  ;;  %v432_v0 = vmax.f32 %v430_v34, %v431_v50  ;;  %v448_v1 = vmax.f32 %v446_v55, %v447_v59  ;;  %v363_v2 = vrot.slane %v362_v45, 1  ;;  %v57_v50 = vld [vmem:[%s3295_s0 + $0x188] sm:$0x1] }
  0x28   :  { %v380_v3 = vmax.f32 %v378_v25, %v379_v47  ;;  %v397_v4 = vrot.slane %v396_v49, 2  ;;  %v440_v5 = vrot.slane %v439_v54, 4  ;;  %v389_v8 = vmax.f32 %v387_v28, %v388_v48 }
  0x29   :  { %v406_v9 = vrot.slane %v405_v52, 2  ;;  %v415_v10 = vrot.slane %v414_v53, 2  ;;  %v449_v11 = vrot.slane %v448_v1, 4  ;;  %v424_v12 = vrot.slane %v423_v58, 2 }
  0x2a   :  { %v441_v14 = vmax.f32 %v439_v54, %v440_v5  ;;  %v455_v15 = vsel %vm264_vm0, %v50_v60, -inf  ;;  %v456_v16 = vsel %vm266_vm1, %v51_v61, -inf  ;;  %v372_v19 = vrot.slane %v371_v63, 1  ;;  %v58_v61 = vld [vmem:[%s3295_s0 + $0x190] sm:$0xff] }
  0x2b   :  { %v433_v20 = vrot.slane %v432_v0, 2  ;;  %v450_v21 = vmax.f32 %v448_v1, %v449_v11  ;;  %v457_v22 = vmax.f32 %v455_v15, %v456_v16  ;;  %v1916_v24 = vmax.f32 %v362_v45, %v363_v2 }
  0x2c   :  { %v381_v25 = vrot.slane %v380_v3, 1  ;;  %v442_v28 = vrot.slane %v441_v14, 2  ;;  %v464_v30 = vsel %vm264_vm0, %v52_v6, -inf  ;;  %v390_v31 = vrot.slane %v389_v8, 1 }
  0x2d   :  { %v398_v27 = vmax.f32 %v396_v49, %v397_v4  ;;  %v407_v32 = vmax.f32 %v405_v52, %v406_v9  ;;  %v451_v33 = vrot.slane %v450_v21, 2  ;;  %v416_v34 = vmax.f32 %v414_v53, %v415_v10  ;;  %v56_v49 = vld [vmem:[%s3295_s0 + $0x180] sm:$0xff] }
  0x2e   :  { %v425_v35 = vmax.f32 %v423_v58, %v424_v12  ;;  %v458_v36 = vrot.slane %v457_v22, 4  ;;  %v465_v37 = vsel %vm266_vm1, %v53_v18, -inf  ;;  %v434_v38 = vmax.f32 %v432_v0, %v433_v20  ;;  %v61_v20 = vld [vmem:[%s3295_s0 + $0x1a8] sm:$0x1] }
  0x2f   :  { %v443_v39 = vmax.f32 %v441_v14, %v442_v28  ;;  %v466_v40 = vmax.f32 %v464_v30, %v465_v37  ;;  %v473_v41 = vsel %vm264_vm0, %v54_v23, -inf  ;;  %v1924_v45 = vmax.f32 %v371_v63, %v372_v19  ;;  %v60_v14 = vld [vmem:[%s3295_s0 + $0x1a0] sm:$0xff]  ;;  %v62_v28 = vld [vmem:[%s3295_s0 + $0x1b0] sm:$0xff] }
  0x30   :  { %v1926_v46 = vmax.f32 %v380_v3, %v381_v25  ;;  %v459_v47 = vmax.f32 %v457_v22, %v458_v36  ;;  %v474_v48 = vsel %vm266_vm1, %v55_v26, -inf  ;;  %v1935_v51 = vmax.f32 %v389_v8, %v390_v31  ;;  %v59_v8 = vld [vmem:[%s3295_s0 + $0x198] sm:$0x1] }
  0x31   :  { %v399_v52 = vrot.slane %v398_v27, 1  ;;  %v452_v53 = vmax.f32 %v450_v21, %v451_v33  ;;  %v475_v54 = vmax.f32 %v473_v41, %v474_v48  ;;  %v408_v55 = vrot.slane %v407_v32, 1  ;;  %v64_v33 = vld [vmem:[%s3295_s0 + $0x1c0] sm:$0xff]  ;;  %v66_v48 = vld [vmem:[%s3295_s0 + $0x1d0] sm:$0xff] }
  0x32   :  { %v417_v58 = vrot.slane %v416_v34, 1  ;;  %v460_v59 = vrot.slane %v459_v47, 2  ;;  %v467_v60 = vrot.slane %v466_v40, 4  ;;  %v426_v63 = vrot.slane %v425_v35, 1 }
  0x33   :  { %v435_v0 = vrot.slane %v434_v38, 1  ;;  %v444_v1 = vrot.slane %v443_v39, 1  ;;  %v476_v2 = vrot.slane %v475_v54, 4  ;;  %v482_v5 = vsel %vm264_vm0, %v56_v49, -inf  ;;  %v67_v49 = vld [vmem:[%s3295_s0 + $0x1d8] sm:$0x1] }
  0x34   :  { %v461_v3 = vmax.f32 %v459_v47, %v460_v59  ;;  %v468_v4 = vmax.f32 %v466_v40, %v467_v60  ;;  %v483_v6 = vsel %vm266_vm1, %v57_v50, -inf  ;;  %v1945_v9 = vmax.f32 %v398_v27, %v399_v52 }
  0x35   :  { %v453_v10 = vrot.slane %v452_v53, 1  ;;  %v477_v11 = vmax.f32 %v475_v54, %v476_v2  ;;  %v484_v12 = vmax.f32 %v482_v5, %v483_v6  ;;  %v1950_v15 = vmax.f32 %v407_v32, %v408_v55  ;;  %v63_v32 = vld [vmem:[%s3295_s0 + $0x1b8] sm:$0x1] }
  0x36   :  { %v462_v16 = vrot.slane %v461_v3, 1  ;;  %v469_v18 = vrot.slane %v468_v4, 2  ;;  %v491_v19 = vsel %vm264_vm0, %v58_v61, -inf  ;;  %v1956_v21 = vmax.f32 %v416_v34, %v417_v58  ;;  %v68_v61 = vld [vmem:[%s3295_s0 + $0x1e0] sm:$0xff] }
  0x37   :  { %v1958_v22 = vmax.f32 %v425_v35, %v426_v63  ;;  %v1960_v23 = vmax.f32 %v434_v38, %v435_v0  ;;  %v478_v25 = vrot.slane %v477_v11, 2  ;;  %v1965_v30 = vmax.f32 %v443_v39, %v444_v1  ;;  %v65_v38 = vld [vmem:[%s3295_s0 + $0x1c8] sm:$0x1] }
  0x38   :  { %v470_v26 = vmax.f32 %v468_v4, %v469_v18  ;;  %v485_v31 = vrot.slane %v484_v12, 4  ;;  %v492_v27 = vsel %vm266_vm1, %v59_v8, -inf  ;;  %v1974_v34 = vmax.f32 %v452_v53, %v453_v10  ;;  %v69_v63 = vld [vmem:[%s3295_s0 + $0x1e8] sm:$0x1]  ;;  %v70_v10 = vld [vmem:[%s3295_s0 + $0x1f0] sm:$0xff] }
  0x39   :  { %v479_v35 = vmax.f32 %v477_v11, %v478_v25  ;;  %v493_v36 = vmax.f32 %v491_v19, %v492_v27  ;;  %v500_v37 = vsel %vm264_vm0, %v60_v14, -inf  ;;  %v1980_v39 = vmax.f32 %v461_v3, %v462_v16 }
  0x3a   :  { %v471_v40 = vrot.slane %v470_v26, 1  ;;  %v486_v41 = vmax.f32 %v484_v12, %v485_v31  ;;  %v501_v47 = vsel %vm266_vm1, %v61_v20, -inf  ;;  %v509_v54 = vsel %vm264_vm0, %v62_v28, -inf  ;;  %v71_v28 = vld [vmem:[%s3295_s0 + $0x1f8] sm:$0x1] }
  0x3b   :  { %v480_v50 = vrot.slane %v479_v35, 1  ;;  %v494_v52 = vrot.slane %v493_v36, 4  ;;  %v502_v53 = vmax.f32 %v500_v37, %v501_v47  ;;  %v510_v59 = vsel %vm266_vm1, %v63_v32, -inf }
  0x3c   :  { %v1990_v55 = vmax.f32 %v470_v26, %v471_v40  ;;  %v487_v58 = vrot.slane %v486_v41, 2  ;;  %v518_v60 = vsel %vm264_vm0, %v64_v33, -inf  ;;  %v511_v3 = vmax.f32 %v509_v54, %v510_v59  ;;  %v72_v26 = vld [vmem:[%s3295_s0 + $0x200] sm:$0xff]  ;;  %v73_v40 = vld [vmem:[%s3295_s0 + $0x208] sm:$0x1] }
  0x3d   :  { %v2000_v0 = vmax.f32 %v479_v35, %v480_v50  ;;  %v495_v1 = vmax.f32 %v493_v36, %v494_v52  ;;  %v503_v2 = vrot.slane %v502_v53, 4  ;;  %v519_v5 = vsel %vm266_vm1, %v65_v38, -inf }
  0x3e   :  { %v488_v4 = vmax.f32 %v486_v41, %v487_v58  ;;  %v527_v6 = vsel %vm264_vm0, %v66_v48, -inf  ;;  %v528_v8 = vsel %vm266_vm1, %v67_v49, -inf  ;;  %v512_v14 = vrot.slane %v511_v3, 4  ;;  %v74_v58 = vld [vmem:[%s3295_s0 + $0x210] sm:$0xff] }
  0x3f   :  { %v496_v11 = vrot.slane %v495_v1, 2  ;;  %v504_v12 = vmax.f32 %v502_v53, %v503_v2  ;;  %v520_v16 = vmax.f32 %v518_v60, %v519_v5  ;;  %v529_v19 = vmax.f32 %v527_v6, %v528_v8 }
  0x40   :  { %v489_v18 = vrot.slane %v488_v4, 1  ;;  %v536_v20 = vsel %vm264_vm0, %v68_v61, -inf  ;;  %v537_v25 = vsel %vm266_vm1, %v69_v63, -inf  ;;  %v513_v32 = vmax.f32 %v511_v3, %v512_v14  ;;  %v77_v14 = vld [vmem:[%s3295_s0 + $0x228] sm:$0x1] }
  0x41   :  { %v497_v31 = vmax.f32 %v495_v1, %v496_v11  ;;  %v505_v27 = vrot.slane %v504_v12, 2  ;;  %v521_v33 = vrot.slane %v520_v16, 4  ;;  %v530_v36 = vrot.slane %v529_v19, 4  ;;  %v75_v1 = vld [vmem:[%s3295_s0 + $0x218] sm:$0x1] }
  0x42   :  { %v2016_v35 = vmax.f32 %v488_v4, %v489_v18  ;;  %v538_v37 = vmax.f32 %v536_v20, %v537_v25  ;;  %v545_v38 = vsel %vm264_vm0, %v70_v10, -inf  ;;  %v514_v48 = vrot.slane %v513_v32, 2 }
  0x43   :  { %v498_v41 = vrot.slane %v497_v31, 1  ;;  %v506_v47 = vmax.f32 %v504_v12, %v505_v27  ;;  %v522_v49 = vmax.f32 %v520_v16, %v521_v33  ;;  %v531_v50 = vmax.f32 %v529_v19, %v530_v36  ;;  %v76_v12 = vld [vmem:[%s3295_s0 + $0x220] sm:$0xff]  ;;  %v78_v27 = vld [vmem:[%s3295_s0 + $0x230] sm:$0xff] }
  0x44   :  { %v539_v52 = vrot.slane %v538_v37, 4  ;;  %v546_v53 = vsel %vm266_vm1, %v71_v28, -inf  ;;  %v554_v54 = vsel %vm264_vm0, %v72_v26, -inf  ;;  %v515_v61 = vmax.f32 %v513_v32, %v514_v48  ;;  %v79_v32 = vld [vmem:[%s3295_s0 + $0x238] sm:$0x1] }
  0x45   :  { %v2027_v59 = vmax.f32 %v497_v31, %v498_v41  ;;  %v507_v60 = vrot.slane %v506_v47, 1  ;;  %v523_v63 = vrot.slane %v522_v49, 2  ;;  %v532_v2 = vrot.slane %v531_v50, 2 }
  0x46   :  { %v540_v3 = vmax.f32 %v538_v37, %v539_v52  ;;  %v547_v4 = vmax.f32 %v545_v38, %v546_v53  ;;  %v555_v5 = vsel %vm266_vm1, %v73_v40, -inf  ;;  %v516_v8 = vrot.slane %v515_v61, 1 }
  0x47   :  { %v2033_v6 = vmax.f32 %v506_v47, %v507_v60  ;;  %v524_v10 = vmax.f32 %v522_v49, %v523_v63  ;;  %v556_v11 = vmax.f32 %v554_v54, %v555_v5  ;;  %v533_v16 = vmax.f32 %v531_v50, %v532_v2  ;;  %v80_v49 = vld [vmem:[%s3295_s0 + $0x240] sm:$0xff]  ;;  %v81_v50 = vld [vmem:[%s3295_s0 + $0x248] sm:$0x1]  ;;  %v82_v2 = vld [vmem:[%s3295_s0 + $0x250] sm:$0xff] }
  0x48   :  { %v541_v18 = vrot.slane %v540_v3, 2  ;;  %v548_v19 = vrot.slane %v547_v4, 4  ;;  %v563_v20 = vsel %vm264_vm0, %v74_v58, -inf  ;;  %v2042_v25 = vmax.f32 %v515_v61, %v516_v8 }
  0x49   :  { %v525_v28 = vrot.slane %v524_v10, 1  ;;  %v557_v26 = vrot.slane %v556_v11, 4  ;;  %v564_v31 = vsel %vm266_vm1, %v75_v1, -inf  ;;  %v534_v33 = vrot.slane %v533_v16, 1 }
  0x4a   :  { %v542_v36 = vmax.f32 %v540_v3, %v541_v18  ;;  %v549_v37 = vmax.f32 %v547_v4, %v548_v19  ;;  %v565_v38 = vmax.f32 %v563_v20, %v564_v31  ;;  %v572_v47 = vsel %vm264_vm0, %v76_v12, -inf  ;;  %v83_v3 = vld [vmem:[%s3295_s0 + $0x258] sm:$0x1]  ;;  %v84_v18 = vld [vmem:[%s3295_s0 + $0x260] sm:$0xff]  ;;  %v85_v31 = vld [vmem:[%s3295_s0 + $0x268] sm:$0x1] }
  0x4b   :  { %v2051_v40 = vmax.f32 %v524_v10, %v525_v28  ;;  %v558_v41 = vmax.f32 %v556_v11, %v557_v26  ;;  %v573_v48 = vsel %vm266_vm1, %v77_v14, -inf  ;;  %v2061_v52 = vmax.f32 %v533_v16, %v534_v33 }
  0x4c   :  { %v543_v53 = vrot.slane %v542_v36, 1  ;;  %v550_v54 = vrot.slane %v549_v37, 2  ;;  %v566_v58 = vrot.slane %v565_v38, 4  ;;  %v574_v61 = vmax.f32 %v572_v47, %v573_v48 }
  0x4d   :  { %v559_v60 = vrot.slane %v558_v41, 2  ;;  %v581_v63 = vsel %vm264_vm0, %v78_v27, -inf  ;;  %v582_v1 = vsel %vm266_vm1, %v79_v32, -inf  ;;  %v590_v14 = vsel %vm264_vm0, %v80_v49, -inf  ;;  %v87_v49 = vld [vmem:[%s3295_s0 + $0x278] sm:$0x1] }
  0x4e   :  { %v2071_v4 = vmax.f32 %v542_v36, %v543_v53  ;;  %v551_v5 = vmax.f32 %v549_v37, %v550_v54  ;;  %v567_v8 = vmax.f32 %v565_v38, %v566_v58  ;;  %v583_v10 = vmax.f32 %v581_v63, %v582_v1  ;;  %v86_v37 = vld [vmem:[%s3295_s0 + $0x270] sm:$0xff] }
  0x4f   :  { %v560_v11 = vmax.f32 %v558_v41, %v559_v60  ;;  %v575_v12 = vrot.slane %v574_v61, 4  ;;  %v591_v16 = vsel %vm266_vm1, %v81_v50, -inf  ;;  %v599_v33 = vsel %vm264_vm0, %v82_v2, -inf  ;;  %v88_v2 = vld [vmem:[%s3295_s0 + $0x280] sm:$0xff] }
  0x50   :  { %v552_v19 = vrot.slane %v551_v5, 1  ;;  %v568_v20 = vrot.slane %v567_v8, 2  ;;  %v584_v28 = vrot.slane %v583_v10, 4  ;;  %v592_v26 = vmax.f32 %v590_v14, %v591_v16 }
  0x51   :  { %v561_v27 = vrot.slane %v560_v11, 1  ;;  %v576_v32 = vmax.f32 %v574_v61, %v575_v12  ;;  %v600_v36 = vsel %vm266_vm1, %v83_v3, -inf  ;;  %v608_v58 = vsel %vm264_vm0, %v84_v18, -inf  ;;  %v89_v3 = vld [vmem:[%s3295_s0 + $0x288] sm:$0x1] }
  0x52   :  { %v2086_v38 = vmax.f32 %v551_v5, %v552_v19  ;;  %v569_v41 = vmax.f32 %v567_v8, %v568_v20  ;;  %v585_v47 = vmax.f32 %v583_v10, %v584_v28  ;;  %v593_v48 = vrot.slane %v592_v26, 4  ;;  %v90_v19 = vld [vmem:[%s3295_s0 + $0x290] sm:$0xff] }
  0x53   :  { %v2091_v50 = vmax.f32 %v560_v11, %v561_v27  ;;  %v577_v53 = vrot.slane %v576_v32, 2  ;;  %v601_v54 = vmax.f32 %v599_v33, %v600_v36  ;;  %v609_v1 = vsel %vm266_vm1, %v85_v31, -inf  ;;  %v91_v27 = vld [vmem:[%s3295_s0 + $0x298] sm:$0x1] }
  0x54   :  { %v570_v60 = vrot.slane %v569_v41, 1  ;;  %v586_v61 = vrot.slane %v585_v47, 2  ;;  %v594_v63 = vmax.f32 %v592_v26, %v593_v48  ;;  %v610_v10 = vmax.f32 %v608_v58, %v609_v1  ;;  %v94_v1 = vld [vmem:[%s3295_s0 + $0x2b0] sm:$0xff] }
  0x55   :  { %v578_v5 = vmax.f32 %v576_v32, %v577_v53  ;;  %v602_v8 = vrot.slane %v601_v54, 4  ;;  %v617_v11 = vsel %vm264_vm0, %v86_v37, -inf  ;;  %v618_v18 = vsel %vm266_vm1, %v87_v49, -inf }
  0x56   :  { %v2102_v12 = vmax.f32 %v569_v41, %v570_v60  ;;  %v587_v14 = vmax.f32 %v585_v47, %v586_v61  ;;  %v595_v16 = vrot.slane %v594_v63, 2  ;;  %v611_v26 = vrot.slane %v610_v10, 4  ;;  %v92_v41 = vld [vmem:[%s3295_s0 + $0x2a0] sm:$0xff] }
  0x57   :  { %v579_v20 = vrot.slane %v578_v5, 1  ;;  %v603_v28 = vmax.f32 %v601_v54, %v602_v8  ;;  %v619_v31 = vmax.f32 %v617_v11, %v618_v18  ;;  %v626_v36 = vsel %vm264_vm0, %v88_v2, -inf  ;;  %v93_v54 = vld [vmem:[%s3295_s0 + $0x2a8] sm:$0x1] }
  0x58   :  { %v588_v32 = vrot.slane %v587_v14, 1  ;;  %v596_v33 = vmax.f32 %v594_v63, %v595_v16  ;;  %v627_v37 = vsel %vm266_vm1, %v89_v3, -inf  ;;  %v612_v49 = vmax.f32 %v610_v10, %v611_v26  ;;  %v95_v10 = vld [vmem:[%s3295_s0 + $0x2b8] sm:$0x1] }
  0x59   :  { %v2116_v47 = vmax.f32 %v578_v5, %v579_v20  ;;  %v604_v48 = vrot.slane %v603_v28, 2  ;;  %v620_v53 = vrot.slane %v619_v31, 4  ;;  %v628_v61 = vmax.f32 %v626_v36, %v627_v37 }
  0x5a   :  { %v2121_v58 = vmax.f32 %v587_v14, %v588_v32  ;;  %v597_v60 = vrot.slane %v596_v33, 1  ;;  %v635_v63 = vsel %vm264_vm0, %v90_v19, -inf  ;;  %v613_v3 = vrot.slane %v612_v49, 2 }
  0x5b   :  { %v605_v2 = vmax.f32 %v603_v28, %v604_v48  ;;  %v621_v5 = vmax.f32 %v619_v31, %v620_v53  ;;  %v636_v8 = vsel %vm266_vm1, %v91_v27, -inf  ;;  %v629_v14 = vrot.slane %v628_v61, 4  ;;  %v96_v28 = vld [vmem:[%s3295_s0 + $0x2c0] sm:$0xff]  ;;  %v97_v31 = vld [vmem:[%s3295_s0 + $0x2c8] sm:$0x1] }
  0x5c   :  { %3297 = vst [vmem:[#allocation2_spill] sm:$0xff] %v2121_v58  ;;  %v2131_v11 = vmax.f32 %v596_v33, %v597_v60  ;;  %v637_v16 = vmax.f32 %v635_v63, %v636_v8  ;;  %v644_v18 = vsel %vm264_vm0, %v92_v41, -inf  ;;  %v614_v20 = vmax.f32 %v612_v49, %v613_v3  ;;  %v99_v60 = vld [vmem:[%s3295_s0 + $0x2d8] sm:$0x1] }
  0x5d   :  { %v606_v19 = vrot.slane %v605_v2, 1  ;;  %v622_v26 = vrot.slane %v621_v5, 2  ;;  %v645_v32 = vsel %vm266_vm1, %v93_v54, -inf  ;;  %v630_v27 = vmax.f32 %v628_v61, %v629_v14  ;;  %v98_v54 = vld [vmem:[%s3295_s0 + $0x2d0] sm:$0xff] }
  0x5e   :  { %3298 = vst [vmem:[#allocation3_spill] sm:$0xff] %v2131_v11  ;;  %v638_v33 = vrot.slane %v637_v16, 4  ;;  %v646_v36 = vmax.f32 %v644_v18, %v645_v32  ;;  %v653_v37 = vsel %vm264_vm0, %v94_v1, -inf  ;;  %v615_v41 = vrot.slane %v614_v20, 1  ;;  %v101_v18 = vld [vmem:[%s3295_s0 + $0x2e8] sm:$0x1] }
  0x5f   :  { %v2142_v48 = vmax.f32 %v605_v2, %v606_v19  ;;  %v623_v49 = vmax.f32 %v621_v5, %v622_v26  ;;  %v654_v53 = vsel %vm266_vm1, %v95_v10, -inf  ;;  %v631_v63 = vrot.slane %v630_v27, 2  ;;  %v100_v10 = vld [vmem:[%s3295_s0 + $0x2e0] sm:$0xff] }
  0x60   :  { %v639_v61 = vmax.f32 %v637_v16, %v638_v33  ;;  %v647_v3 = vrot.slane %v646_v36, 4  ;;  %v655_v8 = vmax.f32 %v653_v37, %v654_v53  ;;  %v2151_v14 = vmax.f32 %v614_v20, %v615_v41 }
  0x61   :  { %3299 = vst [vmem:[#allocation4_spill] sm:$0xff] %v2142_v48  ;;  %v624_v1 = vrot.slane %v623_v49, 1  ;;  %v662_v2 = vsel %vm264_vm0, %v96_v28, -inf  ;;  %v663_v5 = vsel %vm266_vm1, %v97_v31, -inf  ;;  %v632_v19 = vmax.f32 %v630_v27, %v631_v63  ;;  %v102_v31 = vld [vmem:[%s3295_s0 + $0x2f0] sm:$0xff] }
  0x62   :  { %3300 = vst [vmem:[#allocation5_spill] sm:$0xff] %v2151_v14  ;;  %v640_v26 = vrot.slane %v639_v61, 2  ;;  %v648_v16 = vmax.f32 %v646_v36, %v647_v3  ;;  %v656_v32 = vrot.slane %v655_v8, 4  ;;  %v664_v20 = vmax.f32 %v662_v2, %v663_v5  ;;  %v103_v27 = vld [vmem:[%s3295_s0 + $0x2f8] sm:$0x1] }
  0x63   :  { %v2161_v33 = vmax.f32 %v623_v49, %v624_v1  ;;  %v671_v37 = vsel %vm264_vm0, %v98_v54, -inf  ;;  %v672_v28 = vsel %vm266_vm1, %v99_v60, -inf  ;;  %v633_v41 = vrot.slane %v632_v19, 1 }
  0x64   :  { %v641_v53 = vmax.f32 %v639_v61, %v640_v26  ;;  %v649_v14 = vrot.slane %v648_v16, 2  ;;  %v657_v48 = vmax.f32 %v655_v8, %v656_v32  ;;  %v665_v36 = vrot.slane %v664_v20, 4  ;;  %v104_v61 = vld [vmem:[%s3295_s0 + $0x300] sm:$0xff]  ;;  %v105_v8 = vld [vmem:[%s3295_s0 + $0x308] sm:$0x1] }
  0x65   :  { %3301 = vst [vmem:[#allocation6_spill] sm:$0xff] %v2161_v33  ;;  %v673_v49 = vmax.f32 %v671_v37, %v672_v28  ;;  %v680_v63 = vsel %vm264_vm0, %v100_v10, -inf  ;;  %v681_v54 = vsel %vm266_vm1, %v101_v18, -inf  ;;  %v2173_v3 = vmax.f32 %v632_v19, %v633_v41  ;;  %v107_v28 = vld [vmem:[%s3295_s0 + $0x318] sm:$0x1] }
  0x66   :  { %v642_v60 = vrot.slane %v641_v53, 1  ;;  %v650_v1 = vmax.f32 %v648_v16, %v649_v14  ;;  %v658_v2 = vrot.slane %v657_v48, 2  ;;  %v666_v5 = vmax.f32 %v664_v20, %v665_v36  ;;  %v106_v16 = vld [vmem:[%s3295_s0 + $0x310] sm:$0xff] }
  0x67   :  { %3302 = vst [vmem:[#allocation7_spill] sm:$0xff] %v2173_v3  ;;  %v674_v26 = vrot.slane %v673_v49, 4  ;;  %v682_v32 = vmax.f32 %v680_v63, %v681_v54  ;;  %v689_v10 = vsel %vm264_vm0, %v102_v31, -inf  ;;  %v690_v14 = vsel %vm266_vm1, %v103_v27, -inf  ;;  %v108_v27 = vld [vmem:[%s3295_s0 + $0x320] sm:$0xff] }
  0x68   :  { %v2182_v37 = vmax.f32 %v641_v53, %v642_v60  ;;  %v651_v18 = vrot.slane %v650_v1, 1  ;;  %v659_v19 = vmax.f32 %v657_v48, %v658_v2  ;;  %v667_v41 = vrot.slane %v666_v5, 2  ;;  %v109_v60 = vld [vmem:[%s3295_s0 + $0x328] sm:$0x1] }
  0x69   :  { %v675_v20 = vmax.f32 %v673_v49, %v674_v26  ;;  %v683_v36 = vrot.slane %v682_v32, 4  ;;  %v691_v63 = vmax.f32 %v689_v10, %v690_v14  ;;  %v698_v53 = vsel %vm264_vm0, %v104_v61, -inf }
  0x6a   :  { %3303 = vst [vmem:[#allocation8_spill] sm:$0xff] %v2182_v37  ;;  %v2191_v54 = vmax.f32 %v650_v1, %v651_v18  ;;  %v660_v31 = vrot.slane %v659_v19, 1  ;;  %v699_v48 = vsel %vm266_vm1, %v105_v8, -inf  ;;  %v668_v2 = vmax.f32 %v666_v5, %v667_v41  ;;  %v110_v8 = vld [vmem:[%s3295_s0 + $0x330] sm:$0xff]  ;;  %v111_v5 = vld [vmem:[%s3295_s0 + $0x338] sm:$0x1] }
  0x6b   :  { %v676_v33 = vrot.slane %v675_v20, 2  ;;  %v684_v49 = vmax.f32 %v682_v32, %v683_v36  ;;  %v692_v26 = vrot.slane %v691_v63, 4  ;;  %v700_v1 = vmax.f32 %v698_v53, %v699_v48 }
  0x6c   :  { %3304 = vst [vmem:[#allocation9_spill] sm:$0xff] %v2191_v54  ;;  %v2201_v10 = vmax.f32 %v659_v19, %v660_v31  ;;  %v707_v18 = vsel %vm264_vm0, %v106_v16, -inf  ;;  %v708_v61 = vsel %vm266_vm1, %v107_v28, -inf  ;;  %v669_v14 = vrot.slane %v668_v2, 1 }
  0x6d   :  { %v677_v54 = vmax.f32 %v675_v20, %v676_v33  ;;  %v685_v11 = vrot.slane %v684_v49, 2  ;;  %v693_v37 = vmax.f32 %v691_v63, %v692_v26  ;;  %v701_v32 = vrot.slane %v700_v1, 4  ;;  %v112_v33 = vld [vmem:[%s3295_s0 + $0x340] sm:$0xff]  ;;  %v113_v20 = vld [vmem:[%s3295_s0 + $0x348] sm:$0x1] }
  0x6e   :  { %3305 = vst [vmem:[#allocation10_spill] sm:$0xff] %v2201_v10  ;;  %v709_v19 = vmax.f32 %v707_v18, %v708_v61  ;;  %v716_v41 = vsel %vm264_vm0, %v108_v27, -inf  ;;  %v717_v16 = vsel %vm266_vm1, %v109_v60, -inf  ;;  %v2213_v36 = vmax.f32 %v668_v2, %v669_v14  ;;  %v115_v61 = vld [vmem:[%s3295_s0 + $0x358] sm:$0x1] }
  0x6f   :  { %v678_v28 = vrot.slane %v677_v54, 1  ;;  %v686_v31 = vmax.f32 %v684_v49, %v685_v11  ;;  %v694_v53 = vrot.slane %v693_v37, 2  ;;  %v702_v63 = vmax.f32 %v700_v1, %v701_v32  ;;  %v114_v49 = vld [vmem:[%s3295_s0 + $0x350] sm:$0xff] }
  0x70   :  { %3306 = vst [vmem:[#allocation11_spill] sm:$0xff] %v2213_v36  ;;  %v710_v48 = vrot.slane %v709_v19, 4  ;;  %v718_v26 = vmax.f32 %v716_v41, %v717_v16  ;;  %v725_v27 = vsel %vm264_vm0, %v110_v8, -inf  ;;  %v726_v11 = vsel %vm266_vm1, %v111_v5, -inf  ;;  %v116_v5 = vld [vmem:[%s3295_s0 + $0x360] sm:$0xff] }
  0x71   :  { %v2222_v18 = vmax.f32 %v677_v54, %v678_v28  ;;  %v687_v60 = vrot.slane %v686_v31, 1  ;;  %v695_v2 = vmax.f32 %v693_v37, %v694_v53  ;;  %v703_v14 = vrot.slane %v702_v63, 2  ;;  %v117_v28 = vld [vmem:[%s3295_s0 + $0x368] sm:$0x1] }
  0x72   :  { %v711_v1 = vmax.f32 %v709_v19, %v710_v48  ;;  %v719_v32 = vrot.slane %v718_v26, 4  ;;  %v727_v41 = vmax.f32 %v725_v27, %v726_v11  ;;  %v734_v8 = vsel %vm264_vm0, %v112_v33, -inf }
  0x73   :  { %3307 = vst [vmem:[#allocation12_spill] sm:$0xff] %v2222_v18  ;;  %v2231_v16 = vmax.f32 %v686_v31, %v687_v60  ;;  %v696_v54 = vrot.slane %v695_v2, 1  ;;  %v735_v37 = vsel %vm266_vm1, %v113_v20, -inf  ;;  %v704_v53 = vmax.f32 %v702_v63, %v703_v14  ;;  %v118_v20 = vld [vmem:[%s3295_s0 + $0x370] sm:$0xff]  ;;  %v119_v63 = vld [vmem:[%s3295_s0 + $0x378] sm:$0x1] }
  0x74   :  { %v712_v18 = vrot.slane %v711_v1, 2  ;;  %v720_v19 = vmax.f32 %v718_v26, %v719_v32  ;;  %v728_v48 = vrot.slane %v727_v41, 4  ;;  %v736_v31 = vmax.f32 %v734_v8, %v735_v37 }
  0x75   :  { %3308 = vst [vmem:[#allocation13_spill] sm:$0xff] %v2231_v16  ;;  %v2241_v27 = vmax.f32 %v695_v2, %v696_v54  ;;  %v743_v60 = vsel %vm264_vm0, %v114_v49, -inf  ;;  %v744_v33 = vsel %vm266_vm1, %v115_v61, -inf  ;;  %v705_v11 = vrot.slane %v704_v53, 1 }
  0x76   :  { %v713_v16 = vmax.f32 %v711_v1, %v712_v18  ;;  %v721_v36 = vrot.slane %v720_v19, 2  ;;  %v729_v10 = vmax.f32 %v727_v41, %v728_v48  ;;  %v737_v26 = vrot.slane %v736_v31, 4  ;;  %v120_v18 = vld [vmem:[%s3295_s0 + $0x380] sm:$0xff]  ;;  %v121_v1 = vld [vmem:[%s3295_s0 + $0x388] sm:$0x1] }
  0x77   :  { %3309 = vst [vmem:[#allocation14_spill] sm:$0xff] %v2241_v27  ;;  %v745_v2 = vmax.f32 %v743_v60, %v744_v33  ;;  %v752_v14 = vsel %vm264_vm0, %v116_v5, -inf  ;;  %v753_v49 = vsel %vm266_vm1, %v117_v28, -inf  ;;  %v2253_v32 = vmax.f32 %v704_v53, %v705_v11  ;;  %v123_v33 = vld [vmem:[%s3295_s0 + $0x398] sm:$0x1] }
  0x78   :  { %v714_v61 = vrot.slane %v713_v16, 1  ;;  %v722_v54 = vmax.f32 %v720_v19, %v721_v36  ;;  %v730_v8 = vrot.slane %v729_v10, 2  ;;  %v738_v41 = vmax.f32 %v736_v31, %v737_v26  ;;  %v122_v19 = vld [vmem:[%s3295_s0 + $0x390] sm:$0xff] }
  0x79   :  { %3310 = vst [vmem:[#allocation15_spill] sm:$0xff] %v2253_v32  ;;  %v746_v37 = vrot.slane %v745_v2, 4  ;;  %v754_v48 = vmax.f32 %v752_v14, %v753_v49  ;;  %v761_v5 = vsel %vm264_vm0, %v118_v20, -inf  ;;  %v762_v36 = vsel %vm266_vm1, %v119_v63, -inf  ;;  %v124_v63 = vld [vmem:[%s3295_s0 + $0x3a0] sm:$0xff] }
  0x7a   :  { %v2262_v60 = vmax.f32 %v713_v16, %v714_v61  ;;  %v723_v28 = vrot.slane %v722_v54, 1  ;;  %v731_v53 = vmax.f32 %v729_v10, %v730_v8  ;;  %v739_v11 = vrot.slane %v738_v41, 2  ;;  %v125_v61 = vld [vmem:[%s3295_s0 + $0x3a8] sm:$0x1] }
  0x7b   :  { %v747_v31 = vmax.f32 %v745_v2, %v746_v37  ;;  %v755_v26 = vrot.slane %v754_v48, 4  ;;  %v763_v14 = vmax.f32 %v761_v5, %v762_v36  ;;  %v770_v20 = vsel %vm264_vm0, %v120_v18, -inf }
  0x7c   :  { %3311 = vst [vmem:[#allocation16_spill] sm:$0xff] %v2262_v60  ;;  %v2271_v49 = vmax.f32 %v722_v54, %v723_v28  ;;  %v732_v16 = vrot.slane %v731_v53, 1  ;;  %v771_v10 = vsel %vm266_vm1, %v121_v1, -inf  ;;  %v740_v8 = vmax.f32 %v738_v41, %v739_v11  ;;  %v126_v1 = vld [vmem:[%s3295_s0 + $0x3b0] sm:$0xff]  ;;  %v127_v41 = vld [vmem:[%s3295_s0 + $0x3b8] sm:$0x1] }
  0x7d   :  { %v748_v27 = vrot.slane %v747_v31, 2  ;;  %v756_v2 = vmax.f32 %v754_v48, %v755_v26  ;;  %v764_v37 = vrot.slane %v763_v14, 4  ;;  %v772_v54 = vmax.f32 %v770_v20, %v771_v10 }
  0x7e   :  { %3312 = vst [vmem:[#allocation17_spill] sm:$0xff] %v2271_v49  ;;  %v2281_v5 = vmax.f32 %v731_v53, %v732_v16  ;;  %v779_v28 = vsel %vm264_vm0, %v122_v19, -inf  ;;  %v780_v18 = vsel %vm266_vm1, %v123_v33, -inf  ;;  %v741_v36 = vrot.slane %v740_v8, 1 }
  0x7f   :  { %v749_v49 = vmax.f32 %v747_v31, %v748_v27  ;;  %v757_v60 = vrot.slane %v756_v2, 2  ;;  %v765_v32 = vmax.f32 %v763_v14, %v764_v37  ;;  %v773_v48 = vrot.slane %v772_v54, 4  ;;  %v128_v27 = vld [vmem:[%s3295_s0 + $0x3c0] sm:$0xff]  ;;  %v129_v31 = vld [vmem:[%s3295_s0 + $0x3c8] sm:$0x1] }
  0x80   :  { %3313 = vst [vmem:[#allocation18_spill] sm:$0xff] %v2281_v5  ;;  %v781_v53 = vmax.f32 %v779_v28, %v780_v18  ;;  %v788_v11 = vsel %vm264_vm0, %v124_v63, -inf  ;;  %v789_v19 = vsel %vm266_vm1, %v125_v61, -inf  ;;  %v2293_v26 = vmax.f32 %v740_v8, %v741_v36  ;;  %v131_v18 = vld [vmem:[%s3295_s0 + $0x3d8] sm:$0x1] }
  0x81   :  { %v750_v33 = vrot.slane %v749_v49, 1  ;;  %v758_v16 = vmax.f32 %v756_v2, %v757_v60  ;;  %v766_v20 = vrot.slane %v765_v32, 2  ;;  %v774_v14 = vmax.f32 %v772_v54, %v773_v48  ;;  %v130_v2 = vld [vmem:[%s3295_s0 + $0x3d0] sm:$0xff] }
  0x82   :  { %3314 = vst [vmem:[#allocation19_spill] sm:$0xff] %v2293_v26  ;;  %v782_v10 = vrot.slane %v781_v53, 4  ;;  %v790_v37 = vmax.f32 %v788_v11, %v789_v19  ;;  %v797_v63 = vsel %vm264_vm0, %v126_v1, -inf  ;;  %v798_v60 = vsel %vm266_vm1, %v127_v41, -inf  ;;  %v132_v41 = vld [vmem:[%s3295_s0 + $0x3e0] sm:$0xff] }
  0x83   :  { %v2302_v28 = vmax.f32 %v749_v49, %v750_v33  ;;  %v759_v61 = vrot.slane %v758_v16, 1  ;;  %v767_v8 = vmax.f32 %v765_v32, %v766_v20  ;;  %v775_v36 = vrot.slane %v774_v14, 2  ;;  %v133_v33 = vld [vmem:[%s3295_s0 + $0x3e8] sm:$0x1] }
  0x84   :  { %v783_v54 = vmax.f32 %v781_v53, %v782_v10  ;;  %v791_v48 = vrot.slane %v790_v37, 4  ;;  %v799_v11 = vmax.f32 %v797_v63, %v798_v60  ;;  %v806_v1 = vsel %vm264_vm0, %v128_v27, -inf }
  0x85   :  { %3315 = vst [vmem:[#allocation20_spill] sm:$0xff] %v2302_v28  ;;  %v2311_v19 = vmax.f32 %v758_v16, %v759_v61  ;;  %v768_v49 = vrot.slane %v767_v8, 1  ;;  %v807_v32 = vsel %vm266_vm1, %v129_v31, -inf  ;;  %v776_v20 = vmax.f32 %v774_v14, %v775_v36  ;;  %v134_v31 = vld [vmem:[%s3295_s0 + $0x3f0] sm:$0xff]  ;;  %v135_v14 = vld [vmem:[%s3295_s0 + $0x3f8] sm:$0x1] }
  0x86   :  { %v784_v28 = vrot.slane %v783_v54, 2  ;;  %v792_v53 = vmax.f32 %v790_v37, %v791_v48  ;;  %v800_v10 = vrot.slane %v799_v11, 4  ;;  %v808_v16 = vmax.f32 %v806_v1, %v807_v32 }
  0x87   :  { %3316 = vst [vmem:[#allocation21_spill] sm:$0xff] %v2311_v19  ;;  %v2321_v63 = vmax.f32 %v767_v8, %v768_v49  ;;  %v815_v61 = vsel %vm264_vm0, %v130_v2, -inf  ;;  %v816_v27 = vsel %vm266_vm1, %v131_v18, -inf  ;;  %v777_v60 = vrot.slane %v776_v20, 1 }
  0x88   :  { %v785_v19 = vmax.f32 %v783_v54, %v784_v28  ;;  %v793_v26 = vrot.slane %v792_v53, 2  ;;  %v801_v5 = vmax.f32 %v799_v11, %v800_v10  ;;  %v809_v37 = vrot.slane %v808_v16, 4  ;;  %v136_v28 = vld [vmem:[%s3295_s0 + $0x400] sm:$0xff]  ;;  %v137_v54 = vld [vmem:[%s3295_s0 + $0x408] sm:$0x1] }
  0x89   :  { %3317 = vst [vmem:[#allocation22_spill] sm:$0xff] %v2321_v63  ;;  %v817_v8 = vmax.f32 %v815_v61, %v816_v27  ;;  %v824_v36 = vsel %vm264_vm0, %v132_v41, -inf  ;;  %v825_v2 = vsel %vm266_vm1, %v133_v33, -inf  ;;  %v2333_v48 = vmax.f32 %v776_v20, %v777_v60  ;;  %v139_v27 = vld [vmem:[%s3295_s0 + $0x418] sm:$0x1] }
  0x8a   :  { %v786_v18 = vrot.slane %v785_v19, 1  ;;  %v794_v49 = vmax.f32 %v792_v53, %v793_v26  ;;  %v802_v1 = vrot.slane %v801_v5, 2  ;;  %v810_v11 = vmax.f32 %v808_v16, %v809_v37  ;;  %v138_v53 = vld [vmem:[%s3295_s0 + $0x410] sm:$0xff] }
  0x8b   :  { %3318 = vst [vmem:[#allocation23_spill] sm:$0xff] %v2333_v48  ;;  %v818_v32 = vrot.slane %v817_v8, 4  ;;  %v826_v10 = vmax.f32 %v824_v36, %v825_v2  ;;  %v833_v41 = vsel %vm264_vm0, %v134_v31, -inf  ;;  %v834_v26 = vsel %vm266_vm1, %v135_v14, -inf  ;;  %v140_v14 = vld [vmem:[%s3295_s0 + $0x420] sm:$0xff] }
  0x8c   :  { %v2342_v61 = vmax.f32 %v785_v19, %v786_v18  ;;  %v795_v33 = vrot.slane %v794_v49, 1  ;;  %v803_v20 = vmax.f32 %v801_v5, %v802_v1  ;;  %v811_v60 = vrot.slane %v810_v11, 2  ;;  %v141_v18 = vld [vmem:[%s3295_s0 + $0x428] sm:$0x1] }
  0x8d   :  { %v819_v16 = vmax.f32 %v817_v8, %v818_v32  ;;  %v827_v37 = vrot.slane %v826_v10, 4  ;;  %v835_v36 = vmax.f32 %v833_v41, %v834_v26  ;;  %v842_v31 = vsel %vm264_vm0, %v136_v28, -inf }
  0x8e   :  { %3319 = vst [vmem:[#allocation24_spill] sm:$0xff] %v2342_v61  ;;  %v2351_v2 = vmax.f32 %v794_v49, %v795_v33  ;;  %v804_v19 = vrot.slane %v803_v20, 1  ;;  %v843_v5 = vsel %vm266_vm1, %v137_v54, -inf  ;;  %v812_v1 = vmax.f32 %v810_v11, %v811_v60  ;;  %v142_v54 = vld [vmem:[%s3295_s0 + $0x430] sm:$0xff]  ;;  %v143_v11 = vld [vmem:[%s3295_s0 + $0x438] sm:$0x1] }
  0x8f   :  { %v820_v63 = vrot.slane %v819_v16, 2  ;;  %v828_v8 = vmax.f32 %v826_v10, %v827_v37  ;;  %v836_v32 = vrot.slane %v835_v36, 4  ;;  %v844_v49 = vmax.f32 %v842_v31, %v843_v5 }
  0x90   :  { %3320 = vst [vmem:[#allocation25_spill] sm:$0xff] %v2351_v2  ;;  %v2361_v41 = vmax.f32 %v803_v20, %v804_v19  ;;  %v851_v33 = vsel %vm264_vm0, %v138_v53, -inf  ;;  %v852_v28 = vsel %vm266_vm1, %v139_v27, -inf  ;;  %v813_v26 = vrot.slane %v812_v1, 1 }
  0x91   :  { %v821_v2 = vmax.f32 %v819_v16, %v820_v63  ;;  %v829_v61 = vrot.slane %v828_v8, 2  ;;  %v837_v48 = vmax.f32 %v835_v36, %v836_v32  ;;  %v845_v10 = vrot.slane %v844_v49, 4  ;;  %v144_v63 = vld [vmem:[%s3295_s0 + $0x440] sm:$0xff]  ;;  %v145_v16 = vld [vmem:[%s3295_s0 + $0x448] sm:$0x1] }
  0x92   :  { %3321 = vst [vmem:[#allocation26_spill] sm:$0xff] %v2361_v41  ;;  %v853_v20 = vmax.f32 %v851_v33, %v852_v28  ;;  %v860_v60 = vsel %vm264_vm0, %v140_v14, -inf  ;;  %v861_v53 = vsel %vm266_vm1, %v141_v18, -inf  ;;  %v2373_v37 = vmax.f32 %v812_v1, %v813_v26  ;;  %v147_v28 = vld [vmem:[%s3295_s0 + $0x458] sm:$0x1] }
  0x93   :  { %v822_v27 = vrot.slane %v821_v2, 1  ;;  %v830_v19 = vmax.f32 %v828_v8, %v829_v61  ;;  %v838_v31 = vrot.slane %v837_v48, 2  ;;  %v846_v36 = vmax.f32 %v844_v49, %v845_v10  ;;  %v146_v8 = vld [vmem:[%s3295_s0 + $0x450] sm:$0xff] }
  0x94   :  { %3322 = vst [vmem:[#allocation27_spill] sm:$0xff] %v2373_v37  ;;  %v854_v5 = vrot.slane %v853_v20, 4  ;;  %v862_v32 = vmax.f32 %v860_v60, %v861_v53  ;;  %v869_v14 = vsel %vm264_vm0, %v142_v54, -inf  ;;  %v870_v61 = vsel %vm266_vm1, %v143_v11, -inf  ;;  %v148_v11 = vld [vmem:[%s3295_s0 + $0x460] sm:$0xff] }
  0x95   :  { %v2382_v33 = vmax.f32 %v821_v2, %v822_v27  ;;  %v831_v18 = vrot.slane %v830_v19, 1  ;;  %v839_v1 = vmax.f32 %v837_v48, %v838_v31  ;;  %v847_v26 = vrot.slane %v846_v36, 2  ;;  %v149_v27 = vld [vmem:[%s3295_s0 + $0x468] sm:$0x1] }
  0x96   :  { %v855_v49 = vmax.f32 %v853_v20, %v854_v5  ;;  %v863_v10 = vrot.slane %v862_v32, 4  ;;  %v871_v60 = vmax.f32 %v869_v14, %v870_v61  ;;  %v878_v54 = vsel %vm264_vm0, %v144_v63, -inf }
  0x97   :  { %3323 = vst [vmem:[#allocation28_spill] sm:$0xff] %v2382_v33  ;;  %v2391_v53 = vmax.f32 %v830_v19, %v831_v18  ;;  %v840_v2 = vrot.slane %v839_v1, 1  ;;  %v879_v48 = vsel %vm266_vm1, %v145_v16, -inf  ;;  %v848_v31 = vmax.f32 %v846_v36, %v847_v26  ;;  %v150_v16 = vld [vmem:[%s3295_s0 + $0x470] sm:$0xff]  ;;  %v151_v36 = vld [vmem:[%s3295_s0 + $0x478] sm:$0x1] }
  0x98   :  { %v856_v33 = vrot.slane %v855_v49, 2  ;;  %v864_v20 = vmax.f32 %v862_v32, %v863_v10  ;;  %v872_v5 = vrot.slane %v871_v60, 4  ;;  %v880_v19 = vmax.f32 %v878_v54, %v879_v48 }
  0x99   :  { %3324 = vst [vmem:[#allocation29_spill] sm:$0xff] %v2391_v53  ;;  %v2401_v14 = vmax.f32 %v839_v1, %v840_v2  ;;  %v887_v18 = vsel %vm264_vm0, %v146_v8, -inf  ;;  %v888_v63 = vsel %vm266_vm1, %v147_v28, -inf  ;;  %v849_v61 = vrot.slane %v848_v31, 1 }
  0x9a   :  { %v857_v53 = vmax.f32 %v855_v49, %v856_v33  ;;  %v865_v37 = vrot.slane %v864_v20, 2  ;;  %v873_v41 = vmax.f32 %v871_v60, %v872_v5  ;;  %v881_v32 = vrot.slane %v880_v19, 4  ;;  %v152_v33 = vld [vmem:[%s3295_s0 + $0x480] sm:$0xff]  ;;  %v153_v49 = vld [vmem:[%s3295_s0 + $0x488] sm:$0x1] }
  0x9b   :  { %3325 = vst [vmem:[#allocation30_spill] sm:$0xff] %v2401_v14  ;;  %v889_v1 = vmax.f32 %v887_v18, %v888_v63  ;;  %v896_v26 = vsel %vm264_vm0, %v148_v11, -inf  ;;  %v897_v8 = vsel %vm266_vm1, %v149_v27, -inf  ;;  %v2413_v10 = vmax.f32 %v848_v31, %v849_v61  ;;  %v155_v63 = vld [vmem:[%s3295_s0 + $0x498] sm:$0x1] }
  0x9c   :  { %v858_v28 = vrot.slane %v857_v53, 1  ;;  %v866_v2 = vmax.f32 %v864_v20, %v865_v37  ;;  %v874_v54 = vrot.slane %v873_v41, 2  ;;  %v882_v60 = vmax.f32 %v880_v19, %v881_v32  ;;  %v154_v20 = vld [vmem:[%s3295_s0 + $0x490] sm:$0xff] }
  0x9d   :  { %3326 = vst [vmem:[#allocation31_spill] sm:$0xff] %v2413_v10  ;;  %v890_v48 = vrot.slane %v889_v1, 4  ;;  %v898_v5 = vmax.f32 %v896_v26, %v897_v8  ;;  %v905_v11 = vsel %vm264_vm0, %v150_v16, -inf  ;;  %v906_v37 = vsel %vm266_vm1, %v151_v36, -inf  ;;  %v156_v36 = vld [vmem:[%s3295_s0 + $0x4a0] sm:$0xff] }
  0x9e   :  { %v2422_v18 = vmax.f32 %v857_v53, %v858_v28  ;;  %v867_v27 = vrot.slane %v866_v2, 1  ;;  %v875_v31 = vmax.f32 %v873_v41, %v874_v54  ;;  %v883_v61 = vrot.slane %v882_v60, 2  ;;  %v157_v28 = vld [vmem:[%s3295_s0 + $0x4a8] sm:$0x1] }
  0x9f   :  { %v891_v19 = vmax.f32 %v889_v1, %v890_v48  ;;  %v899_v32 = vrot.slane %v898_v5, 4  ;;  %v907_v26 = vmax.f32 %v905_v11, %v906_v37  ;;  %v914_v16 = vsel %vm264_vm0, %v152_v33, -inf }
  0xa0   :  { %3327 = vst [vmem:[#allocation32_spill] sm:$0xff] %v2422_v18  ;;  %v2431_v8 = vmax.f32 %v866_v2, %v867_v27  ;;  %v876_v53 = vrot.slane %v875_v31, 1  ;;  %v915_v41 = vsel %vm266_vm1, %v153_v49, -inf  ;;  %v884_v54 = vmax.f32 %v882_v60, %v883_v61  ;;  %v158_v49 = vld [vmem:[%s3295_s0 + $0x4b0] sm:$0xff]  ;;  %v159_v60 = vld [vmem:[%s3295_s0 + $0x4b8] sm:$0x1] }
  0xa1   :  { %v892_v14 = vrot.slane %v891_v19, 2  ;;  %v900_v1 = vmax.f32 %v898_v5, %v899_v32  ;;  %v908_v48 = vrot.slane %v907_v26, 4  ;;  %v916_v2 = vmax.f32 %v914_v16, %v915_v41 }
  0xa2   :  { %3328 = vst [vmem:[#allocation33_spill] sm:$0xff] %v2431_v8  ;;  %v2441_v11 = vmax.f32 %v875_v31, %v876_v53  ;;  %v923_v27 = vsel %vm264_vm0, %v154_v20, -inf  ;;  %v924_v33 = vsel %vm266_vm1, %v155_v63, -inf  ;;  %v885_v37 = vrot.slane %v884_v54, 1 }
  0xa3   :  { %v893_v8 = vmax.f32 %v891_v19, %v892_v14  ;;  %v901_v18 = vrot.slane %v900_v1, 2  ;;  %v909_v10 = vmax.f32 %v907_v26, %v908_v48  ;;  %v917_v5 = vrot.slane %v916_v2, 4  ;;  %v160_v14 = vld [vmem:[%s3295_s0 + $0x4c0] sm:$0xff]  ;;  %v161_v19 = vld [vmem:[%s3295_s0 + $0x4c8] sm:$0x1] }
  0xa4   :  { %3329 = vst [vmem:[#allocation34_spill] sm:$0xff] %v2441_v11  ;;  %v925_v31 = vmax.f32 %v923_v27, %v924_v33  ;;  %v932_v61 = vsel %vm264_vm0, %v156_v36, -inf  ;;  %v933_v20 = vsel %vm266_vm1, %v157_v28, -inf  ;;  %v2453_v32 = vmax.f32 %v884_v54, %v885_v37  ;;  %v163_v33 = vld [vmem:[%s3295_s0 + $0x4d8] sm:$0x1] }
  0xa5   :  { %v894_v63 = vrot.slane %v893_v8, 1  ;;  %v902_v53 = vmax.f32 %v900_v1, %v901_v18  ;;  %v910_v16 = vrot.slane %v909_v10, 2  ;;  %v918_v26 = vmax.f32 %v916_v2, %v917_v5  ;;  %v162_v1 = vld [vmem:[%s3295_s0 + $0x4d0] sm:$0xff] }
  0xa6   :  { %3330 = vst [vmem:[#allocation35_spill] sm:$0xff] %v2453_v32  ;;  %v926_v41 = vrot.slane %v925_v31, 4  ;;  %v934_v48 = vmax.f32 %v932_v61, %v933_v20  ;;  %v941_v36 = vsel %vm264_vm0, %v158_v49, -inf  ;;  %v942_v18 = vsel %vm266_vm1, %v159_v60, -inf  ;;  %v164_v60 = vld [vmem:[%s3295_s0 + $0x4e0] sm:$0xff] }
  0xa7   :  { %v2462_v27 = vmax.f32 %v893_v8, %v894_v63  ;;  %v903_v28 = vrot.slane %v902_v53, 1  ;;  %v911_v54 = vmax.f32 %v909_v10, %v910_v16  ;;  %v919_v37 = vrot.slane %v918_v26, 2  ;;  %v165_v63 = vld [vmem:[%s3295_s0 + $0x4e8] sm:$0x1] }
  0xa8   :  { %v927_v2 = vmax.f32 %v925_v31, %v926_v41  ;;  %v935_v5 = vrot.slane %v934_v48, 4  ;;  %v943_v61 = vmax.f32 %v941_v36, %v942_v18  ;;  %v950_v49 = vsel %vm264_vm0, %v160_v14, -inf }
  0xa9   :  { %3331 = vst [vmem:[#allocation36_spill] sm:$0xff] %v2462_v27  ;;  %v2471_v20 = vmax.f32 %v902_v53, %v903_v28  ;;  %v912_v8 = vrot.slane %v911_v54, 1  ;;  %v951_v10 = vsel %vm266_vm1, %v161_v19, -inf  ;;  %v920_v16 = vmax.f32 %v918_v26, %v919_v37  ;;  %v166_v19 = vld [vmem:[%s3295_s0 + $0x4f0] sm:$0xff]  ;;  %v167_v26 = vld [vmem:[%s3295_s0 + $0x4f8] sm:$0x1] }
  0xaa   :  { %v928_v27 = vrot.slane %v927_v2, 2  ;;  %v936_v31 = vmax.f32 %v934_v48, %v935_v5  ;;  %v944_v41 = vrot.slane %v943_v61, 4  ;;  %v952_v53 = vmax.f32 %v950_v49, %v951_v10 }
  0xab   :  { %3332 = vst [vmem:[#allocation37_spill] sm:$0xff] %v2471_v20  ;;  %v2481_v36 = vmax.f32 %v911_v54, %v912_v8  ;;  %v959_v28 = vsel %vm264_vm0, %v162_v1, -inf  ;;  %v960_v14 = vsel %vm266_vm1, %v163_v33, -inf  ;;  %v921_v18 = vrot.slane %v920_v16, 1 }
  0xac   :  { %v929_v20 = vmax.f32 %v927_v2, %v928_v27  ;;  %v937_v32 = vrot.slane %v936_v31, 2  ;;  %v945_v11 = vmax.f32 %v943_v61, %v944_v41  ;;  %v953_v48 = vrot.slane %v952_v53, 4  ;;  %v168_v27 = vld [vmem:[%s3295_s0 + $0x500] sm:$0xff]  ;;  %v169_v2 = vld [vmem:[%s3295_s0 + $0x508] sm:$0x1] }
  0xad   :  { %3333 = vst [vmem:[#allocation38_spill] sm:$0xff] %v2481_v36  ;;  %v961_v54 = vmax.f32 %v959_v28, %v960_v14  ;;  %v968_v37 = vsel %vm264_vm0, %v164_v60, -inf  ;;  %v969_v1 = vsel %vm266_vm1, %v165_v63, -inf  ;;  %v2493_v5 = vmax.f32 %v920_v16, %v921_v18  ;;  %v171_v14 = vld [vmem:[%s3295_s0 + $0x518] sm:$0x1] }
  0xae   :  { %v930_v33 = vrot.slane %v929_v20, 1  ;;  %v938_v8 = vmax.f32 %v936_v31, %v937_v32  ;;  %v946_v49 = vrot.slane %v945_v11, 2  ;;  %v954_v61 = vmax.f32 %v952_v53, %v953_v48  ;;  %v170_v31 = vld [vmem:[%s3295_s0 + $0x510] sm:$0xff] }
  0xaf   :  { %3334 = vst [vmem:[#allocation39_spill] sm:$0xff] %v2493_v5  ;;  %v962_v10 = vrot.slane %v961_v54, 4  ;;  %v970_v41 = vmax.f32 %v968_v37, %v969_v1  ;;  %v977_v60 = vsel %vm264_vm0, %v166_v19, -inf  ;;  %v978_v32 = vsel %vm266_vm1, %v167_v26, -inf  ;;  %v172_v26 = vld [vmem:[%s3295_s0 + $0x520] sm:$0xff] }
  0xb0   :  { %v2502_v28 = vmax.f32 %v929_v20, %v930_v33  ;;  %v939_v63 = vrot.slane %v938_v8, 1  ;;  %v947_v16 = vmax.f32 %v945_v11, %v946_v49  ;;  %v955_v18 = vrot.slane %v954_v61, 2  ;;  %v173_v33 = vld [vmem:[%s3295_s0 + $0x528] sm:$0x1] }
  0xb1   :  { %v963_v53 = vmax.f32 %v961_v54, %v962_v10  ;;  %v971_v48 = vrot.slane %v970_v41, 4  ;;  %v979_v37 = vmax.f32 %v977_v60, %v978_v32  ;;  %v986_v19 = vsel %vm264_vm0, %v168_v27, -inf }
  0xb2   :  { %3335 = vst [vmem:[#allocation40_spill] sm:$0xff] %v2502_v28  ;;  %v2511_v1 = vmax.f32 %v938_v8, %v939_v63  ;;  %v948_v20 = vrot.slane %v947_v16, 1  ;;  %v987_v11 = vsel %vm266_vm1, %v169_v2, -inf  ;;  %v956_v49 = vmax.f32 %v954_v61, %v955_v18  ;;  %v174_v2 = vld [vmem:[%s3295_s0 + $0x530] sm:$0xff]  ;;  %v175_v61 = vld [vmem:[%s3295_s0 + $0x538] sm:$0x1] }
  0xb3   :  { %v964_v36 = vrot.slane %v963_v53, 2  ;;  %v972_v54 = vmax.f32 %v970_v41, %v971_v48  ;;  %v980_v10 = vrot.slane %v979_v37, 4  ;;  %v988_v8 = vmax.f32 %v986_v19, %v987_v11 }
  0xb4   :  { %3336 = vst [vmem:[#allocation41_spill] sm:$0xff] %v2511_v1  ;;  %v2521_v60 = vmax.f32 %v947_v16, %v948_v20  ;;  %v995_v63 = vsel %vm264_vm0, %v170_v31, -inf  ;;  %v996_v27 = vsel %vm266_vm1, %v171_v14, -inf  ;;  %v957_v32 = vrot.slane %v956_v49, 1 }
  0xb5   :  { %v965_v1 = vmax.f32 %v963_v53, %v964_v36  ;;  %v973_v28 = vrot.slane %v972_v54, 2  ;;  %v981_v5 = vmax.f32 %v979_v37, %v980_v10  ;;  %v989_v41 = vrot.slane %v988_v8, 4  ;;  %v176_v36 = vld [vmem:[%s3295_s0 + $0x540] sm:$0xff]  ;;  %v177_v53 = vld [vmem:[%s3295_s0 + $0x548] sm:$0x1] }
  0xb6   :  { %3337 = vst [vmem:[#allocation42_spill] sm:$0xff] %v2521_v60  ;;  %v997_v16 = vmax.f32 %v995_v63, %v996_v27  ;;  %v1004_v18 = vsel %vm264_vm0, %v172_v26, -inf  ;;  %v1005_v31 = vsel %vm266_vm1, %v173_v33, -inf  ;;  %v2533_v48 = vmax.f32 %v956_v49, %v957_v32  ;;  %v179_v27 = vld [vmem:[%s3295_s0 + $0x558] sm:$0x1] }
  0xb7   :  { %v966_v14 = vrot.slane %v965_v1, 1  ;;  %v974_v20 = vmax.f32 %v972_v54, %v973_v28  ;;  %v982_v19 = vrot.slane %v981_v5, 2  ;;  %v990_v37 = vmax.f32 %v988_v8, %v989_v41  ;;  %v178_v54 = vld [vmem:[%s3295_s0 + $0x550] sm:$0xff] }
  0xb8   :  { %3338 = vst [vmem:[#allocation43_spill] sm:$0xff] %v2533_v48  ;;  %v998_v11 = vrot.slane %v997_v16, 4  ;;  %v1006_v10 = vmax.f32 %v1004_v18, %v1005_v31  ;;  %v1013_v26 = vsel %vm264_vm0, %v174_v2, -inf  ;;  %v1014_v28 = vsel %vm266_vm1, %v175_v61, -inf  ;;  %v180_v61 = vld [vmem:[%s3295_s0 + $0x560] sm:$0xff] }
  0xb9   :  { %v2542_v63 = vmax.f32 %v965_v1, %v966_v14  ;;  %v975_v33 = vrot.slane %v974_v20, 1  ;;  %v983_v49 = vmax.f32 %v981_v5, %v982_v19  ;;  %v991_v32 = vrot.slane %v990_v37, 2  ;;  %v181_v14 = vld [vmem:[%s3295_s0 + $0x568] sm:$0x1] }
  0xba   :  { %v999_v8 = vmax.f32 %v997_v16, %v998_v11  ;;  %v1007_v41 = vrot.slane %v1006_v10, 4  ;;  %v1015_v18 = vmax.f32 %v1013_v26, %v1014_v28  ;;  %v1022_v2 = vsel %vm264_vm0, %v176_v36, -inf }
  0xbb   :  { %3339 = vst [vmem:[#allocation44_spill] sm:$0xff] %v2542_v63  ;;  %v2551_v31 = vmax.f32 %v974_v20, %v975_v33  ;;  %v984_v1 = vrot.slane %v983_v49, 1  ;;  %v1023_v5 = vsel %vm266_vm1, %v177_v53, -inf  ;;  %v992_v19 = vmax.f32 %v990_v37, %v991_v32  ;;  %v182_v53 = vld [vmem:[%s3295_s0 + $0x570] sm:$0xff]  ;;  %v183_v37 = vld [vmem:[%s3295_s0 + $0x578] sm:$0x1] }
  0xbc   :  { %v1000_v63 = vrot.slane %v999_v8, 2  ;;  %v1008_v16 = vmax.f32 %v1006_v10, %v1007_v41  ;;  %v1016_v11 = vrot.slane %v1015_v18, 4  ;;  %v1024_v20 = vmax.f32 %v1022_v2, %v1023_v5 }
  0xbd   :  { %3340 = vst [vmem:[#allocation45_spill] sm:$0xff] %v2551_v31  ;;  %v2561_v26 = vmax.f32 %v983_v49, %v984_v1  ;;  %v1031_v33 = vsel %vm264_vm0, %v178_v54, -inf  ;;  %v1032_v36 = vsel %vm266_vm1, %v179_v27, -inf  ;;  %v993_v28 = vrot.slane %v992_v19, 1 }
  0xbe   :  { %v1001_v31 = vmax.f32 %v999_v8, %v1000_v63  ;;  %v1009_v48 = vrot.slane %v1008_v16, 2  ;;  %v1017_v60 = vmax.f32 %v1015_v18, %v1016_v11  ;;  %v1025_v10 = vrot.slane %v1024_v20, 4  ;;  %v184_v63 = vld [vmem:[%s3295_s0 + $0x580] sm:$0xff]  ;;  %v185_v8 = vld [vmem:[%s3295_s0 + $0x588] sm:$0x1] }
  0xbf   :  { %3341 = vst [vmem:[#allocation46_spill] sm:$0xff] %v2561_v26  ;;  %v1033_v49 = vmax.f32 %v1031_v33, %v1032_v36  ;;  %v1040_v32 = vsel %vm264_vm0, %v180_v61, -inf  ;;  %v1041_v54 = vsel %vm266_vm1, %v181_v14, -inf  ;;  %v2573_v41 = vmax.f32 %v992_v19, %v993_v28  ;;  %v187_v36 = vld [vmem:[%s3295_s0 + $0x598] sm:$0x1] }
  0xc0   :  { %v1002_v27 = vrot.slane %v1001_v31, 1  ;;  %v1010_v1 = vmax.f32 %v1008_v16, %v1009_v48  ;;  %v1018_v2 = vrot.slane %v1017_v60, 2  ;;  %v1026_v18 = vmax.f32 %v1024_v20, %v1025_v10  ;;  %v186_v16 = vld [vmem:[%s3295_s0 + $0x590] sm:$0xff] }
  0xc1   :  { %3342 = vst [vmem:[#allocation47_spill] sm:$0xff] %v2573_v41  ;;  %v1034_v5 = vrot.slane %v1033_v49, 4  ;;  %v1042_v11 = vmax.f32 %v1040_v32, %v1041_v54  ;;  %v1049_v61 = vsel %vm264_vm0, %v182_v53, -inf  ;;  %v1050_v48 = vsel %vm266_vm1, %v183_v37, -inf  ;;  %v188_v37 = vld [vmem:[%s3295_s0 + $0x5a0] sm:$0xff] }
  0xc2   :  { %v2582_v33 = vmax.f32 %v1001_v31, %v1002_v27  ;;  %v1011_v14 = vrot.slane %v1010_v1, 1  ;;  %v1019_v19 = vmax.f32 %v1017_v60, %v1018_v2  ;;  %v1027_v28 = vrot.slane %v1026_v18, 2  ;;  %v189_v27 = vld [vmem:[%s3295_s0 + $0x5a8] sm:$0x1] }
  0xc3   :  { %v1035_v20 = vmax.f32 %v1033_v49, %v1034_v5  ;;  %v1043_v10 = vrot.slane %v1042_v11, 4  ;;  %v1051_v32 = vmax.f32 %v1049_v61, %v1050_v48  ;;  %v1058_v53 = vsel %vm264_vm0, %v184_v63, -inf }
  0xc4   :  { %3343 = vst [vmem:[#allocation48_spill] sm:$0xff] %v2582_v33  ;;  %v2591_v54 = vmax.f32 %v1010_v1, %v1011_v14  ;;  %v1020_v31 = vrot.slane %v1019_v19, 1  ;;  %v1059_v60 = vsel %vm266_vm1, %v185_v8, -inf  ;;  %v1028_v2 = vmax.f32 %v1026_v18, %v1027_v28  ;;  %v190_v8 = vld [vmem:[%s3295_s0 + $0x5b0] sm:$0xff]  ;;  %v191_v18 = vld [vmem:[%s3295_s0 + $0x5b8] sm:$0x1] }
  0xc5   :  { %v1036_v26 = vrot.slane %v1035_v20, 2  ;;  %v1044_v49 = vmax.f32 %v1042_v11, %v1043_v10  ;;  %v1052_v5 = vrot.slane %v1051_v32, 4  ;;  %v1060_v1 = vmax.f32 %v1058_v53, %v1059_v60 }
  0xc6   :  { %3344 = vst [vmem:[#allocation49_spill] sm:$0xff] %v2591_v54  ;;  %v2601_v61 = vmax.f32 %v1019_v19, %v1020_v31  ;;  %v1067_v14 = vsel %vm264_vm0, %v186_v16, -inf  ;;  %v1068_v63 = vsel %vm266_vm1, %v187_v36, -inf  ;;  %v1029_v48 = vrot.slane %v1028_v2, 1 }
  0xc7   :  { %v1037_v54 = vmax.f32 %v1035_v20, %v1036_v26  ;;  %v1045_v33 = vrot.slane %v1044_v49, 2  ;;  %v1053_v41 = vmax.f32 %v1051_v32, %v1052_v5  ;;  %v1061_v11 = vrot.slane %v1060_v1, 4  ;;  %v192_v26 = vld [vmem:[%s3295_s0 + $0x5c0] sm:$0xff]  ;;  %v193_v20 = vld [vmem:[%s3295_s0 + $0x5c8] sm:$0x1] }
  0xc8   :  { %3345 = vst [vmem:[#allocation50_spill] sm:$0xff] %v2601_v61  ;;  %v1069_v19 = vmax.f32 %v1067_v14, %v1068_v63  ;;  %v1076_v28 = vsel %vm264_vm0, %v188_v37, -inf  ;;  %v1077_v16 = vsel %vm266_vm1, %v189_v27, -inf  ;;  %v2613_v10 = vmax.f32 %v1028_v2, %v1029_v48  ;;  %v195_v63 = vld [vmem:[%s3295_s0 + $0x5d8] sm:$0x1] }
  0xc9   :  { %v1038_v36 = vrot.slane %v1037_v54, 1  ;;  %v1046_v31 = vmax.f32 %v1044_v49, %v1045_v33  ;;  %v1054_v53 = vrot.slane %v1053_v41, 2  ;;  %v1062_v32 = vmax.f32 %v1060_v1, %v1061_v11  ;;  %v194_v49 = vld [vmem:[%s3295_s0 + $0x5d0] sm:$0xff] }
  0xca   :  { %3346 = vst [vmem:[#allocation51_spill] sm:$0xff] %v2613_v10  ;;  %v1070_v60 = vrot.slane %v1069_v19, 4  ;;  %v1078_v5 = vmax.f32 %v1076_v28, %v1077_v16  ;;  %v1085_v37 = vsel %vm264_vm0, %v190_v8, -inf  ;;  %v1086_v33 = vsel %vm266_vm1, %v191_v18, -inf  ;;  %v196_v18 = vld [vmem:[%s3295_s0 + $0x5e0] sm:$0xff] }
  0xcb   :  { %v2622_v14 = vmax.f32 %v1037_v54, %v1038_v36  ;;  %v1047_v27 = vrot.slane %v1046_v31, 1  ;;  %v1055_v2 = vmax.f32 %v1053_v41, %v1054_v53  ;;  %v1063_v48 = vrot.slane %v1062_v32, 2  ;;  %v197_v36 = vld [vmem:[%s3295_s0 + $0x5e8] sm:$0x1] }
  0xcc   :  { %v1071_v1 = vmax.f32 %v1069_v19, %v1070_v60  ;;  %v1079_v11 = vrot.slane %v1078_v5, 4  ;;  %v1087_v28 = vmax.f32 %v1085_v37, %v1086_v33  ;;  %v1094_v8 = vsel %vm264_vm0, %v192_v26, -inf }
  0xcd   :  { %3347 = vst [vmem:[#allocation52_spill] sm:$0xff] %v2622_v14  ;;  %v2631_v16 = vmax.f32 %v1046_v31, %v1047_v27  ;;  %v1056_v54 = vrot.slane %v1055_v2, 1  ;;  %v1095_v41 = vsel %vm266_vm1, %v193_v20, -inf  ;;  %v1064_v53 = vmax.f32 %v1062_v32, %v1063_v48  ;;  %v198_v20 = vld [vmem:[%s3295_s0 + $0x5f0] sm:$0xff]  ;;  %v199_v32 = vld [vmem:[%s3295_s0 + $0x5f8] sm:$0x1] }
  0xce   :  { %v1072_v14 = vrot.slane %v1071_v1, 2  ;;  %v1080_v19 = vmax.f32 %v1078_v5, %v1079_v11  ;;  %v1088_v60 = vrot.slane %v1087_v28, 4  ;;  %v1096_v31 = vmax.f32 %v1094_v8, %v1095_v41 }
  0xcf   :  { %3348 = vst [vmem:[#allocation53_spill] sm:$0xff] %v2631_v16  ;;  %v2641_v37 = vmax.f32 %v1055_v2, %v1056_v54  ;;  %v1103_v27 = vsel %vm264_vm0, %v194_v49, -inf  ;;  %v1104_v26 = vsel %vm266_vm1, %v195_v63, -inf  ;;  %v1065_v33 = vrot.slane %v1064_v53, 1 }
  0xd0   :  { %v1073_v16 = vmax.f32 %v1071_v1, %v1072_v14  ;;  %v1081_v10 = vrot.slane %v1080_v19, 2  ;;  %v1089_v61 = vmax.f32 %v1087_v28, %v1088_v60  ;;  %v1097_v5 = vrot.slane %v1096_v31, 4  ;;  %v200_v14 = vld [vmem:[%s3295_s0 + $0x600] sm:$0xff]  ;;  %v201_v1 = vld [vmem:[%s3295_s0 + $0x608] sm:$0x1] }
  0xd1   :  { %3349 = vst [vmem:[#allocation54_spill] sm:$0xff] %v2641_v37  ;;  %v1105_v2 = vmax.f32 %v1103_v27, %v1104_v26  ;;  %v1112_v48 = vsel %vm264_vm0, %v196_v18, -inf  ;;  %v1113_v49 = vsel %vm266_vm1, %v197_v36, -inf  ;;  %v2653_v11 = vmax.f32 %v1064_v53, %v1065_v33  ;;  %v203_v26 = vld [vmem:[%s3295_s0 + $0x618] sm:$0x1] }
  0xd2   :  { %v1074_v63 = vrot.slane %v1073_v16, 1  ;;  %v1082_v54 = vmax.f32 %v1080_v19, %v1081_v10  ;;  %v1090_v8 = vrot.slane %v1089_v61, 2  ;;  %v1098_v28 = vmax.f32 %v1096_v31, %v1097_v5  ;;  %v202_v19 = vld [vmem:[%s3295_s0 + $0x610] sm:$0xff] }
  0xd3   :  { %3350 = vst [vmem:[#allocation55_spill] sm:$0xff] %v2653_v11  ;;  %v1106_v41 = vrot.slane %v1105_v2, 4  ;;  %v1114_v60 = vmax.f32 %v1112_v48, %v1113_v49  ;;  %v1121_v18 = vsel %vm264_vm0, %v198_v20, -inf  ;;  %v1122_v10 = vsel %vm266_vm1, %v199_v32, -inf  ;;  %v204_v32 = vld [vmem:[%s3295_s0 + $0x620] sm:$0xff] }
  0xd4   :  { %v2662_v27 = vmax.f32 %v1073_v16, %v1074_v63  ;;  %v1083_v36 = vrot.slane %v1082_v54, 1  ;;  %v1091_v53 = vmax.f32 %v1089_v61, %v1090_v8  ;;  %v1099_v33 = vrot.slane %v1098_v28, 2  ;;  %v205_v63 = vld [vmem:[%s3295_s0 + $0x628] sm:$0x1] }
  0xd5   :  { %v1107_v31 = vmax.f32 %v1105_v2, %v1106_v41  ;;  %v1115_v5 = vrot.slane %v1114_v60, 4  ;;  %v1123_v48 = vmax.f32 %v1121_v18, %v1122_v10  ;;  %v1130_v20 = vsel %vm264_vm0, %v200_v14, -inf }
  0xd6   :  { %3351 = vst [vmem:[#allocation56_spill] sm:$0xff] %v2662_v27  ;;  %v2671_v49 = vmax.f32 %v1082_v54, %v1083_v36  ;;  %v1092_v16 = vrot.slane %v1091_v53, 1  ;;  %v1131_v61 = vsel %vm266_vm1, %v201_v1, -inf  ;;  %v1100_v8 = vmax.f32 %v1098_v28, %v1099_v33  ;;  %v206_v1 = vld [vmem:[%s3295_s0 + $0x630] sm:$0xff]  ;;  %v207_v28 = vld [vmem:[%s3295_s0 + $0x638] sm:$0x1] }
  0xd7   :  { %v1108_v37 = vrot.slane %v1107_v31, 2  ;;  %v1116_v2 = vmax.f32 %v1114_v60, %v1115_v5  ;;  %v1124_v41 = vrot.slane %v1123_v48, 4  ;;  %v1132_v54 = vmax.f32 %v1130_v20, %v1131_v61 }
  0xd8   :  { %3352 = vst [vmem:[#allocation57_spill] sm:$0xff] %v2671_v49  ;;  %v2681_v18 = vmax.f32 %v1091_v53, %v1092_v16  ;;  %v1139_v36 = vsel %vm264_vm0, %v202_v19, -inf  ;;  %v1140_v14 = vsel %vm266_vm1, %v203_v26, -inf  ;;  %v1101_v10 = vrot.slane %v1100_v8, 1 }
  0xd9   :  { %v1109_v49 = vmax.f32 %v1107_v31, %v1108_v37  ;;  %v1117_v27 = vrot.slane %v1116_v2, 2  ;;  %v1125_v11 = vmax.f32 %v1123_v48, %v1124_v41  ;;  %v1133_v60 = vrot.slane %v1132_v54, 4  ;;  %v208_v37 = vld [vmem:[%s3295_s0 + $0x640] sm:$0xff]  ;;  %v209_v31 = vld [vmem:[%s3295_s0 + $0x648] sm:$0x1] }
  0xda   :  { %3353 = vst [vmem:[#allocation58_spill] sm:$0xff] %v2681_v18  ;;  %v1141_v53 = vmax.f32 %v1139_v36, %v1140_v14  ;;  %v1148_v33 = vsel %vm264_vm0, %v204_v32, -inf  ;;  %v1149_v19 = vsel %vm266_vm1, %v205_v63, -inf  ;;  %v2693_v5 = vmax.f32 %v1100_v8, %v1101_v10  ;;  %v211_v14 = vld [vmem:[%s3295_s0 + $0x658] sm:$0x1] }
  0xdb   :  { %v1110_v26 = vrot.slane %v1109_v49, 1  ;;  %v1118_v16 = vmax.f32 %v1116_v2, %v1117_v27  ;;  %v1126_v20 = vrot.slane %v1125_v11, 2  ;;  %v1134_v48 = vmax.f32 %v1132_v54, %v1133_v60  ;;  %v210_v2 = vld [vmem:[%s3295_s0 + $0x650] sm:$0xff] }
  0xdc   :  { %3354 = vst [vmem:[#allocation59_spill] sm:$0xff] %v2693_v5  ;;  %v1142_v61 = vrot.slane %v1141_v53, 4  ;;  %v1150_v41 = vmax.f32 %v1148_v33, %v1149_v19  ;;  %v1157_v32 = vsel %vm264_vm0, %v206_v1, -inf  ;;  %v1158_v27 = vsel %vm266_vm1, %v207_v28, -inf  ;;  %v212_v28 = vld [vmem:[%s3295_s0 + $0x660] sm:$0xff] }
  0xdd   :  { %v2702_v36 = vmax.f32 %v1109_v49, %v1110_v26  ;;  %v1119_v63 = vrot.slane %v1118_v16, 1  ;;  %v1127_v8 = vmax.f32 %v1125_v11, %v1126_v20  ;;  %v1135_v10 = vrot.slane %v1134_v48, 2  ;;  %v213_v26 = vld [vmem:[%s3295_s0 + $0x668] sm:$0x1] }
  0xde   :  { %v1143_v54 = vmax.f32 %v1141_v53, %v1142_v61  ;;  %v1151_v60 = vrot.slane %v1150_v41, 4  ;;  %v1159_v33 = vmax.f32 %v1157_v32, %v1158_v27  ;;  %v1166_v1 = vsel %vm264_vm0, %v208_v37, -inf }
  0xdf   :  { %3355 = vst [vmem:[#allocation60_spill] sm:$0xff] %v2702_v36  ;;  %v2711_v19 = vmax.f32 %v1118_v16, %v1119_v63  ;;  %v1128_v49 = vrot.slane %v1127_v8, 1  ;;  %v1167_v11 = vsel %vm266_vm1, %v209_v31, -inf  ;;  %v1136_v20 = vmax.f32 %v1134_v48, %v1135_v10  ;;  %v214_v31 = vld [vmem:[%s3295_s0 + $0x670] sm:$0xff]  ;;  %v215_v48 = vld [vmem:[%s3295_s0 + $0x678] sm:$0x1] }
  0xe0   :  { %v1144_v36 = vrot.slane %v1143_v54, 2  ;;  %v1152_v53 = vmax.f32 %v1150_v41, %v1151_v60  ;;  %v1160_v61 = vrot.slane %v1159_v33, 4  ;;  %v1168_v16 = vmax.f32 %v1166_v1, %v1167_v11 }
  0xe1   :  { %3356 = vst [vmem:[#allocation61_spill] sm:$0xff] %v2711_v19  ;;  %v2721_v32 = vmax.f32 %v1127_v8, %v1128_v49  ;;  %v1175_v63 = vsel %vm264_vm0, %v210_v2, -inf  ;;  %v1176_v37 = vsel %vm266_vm1, %v211_v14, -inf  ;;  %v1137_v27 = vrot.slane %v1136_v20, 1 }
  0xe2   :  { %v1145_v19 = vmax.f32 %v1143_v54, %v1144_v36  ;;  %v1153_v5 = vrot.slane %v1152_v53, 2  ;;  %v1161_v18 = vmax.f32 %v1159_v33, %v1160_v61  ;;  %v1169_v41 = vrot.slane %v1168_v16, 4  ;;  %v216_v36 = vld [vmem:[%s3295_s0 + $0x680] sm:$0xff]  ;;  %v217_v54 = vld [vmem:[%s3295_s0 + $0x688] sm:$0x1] }
  0xe3   :  { %3357 = vst [vmem:[#allocation62_spill] sm:$0xff] %v2721_v32  ;;  %v1177_v8 = vmax.f32 %v1175_v63, %v1176_v37  ;;  %v1184_v10 = vsel %vm264_vm0, %v212_v28, -inf  ;;  %v1185_v2 = vsel %vm266_vm1, %v213_v26, -inf  ;;  %v2733_v60 = vmax.f32 %v1136_v20, %v1137_v27  ;;  %v219_v37 = vld [vmem:[%s3295_s0 + $0x698] sm:$0x1] }
  0xe4   :  { %v1146_v14 = vrot.slane %v1145_v19, 1  ;;  %v1154_v49 = vmax.f32 %v1152_v53, %v1153_v5  ;;  %v1162_v1 = vrot.slane %v1161_v18, 2  ;;  %v1170_v33 = vmax.f32 %v1168_v16, %v1169_v41  ;;  %v218_v53 = vld [vmem:[%s3295_s0 + $0x690] sm:$0xff] }
  0xe5   :  { %3358 = vst [vmem:[#allocation63_spill] sm:$0xff] %v2733_v60  ;;  %v1178_v11 = vrot.slane %v1177_v8, 4  ;;  %v1186_v61 = vmax.f32 %v1184_v10, %v1185_v2  ;;  %v1193_v28 = vsel %vm264_vm0, %v214_v31, -inf  ;;  %v1194_v5 = vsel %vm266_vm1, %v215_v48, -inf  ;;  %v220_v48 = vld [vmem:[%s3295_s0 + $0x6a0] sm:$0xff] }
  0xe6   :  { %v2742_v63 = vmax.f32 %v1145_v19, %v1146_v14  ;;  %v1155_v26 = vrot.slane %v1154_v49, 1  ;;  %v1163_v20 = vmax.f32 %v1161_v18, %v1162_v1  ;;  %v1171_v27 = vrot.slane %v1170_v33, 2  ;;  %v221_v14 = vld [vmem:[%s3295_s0 + $0x6a8] sm:$0x1] }
  0xe7   :  { %v1179_v16 = vmax.f32 %v1177_v8, %v1178_v11  ;;  %v1187_v41 = vrot.slane %v1186_v61, 4  ;;  %v1195_v10 = vmax.f32 %v1193_v28, %v1194_v5  ;;  %v1202_v31 = vsel %vm264_vm0, %v216_v36, -inf }
  0xe8   :  { %3359 = vst [vmem:[#allocation64_spill] sm:$0xff] %v2742_v63  ;;  %v2751_v2 = vmax.f32 %v1154_v49, %v1155_v26  ;;  %v1164_v19 = vrot.slane %v1163_v20, 1  ;;  %v1203_v18 = vsel %vm266_vm1, %v217_v54, -inf  ;;  %v1172_v1 = vmax.f32 %v1170_v33, %v1171_v27  ;;  %v222_v54 = vld [vmem:[%s3295_s0 + $0x6b0] sm:$0xff]  ;;  %v223_v33 = vld [vmem:[%s3295_s0 + $0x6b8] sm:$0x1] }
  0xe9   :  { %v1180_v32 = vrot.slane %v1179_v16, 2  ;;  %v1188_v8 = vmax.f32 %v1186_v61, %v1187_v41  ;;  %v1196_v11 = vrot.slane %v1195_v10, 4  ;;  %v1204_v49 = vmax.f32 %v1202_v31, %v1203_v18 }
  0xea   :  { %3360 = vst [vmem:[#allocation65_spill] sm:$0xff] %v2751_v2  ;;  %v2761_v28 = vmax.f32 %v1163_v20, %v1164_v19  ;;  %v1211_v26 = vsel %vm264_vm0, %v218_v53, -inf  ;;  %v1212_v36 = vsel %vm266_vm1, %v219_v37, -inf  ;;  %v1173_v5 = vrot.slane %v1172_v1, 1 }
  0xeb   :  { %v1181_v2 = vmax.f32 %v1179_v16, %v1180_v32  ;;  %v1189_v63 = vrot.slane %v1188_v8, 2  ;;  %v1197_v60 = vmax.f32 %v1195_v10, %v1196_v11  ;;  %v1205_v61 = vrot.slane %v1204_v49, 4  ;;  %v224_v32 = vld [vmem:[%s3295_s0 + $0x6c0] sm:$0xff]  ;;  %v225_v16 = vld [vmem:[%s3295_s0 + $0x6c8] sm:$0x1] }
  0xec   :  { %3361 = vst [vmem:[#allocation66_spill] sm:$0xff] %v2761_v28  ;;  %v1213_v20 = vmax.f32 %v1211_v26, %v1212_v36  ;;  %v1220_v27 = vsel %vm264_vm0, %v220_v48, -inf  ;;  %v1221_v53 = vsel %vm266_vm1, %v221_v14, -inf  ;;  %v2773_v41 = vmax.f32 %v1172_v1, %v1173_v5  ;;  %v227_v36 = vld [vmem:[%s3295_s0 + $0x6d8] sm:$0x1] }
  0xed   :  { %v1182_v37 = vrot.slane %v1181_v2, 1  ;;  %v1190_v19 = vmax.f32 %v1188_v8, %v1189_v63  ;;  %v1198_v31 = vrot.slane %v1197_v60, 2  ;;  %v1206_v10 = vmax.f32 %v1204_v49, %v1205_v61  ;;  %v226_v8 = vld [vmem:[%s3295_s0 + $0x6d0] sm:$0xff] }
  0xee   :  { %3362 = vst [vmem:[#allocation67_spill] sm:$0xff] %v2773_v41  ;;  %v1214_v18 = vrot.slane %v1213_v20, 4  ;;  %v1222_v11 = vmax.f32 %v1220_v27, %v1221_v53  ;;  %v1229_v48 = vsel %vm264_vm0, %v222_v54, -inf  ;;  %v1230_v63 = vsel %vm266_vm1, %v223_v33, -inf  ;;  %v228_v33 = vld [vmem:[%s3295_s0 + $0x6e0] sm:$0xff] }
  0xef   :  { %v2782_v26 = vmax.f32 %v1181_v2, %v1182_v37  ;;  %v1191_v14 = vrot.slane %v1190_v19, 1  ;;  %v1199_v1 = vmax.f32 %v1197_v60, %v1198_v31  ;;  %v1207_v5 = vrot.slane %v1206_v10, 2  ;;  %v229_v37 = vld [vmem:[%s3295_s0 + $0x6e8] sm:$0x1] }
  0xf0   :  { %v1215_v49 = vmax.f32 %v1213_v20, %v1214_v18  ;;  %v1223_v61 = vrot.slane %v1222_v11, 4  ;;  %v1231_v27 = vmax.f32 %v1229_v48, %v1230_v63  ;;  %v1238_v54 = vsel %vm264_vm0, %v224_v32, -inf }
  0xf1   :  { %3363 = vst [vmem:[#allocation68_spill] sm:$0xff] %v2782_v26  ;;  %v2791_v53 = vmax.f32 %v1190_v19, %v1191_v14  ;;  %v1200_v2 = vrot.slane %v1199_v1, 1  ;;  %v1239_v60 = vsel %vm266_vm1, %v225_v16, -inf  ;;  %v1208_v31 = vmax.f32 %v1206_v10, %v1207_v5  ;;  %v230_v16 = vld [vmem:[%s3295_s0 + $0x6f0] sm:$0xff]  ;;  %v231_v10 = vld [vmem:[%s3295_s0 + $0x6f8] sm:$0x1] }
  0xf2   :  { %v1216_v26 = vrot.slane %v1215_v49, 2  ;;  %v1224_v20 = vmax.f32 %v1222_v11, %v1223_v61  ;;  %v1232_v18 = vrot.slane %v1231_v27, 4  ;;  %v1240_v19 = vmax.f32 %v1238_v54, %v1239_v60 }
  0xf3   :  { %3364 = vst [vmem:[#allocation69_spill] sm:$0xff] %v2791_v53  ;;  %v2801_v48 = vmax.f32 %v1199_v1, %v1200_v2  ;;  %v1247_v14 = vsel %vm264_vm0, %v226_v8, -inf  ;;  %v1248_v32 = vsel %vm266_vm1, %v227_v36, -inf  ;;  %v1209_v63 = vrot.slane %v1208_v31, 1 }
  0xf4   :  { %v1217_v53 = vmax.f32 %v1215_v49, %v1216_v26  ;;  %v1225_v41 = vrot.slane %v1224_v20, 2  ;;  %v1233_v28 = vmax.f32 %v1231_v27, %v1232_v18  ;;  %v1241_v11 = vrot.slane %v1240_v19, 4  ;;  %v232_v26 = vld [vmem:[%s3295_s0 + $0x700] sm:$0xff]  ;;  %v233_v49 = vld [vmem:[%s3295_s0 + $0x708] sm:$0x1] }
  0xf5   :  { %3365 = vst [vmem:[#allocation70_spill] sm:$0xff] %v2801_v48  ;;  %v1249_v1 = vmax.f32 %v1247_v14, %v1248_v32  ;;  %v1256_v5 = vsel %vm264_vm0, %v228_v33, -inf  ;;  %v1257_v8 = vsel %vm266_vm1, %v229_v37, -inf  ;;  %v2813_v61 = vmax.f32 %v1208_v31, %v1209_v63  ;;  %v235_v32 = vld [vmem:[%s3295_s0 + $0x718] sm:$0x1] }
  0xf6   :  { %v1218_v36 = vrot.slane %v1217_v53, 1  ;;  %v1226_v2 = vmax.f32 %v1224_v20, %v1225_v41  ;;  %v1234_v54 = vrot.slane %v1233_v28, 2  ;;  %v1242_v27 = vmax.f32 %v1240_v19, %v1241_v11  ;;  %v234_v20 = vld [vmem:[%s3295_s0 + $0x710] sm:$0xff] }
  0xf7   :  { %3366 = vst [vmem:[#allocation71_spill] sm:$0xff] %v2813_v61  ;;  %v1250_v60 = vrot.slane %v1249_v1, 4  ;;  %v1258_v18 = vmax.f32 %v1256_v5, %v1257_v8  ;;  %v1265_v33 = vsel %vm264_vm0, %v230_v16, -inf  ;;  %v1266_v41 = vsel %vm266_vm1, %v231_v10, -inf  ;;  %v236_v10 = vld [vmem:[%s3295_s0 + $0x720] sm:$0xff] }
  0xf8   :  { %v2822_v14 = vmax.f32 %v1217_v53, %v1218_v36  ;;  %v1227_v37 = vrot.slane %v1226_v2, 1  ;;  %v1235_v31 = vmax.f32 %v1233_v28, %v1234_v54  ;;  %v1243_v63 = vrot.slane %v1242_v27, 2  ;;  %v237_v36 = vld [vmem:[%s3295_s0 + $0x728] sm:$0x1] }
  0xf9   :  { %v1251_v19 = vmax.f32 %v1249_v1, %v1250_v60  ;;  %v1259_v11 = vrot.slane %v1258_v18, 4  ;;  %v1267_v5 = vmax.f32 %v1265_v33, %v1266_v41  ;;  %v1274_v16 = vsel %vm264_vm0, %v232_v26, -inf }
  0xfa   :  { %3367 = vst [vmem:[#allocation72_spill] sm:$0xff] %v2822_v14  ;;  %v2831_v8 = vmax.f32 %v1226_v2, %v1227_v37  ;;  %v1236_v53 = vrot.slane %v1235_v31, 1  ;;  %v1275_v28 = vsel %vm266_vm1, %v233_v49, -inf  ;;  %v1244_v54 = vmax.f32 %v1242_v27, %v1243_v63  ;;  %v238_v49 = vld [vmem:[%s3295_s0 + $0x730] sm:$0xff]  ;;  %v239_v27 = vld [vmem:[%s3295_s0 + $0x738] sm:$0x1] }
  0xfb   :  { %v1252_v48 = vrot.slane %v1251_v19, 2  ;;  %v1260_v1 = vmax.f32 %v1258_v18, %v1259_v11  ;;  %v1268_v60 = vrot.slane %v1267_v5, 4  ;;  %v1276_v2 = vmax.f32 %v1274_v16, %v1275_v28 }
  0xfc   :  { %3368 = vst [vmem:[#allocation73_spill] sm:$0xff] %v2831_v8  ;;  %v2841_v33 = vmax.f32 %v1235_v31, %v1236_v53  ;;  %v1283_v37 = vsel %vm264_vm0, %v234_v20, -inf  ;;  %v1284_v26 = vsel %vm266_vm1, %v235_v32, -inf  ;;  %v1245_v41 = vrot.slane %v1244_v54, 1 }
  0xfd   :  { %v1253_v8 = vmax.f32 %v1251_v19, %v1252_v48  ;;  %v1261_v14 = vrot.slane %v1260_v1, 2  ;;  %v1269_v61 = vmax.f32 %v1267_v5, %v1268_v60  ;;  %v1277_v18 = vrot.slane %v1276_v2, 4  ;;  %v240_v48 = vld [vmem:[%s3295_s0 + $0x740] sm:$0xff]  ;;  %v241_v19 = vld [vmem:[%s3295_s0 + $0x748] sm:$0x1] }
  0xfe   :  { %3369 = vst [vmem:[#allocation74_spill] sm:$0xff] %v2841_v33  ;;  %v1285_v31 = vmax.f32 %v1283_v37, %v1284_v26  ;;  %v1292_v63 = vsel %vm264_vm0, %v236_v10, -inf  ;;  %v1293_v20 = vsel %vm266_vm1, %v237_v36, -inf  ;;  %v2853_v11 = vmax.f32 %v1244_v54, %v1245_v41  ;;  %v243_v26 = vld [vmem:[%s3295_s0 + $0x758] sm:$0x1] }
  0xff   :  { %v1254_v32 = vrot.slane %v1253_v8, 1  ;;  %v1262_v53 = vmax.f32 %v1260_v1, %v1261_v14  ;;  %v1270_v16 = vrot.slane %v1269_v61, 2  ;;  %v1278_v5 = vmax.f32 %v1276_v2, %v1277_v18  ;;  %v242_v1 = vld [vmem:[%s3295_s0 + $0x750] sm:$0xff] }
 0x100   :  { %3370 = vst [vmem:[#allocation75_spill] sm:$0xff] %v2853_v11  ;;  %v1286_v28 = vrot.slane %v1285_v31, 4  ;;  %v1294_v60 = vmax.f32 %v1292_v63, %v1293_v20  ;;  %v1301_v10 = vsel %vm264_vm0, %v238_v49, -inf  ;;  %v1302_v14 = vsel %vm266_vm1, %v239_v27, -inf  ;;  %v244_v27 = vld [vmem:[%s3295_s0 + $0x760] sm:$0xff] }
 0x101   :  { %v2862_v37 = vmax.f32 %v1253_v8, %v1254_v32  ;;  %v1263_v36 = vrot.slane %v1262_v53, 1  ;;  %v1271_v54 = vmax.f32 %v1269_v61, %v1270_v16  ;;  %v1279_v41 = vrot.slane %v1278_v5, 2  ;;  %v245_v32 = vld [vmem:[%s3295_s0 + $0x768] sm:$0x1] }
 0x102   :  { %v1287_v2 = vmax.f32 %v1285_v31, %v1286_v28  ;;  %v1295_v18 = vrot.slane %v1294_v60, 4  ;;  %v1303_v63 = vmax.f32 %v1301_v10, %v1302_v14  ;;  %v1310_v49 = vsel %vm264_vm0, %v240_v48, -inf }
 0x103   :  { %3371 = vst [vmem:[#allocation76_spill] sm:$0xff] %v2862_v37  ;;  %v2871_v20 = vmax.f32 %v1262_v53, %v1263_v36  ;;  %v1272_v8 = vrot.slane %v1271_v54, 1  ;;  %v1311_v61 = vsel %vm266_vm1, %v241_v19, -inf  ;;  %v1280_v16 = vmax.f32 %v1278_v5, %v1279_v41  ;;  %v246_v19 = vld [vmem:[%s3295_s0 + $0x770] sm:$0xff]  ;;  %v247_v5 = vld [vmem:[%s3295_s0 + $0x778] sm:$0x1] }
 0x104   :  { %v1288_v37 = vrot.slane %v1287_v2, 2  ;;  %v1296_v31 = vmax.f32 %v1294_v60, %v1295_v18  ;;  %v1304_v28 = vrot.slane %v1303_v63, 4  ;;  %v1312_v53 = vmax.f32 %v1310_v49, %v1311_v61 }
 0x105   :  { %3372 = vst [vmem:[#allocation77_spill] sm:$0xff] %v2871_v20  ;;  %v2881_v10 = vmax.f32 %v1271_v54, %v1272_v8  ;;  %v1319_v36 = vsel %vm264_vm0, %v242_v1, -inf  ;;  %v1320_v48 = vsel %vm266_vm1, %v243_v26, -inf  ;;  %v1281_v14 = vrot.slane %v1280_v16, 1 }
 0x106   :  { %v1289_v20 = vmax.f32 %v1287_v2, %v1288_v37  ;;  %v1297_v11 = vrot.slane %v1296_v31, 2  ;;  %v1305_v33 = vmax.f32 %v1303_v63, %v1304_v28  ;;  %v1313_v60 = vrot.slane %v1312_v53, 4  ;;  %v248_v37 = vld [vmem:[%s3295_s0 + $0x780] sm:$0xff]  ;;  %v249_v2 = vld [vmem:[%s3295_s0 + $0x788] sm:$0x1] }
 0x107   :  { %3373 = vst [vmem:[#allocation78_spill] sm:$0xff] %v2881_v10  ;;  %v1321_v54 = vmax.f32 %v1319_v36, %v1320_v48  ;;  %v1328_v41 = vsel %vm264_vm0, %v244_v27, -inf  ;;  %v1329_v1 = vsel %vm266_vm1, %v245_v32, -inf  ;;  %v2893_v18 = vmax.f32 %v1280_v16, %v1281_v14  ;;  %v251_v48 = vld [vmem:[%s3295_s0 + $0x798] sm:$0x1] }
 0x108   :  { %v1290_v26 = vrot.slane %v1289_v20, 1  ;;  %v1298_v8 = vmax.f32 %v1296_v31, %v1297_v11  ;;  %v1306_v49 = vrot.slane %v1305_v33, 2  ;;  %v1314_v63 = vmax.f32 %v1312_v53, %v1313_v60  ;;  %v250_v31 = vld [vmem:[%s3295_s0 + $0x790] sm:$0xff] }
 0x109   :  { %3374 = vst [vmem:[#allocation79_spill] sm:$0xff] %v2893_v18  ;;  %v1322_v61 = vrot.slane %v1321_v54, 4  ;;  %v1330_v28 = vmax.f32 %v1328_v41, %v1329_v1  ;;  %v1337_v27 = vsel %vm264_vm0, %v246_v19, -inf  ;;  %v1338_v11 = vsel %vm266_vm1, %v247_v5, -inf  ;;  %v252_v5 = vld [vmem:[%s3295_s0 + $0x7a0] sm:$0xff] }
 0x10a   :  { %v2902_v36 = vmax.f32 %v1289_v20, %v1290_v26  ;;  %v1299_v32 = vrot.slane %v1298_v8, 1  ;;  %v1307_v16 = vmax.f32 %v1305_v33, %v1306_v49  ;;  %v1315_v14 = vrot.slane %v1314_v63, 2  ;;  %v253_v26 = vld [vmem:[%s3295_s0 + $0x7a8] sm:$0x1] }
 0x10b   :  { %v1323_v53 = vmax.f32 %v1321_v54, %v1322_v61  ;;  %v1331_v60 = vrot.slane %v1330_v28, 4  ;;  %v1339_v41 = vmax.f32 %v1337_v27, %v1338_v11  ;;  %v1346_v19 = vsel %vm264_vm0, %v248_v37, -inf }
 0x10c   :  { %3375 = vst [vmem:[#allocation80_spill] sm:$0xff] %v2902_v36  ;;  %v2911_v1 = vmax.f32 %v1298_v8, %v1299_v32  ;;  %v1308_v20 = vrot.slane %v1307_v16, 1  ;;  %v1347_v33 = vsel %vm266_vm1, %v249_v2, -inf  ;;  %v1316_v49 = vmax.f32 %v1314_v63, %v1315_v14  ;;  %v254_v2 = vld [vmem:[%s3295_s0 + $0x7b0] sm:$0xff]  ;;  %v255_v63 = vld [vmem:[%s3295_s0 + $0x7b8] sm:$0x1] }
 0x10d   :  { %v1324_v10 = vrot.slane %v1323_v53, 2  ;;  %v1332_v54 = vmax.f32 %v1330_v28, %v1331_v60  ;;  %v1340_v61 = vrot.slane %v1339_v41, 4  ;;  %v1348_v8 = vmax.f32 %v1346_v19, %v1347_v33 }
 0x10e   :  { %3376 = vst [vmem:[#allocation81_spill] sm:$0xff] %v2911_v1  ;;  %v2921_v27 = vmax.f32 %v1307_v16, %v1308_v20  ;;  %v1355_v32 = vsel %vm264_vm0, %v250_v31, -inf  ;;  %v1356_v37 = vsel %vm266_vm1, %v251_v48, -inf  ;;  %v1317_v11 = vrot.slane %v1316_v49, 1 }
 0x10f   :  { %v1325_v1 = vmax.f32 %v1323_v53, %v1324_v10  ;;  %v1333_v36 = vrot.slane %v1332_v54, 2  ;;  %v1341_v18 = vmax.f32 %v1339_v41, %v1340_v61  ;;  %v1349_v28 = vrot.slane %v1348_v8, 4  ;;  %v256_v10 = vld [vmem:[%s3295_s0 + $0x7c0] sm:$0xff]  ;;  %v257_v53 = vld [vmem:[%s3295_s0 + $0x7c8] sm:$0x1] }
 0x110   :  { %3377 = vst [vmem:[#allocation82_spill] sm:$0xff] %v2921_v27  ;;  %v1357_v16 = vmax.f32 %v1355_v32, %v1356_v37  ;;  %v1364_v14 = vsel %vm264_vm0, %v252_v5, -inf  ;;  %v1365_v31 = vsel %vm266_vm1, %v253_v26, -inf  ;;  %v2933_v60 = vmax.f32 %v1316_v49, %v1317_v11  ;;  %v259_v37 = vld [vmem:[%s3295_s0 + $0x7d8] sm:$0x1] }
 0x111   :  { %v1326_v48 = vrot.slane %v1325_v1, 1  ;;  %v1334_v20 = vmax.f32 %v1332_v54, %v1333_v36  ;;  %v1342_v19 = vrot.slane %v1341_v18, 2  ;;  %v1350_v41 = vmax.f32 %v1348_v8, %v1349_v28  ;;  %v258_v54 = vld [vmem:[%s3295_s0 + $0x7d0] sm:$0xff] }
 0x112   :  { %3378 = vst [vmem:[#allocation83_spill] sm:$0xff] %v2933_v60  ;;  %v1358_v33 = vrot.slane %v1357_v16, 4  ;;  %v1366_v61 = vmax.f32 %v1364_v14, %v1365_v31  ;;  %v1373_v5 = vsel %vm264_vm0, %v254_v2, -inf  ;;  %v1374_v36 = vsel %vm266_vm1, %v255_v63, -inf  ;;  %v260_v63 = vld [vmem:[%s3295_s0 + $0x7e0] sm:$0xff] }
 0x113   :  { %v2942_v32 = vmax.f32 %v1325_v1, %v1326_v48  ;;  %v1335_v26 = vrot.slane %v1334_v20, 1  ;;  %v1343_v49 = vmax.f32 %v1341_v18, %v1342_v19  ;;  %v1351_v11 = vrot.slane %v1350_v41, 2  ;;  %v261_v48 = vld [vmem:[%s3295_s0 + $0x7e8] sm:$0x1] }
 0x114   :  { %v1359_v8 = vmax.f32 %v1357_v16, %v1358_v33  ;;  %v1367_v28 = vrot.slane %v1366_v61, 4  ;;  %v1375_v14 = vmax.f32 %v1373_v5, %v1374_v36  ;;  %v1382_v2 = vsel %vm264_vm0, %v256_v10, -inf }
 0x115   :  { %3379 = vst [vmem:[#allocation84_spill] sm:$0xff] %v2942_v32  ;;  %v2951_v31 = vmax.f32 %v1334_v20, %v1335_v26  ;;  %v1344_v1 = vrot.slane %v1343_v49, 1  ;;  %v1383_v18 = vsel %vm266_vm1, %v257_v53, -inf  ;;  %v1352_v19 = vmax.f32 %v1350_v41, %v1351_v11  ;;  %v262_v53 = vld [vmem:[%s3295_s0 + $0x7f0] sm:$0xff]  ;;  %v263_v41 = vld [vmem:[%s3295_s0 + $0x7f8] sm:$0x1] }
 0x116   :  { %v1360_v32 = vrot.slane %v1359_v8, 2  ;;  %v1368_v16 = vmax.f32 %v1366_v61, %v1367_v28  ;;  %v1376_v33 = vrot.slane %v1375_v14, 4  ;;  %v1384_v20 = vmax.f32 %v1382_v2, %v1383_v18 }
 0x117   :  { %3380 = vst [vmem:[#allocation85_spill] sm:$0xff] %v2951_v31  ;;  %v2961_v5 = vmax.f32 %v1343_v49, %v1344_v1  ;;  %v1391_v26 = vsel %vm264_vm0, %v258_v54, -inf  ;;  %v1392_v10 = vsel %vm266_vm1, %v259_v37, -inf  ;;  %v1353_v36 = vrot.slane %v1352_v19, 1 }
 0x118   :  { %v1361_v31 = vmax.f32 %v1359_v8, %v1360_v32  ;;  %v1369_v60 = vrot.slane %v1368_v16, 2  ;;  %v1377_v27 = vmax.f32 %v1375_v14, %v1376_v33  ;;  %v1385_v61 = vrot.slane %v1384_v20, 4 }
 0x119   :  { %3381 = vst [vmem:[#allocation86_spill] sm:$0xff] %v2961_v5  ;;  %v1393_v49 = vmax.f32 %v1391_v26, %v1392_v10  ;;  %v1400_v11 = vsel %vm264_vm0, %v260_v63, -inf  ;;  %v1401_v54 = vsel %vm266_vm1, %v261_v48, -inf  ;;  %v2973_v28 = vmax.f32 %v1352_v19, %v1353_v36 }
 0x11a   :  { %v1362_v37 = vrot.slane %v1361_v31, 1  ;;  %v1370_v1 = vmax.f32 %v1368_v16, %v1369_v60  ;;  %v1378_v2 = vrot.slane %v1377_v27, 2  ;;  %v1386_v18 = vmax.f32 %v1384_v20, %v1385_v61 }
 0x11b   :  { %v1394_v5 = vrot.slane %v1393_v49, 4  ;;  %v1402_v32 = vmax.f32 %v1400_v11, %v1401_v54  ;;  %v1409_v8 = vsel %vm264_vm0, %v262_v53, -inf  ;;  %v1410_v26 = vsel %vm266_vm1, %v263_v41, -inf }
 0x11c   :  { %v2976_v14 = vmax.f32 %v1361_v31, %v1362_v37  ;;  %v1371_v33 = vrot.slane %v1370_v1, 1  ;;  %v1379_v3 = vmax.f32 %v1377_v27, %v1378_v2  ;;  %v1387_v10 = vrot.slane %v1386_v18, 2 }
 0x11d   :  { %v1395_v63 = vmax.f32 %v1393_v49, %v1394_v5  ;;  %v1403_v58 = vrot.slane %v1402_v32, 4  ;;  %v1411_v48 = vmax.f32 %v1409_v8, %v1410_v26  ;;  %v1547_v27 = vsel %vm1546_vm2, %v1834_v43, %v1832_v42 }
 0x11e   :  { %v2979_v19 = vmax.f32 %v1370_v1, %v1371_v33  ;;  %v1380_v36 = vrot.slane %v1379_v3, 1  ;;  %v1388_v60 = vmax.f32 %v1386_v18, %v1387_v10  ;;  %v1549_v11 = vsel %vm1548_vm3, %v1836_v44, %v1547_v27  ;;  %v3382_v10 = vld [vmem:[#allocation2_spill] sm:$0xff] }
 0x11f   :  { %v1396_v16 = vrot.slane %v1395_v63, 2  ;;  %v1404_v20 = vmax.f32 %v1402_v32, %v1403_v58  ;;  %v1412_v61 = vrot.slane %v1411_v48, 4  ;;  %vm1554_vm6 = vcmask 1045509  }
 0x120   :  { %v2981_v53 = vmax.f32 %v1379_v3, %v1380_v36  ;;  %v1389_v31 = vrot.slane %v1388_v60, 1  ;;  %vm1556_vm7 = vcmask 1046534   ;;  %vm1558_vm8 = vcmask 1047559  }
 0x121   :  { %v1397_v5 = vmax.f32 %v1395_v63, %v1396_v16  ;;  %v1405_v41 = vrot.slane %v1404_v20, 2  ;;  %v1413_v49 = vmax.f32 %v1411_v48, %v1412_v61  ;;  %v1551_v42 = vsel %vm1550_vm4, %v1860_v7, %v1549_v11  ;;  %v3387_v48 = vld [vmem:[#allocation15_spill] sm:$0xff]  ;;  %v3390_v16 = vld [vmem:[#allocation24_spill] sm:$0xff]  ;;  %v3394_v11 = vld [vmem:[#allocation25_spill] sm:$0xff] }
 0x122   :  { %v2988_v58 = vmax.f32 %v1388_v60, %v1389_v31  ;;  %v1560_v43 = vsel %vm1546_vm2, %v1903_v62, %v1894_v57  ;;  %v1567_v1 = vsel %vm1546_vm2, %v1958_v22, %v1956_v21  ;;  %v1574_v44 = vsel %vm1546_vm2, %v2027_v59, %v2016_v35  ;;  %v3389_v60 = vld [vmem:[#allocation23_spill] sm:$0xff]  ;;  %v3391_v61 = vld [vmem:[#allocation4_spill] sm:$0xff]  ;;  %v3392_v31 = vld [vmem:[#allocation10_spill] sm:$0xff] }
 0x123   :  { %v1398_v3 = vrot.slane %v1397_v5, 1  ;;  %v1406_v54 = vmax.f32 %v1404_v20, %v1405_v41  ;;  %v1414_v37 = vrot.slane %v1413_v49, 2  ;;  %v1553_v8 = vsel %vm1552_vm5, %v1869_v13, %v1551_v42  ;;  %v3393_v41 = vld [vmem:[#allocation17_spill] sm:$0xff]  ;;  %v3396_v42 = vld [vmem:[#allocation11_spill] sm:$0xff] }
 0x124   :  { %v1555_v7 = vsel %vm1554_vm6, %v1871_v17, %v1553_v8  ;;  %v1561_v57 = vsel %vm1548_vm3, %v1916_v24, %v1560_v43  ;;  %v1568_v62 = vsel %vm1548_vm3, %v1960_v23, %v1567_v1  ;;  %v1575_v21 = vsel %vm1548_vm3, %v2033_v6, %v1574_v44  ;;  %v3397_v1 = vld [vmem:[#allocation18_spill] sm:$0xff] }
 0x125   :  { %v3001_v2 = vmax.f32 %v1397_v5, %v1398_v3  ;;  %v1407_v18 = vrot.slane %v1406_v54, 1  ;;  %v1415_v32 = vmax.f32 %v1413_v49, %v1414_v37  ;;  %v1557_v59 = vsel %vm1556_vm7, %v1881_v29, %v1555_v7  ;;  %v3399_v8 = vld [vmem:[#allocation6_spill] sm:$0xff] }
 0x126   :  { %v1562_v13 = vsel %vm1550_vm4, %v1924_v45, %v1561_v57  ;;  %v1559_v17 = vsel %vm1558_vm8, %v1892_v56, %v1557_v59  ;;  %v1569_v23 = vsel %vm1550_vm4, %v1965_v30, %v1568_v62  ;;  %v1576_v6 = vsel %vm1550_vm4, %v2042_v25, %v1575_v21  ;;  %v3400_v57 = vld [vmem:[#allocation12_spill] sm:$0xff]  ;;  %v3401_v21 = vld [vmem:[#allocation19_spill] sm:$0xff] }
 0x127   :  { %v3013_v22 = vmax.f32 %v1406_v54, %v1407_v18  ;;  %v1416_v35 = vrot.slane %v1415_v32, 1  ;;  %v1563_v24 = vsel %vm1552_vm5, %v1926_v46, %v1562_v13  ;;  %v1570_v45 = vsel %vm1552_vm5, %v1974_v34, %v1569_v23  ;;  %1681 = vst.msk [vmem:[%s3296_s1] sm:$0xff] %vm264_vm0, %v1559_v17  ;;  %v3395_v54 = vld [vmem:[#allocation5_spill] sm:$0xff]  ;;  %v3398_v18 = vld [vmem:[#allocation26_spill] sm:$0xff]  ;;  %v3402_v59 = vld [vmem:[#allocation27_spill] sm:$0xff] }
 0x128   :  { %v1564_v29 = vsel %vm1554_vm6, %v1935_v51, %v1563_v24  ;;  %v1577_v56 = vsel %vm1552_vm5, %v2051_v40, %v1576_v6  ;;  %v1571_v30 = vsel %vm1554_vm6, %v1980_v39, %v1570_v45  ;;  %v1581_v34 = vsel %vm1546_vm2, %v2102_v12, %v2091_v50  ;;  %v3383_v12 = vld [vmem:[#allocation7_spill] sm:$0xff]  ;;  %v3403_v17 = vld [vmem:[#allocation13_spill] sm:$0xff]  ;;  %v3404_v23 = vld [vmem:[#allocation20_spill] sm:$0xff] }
 0x129   :  { %v3027_v33 = vmax.f32 %v1415_v32, %v1416_v35  ;;  %v1565_v46 = vsel %vm1556_vm7, %v1945_v9, %v1564_v29  ;;  %v1578_v51 = vsel %vm1554_vm6, %v2061_v52, %v1577_v56  ;;  %v1572_v40 = vsel %vm1556_vm7, %v1990_v55, %v1571_v30  ;;  %v3385_v55 = vld [vmem:[#allocation3_spill] sm:$0xff]  ;;  %v3405_v29 = vld [vmem:[#allocation28_spill] sm:$0xff] }
 0x12a   :  { %v1566_v25 = vsel %vm1558_vm8, %v1950_v15, %v1565_v46  ;;  %v1579_v26 = vsel %vm1556_vm7, %v2071_v4, %v1578_v51  ;;  %v1582_v9 = vsel %vm1548_vm3, %v2116_v47, %v1581_v34  ;;  %v1573_v39 = vsel %vm1558_vm8, %v2000_v0, %v1572_v40  ;;  %v3384_v15 = vld [vmem:[#allocation8_spill] sm:$0xff]  ;;  %v3386_v47 = vld [vmem:[#allocation9_spill] sm:$0xff]  ;;  %v3406_v56 = vld [vmem:[#allocation31_spill] sm:$0xff] }
 0x12b   :  { %v1580_v52 = vsel %vm1558_vm8, %v2086_v38, %v1579_v26  ;;  %v1583_v50 = vsel %vm1550_vm4, %v3382_v10, %v1582_v9  ;;  %v1588_v63 = vsel %vm1546_vm2, %v3384_v15, %v3383_v12  ;;  %1682 = vst.msk [vmem:[%s3296_s1 + $0x8] sm:$0xff] %vm264_vm0, %v1566_v25  ;;  %v3388_v38 = vld [vmem:[#allocation16_spill] sm:$0xff]  ;;  %v1602_v20 = vsel %vm1546_vm2, %v3390_v16, %v3389_v60  ;;  %v3408_v51 = vld [vmem:[#allocation14_spill] sm:$0xff]  ;;  %v3409_v25 = vld [vmem:[#allocation21_spill] sm:$0xff] }
 0x12c   :  { %v1584_v4 = vsel %vm1552_vm5, %v3385_v55, %v1583_v50  ;;  %v1589_v0 = vsel %vm1548_vm3, %v3386_v47, %v1588_v63  ;;  %v1595_v36 = vsel %vm1546_vm2, %v3388_v38, %v3387_v48  ;;  %1683 = vst.msk [vmem:[%s3296_s1 + $0x10] sm:$0xff] %vm264_vm0, %v1573_v39  ;;  %1684 = vst.msk [vmem:[%s3296_s1 + $0x18] sm:$0xff] %vm264_vm0, %v1580_v52  ;;  %v3407_v46 = vld [vmem:[#allocation32_spill] sm:$0xff]  ;;  %v3410_v26 = vld [vmem:[#allocation29_spill] sm:$0xff] }
 0x12d   :  { %v1585_v27 = vsel %vm1554_vm6, %v3391_v61, %v1584_v4  ;;  %v1590_v5 = vsel %vm1550_vm4, %v3392_v31, %v1589_v0  ;;  %v1596_v49 = vsel %vm1548_vm3, %v3393_v41, %v1595_v36  ;;  %v1603_v3 = vsel %vm1548_vm3, %v3394_v11, %v1602_v20  ;;  %v3411_v39 = vld [vmem:[#allocation33_spill] sm:$0xff]  ;;  %v3412_v10 = vld [vmem:[#allocation22_spill] sm:$0xff]  ;;  %v3415_v4 = vld [vmem:[#allocation39_spill] sm:$0xff] }
 0x12e   :  { %v1586_v37 = vsel %vm1556_vm7, %v3395_v54, %v1585_v27  ;;  %v1591_v43 = vsel %vm1552_vm5, %v3396_v42, %v1590_v5  ;;  %v1597_v44 = vsel %vm1550_vm4, %v3397_v1, %v1596_v49  ;;  %v1604_v32 = vsel %vm1550_vm4, %v3398_v18, %v1603_v3  ;;  %v3413_v12 = vld [vmem:[#allocation30_spill] sm:$0xff]  ;;  %v3416_v47 = vld [vmem:[#allocation40_spill] sm:$0xff]  ;;  %v3417_v48 = vld [vmem:[#allocation35_spill] sm:$0xff] }
 0x12f   :  { %v1587_v7 = vsel %vm1558_vm8, %v3399_v8, %v1586_v37  ;;  %v1592_v62 = vsel %vm1554_vm6, %v3400_v57, %v1591_v43  ;;  %v1598_v35 = vsel %vm1552_vm5, %v3401_v21, %v1597_v44  ;;  %v1605_v13 = vsel %vm1552_vm5, %v3402_v59, %v1604_v32  ;;  %v3414_v63 = vld [vmem:[#allocation34_spill] sm:$0xff]  ;;  %v3418_v36 = vld [vmem:[#allocation41_spill] sm:$0xff]  ;;  %v3419_v16 = vld [vmem:[#allocation47_spill] sm:$0xff] }
 0x130   :  { %v1593_v24 = vsel %vm1556_vm7, %v3403_v17, %v1592_v62  ;;  %v1599_v6 = vsel %vm1554_vm6, %v3404_v23, %v1598_v35  ;;  %v1606_v45 = vsel %vm1554_vm6, %v3405_v29, %v1605_v13  ;;  %v1609_v30 = vsel %vm1546_vm2, %v3407_v46, %v3406_v56  ;;  %1685 = vst.msk [vmem:[%s3296_s1 + $0x20] sm:$0xff] %vm264_vm0, %v1587_v7  ;;  %v3420_v20 = vld [vmem:[#allocation48_spill] sm:$0xff]  ;;  %v3421_v27 = vld [vmem:[#allocation55_spill] sm:$0xff]  ;;  %v3424_v11 = vld [vmem:[#allocation42_spill] sm:$0xff] }
 0x131   :  { %v1594_v34 = vsel %vm1558_vm8, %v3408_v51, %v1593_v24  ;;  %v1600_v40 = vsel %vm1556_vm7, %v3409_v25, %v1599_v6  ;;  %v1607_v9 = vsel %vm1556_vm7, %v3410_v26, %v1606_v45  ;;  %v1610_v52 = vsel %vm1548_vm3, %v3411_v39, %v1609_v30  ;;  %v3422_v31 = vld [vmem:[#allocation56_spill] sm:$0xff]  ;;  %v3425_v54 = vld [vmem:[#allocation49_spill] sm:$0xff]  ;;  %v3428_v18 = vld [vmem:[#allocation43_spill] sm:$0xff] }
 0x132   :  { %v1601_v50 = vsel %vm1558_vm8, %v3412_v10, %v1600_v40  ;;  %v1608_v15 = vsel %vm1558_vm8, %v3413_v12, %v1607_v9  ;;  %v1611_v55 = vsel %vm1550_vm4, %v3414_v63, %v1610_v52  ;;  %v1616_v0 = vsel %vm1546_vm2, %v3416_v47, %v3415_v4  ;;  %1686 = vst.msk [vmem:[%s3296_s1 + $0x28] sm:$0xff] %vm264_vm0, %v1594_v34  ;;  %v3423_v41 = vld [vmem:[#allocation36_spill] sm:$0xff]  ;;  %v3426_v42 = vld [vmem:[#allocation57_spill] sm:$0xff]  ;;  %v3429_v8 = vld [vmem:[#allocation50_spill] sm:$0xff] }
 0x133   :  { %v1612_v38 = vsel %vm1552_vm5, %v3417_v48, %v1611_v55  ;;  %v1617_v60 = vsel %vm1548_vm3, %v3418_v36, %v1616_v0  ;;  %v1623_v61 = vsel %vm1546_vm2, %v3420_v20, %v3419_v16  ;;  %v1630_v5 = vsel %vm1546_vm2, %v3422_v31, %v3421_v27  ;;  %1687 = vst.msk [vmem:[%s3296_s1 + $0x30] sm:$0xff] %vm264_vm0, %v1601_v50  ;;  %v3427_v1 = vld [vmem:[#allocation37_spill] sm:$0xff]  ;;  %v3430_v57 = vld [vmem:[#allocation58_spill] sm:$0xff]  ;;  %v3432_v59 = vld [vmem:[#allocation44_spill] sm:$0xff] }
 0x134   :  { %1688 = vst.msk [vmem:[%s3296_s1 + $0x38] sm:$0xff] %vm264_vm0, %v1608_v15  ;;  %v1613_v49 = vsel %vm1554_vm6, %v3423_v41, %v1612_v38  ;;  %v1618_v3 = vsel %vm1550_vm4, %v3424_v11, %v1617_v60  ;;  %v1624_v37 = vsel %vm1548_vm3, %v3425_v54, %v1623_v61  ;;  %v1631_v43 = vsel %vm1548_vm3, %v3426_v42, %v1630_v5  ;;  %v3431_v21 = vld [vmem:[#allocation38_spill] sm:$0xff]  ;;  %v3433_v17 = vld [vmem:[#allocation51_spill] sm:$0xff]  ;;  %v3435_v29 = vld [vmem:[#allocation45_spill] sm:$0xff] }
 0x135   :  { %v1614_v44 = vsel %vm1556_vm7, %v3427_v1, %v1613_v49  ;;  %v1619_v32 = vsel %vm1552_vm5, %v3428_v18, %v1618_v3  ;;  %v1625_v7 = vsel %vm1550_vm4, %v3429_v8, %v1624_v37  ;;  %v1632_v62 = vsel %vm1550_vm4, %v3430_v57, %v1631_v43  ;;  %v3434_v23 = vld [vmem:[#allocation59_spill] sm:$0xff]  ;;  %v3436_v56 = vld [vmem:[#allocation52_spill] sm:$0xff]  ;;  %v3440_v26 = vld [vmem:[#allocation46_spill] sm:$0xff] }
 0x136   :  { %v1615_v35 = vsel %vm1558_vm8, %v3431_v21, %v1614_v44  ;;  %v1620_v13 = vsel %vm1554_vm6, %v3432_v59, %v1619_v32  ;;  %v1626_v24 = vsel %vm1552_vm5, %v3433_v17, %v1625_v7  ;;  %v1633_v6 = vsel %vm1552_vm5, %v3434_v23, %v1632_v62  ;;  %v3437_v30 = vld [vmem:[#allocation60_spill] sm:$0xff]  ;;  %v3438_v34 = vld [vmem:[#allocation63_spill] sm:$0xff]  ;;  %v3441_v39 = vld [vmem:[#allocation53_spill] sm:$0xff] }
 0x137   :  { %v1621_v45 = vsel %vm1556_vm7, %v3435_v29, %v1620_v13  ;;  %v1627_v46 = vsel %vm1554_vm6, %v3436_v56, %v1626_v24  ;;  %v1634_v51 = vsel %vm1554_vm6, %v3437_v30, %v1633_v6  ;;  %v3439_v25 = vld [vmem:[#allocation64_spill] sm:$0xff]  ;;  %1689 = vst.msk [vmem:[%s3296_s1 + $0x40] sm:$0xff] %vm264_vm0, %v1615_v35  ;;  %v3442_v10 = vld [vmem:[#allocation61_spill] sm:$0xff]  ;;  %v3444_v63 = vld [vmem:[#allocation54_spill] sm:$0xff]  ;;  %v1658_v49 = vsel %vm1546_vm2, %v2976_v14, %v2973_v28 }
 0x138   :  { %v1637_v40 = vsel %vm1546_vm2, %v3439_v25, %v3438_v34  ;;  %v1622_v9 = vsel %vm1558_vm8, %v3440_v26, %v1621_v45  ;;  %v1628_v52 = vsel %vm1556_vm7, %v3441_v39, %v1627_v46  ;;  %v1635_v50 = vsel %vm1556_vm7, %v3442_v10, %v1634_v51  ;;  %v3443_v12 = vld [vmem:[#allocation65_spill] sm:$0xff]  ;;  %v3445_v4 = vld [vmem:[#allocation62_spill] sm:$0xff]  ;;  %v3447_v38 = vld [vmem:[#allocation71_spill] sm:$0xff] }
 0x139   :  { %v1638_v15 = vsel %vm1548_vm3, %v3443_v12, %v1637_v40  ;;  %v1629_v55 = vsel %vm1558_vm8, %v3444_v63, %v1628_v52  ;;  %v1636_v47 = vsel %vm1558_vm8, %v3445_v4, %v1635_v50  ;;  %v3446_v0 = vld [vmem:[#allocation66_spill] sm:$0xff]  ;;  %v3448_v36 = vld [vmem:[#allocation72_spill] sm:$0xff]  ;;  %1690 = vst.msk [vmem:[%s3296_s1 + $0x48] sm:$0xff] %vm264_vm0, %v1622_v9  ;;  %v3449_v16 = vld [vmem:[#allocation67_spill] sm:$0xff]  ;;  %v1659_v28 = vsel %vm1548_vm3, %v2979_v19, %v1658_v49 }
 0x13a   :  { %v1639_v48 = vsel %vm1550_vm4, %v3446_v0, %v1638_v15  ;;  %v1644_v60 = vsel %vm1546_vm2, %v3448_v36, %v3447_v38  ;;  %v3450_v61 = vld [vmem:[#allocation73_spill] sm:$0xff]  ;;  %v3451_v31 = vld [vmem:[#allocation79_spill] sm:$0xff]  ;;  %v3452_v5 = vld [vmem:[#allocation80_spill] sm:$0xff]  ;;  %1691 = vst.msk [vmem:[%s3296_s1 + $0x50] sm:$0xff] %vm264_vm0, %v1629_v55  ;;  %v1660_v7 = vsel %vm1550_vm4, %v2981_v53, %v1659_v28 }
 0x13b   :  { %v1640_v20 = vsel %vm1552_vm5, %v3449_v16, %v1639_v48  ;;  %v1645_v27 = vsel %vm1548_vm3, %v3450_v61, %v1644_v60  ;;  %v1651_v41 = vsel %vm1546_vm2, %v3452_v5, %v3451_v31  ;;  %1692 = vst.msk [vmem:[%s3296_s1 + $0x58] sm:$0xff] %vm264_vm0, %v1636_v47  ;;  %v3453_v11 = vld [vmem:[#allocation68_spill] sm:$0xff]  ;;  %v3454_v54 = vld [vmem:[#allocation74_spill] sm:$0xff]  ;;  %v3455_v42 = vld [vmem:[#allocation81_spill] sm:$0xff]  ;;  %v1661_v13 = vsel %vm1552_vm5, %v2988_v58, %v1660_v7 }
 0x13c   :  { %v1641_v3 = vsel %vm1554_vm6, %v3453_v11, %v1640_v20  ;;  %v1646_v37 = vsel %vm1550_vm4, %v3454_v54, %v1645_v27  ;;  %v1652_v43 = vsel %vm1548_vm3, %v3455_v42, %v1651_v41  ;;  %v3456_v14 = vld [vmem:[#allocation69_spill] sm:$0xff]  ;;  %v3457_v44 = vld [vmem:[#allocation75_spill] sm:$0xff]  ;;  %v3458_v32 = vld [vmem:[#allocation82_spill] sm:$0xff]  ;;  %v1662_v53 = vsel %vm1554_vm6, %v3001_v2, %v1661_v13 }
 0x13d   :  { %v1642_v1 = vsel %vm1556_vm7, %v3456_v14, %v1641_v3  ;;  %v1647_v18 = vsel %vm1552_vm5, %v3457_v44, %v1646_v37  ;;  %v1653_v8 = vsel %vm1550_vm4, %v3458_v32, %v1652_v43  ;;  %v3459_v57 = vld [vmem:[#allocation70_spill] sm:$0xff]  ;;  %v3460_v21 = vld [vmem:[#allocation76_spill] sm:$0xff]  ;;  %v3461_v59 = vld [vmem:[#allocation83_spill] sm:$0xff]  ;;  %v1663_v46 = vsel %vm1556_vm7, %v3013_v22, %v1662_v53 }
 0x13e   :  { %v1643_v62 = vsel %vm1558_vm8, %v3459_v57, %v1642_v1  ;;  %v1648_v35 = vsel %vm1554_vm6, %v3460_v21, %v1647_v18  ;;  %v1654_v19 = vsel %vm1552_vm5, %v3461_v59, %v1653_v8  ;;  %v3462_v17 = vld [vmem:[#allocation77_spill] sm:$0xff]  ;;  %v3463_v23 = vld [vmem:[#allocation84_spill] sm:$0xff]  ;;  %v3464_v29 = vld [vmem:[#allocation78_spill] sm:$0xff]  ;;  %v1664_v2 = vsel %vm1558_vm8, %v3027_v33, %v1663_v46 }
 0x13f   :  { %v1649_v24 = vsel %vm1556_vm7, %v3462_v17, %v1648_v35  ;;  %v1655_v6 = vsel %vm1554_vm6, %v3463_v23, %v1654_v19  ;;  %1693 = vst.msk [vmem:[%s3296_s1 + $0x60] sm:$0xff] %vm264_vm0, %v1643_v62  ;;  %v3465_v56 = vld [vmem:[#allocation85_spill] sm:$0xff]  ;;  %v3466_v30 = vld [vmem:[#allocation86_spill] sm:$0xff]  ;;  %1696 = vst.msk [vmem:[%s3296_s1 + $0x78] sm:$0xff] %vm264_vm0, %v1664_v2 }
 0x140   :  { %v1650_v45 = vsel %vm1558_vm8, %v3464_v29, %v1649_v24  ;;  %v1656_v58 = vsel %vm1556_vm7, %v3465_v56, %v1655_v6 }
 0x141   :  { %v1657_v51 = vsel %vm1558_vm8, %v3466_v30, %v1656_v58  ;;  %1694 = vst.msk [vmem:[%s3296_s1 + $0x68] sm:$0xff] %vm264_vm0, %v1650_v45 }
 0x142   :  { %1695 = vst.msk [vmem:[%s3296_s1 + $0x70] sm:$0xff] %vm264_vm0, %v1657_v51 }

// kernel: densenet_forward.23
= control target key start
LH: loop header
LB: loop body
LE: loop exit
PB: predicated region body
PF: predicated region fallthrough
CT: control target
= control target key end

     0   :  { %s2257_s18 = smov 0   ;;  %s2770_s0 = inlined_call_operand.vmem [shape: f32[2,64,64], index: 0, kind: input, shape index: {}]   ;;  %s2771_s1 = inlined_call_operand.vmem [shape: f32[1,64], index: 1, kind: input, shape index: {}]   ;;  %s2772_s2 = inlined_call_operand.vmem [shape: f32[1,64], index: 2, kind: input, shape index: {}]   ;;  %s2773_s3 = inlined_call_operand.vmem [shape: bf16[9,64,16], index: 3, kind: input, shape index: {}]   ;;  %s2774_s4 = inlined_call_operand.vmem [shape: f32[1,16], index: 4, kind: input, shape index: {}]   ;;  %s2775_s5 = inlined_call_operand.vmem [shape: f32[2,80,16], index: 5, kind: output, shape index: {}]  }
   0x1 LB: > { %s1670_s19 = sadd.s32 4294967295, %s2223_s18   ;;  %p1674_p0 = scmp.ge.s32.totalorder %s2223_s18, 1  ;;  %s2223_s18 = sphi %s2257_s18, %s15_s18  }
   0x2   : > { %p187_p1 = scmp.lt.s32.totalorder %s2223_s18, 3 }
   0x4   : > { %p188_p2 = pnand %p1674_p0, %p187_p1 }
   0x5   : > { %p215_p3 = scmp.lt.s32.totalorder (!%p188_p2), %s1670_s19, 1 }
   0x6   : > { %191 = sbr.rel (%p188_p2) target bundleno = 412 (0x19c), region = 40 }
   0xb   : > { %v2181_v0 = vld [vmem:[%s2773_s3 + $0x38] sm:$0xff]   ;;  %v2225_v1 = vmov 0.0   ;;  %v2182_v2 = vld [vmem:[%s2773_s3 + $0x30] sm:$0xff]   ;;  %vm226_vm0 = vcmask 523264   ;;  %vm2226_vm1 = vmmov 0   ;;  %s2777_s19 = smov (!%p215_p3, %s1670_s19), 1 }
   0xc   : > { %2162 = vmatprep.subr.bf16.mxu1 %v2225_v1  ;;  %1910 = vmatprep.subr.bf16.mxu0 %v2225_v1  ;;  %230 = vst.msk [vmem:[#allocation2 + $0x18] sm:$0xff] %vm226_vm0, %v2225_v1  ;;  %231 = vst.msk [vmem:[#allocation2 + $0x20] sm:$0xff] %vm226_vm0, %v2225_v1  ;;  %v2290_v3 = vld [vmem:[%s2771_s1] ss:$0 sm:$0xff]  ;;  %v2183_v4 = vld [vmem:[%s2773_s3 + $0x28] sm:$0xff]   ;;  %s1828_s28 = sshll.u32 %s2777_s19, 6 }
   0xd   : > { %2166 = vmatpush3.bf16.msra.mxu1 %v2181_v0  ;;  %1911 = vmatpush3.bf16.msra.mxu0 %v2181_v0  ;;  %232 = vst.msk [vmem:[#allocation2 + $0x28] sm:$0xff] %vm226_vm0, %v2225_v1  ;;  %233 = vst.msk [vmem:[#allocation2 + $0x30] sm:$0xff] %vm226_vm0, %v2225_v1  ;;  %s2321_s6 = scalar_lea.vmem %s2770_s0, %s1828_s28  ;;  %v2326_v5 = vld [vmem:[%s2772_s2] ss:$0 sm:$0xff]  ;;  %v2185_v35 = vld [vmem:[%s2773_s3 + $0x18] sm:$0xff]   ;;  %vm1604_vm2 = vcmask 130048  }
   0xe   : > { %2163 = vmatprep.subr.bf16.mxu1 %v2225_v1  ;;  %1912 = vmatprep.subr.bf16.mxu0 %v2225_v1  ;;  %227 = vst.msk [vmem:[#allocation2] sm:$0xff] %vm226_vm0, %v2225_v1  ;;  %228 = vst.msk [vmem:[#allocation2 + $0x8] sm:$0xff] %vm226_vm0, %v2225_v1  ;;  %v242_v6 = vld [vmem:[%s2321_s6 + $0x10] sm:$0xff]  ;;  %v243_v7 = vld [vmem:[%s2321_s6 + $0x18] sm:$0xff] }
   0xf   : > { %1926 = vmatprep.mubr.msk.bf16.mxu1 %vm2226_vm1, %v2225_v1  ;;  %229 = vst.msk [vmem:[#allocation2 + $0x10] sm:$0xff] %vm226_vm0, %v2225_v1  ;;  %234 = vst.msk [vmem:[#allocation2 + $0x38] sm:$0xff] %vm226_vm0, %v2225_v1  ;;  %1918 = vmatprep.mubr.msk.bf16.mxu0 %vm2226_vm1, %v2225_v1  ;;  %v240_v8 = vld [vmem:[%s2321_s6] sm:$0xff]  ;;  %v257_v9 = vmul.f32 %v2290_v3, %v242_v6  ;;  %v258_v10 = vmul.f32 %v2290_v3, %v243_v7  ;;  %v245_v13 = vld [vmem:[%s2321_s6 + $0x28] sm:$0xff] }
  0x10   : > { %235 = vst.msk [vmem:[#allocation2 + $0x40] sm:$0xff] %vm226_vm0, %v2225_v1  ;;  %236 = vst.msk [vmem:[#allocation2 + $0x48] sm:$0xff] %vm226_vm0, %v2225_v1  ;;  %v255_v11 = vmul.f32 %v2290_v3, %v240_v8  ;;  %v244_v12 = vld [vmem:[%s2321_s6 + $0x20] sm:$0xff]  ;;  %v260_v16 = vmul.f32 %v2290_v3, %v245_v13  ;;  %v241_v17 = vld [vmem:[%s2321_s6 + $0x8] sm:$0xff] }
  0x11   : > { %237 = vst.msk [vmem:[#allocation2 + $0x50] sm:$0xff] %vm226_vm0, %v2225_v1  ;;  %238 = vst.msk [vmem:[#allocation2 + $0x58] sm:$0xff] %vm226_vm0, %v2225_v1  ;;  %2167 = vmatpush3.bf16.msra.mxu1 %v2182_v2  ;;  %1913 = vmatpush3.bf16.msra.mxu0 %v2182_v2  ;;  %v2184_v14 = vld [vmem:[%s2773_s3 + $0x20] sm:$0xff]   ;;  %v259_v15 = vmul.f32 %v2290_v3, %v244_v12  ;;  %v272_v18 = vadd.f32 %v2326_v5, %v257_v9  ;;  %v246_v27 = vld [vmem:[%s2321_s6 + $0x30] sm:$0xff] }
  0x12   : > { %239 = vst.msk [vmem:[#allocation2 + $0x60] sm:$0xff] %vm226_vm0, %v2225_v1  ;;  %2164 = vmatprep.subr.bf16.mxu1 %v2225_v1  ;;  %1914 = vmatprep.subr.bf16.mxu0 %v2225_v1  ;;  %v273_v19 = vadd.f32 %v2326_v5, %v258_v10  ;;  %v270_v20 = vadd.f32 %v2326_v5, %v255_v11  ;;  %v2186_v37 = vld [vmem:[%s2773_s3 + $0x58] sm:$0xff]   ;;  %v2187_v43 = vld [vmem:[%s2773_s3 + $0x10] sm:$0xff]   ;;  %v2189_v51 = vld [vmem:[%s2773_s3 + $0x8] sm:$0xff]  }
  0x13   : > { %v274_v21 = vadd.f32 %v2326_v5, %v259_v15  ;;  %v275_v22 = vadd.f32 %v2326_v5, %v260_v16  ;;  %v256_v23 = vmul.f32 %v2290_v3, %v241_v17  ;;  %v280_v24 = vmax.f32 %v272_v18, 0.0  ;;  %v2188_v45 = vld [vmem:[%s2773_s3 + $0x50] sm:$0xff]   ;;  %v2190_v52 = vld [vmem:[%s2773_s3 + $0x48] sm:$0xff]   ;;  %v247_v53 = vld [vmem:[%s2321_s6 + $0x38] sm:$0xff]  ;;  %s2170_s6 = smul.u32 80, %s2777_s19 }
  0x14   : > { %v281_v25 = vmax.f32 %v273_v19, 0.0  ;;  %v278_v26 = vmax.f32 %v270_v20, 0.0  ;;  %v261_v31 = vmul.f32 %v2290_v3, %v246_v27  ;;  %v262_v54 = vmul.f32 %v2290_v3, %v247_v53  ;;  %v2191_v55 = vld [vmem:[%s2773_s3 + $0x40] sm:$0xff]   ;;  %v2194_v2 = vld [vmem:[%s2773_s3 + $0x98] sm:$0xff]   ;;  %v2195_v11 = vld [vmem:[%s2773_s3 + $0x70] sm:$0xff]  }
  0x15   : > { %2168 = vmatpush3.bf16.msra.mxu1 %v2183_v4  ;;  %1915 = vmatpush3.bf16.msra.mxu0 %v2183_v4  ;;  %v282_v28 = vmax.f32 %v274_v21, 0.0  ;;  %v283_v29 = vmax.f32 %v275_v22, 0.0  ;;  %v271_v30 = vadd.f32 %v2326_v5, %v256_v23  ;;  %288 = vst.msk [vmem:[#allocation2 + $0x1f] sm:$0xff] %vm226_vm0, %v280_v24  ;;  %v317_v36 = vld [vmem:[#allocation2 + $0x1] sm:$0xff]  ;;  %v2193_v10 = vld [vmem:[%s2773_s3 + $0x78] sm:$0xff]   ;;  %s2716_s11 = scalar_lea.vmem %s2775_s5, %s2170_s6 }
  0x16   : > { %2165 = vmatprep.subr.bf16.mxu1 %v2225_v1  ;;  %1916 = vmatprep.subr.bf16.mxu0 %v2225_v1  ;;  %289 = vst.msk [vmem:[#allocation2 + $0x29] sm:$0xff] %vm226_vm0, %v281_v25  ;;  %286 = vst.msk [vmem:[#allocation2 + $0xb] sm:$0xff] %vm226_vm0, %v278_v26  ;;  %v276_v33 = vadd.f32 %v2326_v5, %v261_v31  ;;  %v2192_v56 = vld [vmem:[%s2773_s3] sm:$0xff]   ;;  %v277_v60 = vadd.f32 %v2326_v5, %v262_v54  ;;  %v2196_v5 = vld [vmem:[%s2773_s3 + $0x90] sm:$0xff]  }
  0x17   : > { %290 = vst.msk [vmem:[#allocation2 + $0x33] sm:$0xff] %vm226_vm0, %v282_v28  ;;  %291 = vst.msk [vmem:[#allocation2 + $0x3d] sm:$0xff] %vm226_vm0, %v283_v29  ;;  %v279_v32 = vmax.f32 %v271_v30, 0.0  ;;  %v565_v58 = vld [vmem:[#allocation2 + $0x2] sm:$0xff] }
  0x18   : > { %v284_v34 = vmax.f32 %v276_v33, 0.0  ;;  %v285_v62 = vmax.f32 %v277_v60, 0.0  ;;  %v294_v3 = vld [vmem:[#allocation2] sm:$0xff]  ;;  %v2198_v13 = vld [vmem:[%s2773_s3 + $0x88] sm:$0xff]  }
  0x19   : > { %2169 = vmatpush3.bf16.msra.mxu1 %v2184_v14  ;;  %1917 = vmatpush3.bf16.msra.mxu0 %v2184_v14  ;;  %287 = vst.msk [vmem:[#allocation2 + $0x15] sm:$0xff] %vm226_vm0, %v279_v32  ;;  %v2200_v17 = vld [vmem:[%s2773_s3 + $0x80] sm:$0xff]   ;;  %v2197_v20 = vld [vmem:[%s2773_s3 + $0x68] sm:$0xff]  }
  0x1a   : > { %1938 = vmatprep.subr.bf16.mxu1 %v2225_v1  ;;  %1966 = vmatprep.subr.bf16.mxu0 %v2225_v1  ;;  %292 = vst.msk [vmem:[#allocation2 + $0x47] sm:$0xff] %vm226_vm0, %v284_v34  ;;  %293 = vst.msk [vmem:[#allocation2 + $0x51] sm:$0xff] %vm226_vm0, %v285_v62  ;;  %v2199_v25 = vld [vmem:[%s2773_s3 + $0x60] sm:$0xff]   ;;  %v2205_v54 = vld [vmem:[%s2773_s3 + $0xa8] sm:$0xff]  }
  0x1c   : > { %v321_v38 = vld [vmem:[#allocation2 + $0x21] sm:$0xff] }
  0x1d   : > { %v322_v39 = vld [vmem:[#allocation2 + $0x29] sm:$0xff]  ;;  %v298_v21 = vld [vmem:[#allocation2 + $0x20] sm:$0xff] }
  0x1e   : > { %v318_v40 = vld [vmem:[#allocation2 + $0x9] sm:$0xff]  ;;  %v329_v41 = vpack.c.bf16 %v322_v39, %v321_v38  ;;  %v323_v44 = vld [vmem:[#allocation2 + $0x31] sm:$0xff]  ;;  %v324_v46 = vld [vmem:[#allocation2 + $0x39] sm:$0xff] }
  0x1f   : > { %v327_v42 = vpack.c.bf16 %v318_v40, %v317_v36  ;;  %v330_v49 = vpack.c.bf16 %v324_v46, %v323_v44  ;;  %v2401_v59 = vld [vmem:[#allocation2 + $0xa] sm:$0xff]  ;;  %v2440_v12 = vld [vmem:[#allocation2 + $0x22] sm:$0xff]  ;;  %v2470_v23 = vld [vmem:[#allocation2 + $0x32] sm:$0xff] }
  0x20   : > { %1927 = vmatmul.mubr.msk.bf16.vlgmr.msra.gmra.mxu1 %vm226_vm0, %v329_v41  ;;  %v319_v47 = vld [vmem:[#allocation2 + $0x11] sm:$0xff]  ;;  %v320_v48 = vld [vmem:[#allocation2 + $0x19] sm:$0xff]  ;;  %v575_v0 = vpack.c.bf16 %v2401_v59, %v565_v58  ;;  %v295_v4 = vld [vmem:[#allocation2 + $0x8] sm:$0xff] }
  0x21   : > { %1919 = vmatmul.mubr.msk.bf16.vlgmr.msra.gmra.mxu0 %vm226_vm0, %v327_v42  ;;  %1939 = vmatpush3.bf16.msra.mxu1 %v2185_v35  ;;  %v328_v50 = vpack.c.bf16 %v320_v48, %v319_v47  ;;  %v325_v57 = vld [vmem:[#allocation2 + $0x41] sm:$0xff]  ;;  %v326_v61 = vld [vmem:[#allocation2 + $0x49] sm:$0xff]  ;;  %v2422_v6 = vld [vmem:[#allocation2 + $0x12] sm:$0xff]  ;;  %v304_v8 = vpack.c.bf16 %v295_v4, %v294_v3 }
  0x22   : > { %1967 = vmatpush3.bf16.msra.mxu0 %v2186_v37  ;;  %1940 = vmatprep.subr.bf16.mxu1 %v2225_v1  ;;  %v331_v63 = vpack.c.bf16 %v326_v61, %v325_v57  ;;  %v2426_v7 = vld [vmem:[#allocation2 + $0x1a] sm:$0xff]  ;;  %v2447_v14 = vld [vmem:[#allocation2 + $0x2a] sm:$0xff]  ;;  %v2488_v30 = vld [vmem:[#allocation2 + $0x42] sm:$0xff]  ;;  %v721_v44 = vpack.c.bf16 %v2422_v6, %v2401_v59 }
  0x23   : > { %1930 = vmatprep.mubr.msk.bf16.mxu1 %vm2226_vm1, %v2225_v1  ;;  %1968 = vmatprep.subr.bf16.mxu0 %v2225_v1  ;;  %v576_v9 = vpack.c.bf16 %v2426_v7, %v2422_v6  ;;  %v296_v15 = vld [vmem:[#allocation2 + $0x10] sm:$0xff]  ;;  %v297_v16 = vld [vmem:[#allocation2 + $0x18] sm:$0xff]  ;;  %v577_v19 = vpack.c.bf16 %v2447_v14, %v2440_v12  ;;  %v299_v22 = vld [vmem:[#allocation2 + $0x28] sm:$0xff]  ;;  %v723_v58 = vpack.c.bf16 %v2470_v23, %v2447_v14 }
  0x24   : > { %1922 = vmatprep.mubr.msk.bf16.mxu0 %vm2226_vm1, %v2225_v1  ;;  %v305_v18 = vpack.c.bf16 %v297_v16, %v296_v15  ;;  %v2472_v24 = vld [vmem:[#allocation2 + $0x3a] sm:$0xff]  ;;  %v306_v26 = vpack.c.bf16 %v299_v22, %v298_v21  ;;  %v300_v28 = vld [vmem:[#allocation2 + $0x30] sm:$0xff]  ;;  %v303_v35 = vld [vmem:[#allocation2 + $0x48] sm:$0xff] }
  0x25   : > { %1941 = vmatpush3.bf16.msra.mxu1 %v2187_v43  ;;  %v578_v27 = vpack.c.bf16 %v2472_v24, %v2470_v23  ;;  %v301_v29 = vld [vmem:[#allocation2 + $0x38] sm:$0xff]  ;;  %v2490_v31 = vld [vmem:[#allocation2 + $0x4a] sm:$0xff]  ;;  %v302_v34 = vld [vmem:[#allocation2 + $0x40] sm:$0xff]  ;;  %v724_v62 = vpack.c.bf16 %v2488_v30, %v2472_v24 }
  0x26   : > { %1969 = vmatpush3.bf16.msra.mxu0 %v2188_v45  ;;  %1942 = vmatprep.subr.bf16.mxu1 %v2225_v1  ;;  %v307_v32 = vpack.c.bf16 %v301_v29, %v300_v28  ;;  %v579_v33 = vpack.c.bf16 %v2490_v31, %v2488_v30  ;;  %v857_v36 = vld [vmem:[#allocation2 + $0xb] sm:$0xff]  ;;  %v858_v37 = vld [vmem:[#allocation2 + $0x13] sm:$0xff]  ;;  %v308_v38 = vpack.c.bf16 %v303_v35, %v302_v34  ;;  %v859_v41 = vld [vmem:[#allocation2 + $0x1b] sm:$0xff] }
  0x27   : > { %1970 = vmatprep.subr.bf16.mxu0 %v2225_v1  ;;  %v867_v39 = vpack.c.bf16 %v858_v37, %v857_v36  ;;  %v2202_v40 = vld [vmem:[%s2773_s3 + $0xd8] sm:$0xff]   ;;  %v860_v42 = vld [vmem:[#allocation2 + $0x23] sm:$0xff]  ;;  %v2204_v43 = vld [vmem:[%s2773_s3 + $0xd0] sm:$0xff]  }
  0x28   : > { %1931 = vmatmul.mubr.msk.bf16.gmra.mxu1 %vm226_vm0, %v330_v49  ;;  %v868_v45 = vpack.c.bf16 %v860_v42, %v859_v41  ;;  %v2201_v46 = vld [vmem:[%s2773_s3 + $0xb8] sm:$0xff]   ;;  %v2206_v47 = vld [vmem:[%s2773_s3 + $0xc8] sm:$0xff]   ;;  %v2203_v48 = vld [vmem:[%s2773_s3 + $0xb0] sm:$0xff]  }
  0x29   : > { %1923 = vmatmul.mubr.msk.bf16.gmra.mxu0 %vm226_vm0, %v328_v50  ;;  %1943 = vmatpush3.bf16.msra.mxu1 %v2189_v51  ;;  %v861_v49 = vld [vmem:[#allocation2 + $0x2b] sm:$0xff]  ;;  %v862_v50 = vld [vmem:[#allocation2 + $0x33] sm:$0xff]  ;;  %v2208_v51 = vld [vmem:[%s2773_s3 + $0xc0] sm:$0xff]  }
  0x2a   : > { %1971 = vmatpush3.bf16.msra.mxu0 %v2190_v52  ;;  %1934 = vmatprep.mubr.msk.bf16.mxu1 %vm2226_vm1, %v2225_v1  ;;  %v722_v52 = vpack.c.bf16 %v2440_v12, %v2426_v7  ;;  %v869_v53 = vpack.c.bf16 %v862_v50, %v861_v49  ;;  %v2207_v57 = vld [vmem:[%s2773_s3 + $0xa0] sm:$0xff]   ;;  %v865_v60 = vld [vmem:[#allocation2 + $0x4b] sm:$0xff]  ;;  %v866_v61 = vld [vmem:[#allocation2 + $0x53] sm:$0xff] }
  0x2b   : > { %1972 = vmatprep.subr.bf16.mxu0 %v2225_v1  ;;  %1944 = vmatprep.subr.bf16.mxu1 %v2225_v1  ;;  %v1150_v3 = vld [vmem:[#allocation2 + $0x1c] sm:$0xff]  ;;  %v1003_v7 = vld [vmem:[#allocation2 + $0xc] sm:$0xff]  ;;  %v1153_v16 = vld [vmem:[#allocation2 + $0x34] sm:$0xff] }
  0x2c   : > { %1974 = vmatprep.mubr.msk.bf16.mxu0 %vm2226_vm1, %v2225_v1  ;;  %v2210_v6 = vld [vmem:[%s2773_s3 + $0x118] sm:$0xff]   ;;  %v2214_v14 = vld [vmem:[%s2773_s3 + $0x108] sm:$0xff]   ;;  %v2211_v15 = vld [vmem:[%s2773_s3 + $0xf0] sm:$0xff]  }
  0x2d   : > { %1945 = vmatpush3.bf16.msra.mxu1 %v2192_v56  ;;  %v864_v56 = vld [vmem:[#allocation2 + $0x43] sm:$0xff]  ;;  %v1156_v23 = vld [vmem:[#allocation2 + $0x4c] sm:$0xff]  ;;  %v1295_v35 = vld [vmem:[#allocation2 + $0x15] sm:$0xff] }
  0x2e   : > { %1973 = vmatpush3.bf16.msra.mxu0 %v2191_v55  ;;  %1994 = vmatprep.subr.bf16.mxu1 %v2225_v1  ;;  %v863_v55 = vld [vmem:[#allocation2 + $0x3b] sm:$0xff]  ;;  %v2213_v21 = vld [vmem:[%s2773_s3 + $0xe8] sm:$0xff]  }
  0x2f   : > { %2022 = vmatprep.subr.bf16.mxu0 %v2225_v1  ;;  %v870_v59 = vpack.c.bf16 %v864_v56, %v863_v55  ;;  %v1155_v22 = vld [vmem:[#allocation2 + $0x44] sm:$0xff]  ;;  %v1158_v28 = vld [vmem:[#allocation2 + $0x5c] sm:$0xff]  ;;  %v1298_v42 = vld [vmem:[#allocation2 + $0x2d] sm:$0xff] }
  0x30   : > { %1935 = vmatmul.mubr.msk.bf16.gmra.mxu1 %vm226_vm0, %v331_v63  ;;  %v871_v63 = vpack.c.bf16 %v866_v61, %v865_v60  ;;  %v2215_v24 = vld [vmem:[%s2773_s3 + $0xe0] sm:$0xff]   ;;  %v1448_v50 = vld [vmem:[#allocation2 + $0x4e] sm:$0xff]  ;;  %v1449_v55 = vld [vmem:[#allocation2 + $0x56] sm:$0xff] }
  0x31   : > { %1975 = vmatmul.mubr.msk.bf16.vlgmr.msra.gmra.mxu0 %vm226_vm0, %v575_v0  ;;  %1946 = vmatprep.mubr.msk.bf16.mxu1 %vm2226_vm1, %v2225_v1  ;;  %v720_v0 = vld [vmem:[#allocation2 + $0x52] sm:$0xff]  ;;  %v1296_v36 = vld [vmem:[#allocation2 + $0x1d] sm:$0xff]  ;;  %v1443_v37 = vld [vmem:[#allocation2 + $0x26] sm:$0xff] }
  0x32   : > { %2023 = vmatpush3.bf16.msra.mxu0 %v2194_v2  ;;  %1978 = vmatprep.mubr.msk.bf16.mxu0 %vm2226_vm1, %v2225_v1  ;;  %v1149_v2 = vld [vmem:[#allocation2 + $0x14] sm:$0xff]  ;;  %v725_v4 = vpack.c.bf16 %v720_v0, %v2490_v31  ;;  %v1297_v41 = vld [vmem:[#allocation2 + $0x25] sm:$0xff]  ;;  %v1304_v60 = vld [vmem:[#allocation2 + $0x5d] sm:$0xff] }
  0x33   : > { %2024 = vmatprep.subr.bf16.mxu0 %v2225_v1  ;;  %v1441_v31 = vld [vmem:[#allocation2 + $0x16] sm:$0xff]  ;;  %v1447_v49 = vld [vmem:[#allocation2 + $0x46] sm:$0xff]  ;;  %v1450_v56 = vld [vmem:[#allocation2 + $0x5e] sm:$0xff] }
  0x36   : > { %2025 = vmatpush3.bf16.msra.mxu0 %v2196_v5  ;;  %v1159_v5 = vpack.c.bf16 %v1150_v3, %v1149_v2 }
  0x37   : > { %2026 = vmatprep.subr.bf16.mxu0 %v2225_v1 }
  0x38   : > { %1947 = vmatmul.mubr.msk.bf16.vlgmr.msra.gmra.mxu1 %vm226_vm0, %v304_v8  ;;  %v1151_v8 = vld [vmem:[#allocation2 + $0x24] sm:$0xff] }
  0x39   : > { %1979 = vmatmul.mubr.msk.bf16.gmra.mxu0 %vm226_vm0, %v576_v9  ;;  %1995 = vmatpush3.bf16.msra.mxu1 %v2193_v10  ;;  %v1152_v9 = vld [vmem:[#allocation2 + $0x2c] sm:$0xff] }
  0x3a   : > { %1950 = vmatprep.mubr.msk.bf16.mxu1 %vm2226_vm1, %v2225_v1  ;;  %1996 = vmatprep.subr.bf16.mxu1 %v2225_v1  ;;  %v2212_v10 = vld [vmem:[%s2773_s3 + $0x110] sm:$0xff]   ;;  %v1160_v12 = vpack.c.bf16 %v1152_v9, %v1151_v8 }
  0x3b   : > { %1982 = vmatprep.mubr.msk.bf16.mxu0 %vm2226_vm1, %v2225_v1  ;;  %2027 = vmatpush3.bf16.msra.mxu0 %v2198_v13  ;;  %v2209_v13 = vld [vmem:[%s2773_s3 + $0xf8] sm:$0xff]  }
  0x3c   : > { %2028 = vmatprep.subr.bf16.mxu0 %v2225_v1 }
  0x3d   : > { %1997 = vmatpush3.bf16.msra.mxu1 %v2195_v11  ;;  %v1013_v11 = vpack.c.bf16 %v1149_v2, %v1003_v7 }
  0x3e   : > { %1998 = vmatprep.subr.bf16.mxu1 %v2225_v1 }
  0x3f   : > { %2029 = vmatpush3.bf16.msra.mxu0 %v2200_v17  ;;  %v1154_v17 = vld [vmem:[#allocation2 + $0x3c] sm:$0xff] }
  0x40   : > { %1951 = vmatmul.mubr.msk.bf16.gmra.mxu1 %vm226_vm0, %v305_v18  ;;  %2078 = vmatprep.subr.bf16.mxu0 %v2225_v1  ;;  %v2216_v18 = vld [vmem:[%s2773_s3 + $0x100] sm:$0xff]   ;;  %v1016_v29 = vpack.c.bf16 %v1155_v22, %v1154_v17 }
  0x41   : > { %1983 = vmatmul.mubr.msk.bf16.gmra.mxu0 %vm226_vm0, %v577_v19  ;;  %1954 = vmatprep.mubr.msk.bf16.mxu1 %vm2226_vm1, %v2225_v1  ;;  %v1014_v19 = vpack.c.bf16 %v1151_v8, %v1150_v3 }
  0x42   : > { %1986 = vmatprep.mubr.msk.bf16.mxu0 %vm2226_vm1, %v2225_v1  ;;  %1999 = vmatpush3.bf16.msra.mxu1 %v2197_v20  ;;  %v1161_v20 = vpack.c.bf16 %v1154_v17, %v1153_v16 }
  0x43   : > { %2000 = vmatprep.subr.bf16.mxu1 %v2225_v1 }
  0x46   : > { %2001 = vmatpush3.bf16.msra.mxu1 %v2199_v25  ;;  %v1015_v25 = vpack.c.bf16 %v1153_v16, %v1152_v9 }
  0x47   : > { %2050 = vmatprep.subr.bf16.mxu1 %v2225_v1 }
  0x48   : > { %1955 = vmatmul.mubr.msk.bf16.gmra.mxu1 %vm226_vm0, %v306_v26  ;;  %v1162_v26 = vpack.c.bf16 %v1156_v23, %v1155_v22 }
  0x49   : > { %1987 = vmatmul.mubr.msk.bf16.gmra.mxu0 %vm226_vm0, %v578_v27  ;;  %1958 = vmatprep.mubr.msk.bf16.mxu1 %vm2226_vm1, %v2225_v1  ;;  %v1157_v27 = vld [vmem:[#allocation2 + $0x54] sm:$0xff] }
  0x4a   : > { %1990 = vmatprep.mubr.msk.bf16.mxu0 %vm2226_vm1, %v2225_v1  ;;  %v1163_v30 = vpack.c.bf16 %v1158_v28, %v1157_v27 }
  0x50   : > { %1959 = vmatmul.mubr.msk.bf16.gmra.mxu1 %vm226_vm0, %v307_v32  ;;  %v1442_v32 = vld [vmem:[#allocation2 + $0x1e] sm:$0xff] }
  0x51   : > { %1991 = vmatmul.mubr.msk.bf16.gmra.mxu0 %vm226_vm0, %v579_v33  ;;  %1962 = vmatprep.mubr.msk.bf16.mxu1 %vm2226_vm1, %v2225_v1  ;;  %v1017_v33 = vpack.c.bf16 %v1157_v27, %v1156_v23  ;;  %v1451_v34 = vpack.c.bf16 %v1442_v32, %v1441_v31 }
  0x52   : > { %2030 = vmatprep.mubr.msk.bf16.mxu0 %vm2226_vm1, %v2225_v1 }
  0x58   : > { %1963 = vmatmul.mubr.msk.bf16.gmra.mxu1 %vm226_vm0, %v308_v38  ;;  %v1444_v38 = vld [vmem:[#allocation2 + $0x2e] sm:$0xff] }
  0x59   : > { %2031 = vmatmul.mubr.msk.bf16.vlgmr.msra.gmra.mxu0 %vm226_vm0, %v867_v39  ;;  %2002 = vmatprep.mubr.msk.bf16.mxu1 %vm2226_vm1, %v2225_v1  ;;  %v1305_v39 = vpack.c.bf16 %v1296_v36, %v1295_v35 }
  0x5a   : > { %2079 = vmatpush3.bf16.msra.mxu0 %v2202_v40  ;;  %2034 = vmatprep.mubr.msk.bf16.mxu0 %vm2226_vm1, %v2225_v1  ;;  %v1452_v40 = vpack.c.bf16 %v1444_v38, %v1443_v37 }
  0x5b   : > { %2080 = vmatprep.subr.bf16.mxu0 %v2225_v1 }
  0x5e   : > { %2081 = vmatpush3.bf16.msra.mxu0 %v2204_v43  ;;  %v1445_v43 = vld [vmem:[#allocation2 + $0x36] sm:$0xff] }
  0x5f   : > { %2082 = vmatprep.subr.bf16.mxu0 %v2225_v1 }
  0x60   : > { %2003 = vmatmul.mubr.msk.bf16.vlgmr.msra.gmra.mxu1 %vm226_vm0, %v721_v44  ;;  %v1446_v44 = vld [vmem:[#allocation2 + $0x3e] sm:$0xff] }
  0x61   : > { %2035 = vmatmul.mubr.msk.bf16.gmra.mxu0 %vm226_vm0, %v868_v45  ;;  %2051 = vmatpush3.bf16.msra.mxu1 %v2201_v46  ;;  %v1306_v45 = vpack.c.bf16 %v1298_v42, %v1297_v41  ;;  %v1453_v46 = vpack.c.bf16 %v1446_v44, %v1445_v43 }
  0x62   : > { %2006 = vmatprep.mubr.msk.bf16.mxu1 %vm2226_vm1, %v2225_v1  ;;  %2052 = vmatprep.subr.bf16.mxu1 %v2225_v1 }
  0x63   : > { %2038 = vmatprep.mubr.msk.bf16.mxu0 %vm2226_vm1, %v2225_v1  ;;  %2083 = vmatpush3.bf16.msra.mxu0 %v2206_v47  ;;  %v1299_v47 = vld [vmem:[#allocation2 + $0x35] sm:$0xff] }
  0x64   : > { %2084 = vmatprep.subr.bf16.mxu0 %v2225_v1 }
  0x65   : > { %2053 = vmatpush3.bf16.msra.mxu1 %v2203_v48  ;;  %v1300_v48 = vld [vmem:[#allocation2 + $0x3d] sm:$0xff] }
  0x66   : > { %2054 = vmatprep.subr.bf16.mxu1 %v2225_v1 }
  0x67   : > { %2085 = vmatpush3.bf16.msra.mxu0 %v2208_v51  ;;  %v1307_v51 = vpack.c.bf16 %v1300_v48, %v1299_v47 }
  0x68   : > { %2007 = vmatmul.mubr.msk.bf16.gmra.mxu1 %vm226_vm0, %v722_v52  ;;  %2134 = vmatprep.subr.bf16.mxu0 %v2225_v1  ;;  %v1454_v52 = vpack.c.bf16 %v1448_v50, %v1447_v49 }
  0x69   : > { %2039 = vmatmul.mubr.msk.bf16.gmra.mxu0 %vm226_vm0, %v869_v53  ;;  %2010 = vmatprep.mubr.msk.bf16.mxu1 %vm2226_vm1, %v2225_v1  ;;  %v1301_v53 = vld [vmem:[#allocation2 + $0x45] sm:$0xff] }
  0x6a   : > { %2042 = vmatprep.mubr.msk.bf16.mxu0 %vm2226_vm1, %v2225_v1  ;;  %2055 = vmatpush3.bf16.msra.mxu1 %v2205_v54  ;;  %v1302_v54 = vld [vmem:[#allocation2 + $0x4d] sm:$0xff] }
  0x6b   : > { %2056 = vmatprep.subr.bf16.mxu1 %v2225_v1 }
  0x6e   : > { %2057 = vmatpush3.bf16.msra.mxu1 %v2207_v57  ;;  %v1308_v57 = vpack.c.bf16 %v1302_v54, %v1301_v53 }
  0x6f   : > { %2106 = vmatprep.subr.bf16.mxu1 %v2225_v1 }
  0x70   : > { %2011 = vmatmul.mubr.msk.bf16.gmra.mxu1 %vm226_vm0, %v723_v58  ;;  %v1455_v58 = vpack.c.bf16 %v1450_v56, %v1449_v55 }
  0x71   : > { %2043 = vmatmul.mubr.msk.bf16.gmra.mxu0 %vm226_vm0, %v870_v59  ;;  %2014 = vmatprep.mubr.msk.bf16.mxu1 %vm2226_vm1, %v2225_v1  ;;  %v1303_v59 = vld [vmem:[#allocation2 + $0x55] sm:$0xff] }
  0x72   : > { %2046 = vmatprep.mubr.msk.bf16.mxu0 %vm2226_vm1, %v2225_v1  ;;  %v1309_v61 = vpack.c.bf16 %v1304_v60, %v1303_v59 }
  0x78   : > { %2015 = vmatmul.mubr.msk.bf16.gmra.mxu1 %vm226_vm0, %v724_v62 }
  0x79   : > { %2047 = vmatmul.mubr.msk.bf16.gmra.mxu0 %vm226_vm0, %v871_v63  ;;  %2018 = vmatprep.mubr.msk.bf16.mxu1 %vm2226_vm1, %v2225_v1 }
  0x7a   : > { %2086 = vmatprep.mubr.msk.bf16.mxu0 %vm2226_vm1, %v2225_v1 }
  0x80   : > { %2019 = vmatmul.mubr.msk.bf16.gmra.mxu1 %vm226_vm0, %v725_v4 }
  0x81   : > { %2087 = vmatmul.mubr.msk.bf16.vlgmr.msra.gmra.mxu0 %vm226_vm0, %v1159_v5  ;;  %2058 = vmatprep.mubr.msk.bf16.mxu1 %vm2226_vm1, %v2225_v1 }
  0x82   : > { %2135 = vmatpush3.bf16.msra.mxu0 %v2210_v6  ;;  %2090 = vmatprep.mubr.msk.bf16.mxu0 %vm2226_vm1, %v2225_v1 }
  0x83   : > { %2136 = vmatprep.subr.bf16.mxu0 %v2225_v1 }
  0x86   : > { %2137 = vmatpush3.bf16.msra.mxu0 %v2212_v10 }
  0x87   : > { %2138 = vmatprep.subr.bf16.mxu0 %v2225_v1 }
  0x88   : > { %2059 = vmatmul.mubr.msk.bf16.vlgmr.msra.gmra.mxu1 %vm226_vm0, %v1013_v11 }
  0x89   : > { %2091 = vmatmul.mubr.msk.bf16.gmra.mxu0 %vm226_vm0, %v1160_v12  ;;  %2107 = vmatpush3.bf16.msra.mxu1 %v2209_v13 }
  0x8a   : > { %2062 = vmatprep.mubr.msk.bf16.mxu1 %vm2226_vm1, %v2225_v1  ;;  %2108 = vmatprep.subr.bf16.mxu1 %v2225_v1 }
  0x8b   : > { %2094 = vmatprep.mubr.msk.bf16.mxu0 %vm2226_vm1, %v2225_v1  ;;  %2139 = vmatpush3.bf16.msra.mxu0 %v2214_v14 }
  0x8c   : > { %2140 = vmatprep.subr.bf16.mxu0 %v2225_v1 }
  0x8d   : > { %2109 = vmatpush3.bf16.msra.mxu1 %v2211_v15 }
  0x8e   : > { %2110 = vmatprep.subr.bf16.mxu1 %v2225_v1 }
  0x8f   : > { %2141 = vmatpush3.bf16.msra.mxu0 %v2216_v18 }
  0x90   : > { %2063 = vmatmul.mubr.msk.bf16.gmra.mxu1 %vm226_vm0, %v1014_v19 }
  0x91   : > { %2095 = vmatmul.mubr.msk.bf16.gmra.mxu0 %vm226_vm0, %v1161_v20  ;;  %2066 = vmatprep.mubr.msk.bf16.mxu1 %vm2226_vm1, %v2225_v1 }
  0x92   : > { %2098 = vmatprep.mubr.msk.bf16.mxu0 %vm2226_vm1, %v2225_v1  ;;  %2111 = vmatpush3.bf16.msra.mxu1 %v2213_v21 }
  0x93   : > { %2112 = vmatprep.subr.bf16.mxu1 %v2225_v1 }
  0x96   : > { %2113 = vmatpush3.bf16.msra.mxu1 %v2215_v24 }
  0x98   : > { %2067 = vmatmul.mubr.msk.bf16.gmra.mxu1 %vm226_vm0, %v1015_v25 }
  0x99   : > { %2099 = vmatmul.mubr.msk.bf16.gmra.mxu0 %vm226_vm0, %v1162_v26  ;;  %2070 = vmatprep.mubr.msk.bf16.mxu1 %vm2226_vm1, %v2225_v1 }
  0x9a   : > { %2102 = vmatprep.mubr.msk.bf16.mxu0 %vm2226_vm1, %v2225_v1 }
  0xa0   : > { %2071 = vmatmul.mubr.msk.bf16.gmra.mxu1 %vm226_vm0, %v1016_v29 }
  0xa1   : > { %2103 = vmatmul.mubr.msk.bf16.gmra.mxu0 %vm226_vm0, %v1163_v30  ;;  %2074 = vmatprep.mubr.msk.bf16.mxu1 %vm2226_vm1, %v2225_v1 }
  0xa2   : > { %2142 = vmatprep.mubr.msk.bf16.mxu0 %vm2226_vm1, %v2225_v1 }
  0xa8   : > { %2075 = vmatmul.mubr.msk.bf16.gmra.mxu1 %vm226_vm0, %v1017_v33 }
  0xa9   : > { %2143 = vmatmul.mubr.msk.bf16.vlgmr.msra.gmra.mxu0 %vm226_vm0, %v1451_v34  ;;  %2114 = vmatprep.mubr.msk.bf16.mxu1 %vm2226_vm1, %v2225_v1 }
  0xaa   : > { %2146 = vmatprep.mubr.msk.bf16.mxu0 %vm2226_vm1, %v2225_v1 }
  0xb0   : > { %2115 = vmatmul.mubr.msk.bf16.vlgmr.msra.gmra.mxu1 %vm226_vm0, %v1305_v39 }
  0xb1   : > { %2147 = vmatmul.mubr.msk.bf16.gmra.mxu0 %vm226_vm0, %v1452_v40  ;;  %2118 = vmatprep.mubr.msk.bf16.mxu1 %vm2226_vm1, %v2225_v1 }
  0xb2   : > { %2150 = vmatprep.mubr.msk.bf16.mxu0 %vm2226_vm1, %v2225_v1 }
  0xb8   : > { %2119 = vmatmul.mubr.msk.bf16.gmra.mxu1 %vm226_vm0, %v1306_v45 }
  0xb9   : > { %2151 = vmatmul.mubr.msk.bf16.gmra.mxu0 %vm226_vm0, %v1453_v46  ;;  %2122 = vmatprep.mubr.msk.bf16.mxu1 %vm2226_vm1, %v2225_v1 }
  0xba   : > { %2154 = vmatprep.mubr.msk.bf16.mxu0 %vm2226_vm1, %v2225_v1 }
  0xc0   : > { %2123 = vmatmul.mubr.msk.bf16.gmra.mxu1 %vm226_vm0, %v1307_v51 }
  0xc1   : > { %2155 = vmatmul.mubr.msk.bf16.gmra.mxu0 %vm226_vm0, %v1454_v52  ;;  %2126 = vmatprep.mubr.msk.bf16.mxu1 %vm2226_vm1, %v2225_v1 }
  0xc2   : > { %2158 = vmatprep.mubr.msk.bf16.mxu0 %vm2226_vm1, %v2225_v1 }
  0xc8   : > { %2127 = vmatmul.mubr.msk.bf16.gmra.mxu1 %vm226_vm0, %v1308_v57 }
  0xc9   : > { %2159 = vmatmul.mubr.msk.bf16.gmra.mxu0 %vm226_vm0, %v1455_v58  ;;  %2130 = vmatprep.mubr.msk.bf16.mxu1 %vm2226_vm1, %v2225_v1 }
  0xd0   : > { %2131 = vmatmul.mubr.msk.bf16.gmra.mxu1 %vm226_vm0, %v1309_v61 }
  0xe0   : > { %v430_v62 = vpop.f32.mrf.mxu1 }
  0xe1   : > { %v414_v63 = vpop.f32.mrf.mxu0 }
  0xe2   : > { %v1928_v0 = vpop.f32.mrf.mxu1 }
  0xe3   : > { %v1920_v2 = vpop.f32.mrf.mxu0 }
  0xe4   : > { %v433_v3 = vpop.f32.mrf.mxu1 }
  0xe5   : > { %v417_v4 = vpop.f32.mrf.mxu0 }
  0xe6   : > { %v1929_v5 = vpop.f32.mrf.mxu1 }
  0xe7   : > { %v1921_v6 = vpop.f32.mrf.mxu0 }
  0xe8   : > { %v438_v7 = vpop.f32.mrf.mxu1 }
  0xe9   : > { %v422_v8 = vpop.f32.mrf.mxu0 }
  0xea   : > { %v1932_v9 = vpop.f32.mrf.mxu1 }
  0xeb   : > { %v1924_v10 = vpop.f32.mrf.mxu0 }
  0xec   : > { %v441_v11 = vpop.f32.mrf.mxu1 }
  0xed   : > { %v425_v12 = vpop.f32.mrf.mxu0 }
  0xee   : > { %v1933_v1 = vpop.f32.mrf.mxu1 }
  0xef   : > { %v1925_v13 = vpop.f32.mrf.mxu0 }
  0xf0   : > { %v446_v14 = vpop.f32.mrf.mxu1 }
  0xf1   : > { %v662_v15 = vpop.f32.mrf.mxu0 }
  0xf2   : > { %v1936_v16 = vpop.f32.mrf.mxu1 }
  0xf3   : > { %v1976_v17 = vpop.f32.mrf.mxu0 }
  0xf4   : > { %v449_v18 = vpop.f32.mrf.mxu1 }
  0xf5   : > { %v665_v19 = vpop.f32.mrf.mxu0 }
  0xf6   : > { %v1937_v20 = vpop.f32.mrf.mxu1 }
  0xf7   : > { %v1977_v21 = vpop.f32.mrf.mxu0 }
  0xf8   : > { %v526_v22 = vpop.f32.mrf.mxu1 }
  0xf9   : > { %v670_v23 = vpop.f32.mrf.mxu0  ;;  %v527_v24 = vadd.f32 %v526_v22, %v414_v63 }
  0xfa   : > { %v1948_v25 = vpop.f32.mrf.mxu1 }
  0xfb   : > { %v1980_v26 = vpop.f32.mrf.mxu0  ;;  %v701_v27 = vadd.f32 %v662_v15, %v527_v24 }
  0xfc   : > { %v529_v28 = vpop.f32.mrf.mxu1 }
  0xfd   : > { %v673_v29 = vpop.f32.mrf.mxu0  ;;  %v530_v30 = vadd.f32 %v529_v28, %v417_v4 }
  0xfe   : > { %v1949_v31 = vpop.f32.mrf.mxu1 }
  0xff   : > { %v1981_v32 = vpop.f32.mrf.mxu0  ;;  %v702_v33 = vadd.f32 %v665_v19, %v530_v30 }
 0x100   : > { %v534_v34 = vpop.f32.mrf.mxu1 }
 0x101   : > { %v678_v35 = vpop.f32.mrf.mxu0  ;;  %v535_v36 = vadd.f32 %v534_v34, %v422_v8 }
 0x102   : > { %v1952_v37 = vpop.f32.mrf.mxu1 }
 0x103   : > { %v1984_v38 = vpop.f32.mrf.mxu0  ;;  %v703_v39 = vadd.f32 %v670_v23, %v535_v36 }
 0x104   : > { %v537_v40 = vpop.f32.mrf.mxu1 }
 0x105   : > { %v681_v41 = vpop.f32.mrf.mxu0  ;;  %v538_v42 = vadd.f32 %v537_v40, %v425_v12 }
 0x106   : > { %v1953_v43 = vpop.f32.mrf.mxu1 }
 0x107   : > { %v1985_v44 = vpop.f32.mrf.mxu0  ;;  %v704_v45 = vadd.f32 %v673_v29, %v538_v42 }
 0x108   : > { %v542_v46 = vpop.f32.mrf.mxu1 }
 0x109   : > { %v686_v47 = vpop.f32.mrf.mxu0  ;;  %v543_v48 = vadd.f32 %v542_v46, %v430_v62 }
 0x10a   : > { %v1956_v49 = vpop.f32.mrf.mxu1 }
 0x10b   : > { %v1988_v50 = vpop.f32.mrf.mxu0  ;;  %v705_v51 = vadd.f32 %v678_v35, %v543_v48 }
 0x10c   : > { %v545_v52 = vpop.f32.mrf.mxu1 }
 0x10d   : > { %v689_v53 = vpop.f32.mrf.mxu0  ;;  %v546_v54 = vadd.f32 %v545_v52, %v433_v3 }
 0x10e   : > { %v1957_v55 = vpop.f32.mrf.mxu1 }
 0x10f   : > { %v1989_v56 = vpop.f32.mrf.mxu0  ;;  %v706_v57 = vadd.f32 %v681_v41, %v546_v54 }
 0x110   : > { %v550_v58 = vpop.f32.mrf.mxu1 }
 0x111   : > { %v694_v59 = vpop.f32.mrf.mxu0  ;;  %v551_v60 = vadd.f32 %v550_v58, %v438_v7 }
 0x112   : > { %v1960_v61 = vpop.f32.mrf.mxu1 }
 0x113   : > { %v1992_v63 = vpop.f32.mrf.mxu0  ;;  %v707_v0 = vadd.f32 %v686_v47, %v551_v60 }
 0x114   : > { %v553_v2 = vpop.f32.mrf.mxu1 }
 0x115   : > { %v697_v4 = vpop.f32.mrf.mxu0  ;;  %v554_v5 = vadd.f32 %v553_v2, %v441_v11 }
 0x116   : > { %v1961_v6 = vpop.f32.mrf.mxu1 }
 0x117   : > { %v1993_v62 = vpop.f32.mrf.mxu0  ;;  %v708_v8 = vadd.f32 %v689_v53, %v554_v5 }
 0x118   : > { %v558_v9 = vpop.f32.mrf.mxu1 }
 0x119   : > { %v954_v10 = vpop.f32.mrf.mxu0  ;;  %v559_v12 = vadd.f32 %v558_v9, %v446_v14 }
 0x11a   : > { %v1964_v1 = vpop.f32.mrf.mxu1 }
 0x11b   : > { %v2032_v3 = vpop.f32.mrf.mxu0  ;;  %v709_v13 = vadd.f32 %v694_v59, %v559_v12 }
 0x11c   : > { %v561_v15 = vpop.f32.mrf.mxu1 }
 0x11d   : > { %v957_v16 = vpop.f32.mrf.mxu0  ;;  %v562_v17 = vadd.f32 %v561_v15, %v449_v18 }
 0x11e   : > { %v1965_v19 = vpop.f32.mrf.mxu1 }
 0x11f   : > { %v2033_v7 = vpop.f32.mrf.mxu0  ;;  %v710_v20 = vadd.f32 %v697_v4, %v562_v17 }
 0x120   : > { %v808_v21 = vpop.f32.mrf.mxu1 }
 0x121   : > { %v962_v22 = vpop.f32.mrf.mxu0  ;;  %v847_v23 = vadd.f32 %v808_v21, %v701_v27 }
 0x122   : > { %v2004_v24 = vpop.f32.mrf.mxu1 }
 0x123   : > { %v2036_v11 = vpop.f32.mrf.mxu0  ;;  %v2660_v25 = vadd.f32 %v954_v10, %v847_v23 }
 0x124   : > { %v811_v26 = vpop.f32.mrf.mxu1 }
 0x125   : > { %v965_v28 = vpop.f32.mrf.mxu0  ;;  %v848_v29 = vadd.f32 %v811_v26, %v702_v33 }
 0x126   : > { %v2005_v14 = vpop.f32.mrf.mxu1 }
 0x127   : > { %v2037_v30 = vpop.f32.mrf.mxu0  ;;  %v2662_v31 = vadd.f32 %v957_v16, %v848_v29 }
 0x128   : > { %v816_v32 = vpop.f32.mrf.mxu1 }
 0x129   : > { %v970_v34 = vpop.f32.mrf.mxu0  ;;  %v849_v18 = vadd.f32 %v816_v32, %v703_v39 }
 0x12a   : > { %v2008_v35 = vpop.f32.mrf.mxu1 }
 0x12b   : > { %v2040_v36 = vpop.f32.mrf.mxu0  ;;  %v2664_v37 = vadd.f32 %v962_v22, %v849_v18 }
 0x12c   : > { %v819_v38 = vpop.f32.mrf.mxu1 }
 0x12d   : > { %v973_v27 = vpop.f32.mrf.mxu0  ;;  %v850_v40 = vadd.f32 %v819_v38, %v704_v45 }
 0x12e   : > { %v2009_v41 = vpop.f32.mrf.mxu1 }
 0x12f   : > { %v2041_v42 = vpop.f32.mrf.mxu0  ;;  %v2666_v43 = vadd.f32 %v965_v28, %v850_v40 }
 0x130   : > { %v824_v44 = vpop.f32.mrf.mxu1 }
 0x131   : > { %v978_v33 = vpop.f32.mrf.mxu0  ;;  %v851_v46 = vadd.f32 %v824_v44, %v705_v51 }
 0x132   : > { %v2012_v47 = vpop.f32.mrf.mxu1 }
 0x133   : > { %v2044_v48 = vpop.f32.mrf.mxu0  ;;  %v2668_v49 = vadd.f32 %v970_v34, %v851_v46 }
 0x134   : > { %v827_v50 = vpop.f32.mrf.mxu1 }
 0x135   : > { %v981_v39 = vpop.f32.mrf.mxu0  ;;  %v852_v52 = vadd.f32 %v827_v50, %v706_v57 }
 0x136   : > { %v2013_v53 = vpop.f32.mrf.mxu1 }
 0x137   : > { %v2045_v54 = vpop.f32.mrf.mxu0  ;;  %v2670_v55 = vadd.f32 %v973_v27, %v852_v52 }
 0x138   : > { %v832_v56 = vpop.f32.mrf.mxu1 }
 0x139   : > { %v986_v45 = vpop.f32.mrf.mxu0  ;;  %v853_v58 = vadd.f32 %v832_v56, %v707_v0 }
 0x13a   : > { %v2016_v59 = vpop.f32.mrf.mxu1 }
 0x13b   : > { %v2048_v60 = vpop.f32.mrf.mxu0  ;;  %v2672_v61 = vadd.f32 %v978_v33, %v853_v58 }
 0x13c   : > { %v835_v63 = vpop.f32.mrf.mxu1 }
 0x13d   : > { %v989_v51 = vpop.f32.mrf.mxu0  ;;  %v854_v2 = vadd.f32 %v835_v63, %v708_v8 }
 0x13e   : > { %v2017_v4 = vpop.f32.mrf.mxu1 }
 0x13f   : > { %v2049_v5 = vpop.f32.mrf.mxu0  ;;  %v2674_v6 = vadd.f32 %v981_v39, %v854_v2 }
 0x140   : > { %v840_v62 = vpop.f32.mrf.mxu1 }
 0x141   : > { %v1246_v57 = vpop.f32.mrf.mxu0  ;;  %v855_v9 = vadd.f32 %v840_v62, %v709_v13 }
 0x142   : > { %v2020_v10 = vpop.f32.mrf.mxu1 }
 0x143   : > { %v2088_v12 = vpop.f32.mrf.mxu0  ;;  %v2676_v1 = vadd.f32 %v986_v45, %v855_v9  ;;  %v2710_v10 = vld [vmem:[%s2774_s4] ss:$0 sm:$0xff] }
 0x144   : > { %v843_v3 = vpop.f32.mrf.mxu1 }
 0x145   : > { %v1249_v0 = vpop.f32.mrf.mxu0  ;;  %v856_v15 = vadd.f32 %v843_v3, %v710_v20 }
 0x146   : > { %v2021_v16 = vpop.f32.mrf.mxu1 }
 0x147   : > { %v2089_v17 = vpop.f32.mrf.mxu0  ;;  %v2678_v19 = vadd.f32 %v989_v51, %v856_v15 }
 0x148   : > { %v1100_v7 = vpop.f32.mrf.mxu1 }
 0x149   : > { %v2680_v8 = vpop.f32.mrf.mxu0  ;;  %v1139_v58 = vadd.f32 %v1100_v7, %v2660_v25 }
 0x14a   : > { %v2060_v21 = vpop.f32.mrf.mxu1 }
 0x14b   : > { %v2092_v22 = vpop.f32.mrf.mxu0  ;;  %v1285_v4 = vadd.f32 %v1246_v57, %v1139_v58 }
 0x14c   : > { %v1103_v23 = vpop.f32.mrf.mxu1 }
 0x14d   : > { %v2682_v24 = vpop.f32.mrf.mxu0  ;;  %v1140_v2 = vadd.f32 %v1103_v23, %v2662_v31 }
 0x14e   : > { %v2061_v13 = vpop.f32.mrf.mxu1 }
 0x14f   : > { %v2093_v11 = vpop.f32.mrf.mxu0  ;;  %v1286_v16 = vadd.f32 %v1249_v0, %v1140_v2 }
 0x150   : > { %v1108_v26 = vpop.f32.mrf.mxu1 }
 0x151   : > { %v2684_v28 = vpop.f32.mrf.mxu0  ;;  %v1141_v25 = vadd.f32 %v1108_v26, %v2664_v37 }
 0x152   : > { %v2064_v29 = vpop.f32.mrf.mxu1 }
 0x153   : > { %v2096_v14 = vpop.f32.mrf.mxu0  ;;  %v1287_v0 = vadd.f32 %v2680_v8, %v1141_v25 }
 0x154   : > { %v1111_v20 = vpop.f32.mrf.mxu1 }
 0x155   : > { %v2686_v30 = vpop.f32.mrf.mxu0  ;;  %v1142_v23 = vadd.f32 %v1111_v20, %v2666_v43 }
 0x156   : > { %v2065_v32 = vpop.f32.mrf.mxu1 }
 0x157   : > { %v2097_v34 = vpop.f32.mrf.mxu0  ;;  %v1288_v43 = vadd.f32 %v2682_v24, %v1142_v23 }
 0x158   : > { %v1116_v18 = vpop.f32.mrf.mxu1 }
 0x159   : > { %v2688_v35 = vpop.f32.mrf.mxu0  ;;  %v1143_v34 = vadd.f32 %v1116_v18, %v2668_v49 }
 0x15a   : > { %v2068_v36 = vpop.f32.mrf.mxu1 }
 0x15b   : > { %v2100_v38 = vpop.f32.mrf.mxu0  ;;  %v1289_v49 = vadd.f32 %v2684_v28, %v1143_v34 }
 0x15c   : > { %v1119_v27 = vpop.f32.mrf.mxu1 }
 0x15d   : > { %v2690_v40 = vpop.f32.mrf.mxu0 }
 0x15e   : > { %v2069_v41 = vpop.f32.mrf.mxu1 }
 0x15f   : > { %v2101_v42 = vpop.f32.mrf.mxu0 }
 0x160   : > { %v2692_v44 = vpop.f32.mrf.mxu1 }
 0x161   : > { %v2694_v33 = vpop.f32.mrf.mxu0  ;;  %v1145_v58 = vadd.f32 %v2692_v44, %v2672_v61 }
 0x162   : > { %v2072_v46 = vpop.f32.mrf.mxu1 }
 0x163   : > { %v2104_v47 = vpop.f32.mrf.mxu0  ;;  %v1291_v61 = vadd.f32 %v2688_v35, %v1145_v58 }
 0x164   : > { %v2696_v48 = vpop.f32.mrf.mxu1  ;;  %v1144_v47 = vadd.f32 %v1119_v27, %v2670_v55 }
 0x165   : > { %v2698_v50 = vpop.f32.mrf.mxu0 }
 0x166   : > { %v2073_v39 = vpop.f32.mrf.mxu1  ;;  %v1290_v55 = vadd.f32 %v2686_v30, %v1144_v47 }
 0x167   : > { %v2105_v52 = vpop.f32.mrf.mxu0 }
 0x168   : > { %v2700_v53 = vpop.f32.mrf.mxu1 }
 0x169   : > { %v1538_v54 = vpop.f32.mrf.mxu0 }
 0x16a   : > { %v2076_v56 = vpop.f32.mrf.mxu1 }
 0x16b   : > { %v2144_v45 = vpop.f32.mrf.mxu0 }
 0x16c   : > { %v2703_v59 = vpop.f32.mrf.mxu1 }
 0x16d   : > { %v1541_v60 = vpop.f32.mrf.mxu0 }
 0x16e   : > { %v2077_v63 = vpop.f32.mrf.mxu1 }
 0x16f   : > { %v2145_v51 = vpop.f32.mrf.mxu0 }
 0x170   : > { %v1392_v5 = vpop.f32.mrf.mxu1 }
 0x171   : > { %v1546_v62 = vpop.f32.mrf.mxu0  ;;  %v1431_v9 = vadd.f32 %v1392_v5, %v1285_v4  ;;  %v1146_v5 = vadd.f32 %v2696_v48, %v2674_v6 }
 0x172   : > { %v2116_v12 = vpop.f32.mrf.mxu1 }
 0x173   : > { %v2148_v3 = vpop.f32.mrf.mxu0  ;;  %v1577_v15 = vadd.f32 %v1538_v54, %v1431_v9  ;;  %v1292_v6 = vadd.f32 %v2690_v40, %v1146_v5 }
 0x174   : > { %v1395_v31 = vpop.f32.mrf.mxu1 }
 0x175   : > { %v1549_v57 = vpop.f32.mrf.mxu0  ;;  %v1594_v17 = vadd.f32 %v2710_v10, %v1577_v15  ;;  %v1432_v7 = vadd.f32 %v1395_v31, %v1286_v16  ;;  %v1147_v15 = vadd.f32 %v2700_v53, %v2676_v1 }
 0x176   : > { %v2117_v21 = vpop.f32.mrf.mxu1 }
 0x177   : > { %v2149_v22 = vpop.f32.mrf.mxu0  ;;  %1605 = vst.msk [vmem:[%s2716_s11] sm:$0xff] %vm1604_vm2, %v1594_v17  ;;  %v1578_v37 = vadd.f32 %v1541_v60, %v1432_v7  ;;  %v1148_v21 = vadd.f32 %v2703_v59, %v2678_v19  ;;  %v1293_v53 = vadd.f32 %v2694_v33, %v1147_v15 }
 0x178   : > { %v1400_v13 = vpop.f32.mrf.mxu1 }
 0x179   : > { %v1554_v11 = vpop.f32.mrf.mxu0  ;;  %v1595_v26 = vadd.f32 %v2710_v10, %v1578_v37  ;;  %v1433_v29 = vadd.f32 %v1400_v13, %v1287_v0  ;;  %v1294_v13 = vadd.f32 %v2698_v50, %v1148_v21 }
 0x17a   : > { %v2120_v14 = vpop.f32.mrf.mxu1 }
 0x17b   : > { %v2152_v32 = vpop.f32.mrf.mxu0  ;;  %1606 = vst.msk [vmem:[%s2716_s11 + $0x8] sm:$0xff] %vm1604_vm2, %v1595_v26  ;;  %v1579_v36 = vadd.f32 %v1546_v62, %v1433_v29 }
 0x17c   : > { %v1403_v20 = vpop.f32.mrf.mxu1 }
 0x17d   : > { %v1557_v38 = vpop.f32.mrf.mxu0  ;;  %v1596_v8 = vadd.f32 %v2710_v10, %v1579_v36  ;;  %v1434_v41 = vadd.f32 %v1403_v20, %v1288_v43 }
 0x17e   : > { %v2121_v42 = vpop.f32.mrf.mxu1 }
 0x17f   : > { %v2153_v46 = vpop.f32.mrf.mxu0  ;;  %1607 = vst.msk [vmem:[%s2716_s11 + $0x10] sm:$0xff] %vm1604_vm2, %v1596_v8  ;;  %v1580_v39 = vadd.f32 %v1549_v57, %v1434_v41 }
 0x180   : > { %v1408_v18 = vpop.f32.mrf.mxu1 }
 0x181   : > { %v1562_v52 = vpop.f32.mrf.mxu0  ;;  %v1597_v24 = vadd.f32 %v2710_v10, %v1580_v39  ;;  %v1435_v54 = vadd.f32 %v1408_v18, %v1289_v49 }
 0x182   : > { %v2124_v56 = vpop.f32.mrf.mxu1 }
 0x183   : > { %v2156_v45 = vpop.f32.mrf.mxu0  ;;  %1608 = vst.msk [vmem:[%s2716_s11 + $0x18] sm:$0xff] %vm1604_vm2, %v1597_v24  ;;  %v1581_v60 = vadd.f32 %v1554_v11, %v1435_v54 }
 0x184   : > { %v1411_v27 = vpop.f32.mrf.mxu1 }
 0x185   : > { %v1565_v63 = vpop.f32.mrf.mxu0  ;;  %v1598_v28 = vadd.f32 %v2710_v10, %v1581_v60  ;;  %v1436_v51 = vadd.f32 %v1411_v27, %v1290_v55 }
 0x186   : > { %v2125_v2 = vpop.f32.mrf.mxu1 }
 0x187   : > { %v2157_v4 = vpop.f32.mrf.mxu0  ;;  %1609 = vst.msk [vmem:[%s2716_s11 + $0x20] sm:$0xff] %vm1604_vm2, %v1598_v28  ;;  %v1582_v62 = vadd.f32 %v1557_v38, %v1436_v51 }
 0x188   : > { %v1416_v44 = vpop.f32.mrf.mxu1 }
 0x189   : > { %v1570_v9 = vpop.f32.mrf.mxu0  ;;  %v1599_v30 = vadd.f32 %v2710_v10, %v1582_v62  ;;  %v1437_v12 = vadd.f32 %v1416_v44, %v1291_v61 }
 0x18a   : > { %v2128_v3 = vpop.f32.mrf.mxu1 }
 0x18b   : > { %v2160_v25 = vpop.f32.mrf.mxu0  ;;  %1610 = vst.msk [vmem:[%s2716_s11 + $0x28] sm:$0xff] %vm1604_vm2, %v1599_v30  ;;  %v1583_v16 = vadd.f32 %v1562_v52, %v1437_v12 }
 0x18c   : > { %v1419_v48 = vpop.f32.mrf.mxu1 }
 0x18d   : > { %v1573_v31 = vpop.f32.mrf.mxu0  ;;  %v1600_v35 = vadd.f32 %v2710_v10, %v1583_v16  ;;  %v1438_v57 = vadd.f32 %v1419_v48, %v1292_v6 }
 0x18e   : > { %v2129_v17 = vpop.f32.mrf.mxu1 }
 0x18f   : > { %v2161_v7 = vpop.f32.mrf.mxu0  ;;  %1611 = vst.msk [vmem:[%s2716_s11 + $0x30] sm:$0xff] %vm1604_vm2, %v1600_v35  ;;  %v1584_v1 = vadd.f32 %v1565_v63, %v1438_v57 }
 0x190   : > { %v1424_v22 = vpop.f32.mrf.mxu1 }
 0x191   : > { %v1601_v40 = vadd.f32 %v2710_v10, %v1584_v1  ;;  %v1439_v23 = vadd.f32 %v1424_v22, %v1293_v53 }
 0x192   : > { %v2132_v37 = vpop.f32.mrf.mxu1 }
 0x193   : > { %1612 = vst.msk [vmem:[%s2716_s11 + $0x38] sm:$0xff] %vm1604_vm2, %v1601_v40  ;;  %v1585_v0 = vadd.f32 %v1570_v9, %v1439_v23 }
 0x194   : > { %v1427_v11 = vpop.f32.mrf.mxu1 }
 0x195   : > { %v1602_v26 = vadd.f32 %v2710_v10, %v1585_v0  ;;  %v1440_v19 = vadd.f32 %v1427_v11, %v1294_v13 }
 0x196   : > { %v2133_v59 = vpop.f32.mrf.mxu1 }
 0x197   : > { %1613 = vst.msk [vmem:[%s2716_s11 + $0x40] sm:$0xff] %vm1604_vm2, %v1602_v26  ;;  %v1586_v29 = vadd.f32 %v1573_v31, %v1440_v19 }
 0x199   : > { %v1603_v33 = vadd.f32 %v2710_v10, %v1586_v29 }
 0x19b   : > { %1614 = vst.msk [vmem:[%s2716_s11 + $0x48] sm:$0xff] %vm1604_vm2, %v1603_v33 }
 0x19c PF: > { %s15_s18 = sadd.s32 1, %s2223_s18  }
 0x19d   : > { %p12_p4 = scmp.ge.s32.totalorder %s15_s18, 4  }
 0x19f   :  { %14 = sbr.rel (!%p12_p4) target bundleno = 1 (0x1), region = 78 }

// kernel: densenet_forward.24
= control target key start
LH: loop header
LB: loop body
LE: loop exit
PB: predicated region body
PF: predicated region fallthrough
CT: control target
= control target key end

     0   :  { %vm14_vm0 = vcmask 122880   ;;  %vm34_vm1 = vcmask 130048   ;;  %v140_v0 = vmov 0.0   ;;  %s258_s0 = inlined_call_operand.vmem [shape: f32[128,16], index: 0, kind: input, shape index: {}]   ;;  %s259_s1 = inlined_call_operand.vmem [shape: f32[1,16], index: 1, kind: output, shape index: {0}]   ;;  %s260_s2 = inlined_call_operand.vmem [shape: f32[1,16], index: 2, kind: output, shape index: {1}]  }
   0x1   :  { %15 = vst.msk [vmem:[%s259_s1] sm:$0x1] %vm14_vm0, %v140_v0  ;;  %v17_v1 = vld [vmem:[%s258_s0] sm:$0xff]  ;;  %v18_v2 = vld [vmem:[%s258_s0 + $0x8] sm:$0xff]  ;;  %v19_v3 = vld [vmem:[%s258_s0 + $0x10] sm:$0xff] }
   0x2   :  { %16 = vst.msk [vmem:[%s260_s2] sm:$0x1] %vm14_vm0, %v140_v0  ;;  %v35_v4 = vsel %vm34_vm1, %v17_v1, 0.0  ;;  %v36_v5 = vsel %vm34_vm1, %v18_v2, 0.0  ;;  %v38_v6 = vsel %vm34_vm1, %v19_v3, 0.0  ;;  %v20_v7 = vld [vmem:[%s258_s0 + $0x18] sm:$0xff]  ;;  %v76_v15 = vmul.f32 %v17_v1, %v17_v1 }
   0x3   :  { %v37_v8 = vadd.f32 %v36_v5, %v35_v4  ;;  %v40_v9 = vsel %vm34_vm1, %v20_v7, 0.0  ;;  %v21_v10 = vld [vmem:[%s258_s0 + $0x20] sm:$0xff]  ;;  %v22_v13 = vld [vmem:[%s258_s0 + $0x28] sm:$0xff]  ;;  %v77_v16 = vmul.f32 %v18_v2, %v18_v2  ;;  %v78_v17 = vmul.f32 %v19_v3, %v19_v3  ;;  %v23_v19 = vld [vmem:[%s258_s0 + $0x30] sm:$0xff] }
   0x4   :  { %v42_v12 = vsel %vm34_vm1, %v21_v10, 0.0  ;;  %v44_v18 = vsel %vm34_vm1, %v22_v13, 0.0  ;;  %v79_v21 = vmul.f32 %v20_v7, %v20_v7  ;;  %v46_v22 = vsel %vm34_vm1, %v23_v19, 0.0  ;;  %v24_v24 = vld [vmem:[%s258_s0 + $0x38] sm:$0xff]  ;;  %v25_v31 = vld [vmem:[%s258_s0 + $0x40] sm:$0xff]  ;;  %v26_v37 = vld [vmem:[%s258_s0 + $0x48] sm:$0xff] }
   0x5   :  { %v39_v11 = vadd.f32 %v38_v6, %v37_v8  ;;  %v80_v23 = vmul.f32 %v21_v10, %v21_v10  ;;  %v92_v26 = vsel %vm34_vm1, %v76_v15, 0.0  ;;  %v93_v27 = vsel %vm34_vm1, %v77_v16, 0.0  ;;  %v27_v43 = vld [vmem:[%s258_s0 + $0x50] sm:$0xff]  ;;  %v28_v49 = vld [vmem:[%s258_s0 + $0x58] sm:$0xff]  ;;  %v29_v55 = vld [vmem:[%s258_s0 + $0x60] sm:$0xff] }
   0x6   :  { %v95_v28 = vsel %vm34_vm1, %v78_v17, 0.0  ;;  %v48_v29 = vsel %vm34_vm1, %v24_v24, 0.0  ;;  %v94_v30 = vadd.f32 %v93_v27, %v92_v26  ;;  %v81_v33 = vmul.f32 %v22_v13, %v22_v13  ;;  %v30_v61 = vld [vmem:[%s258_s0 + $0x68] sm:$0xff]  ;;  %v31_v3 = vld [vmem:[%s258_s0 + $0x70] sm:$0xff] }
   0x7   :  { %v41_v14 = vadd.f32 %v40_v9, %v39_v11  ;;  %v97_v34 = vsel %vm34_vm1, %v79_v21, 0.0  ;;  %v50_v35 = vsel %vm34_vm1, %v25_v31, 0.0  ;;  %v82_v39 = vmul.f32 %v23_v19, %v23_v19  ;;  %v32_v9 = vld [vmem:[%s258_s0 + $0x78] sm:$0xff] }
   0x8   :  { %v96_v36 = vadd.f32 %v95_v28, %v94_v30  ;;  %v99_v40 = vsel %vm34_vm1, %v80_v23, 0.0  ;;  %v52_v41 = vsel %vm34_vm1, %v26_v37, 0.0  ;;  %v83_v45 = vmul.f32 %v24_v24, %v24_v24 }
   0x9   :  { %v43_v20 = vadd.f32 %v42_v12, %v41_v14  ;;  %v101_v46 = vsel %vm34_vm1, %v81_v33, 0.0  ;;  %v54_v47 = vsel %vm34_vm1, %v27_v43, 0.0  ;;  %v84_v51 = vmul.f32 %v25_v31, %v25_v31 }
   0xa   :  { %v98_v42 = vadd.f32 %v97_v34, %v96_v36  ;;  %v103_v52 = vsel %vm34_vm1, %v82_v39, 0.0  ;;  %v56_v53 = vsel %vm34_vm1, %v28_v49, 0.0  ;;  %v85_v57 = vmul.f32 %v26_v37, %v26_v37  ;;  %v33_v36 = vld [vmem:[%s259_s1] sm:$0x1] }
   0xb   :  { %v45_v25 = vadd.f32 %v44_v18, %v43_v20  ;;  %v105_v58 = vsel %vm34_vm1, %v83_v45, 0.0  ;;  %v58_v59 = vsel %vm34_vm1, %v29_v55, 0.0  ;;  %v86_v63 = vmul.f32 %v27_v43, %v27_v43 }
   0xc   :  { %v100_v48 = vadd.f32 %v99_v40, %v98_v42  ;;  %v107_v0 = vsel %vm34_vm1, %v84_v51, 0.0  ;;  %v60_v1 = vsel %vm34_vm1, %v30_v61, 0.0  ;;  %v87_v5 = vmul.f32 %v28_v49, %v28_v49 }
   0xd   :  { %v47_v32 = vadd.f32 %v46_v22, %v45_v25  ;;  %v109_v6 = vsel %vm34_vm1, %v85_v57, 0.0  ;;  %v62_v7 = vsel %vm34_vm1, %v31_v3, 0.0  ;;  %v88_v11 = vmul.f32 %v29_v55, %v29_v55 }
   0xe   :  { %v102_v54 = vadd.f32 %v101_v46, %v100_v48  ;;  %v111_v12 = vsel %vm34_vm1, %v86_v63, 0.0  ;;  %v64_v13 = vsel %vm34_vm1, %v32_v9, 0.0  ;;  %v89_v16 = vmul.f32 %v30_v61, %v30_v61 }
   0xf   :  { %v49_v38 = vadd.f32 %v48_v29, %v47_v32  ;;  %v113_v17 = vsel %vm34_vm1, %v87_v5, 0.0  ;;  %v90_v20 = vmul.f32 %v31_v3, %v31_v3  ;;  %v115_v21 = vsel %vm34_vm1, %v88_v11, 0.0 }
  0x10   :  { %v104_v60 = vadd.f32 %v103_v52, %v102_v54  ;;  %v91_v24 = vmul.f32 %v32_v9, %v32_v9  ;;  %v117_v25 = vsel %vm34_vm1, %v89_v16, 0.0 }
  0x11   :  { %v51_v44 = vadd.f32 %v50_v35, %v49_v38  ;;  %v119_v28 = vsel %vm34_vm1, %v90_v20, 0.0 }
  0x12   :  { %v106_v2 = vadd.f32 %v105_v58, %v104_v60  ;;  %v121_v31 = vsel %vm34_vm1, %v91_v24, 0.0 }
  0x13   :  { %v53_v50 = vadd.f32 %v52_v41, %v51_v44  ;;  %v75_v44 = vld [vmem:[%s260_s2] sm:$0x1] }
  0x14   :  { %v108_v8 = vadd.f32 %v107_v0, %v106_v2 }
  0x15   :  { %v55_v56 = vadd.f32 %v54_v47, %v53_v50 }
  0x16   :  { %v110_v14 = vadd.f32 %v109_v6, %v108_v8 }
  0x17   :  { %v57_v62 = vadd.f32 %v56_v53, %v55_v56 }
  0x18   :  { %v112_v18 = vadd.f32 %v111_v12, %v110_v14 }
  0x19   :  { %v59_v4 = vadd.f32 %v58_v59, %v57_v62 }
  0x1a   :  { %v114_v22 = vadd.f32 %v113_v17, %v112_v18 }
  0x1b   :  { %v61_v10 = vadd.f32 %v60_v1, %v59_v4 }
  0x1c   :  { %v116_v26 = vadd.f32 %v115_v21, %v114_v22 }
  0x1d   :  { %v63_v15 = vadd.f32 %v62_v7, %v61_v10 }
  0x1e   :  { %v118_v29 = vadd.f32 %v117_v25, %v116_v26 }
  0x1f   :  { %v65_v19 = vadd.f32 %v64_v13, %v63_v15 }
  0x20   :  { %v120_v32 = vadd.f32 %v119_v28, %v118_v29 }
  0x21   :  { %v66_v23 = vrot.slane %v65_v19, 4 }
  0x22   :  { %v122_v34 = vadd.f32 %v121_v31, %v120_v32 }
  0x23   :  { %v67_v27 = vadd.f32 %v66_v23, %v65_v19 }
  0x24   :  { %v123_v37 = vrot.slane %v122_v34, 4 }
  0x25   :  { %v68_v30 = vrot.slane %v67_v27, 2 }
  0x26   :  { %v124_v39 = vadd.f32 %v123_v37, %v122_v34 }
  0x27   :  { %v69_v33 = vadd.f32 %v68_v30, %v67_v27 }
  0x28   :  { %v125_v41 = vrot.slane %v124_v39, 2 }
  0x29   :  { %v70_v35 = vrot.slane %v69_v33, 1 }
  0x2a   :  { %v126_v42 = vadd.f32 %v125_v41, %v124_v39 }
  0x2b   :  { %v71_v38 = vadd.f32 %v70_v35, %v69_v33 }
  0x2c   :  { %v127_v43 = vrot.slane %v126_v42, 1 }
  0x2d   :  { %v72_v40 = vadd.f32 %v71_v38, %v33_v36 }
  0x2e   :  { %v128_v45 = vadd.f32 %v127_v43, %v126_v42 }
  0x2f   :  { %74 = vst.msk [vmem:[%s259_s1] sm:$0x1] %vm14_vm0, %v72_v40 }
  0x30   :  { %v129_v46 = vadd.f32 %v128_v45, %v75_v44 }
  0x32   :  { %130 = vst.msk [vmem:[%s260_s2] sm:$0x1] %vm14_vm0, %v129_v46 }

// kernel: densenet_forward.28
= control target key start
LH: loop header
LB: loop body
LE: loop exit
PB: predicated region body
PF: predicated region fallthrough
CT: control target
= control target key end

     0   :  { %s268_s6 = smov 0   ;;  %s293_s0 = inlined_call_operand.vmem [shape: f32[8,2,4,2,48], index: 0, kind: input, shape index: {}]   ;;  %s294_s1 = inlined_call_operand.vmem [shape: f32[8,4,48], index: 1, kind: output, shape index: {}]  }
   0x1 LB: > { %s227_s7 = sadd.s32 4294967295, %s256_s6   ;;  %p231_p0 = scmp.ge.s32.totalorder %s256_s6, 1  ;;  %s256_s6 = sphi %s268_s6, %s11_s6  }
   0x2   : > { %p87_p1 = scmp.lt.s32.totalorder %s256_s6, 9 }
   0x4   : > { %p88_p2 = pnand %p231_p0, %p87_p1 }
   0x5   : > { %p106_p3 = scmp.lt.s32.totalorder (!%p88_p2), %s227_s7, 7 }
   0x6   : > { %91 = sbr.rel (%p88_p2) target bundleno = 37 (0x25), region = 24 }
   0xb   : > { %s296_s7 = smov (!%p106_p3, %s227_s7), 7  ;;  %vm128_vm0 = vcmask 386048   ;;  %vm165_vm1 = vcmask 1041409   ;;  %vm167_vm2 = vcmask 1042434   ;;  %vm169_vm3 = vcmask 1043459  }
   0xc   : > { %s241_s8 = sshll.u32 %s296_s7, 4  ;;  %s234_s12 = sshll.u32 %s296_s7, 2  ;;  %vm172_vm4 = vcmask 388096  }
   0xd   : > { %s110_s11 = scalar_lea.vmem %s293_s0, %s241_s8  ;;  %s114_s15 = scalar_lea.vmem %s294_s1, %s234_s12 }
   0xe   : > { %v115_v0 = vld [vmem:[%s110_s11] sm:$0x3]  ;;  %v116_v1 = vld [vmem:[%s110_s11 + $0x2] sm:$0x3]  ;;  %v117_v2 = vld [vmem:[%s110_s11 + $0x4] sm:$0x3] }
   0xf   : > { %v118_v3 = vld [vmem:[%s110_s11 + $0x6] sm:$0x3]  ;;  %v235_v4 = vld [vmem:[%s110_s11 + $0x8] sm:$0x3]  ;;  %v236_v5 = vld [vmem:[%s110_s11 + $0xa] sm:$0x3] }
  0x10   : > { %v237_v6 = vld [vmem:[%s110_s11 + $0xc] sm:$0x3]  ;;  %v238_v7 = vld [vmem:[%s110_s11 + $0xe] sm:$0x3]  ;;  %v124_v8 = vadd.f32 %v235_v4, %v115_v0  ;;  %v125_v9 = vadd.f32 %v236_v5, %v116_v1 }
  0x11   : > { %v126_v10 = vadd.f32 %v237_v6, %v117_v2  ;;  %v127_v11 = vadd.f32 %v238_v7, %v118_v3 }
  0x12   : > { %v129_v12 = vsel %vm128_vm0, %v124_v8, 0.0  ;;  %v136_v13 = vsel %vm128_vm0, %v125_v9, 0.0 }
  0x13   : > { %v130_v14 = vrot.slane %v129_v12, 4  ;;  %v137_v15 = vrot.slane %v136_v13, 4  ;;  %v143_v16 = vsel %vm128_vm0, %v126_v10, 0.0  ;;  %v150_v17 = vsel %vm128_vm0, %v127_v11, 0.0 }
  0x14   : > { %v144_v18 = vrot.slane %v143_v16, 4  ;;  %v151_v19 = vrot.slane %v150_v17, 4 }
  0x15   : > { %v131_v20 = vadd.f32 %v130_v14, %v129_v12  ;;  %v138_v21 = vadd.f32 %v137_v15, %v136_v13 }
  0x16   : > { %v145_v22 = vadd.f32 %v144_v18, %v143_v16  ;;  %v152_v23 = vadd.f32 %v151_v19, %v150_v17 }
  0x17   : > { %v132_v24 = vrot.slane %v131_v20, 2  ;;  %v139_v25 = vrot.slane %v138_v21, 2 }
  0x18   : > { %v146_v26 = vrot.slane %v145_v22, 2  ;;  %v153_v27 = vrot.slane %v152_v23, 2 }
  0x19   : > { %v133_v28 = vadd.f32 %v132_v24, %v131_v20  ;;  %v140_v29 = vadd.f32 %v139_v25, %v138_v21 }
  0x1a   : > { %v147_v30 = vadd.f32 %v146_v26, %v145_v22  ;;  %v154_v31 = vadd.f32 %v153_v27, %v152_v23 }
  0x1b   : > { %v134_v32 = vrot.slane %v133_v28, 1  ;;  %v141_v33 = vrot.slane %v140_v29, 1 }
  0x1c   : > { %v148_v34 = vrot.slane %v147_v30, 1  ;;  %v155_v35 = vrot.slane %v154_v31, 1 }
  0x1d   : > { %v135_v36 = vadd.f32 %v134_v32, %v133_v28  ;;  %v142_v37 = vadd.f32 %v141_v33, %v140_v29 }
  0x1e   : > { %v149_v38 = vadd.f32 %v148_v34, %v147_v30  ;;  %v156_v39 = vadd.f32 %v155_v35, %v154_v31 }
  0x1f   : > { %v157_v40 = vmul.f32 0.25, %v135_v36  ;;  %v158_v41 = vmul.f32 0.25, %v142_v37 }
  0x20   : > { %v159_v42 = vmul.f32 0.25, %v149_v38  ;;  %v160_v43 = vmul.f32 0.25, %v156_v39 }
  0x21   : > { %v166_v44 = vsel %vm165_vm1, %v158_v41, %v157_v40 }
  0x22   : > { %v168_v45 = vsel %vm167_vm2, %v159_v42, %v166_v44 }
  0x23   : > { %v170_v46 = vsel %vm169_vm3, %v160_v43, %v168_v45 }
  0x24   : > { %173 = vst.msk [vmem:[%s114_s15] sm:$0xf] %vm172_vm4, %v170_v46 }
  0x25 PF: > { %s11_s6 = sadd.s32 1, %s256_s6  }
  0x26   : > { %p8_p4 = scmp.ge.s32.totalorder %s11_s6, 10  }
  0x28   :  { %10 = sbr.rel (!%p8_p4) target bundleno = 1 (0x1), region = 55 }

// kernel: densenet_forward.27
= control target key start
LH: loop header
LB: loop body
LE: loop exit
PB: predicated region body
PF: predicated region fallthrough
CT: control target
= control target key end

     0   :  { %vm162_vm0 = vcmask 785408   ;;  %vm284_vm1 = vcmask 392192   ;;  %s595_s3 = inlined_call_operand.vmem [shape: bf16[96,48], index: 3, kind: input, shape index: {}]   ;;  %s596_s0 = inlined_call_operand.vmem [shape: f32[128,96], index: 0, kind: input, shape index: {}]   ;;  %s597_s1 = inlined_call_operand.vmem [shape: f32[1,96], index: 1, kind: input, shape index: {}]   ;;  %s598_s2 = inlined_call_operand.vmem [shape: f32[1,96], index: 2, kind: input, shape index: {}]   ;;  %s599_s4 = inlined_call_operand.vmem [shape: f32[1,48], index: 4, kind: input, shape index: {}]   ;;  %s600_s5 = inlined_call_operand.vmem [shape: f32[128,48], index: 5, kind: output, shape index: {}]  }
   0x1   :  { %v376_v0 = vld [vmem:[%s595_s3 + $0x28] sm:$0xff]   ;;  %v377_v1 = vld [vmem:[%s595_s3 + $0x20] sm:$0xff]   ;;  %v378_v2 = vld [vmem:[%s595_s3 + $0x18] sm:$0xff]  }
   0x2   :  { %336 = vmatprep.subr.bf16.mxu0 %v376_v0  ;;  %364 = vmatprep.subr.bf16.mxu1 %v376_v0  ;;  %v379_v3 = vld [vmem:[%s595_s3 + $0x10] sm:$0xff]   ;;  %v21_v4 = vld [vmem:[%s596_s0] sm:$0xff]  ;;  %v22_v5 = vld [vmem:[%s596_s0 + $0x8] sm:$0xff] }
   0x3   :  { %337 = vmatpush3.bf16.msra.mxu0 %v376_v0  ;;  %370 = vmatpush3.bf16.msra.mxu1 %v376_v0  ;;  %v433_v6 = vld [vmem:[%s597_s1] ss:$0 sm:$0xff]  ;;  %v30_v11 = vld [vmem:[%s596_s0 + $0x48] sm:$0xff]  ;;  %v23_v14 = vld [vmem:[%s596_s0 + $0x10] sm:$0xff] }
   0x4   :  { %338 = vmatprep.subr.bf16.mxu0 %v377_v1  ;;  %365 = vmatprep.subr.bf16.mxu1 %v377_v1  ;;  %v44_v7 = vmul.f32 %v433_v6, %v21_v4  ;;  %v45_v8 = vmul.f32 %v433_v6, %v22_v5  ;;  %v440_v9 = vld [vmem:[%s598_s2] ss:$0 sm:$0xff]  ;;  %v53_v13 = vmul.f32 %v433_v6, %v30_v11  ;;  %v24_v15 = vld [vmem:[%s596_s0 + $0x18] sm:$0xff]  ;;  %v31_v16 = vld [vmem:[%s596_s0 + $0x50] sm:$0xff] }
   0x5   :  { %v29_v10 = vld [vmem:[%s596_s0 + $0x40] sm:$0xff]  ;;  %v46_v19 = vmul.f32 %v433_v6, %v23_v14  ;;  %v47_v20 = vmul.f32 %v433_v6, %v24_v15  ;;  %v32_v21 = vld [vmem:[%s596_s0 + $0x58] sm:$0xff]  ;;  %v54_v24 = vmul.f32 %v433_v6, %v31_v16  ;;  %v26_v29 = vld [vmem:[%s596_s0 + $0x28] sm:$0xff] }
   0x6   :  { %v52_v12 = vmul.f32 %v433_v6, %v29_v10  ;;  %v67_v17 = vadd.f32 %v440_v9, %v44_v7  ;;  %v68_v18 = vadd.f32 %v440_v9, %v45_v8  ;;  %v76_v23 = vadd.f32 %v440_v9, %v53_v13  ;;  %v25_v26 = vld [vmem:[%s596_s0 + $0x20] sm:$0xff]  ;;  %v380_v30 = vld [vmem:[%s595_s3 + $0x8] sm:$0xff]   ;;  %v27_v43 = vld [vmem:[%s596_s0 + $0x30] sm:$0xff] }
   0x7   :  { %339 = vmatpush3.bf16.msra.mxu0 %v377_v1  ;;  %371 = vmatpush3.bf16.msra.mxu1 %v377_v1  ;;  %v55_v25 = vmul.f32 %v433_v6, %v32_v21  ;;  %v69_v33 = vadd.f32 %v440_v9, %v46_v19  ;;  %v70_v34 = vadd.f32 %v440_v9, %v47_v20  ;;  %v33_v35 = vld [vmem:[%s596_s0 + $0x60] sm:$0xff]  ;;  %v34_v40 = vld [vmem:[%s596_s0 + $0x68] sm:$0xff]  ;;  %v28_v46 = vld [vmem:[%s596_s0 + $0x38] sm:$0xff] }
   0x8   :  { %340 = vmatprep.subr.bf16.mxu0 %v378_v2  ;;  %366 = vmatprep.subr.bf16.mxu1 %v378_v2  ;;  %v75_v22 = vadd.f32 %v440_v9, %v52_v12  ;;  %v83_v27 = vmax.f32 %v67_v17, 0.0  ;;  %v84_v28 = vmax.f32 %v68_v18, 0.0  ;;  %v92_v32 = vmax.f32 %v76_v23, 0.0  ;;  %v35_v47 = vld [vmem:[%s596_s0 + $0x70] sm:$0xff]  ;;  %v36_v48 = vld [vmem:[%s596_s0 + $0x78] sm:$0xff]  ;;  %v381_v49 = vld [vmem:[%s595_s3] sm:$0xff]  }
   0x9   :  { %v77_v37 = vadd.f32 %v440_v9, %v54_v24  ;;  %v78_v38 = vadd.f32 %v440_v9, %v55_v25  ;;  %v48_v39 = vmul.f32 %v433_v6, %v25_v26  ;;  %v49_v42 = vmul.f32 %v433_v6, %v26_v29 }
   0xa   :  { %v91_v31 = vmax.f32 %v75_v22, 0.0  ;;  %v99_v36 = vpack.c.bf16 %v84_v28, %v83_v27  ;;  %v56_v45 = vmul.f32 %v433_v6, %v33_v35  ;;  %v85_v50 = vmax.f32 %v69_v33, 0.0 }
   0xb   :  { %341 = vmatpush3.bf16.msra.mxu0 %v378_v2  ;;  %372 = vmatpush3.bf16.msra.mxu1 %v378_v2  ;;  %v71_v44 = vadd.f32 %v440_v9, %v48_v39  ;;  %v86_v51 = vmax.f32 %v70_v34, 0.0  ;;  %v72_v52 = vadd.f32 %v440_v9, %v49_v42  ;;  %v57_v53 = vmul.f32 %v433_v6, %v34_v40 }
   0xc   :  { %342 = vmatprep.subr.bf16.mxu0 %v379_v3  ;;  %367 = vmatprep.subr.bf16.mxu1 %v379_v3  ;;  %v103_v41 = vpack.c.bf16 %v92_v32, %v91_v31  ;;  %v93_v54 = vmax.f32 %v77_v37, 0.0  ;;  %v94_v55 = vmax.f32 %v78_v38, 0.0  ;;  %v79_v56 = vadd.f32 %v440_v9, %v56_v45 }
   0xd   :  { %348 = vmatprep.mubr.msk.bf16.mxu0 %vm162_vm0, %v99_v36  ;;  %v50_v57 = vmul.f32 %v433_v6, %v27_v43  ;;  %v80_v58 = vadd.f32 %v440_v9, %v57_v53  ;;  %v51_v59 = vmul.f32 %v433_v6, %v28_v46  ;;  %v58_v60 = vmul.f32 %v433_v6, %v35_v47 }
   0xe   :  { %356 = vmatprep.mubr.msk.bf16.mxu1 %vm162_vm0, %v103_v41  ;;  %v59_v61 = vmul.f32 %v433_v6, %v36_v48  ;;  %v87_v62 = vmax.f32 %v71_v44, 0.0  ;;  %v88_v63 = vmax.f32 %v72_v52, 0.0  ;;  %v95_v0 = vmax.f32 %v79_v56, 0.0 }
   0xf   :  { %343 = vmatpush3.bf16.msra.mxu0 %v379_v3  ;;  %373 = vmatpush3.bf16.msra.mxu1 %v379_v3  ;;  %v96_v1 = vmax.f32 %v80_v58, 0.0  ;;  %v100_v2 = vpack.c.bf16 %v86_v51, %v85_v50  ;;  %v104_v3 = vpack.c.bf16 %v94_v55, %v93_v54  ;;  %v73_v4 = vadd.f32 %v440_v9, %v50_v57 }
  0x10   :  { %344 = vmatprep.subr.bf16.mxu0 %v380_v30  ;;  %368 = vmatprep.subr.bf16.mxu1 %v380_v30  ;;  %v74_v5 = vadd.f32 %v440_v9, %v51_v59  ;;  %v81_v7 = vadd.f32 %v440_v9, %v58_v60  ;;  %v82_v8 = vadd.f32 %v440_v9, %v59_v61  ;;  %v307_v9 = vld [vmem:[%s599_s4] ss:$0 sm:$0xff] }
  0x11   :  { %v101_v6 = vpack.c.bf16 %v88_v63, %v87_v62  ;;  %v105_v10 = vpack.c.bf16 %v96_v1, %v95_v0  ;;  %v89_v11 = vmax.f32 %v73_v4, 0.0 }
  0x12   :  { %v90_v12 = vmax.f32 %v74_v5, 0.0  ;;  %v97_v13 = vmax.f32 %v81_v7, 0.0  ;;  %v98_v14 = vmax.f32 %v82_v8, 0.0 }
  0x13   :  { %345 = vmatpush3.bf16.msra.mxu0 %v380_v30  ;;  %374 = vmatpush3.bf16.msra.mxu1 %v380_v30 }
  0x14   :  { %346 = vmatprep.subr.bf16.mxu0 %v381_v49  ;;  %369 = vmatprep.subr.bf16.mxu1 %v381_v49  ;;  %v102_v15 = vpack.c.bf16 %v90_v12, %v89_v11  ;;  %v106_v16 = vpack.c.bf16 %v98_v14, %v97_v13 }
  0x17   :  { %347 = vmatpush3.bf16.msra.mxu0 %v381_v49  ;;  %375 = vmatpush3.bf16.msra.mxu1 %v381_v49 }
  0x1a   :  { %349 = vmatmul.mubr.msk.bf16.vlgmr.msra.gmra.mxu0 %vm162_vm0, %v100_v2  ;;  %357 = vmatmul.mubr.msk.bf16.vlgmr.msra.gmra.mxu1 %vm162_vm0, %v104_v3 }
  0x1b   :  { %352 = vmatprep.mubr.msk.bf16.mxu0 %vm162_vm0, %v101_v6  ;;  %360 = vmatprep.mubr.msk.bf16.mxu1 %vm162_vm0, %v105_v10 }
  0x22   :  { %353 = vmatmul.mubr.msk.bf16.gmra.mxu0 %vm162_vm0, %v102_v15  ;;  %361 = vmatmul.mubr.msk.bf16.gmra.mxu1 %vm162_vm0, %v106_v16 }
  0xda   :  { %v350_v17 = vpop.f32.mrf.mxu0  ;;  %v358_v18 = vpop.f32.mrf.mxu1 }
  0xdb   :  { %v230_v19 = vadd.f32 %v350_v17, %v307_v9  ;;  %v262_v20 = vadd.f32 %v358_v18, %v307_v9 }
  0xdc   :  { %v221_v21 = vpop.f32.mrf.mxu0  ;;  %v253_v22 = vpop.f32.mrf.mxu1 }
  0xdd   :  { %287 = vst.msk [vmem:[%s600_s5 + $0x10] sm:$0xff] %vm284_vm1, %v230_v19  ;;  %295 = vst.msk [vmem:[%s600_s5 + $0x50] sm:$0xff] %vm284_vm1, %v262_v20  ;;  %v222_v23 = vadd.f32 %v307_v9, %v221_v21  ;;  %v254_v24 = vadd.f32 %v307_v9, %v253_v22 }
  0xde   :  { %v351_v25 = vpop.f32.mrf.mxu0  ;;  %v359_v26 = vpop.f32.mrf.mxu1 }
  0xdf   :  { %285 = vst.msk [vmem:[%s600_s5] sm:$0xff] %vm284_vm1, %v222_v23  ;;  %293 = vst.msk [vmem:[%s600_s5 + $0x40] sm:$0xff] %vm284_vm1, %v254_v24  ;;  %v233_v27 = vadd.f32 %v351_v25, %v307_v9  ;;  %v265_v28 = vadd.f32 %v359_v26, %v307_v9 }
  0xe0   :  { %v224_v29 = vpop.f32.mrf.mxu0  ;;  %v256_v30 = vpop.f32.mrf.mxu1 }
  0xe1   :  { %288 = vst.msk [vmem:[%s600_s5 + $0x18] sm:$0xff] %vm284_vm1, %v233_v27  ;;  %296 = vst.msk [vmem:[%s600_s5 + $0x58] sm:$0xff] %vm284_vm1, %v265_v28  ;;  %v225_v31 = vadd.f32 %v307_v9, %v224_v29  ;;  %v257_v32 = vadd.f32 %v307_v9, %v256_v30 }
  0xe2   :  { %v354_v33 = vpop.f32.mrf.mxu0  ;;  %v362_v34 = vpop.f32.mrf.mxu1 }
  0xe3   :  { %286 = vst.msk [vmem:[%s600_s5 + $0x8] sm:$0xff] %vm284_vm1, %v225_v31  ;;  %294 = vst.msk [vmem:[%s600_s5 + $0x48] sm:$0xff] %vm284_vm1, %v257_v32  ;;  %v246_v35 = vadd.f32 %v354_v33, %v307_v9  ;;  %v278_v36 = vadd.f32 %v362_v34, %v307_v9 }
  0xe4   :  { %v237_v37 = vpop.f32.mrf.mxu0  ;;  %v269_v38 = vpop.f32.mrf.mxu1 }
  0xe5   :  { %291 = vst.msk [vmem:[%s600_s5 + $0x30] sm:$0xff] %vm284_vm1, %v246_v35  ;;  %299 = vst.msk [vmem:[%s600_s5 + $0x70] sm:$0xff] %vm284_vm1, %v278_v36  ;;  %v238_v39 = vadd.f32 %v307_v9, %v237_v37  ;;  %v270_v40 = vadd.f32 %v307_v9, %v269_v38 }
  0xe6   :  { %v355_v41 = vpop.f32.mrf.mxu0  ;;  %v363_v42 = vpop.f32.mrf.mxu1 }
  0xe7   :  { %289 = vst.msk [vmem:[%s600_s5 + $0x20] sm:$0xff] %vm284_vm1, %v238_v39  ;;  %297 = vst.msk [vmem:[%s600_s5 + $0x60] sm:$0xff] %vm284_vm1, %v270_v40  ;;  %v249_v43 = vadd.f32 %v355_v41, %v307_v9  ;;  %v281_v44 = vadd.f32 %v363_v42, %v307_v9 }
  0xe8   :  { %v240_v45 = vpop.f32.mrf.mxu0  ;;  %v272_v46 = vpop.f32.mrf.mxu1 }
  0xe9   :  { %292 = vst.msk [vmem:[%s600_s5 + $0x38] sm:$0xff] %vm284_vm1, %v249_v43  ;;  %300 = vst.msk [vmem:[%s600_s5 + $0x78] sm:$0xff] %vm284_vm1, %v281_v44  ;;  %v241_v47 = vadd.f32 %v307_v9, %v240_v45  ;;  %v273_v48 = vadd.f32 %v307_v9, %v272_v46 }
  0xeb   :  { %290 = vst.msk [vmem:[%s600_s5 + $0x28] sm:$0xff] %vm284_vm1, %v241_v47  ;;  %298 = vst.msk [vmem:[%s600_s5 + $0x68] sm:$0xff] %vm284_vm1, %v273_v48 }

// kernel: densenet_forward.25
= control target key start
LH: loop header
LB: loop body
LE: loop exit
PB: predicated region body
PF: predicated region fallthrough
CT: control target
= control target key end

     0   :  { %s2392_s18 = smov 0   ;;  %s2932_s0 = inlined_call_operand.vmem [shape: f32[2,64,80], index: 0, kind: input, shape index: {}]   ;;  %s2933_s1 = inlined_call_operand.vmem [shape: f32[1,80], index: 1, kind: input, shape index: {}]   ;;  %s2934_s2 = inlined_call_operand.vmem [shape: f32[1,80], index: 2, kind: input, shape index: {}]   ;;  %s2935_s3 = inlined_call_operand.vmem [shape: bf16[9,80,16], index: 3, kind: input, shape index: {}]   ;;  %s2936_s4 = inlined_call_operand.vmem [shape: f32[1,16], index: 4, kind: input, shape index: {}]   ;;  %s2937_s5 = inlined_call_operand.vmem [shape: f32[2,80,16], index: 5, kind: output, shape index: {}]  }
   0x1 LB: > { %s1742_s19 = sadd.s32 4294967295, %s2358_s18   ;;  %p1746_p0 = scmp.ge.s32.totalorder %s2358_s18, 1  ;;  %s2358_s18 = sphi %s2392_s18, %s15_s18  }
   0x2   : > { %p187_p1 = scmp.lt.s32.totalorder %s2358_s18, 3 }
   0x4   : > { %p188_p2 = pnand %p1746_p0, %p187_p1 }
   0x5   : > { %p215_p3 = scmp.lt.s32.totalorder (!%p188_p2), %s1742_s19, 1 }
   0x6   : > { %191 = sbr.rel (%p188_p2) target bundleno = 410 (0x19a), region = 40 }
   0xb   : > { %v2307_v0 = vld [vmem:[%s2935_s3 + $0x48] sm:$0xff]   ;;  %v2360_v1 = vmov 0.0   ;;  %v2308_v2 = vld [vmem:[%s2935_s3 + $0x40] sm:$0xff]   ;;  %vm226_vm0 = vcmask 654336   ;;  %vm2361_vm1 = vmmov 0   ;;  %s2939_s19 = smov (!%p215_p3, %s1742_s19), 1 }
   0xc   : > { %2016 = vmatprep.subr.bf16.mxu0 %v2360_v1  ;;  %2286 = vmatprep.subr.bf16.mxu1 %v2360_v1  ;;  %227 = vst.msk [vmem:[#allocation2] sm:$0xff] %vm226_vm0, %v2360_v1  ;;  %228 = vst.msk [vmem:[#allocation2 + $0x8] sm:$0xff] %vm226_vm0, %v2360_v1  ;;  %v2445_v3 = vld [vmem:[%s2933_s1] ss:$0 sm:$0xff]  ;;  %v2309_v4 = vld [vmem:[%s2935_s3 + $0x38] sm:$0xff]   ;;  %s1925_s28 = sshll.u32 %s2939_s19, 6 }
   0xd   : > { %2017 = vmatpush3.bf16.msra.mxu0 %v2307_v0  ;;  %2291 = vmatpush3.bf16.msra.mxu1 %v2307_v0  ;;  %229 = vst.msk [vmem:[#allocation2 + $0x10] sm:$0xff] %vm226_vm0, %v2360_v1  ;;  %230 = vst.msk [vmem:[#allocation2 + $0x18] sm:$0xff] %vm226_vm0, %v2360_v1  ;;  %s2456_s6 = scalar_lea.vmem %s2932_s0, %s1925_s28  ;;  %v2461_v5 = vld [vmem:[%s2934_s2] ss:$0 sm:$0xff]  ;;  %v2310_v12 = vld [vmem:[%s2935_s3 + $0x30] sm:$0xff]   ;;  %s2296_s26 = smul.u32 80, %s2939_s19 }
   0xe   : > { %2018 = vmatprep.subr.bf16.mxu0 %v2360_v1  ;;  %2287 = vmatprep.subr.bf16.mxu1 %v2360_v1  ;;  %231 = vst.msk [vmem:[#allocation2 + $0x20] sm:$0xff] %vm226_vm0, %v2360_v1  ;;  %232 = vst.msk [vmem:[#allocation2 + $0x28] sm:$0xff] %vm226_vm0, %v2360_v1  ;;  %v240_v6 = vld [vmem:[%s2456_s6] sm:$0xff]  ;;  %v245_v8 = vld [vmem:[%s2456_s6 + $0x28] sm:$0xff]  ;;  %vm1676_vm2 = vcmask 130048  }
   0xf   : > { %2026 = vmatprep.mubr.msk.bf16.mxu0 %vm2361_vm1, %v2360_v1  ;;  %2038 = vmatprep.mubr.msk.bf16.mxu1 %vm2361_vm1, %v2360_v1  ;;  %233 = vst.msk [vmem:[#allocation2 + $0x30] sm:$0xff] %vm226_vm0, %v2360_v1  ;;  %234 = vst.msk [vmem:[#allocation2 + $0x38] sm:$0xff] %vm226_vm0, %v2360_v1  ;;  %v244_v7 = vld [vmem:[%s2456_s6 + $0x20] sm:$0xff]  ;;  %v255_v9 = vmul.f32 %v2445_v3, %v240_v6  ;;  %v260_v11 = vmul.f32 %v2445_v3, %v245_v8  ;;  %v241_v13 = vld [vmem:[%s2456_s6 + $0x8] sm:$0xff]  ;;  %s2879_s7 = scalar_lea.vmem %s2937_s5, %s2296_s26 }
  0x10   : > { %235 = vst.msk [vmem:[#allocation2 + $0x40] sm:$0xff] %vm226_vm0, %v2360_v1  ;;  %236 = vst.msk [vmem:[#allocation2 + $0x48] sm:$0xff] %vm226_vm0, %v2360_v1  ;;  %v259_v10 = vmul.f32 %v2445_v3, %v244_v7  ;;  %v242_v17 = vld [vmem:[%s2456_s6 + $0x10] sm:$0xff]  ;;  %v256_v19 = vmul.f32 %v2445_v3, %v241_v13  ;;  %v2311_v22 = vld [vmem:[%s2935_s3 + $0x28] sm:$0xff]  }
  0x11   : > { %237 = vst.msk [vmem:[#allocation2 + $0x50] sm:$0xff] %vm226_vm0, %v2360_v1  ;;  %238 = vst.msk [vmem:[#allocation2 + $0x58] sm:$0xff] %vm226_vm0, %v2360_v1  ;;  %2019 = vmatpush3.bf16.msra.mxu0 %v2308_v2  ;;  %2292 = vmatpush3.bf16.msra.mxu1 %v2308_v2  ;;  %v270_v14 = vadd.f32 %v2461_v5, %v255_v9  ;;  %v275_v16 = vadd.f32 %v2461_v5, %v260_v11  ;;  %v246_v18 = vld [vmem:[%s2456_s6 + $0x30] sm:$0xff]  ;;  %v243_v32 = vld [vmem:[%s2456_s6 + $0x18] sm:$0xff] }
  0x12   : > { %239 = vst.msk [vmem:[#allocation2 + $0x60] sm:$0xff] %vm226_vm0, %v2360_v1  ;;  %2020 = vmatprep.subr.bf16.mxu0 %v2360_v1  ;;  %2288 = vmatprep.subr.bf16.mxu1 %v2360_v1  ;;  %v274_v15 = vadd.f32 %v2461_v5, %v259_v10  ;;  %v257_v20 = vmul.f32 %v2445_v3, %v242_v17  ;;  %v2312_v36 = vld [vmem:[%s2935_s3 + $0x20] sm:$0xff]   ;;  %v2313_v37 = vld [vmem:[%s2935_s3 + $0x70] sm:$0xff]   ;;  %v2314_v44 = vld [vmem:[%s2935_s3 + $0x18] sm:$0xff]  }
  0x13   : > { %v261_v21 = vmul.f32 %v2445_v3, %v246_v18  ;;  %v278_v23 = vmax.f32 %v270_v14, 0.0  ;;  %v283_v25 = vmax.f32 %v275_v16, 0.0  ;;  %v271_v26 = vadd.f32 %v2461_v5, %v256_v19  ;;  %v319_v35 = vld [vmem:[#allocation2 + $0x1] sm:$0xff]  ;;  %v2316_v52 = vld [vmem:[%s2935_s3 + $0x10] sm:$0xff]   ;;  %v2319_v55 = vld [vmem:[%s2935_s3 + $0x58] sm:$0xff]  }
  0x14   : > { %v282_v24 = vmax.f32 %v274_v15, 0.0  ;;  %v272_v27 = vadd.f32 %v2461_v5, %v257_v20  ;;  %v258_v33 = vmul.f32 %v2445_v3, %v243_v32  ;;  %v2315_v45 = vld [vmem:[%s2935_s3 + $0x68] sm:$0xff]   ;;  %v2317_v53 = vld [vmem:[%s2935_s3 + $0x60] sm:$0xff]   ;;  %v247_v60 = vld [vmem:[%s2456_s6 + $0x38] sm:$0xff] }
  0x15   : > { %2021 = vmatpush3.bf16.msra.mxu0 %v2309_v4  ;;  %2293 = vmatpush3.bf16.msra.mxu1 %v2309_v4  ;;  %v276_v28 = vadd.f32 %v2461_v5, %v261_v21  ;;  %286 = vst.msk [vmem:[#allocation2 + $0xb] sm:$0xff] %vm226_vm0, %v278_v23  ;;  %291 = vst.msk [vmem:[#allocation2 + $0x3d] sm:$0xff] %vm226_vm0, %v283_v25  ;;  %v279_v29 = vmax.f32 %v271_v26, 0.0  ;;  %v2318_v54 = vld [vmem:[%s2935_s3 + $0x8] sm:$0xff]   ;;  %v2320_v58 = vld [vmem:[%s2935_s3] sm:$0xff]   ;;  %v262_v63 = vmul.f32 %v2445_v3, %v247_v60 }
  0x16   : > { %2022 = vmatprep.subr.bf16.mxu0 %v2360_v1  ;;  %2289 = vmatprep.subr.bf16.mxu1 %v2360_v1  ;;  %290 = vst.msk [vmem:[#allocation2 + $0x33] sm:$0xff] %vm226_vm0, %v282_v24  ;;  %v280_v30 = vmax.f32 %v272_v27, 0.0  ;;  %v273_v34 = vadd.f32 %v2461_v5, %v258_v33  ;;  %v294_v59 = vld [vmem:[#allocation2] sm:$0xff]  ;;  %v2321_v62 = vld [vmem:[%s2935_s3 + $0x50] sm:$0xff]   ;;  %v2322_v6 = vld [vmem:[%s2935_s3 + $0x98] sm:$0xff]  }
  0x17   : > { %v284_v31 = vmax.f32 %v276_v28, 0.0  ;;  %287 = vst.msk [vmem:[#allocation2 + $0x15] sm:$0xff] %vm226_vm0, %v279_v29  ;;  %v277_v2 = vadd.f32 %v2461_v5, %v262_v63  ;;  %v581_v3 = vld [vmem:[#allocation2 + $0x2] sm:$0xff]  ;;  %v2324_v9 = vld [vmem:[%s2935_s3 + $0x90] sm:$0xff]   ;;  %v2325_v16 = vld [vmem:[%s2935_s3 + $0xb8] sm:$0xff]  }
  0x18   : > { %288 = vst.msk [vmem:[#allocation2 + $0x1f] sm:$0xff] %vm226_vm0, %v280_v30  ;;  %v281_v38 = vmax.f32 %v273_v34, 0.0  ;;  %v2323_v5 = vld [vmem:[%s2935_s3 + $0xc0] sm:$0xff]   ;;  %v2326_v17 = vld [vmem:[%s2935_s3 + $0x88] sm:$0xff]   ;;  %v2327_v21 = vld [vmem:[%s2935_s3 + $0xb0] sm:$0xff]  }
  0x19   : > { %2023 = vmatpush3.bf16.msra.mxu0 %v2310_v12  ;;  %2294 = vmatpush3.bf16.msra.mxu1 %v2310_v12  ;;  %292 = vst.msk [vmem:[#allocation2 + $0x47] sm:$0xff] %vm226_vm0, %v284_v31  ;;  %v285_v7 = vmax.f32 %v277_v2, 0.0  ;;  %v2329_v26 = vld [vmem:[%s2935_s3 + $0xa8] sm:$0xff]   ;;  %v2330_v27 = vld [vmem:[%s2935_s3 + $0x78] sm:$0xff]   ;;  %v2331_v31 = vld [vmem:[%s2935_s3 + $0xa0] sm:$0xff]  }
  0x1a   : > { %2024 = vmatprep.subr.bf16.mxu0 %v2360_v1  ;;  %2290 = vmatprep.subr.bf16.mxu1 %v2360_v1  ;;  %289 = vst.msk [vmem:[#allocation2 + $0x29] sm:$0xff] %vm226_vm0, %v281_v38  ;;  %v2339_v60 = vld [vmem:[%s2935_s3 + $0xf8] sm:$0xff]   ;;  %v2341_v63 = vld [vmem:[%s2935_s3 + $0xf0] sm:$0xff]  }
  0x1b   : > { %293 = vst.msk [vmem:[#allocation2 + $0x51] sm:$0xff] %vm226_vm0, %v285_v7 }
  0x1c   : > { %v320_v39 = vld [vmem:[#allocation2 + $0x9] sm:$0xff]  ;;  %v895_v2 = vld [vmem:[#allocation2 + $0x3b] sm:$0xff] }
  0x1d   : > { %2025 = vmatpush3.bf16.msra.mxu0 %v2311_v22  ;;  %2295 = vmatpush3.bf16.msra.mxu1 %v2311_v22  ;;  %v325_v40 = vld [vmem:[#allocation2 + $0x31] sm:$0xff]  ;;  %v326_v41 = vld [vmem:[#allocation2 + $0x39] sm:$0xff]  ;;  %v329_v42 = vpack.c.bf16 %v320_v39, %v319_v35  ;;  %v295_v0 = vld [vmem:[#allocation2 + $0x8] sm:$0xff] }
  0x1e   : > { %2046 = vmatprep.subr.bf16.mxu1 %v2360_v1  ;;  %2076 = vmatprep.subr.bf16.mxu0 %v2360_v1  ;;  %v332_v43 = vpack.c.bf16 %v326_v41, %v325_v40  ;;  %v321_v46 = vld [vmem:[#allocation2 + $0x11] sm:$0xff]  ;;  %v304_v4 = vpack.c.bf16 %v295_v0, %v294_v59  ;;  %v2328_v22 = vld [vmem:[%s2935_s3 + $0x80] sm:$0xff]  }
  0x1f   : > { %v322_v47 = vld [vmem:[#allocation2 + $0x19] sm:$0xff]  ;;  %v323_v56 = vld [vmem:[#allocation2 + $0x21] sm:$0xff]  ;;  %v2560_v8 = vld [vmem:[#allocation2 + $0xa] sm:$0xff] }
  0x20   : > { %2027 = vmatmul.mubr.msk.bf16.vlgmr.msra.gmra.mxu0 %vm226_vm0, %v329_v42  ;;  %2039 = vmatmul.mubr.msk.bf16.vlgmr.msra.gmra.mxu1 %vm226_vm0, %v332_v43  ;;  %v327_v48 = vld [vmem:[#allocation2 + $0x41] sm:$0xff]  ;;  %v328_v49 = vld [vmem:[#allocation2 + $0x49] sm:$0xff]  ;;  %v330_v50 = vpack.c.bf16 %v322_v47, %v321_v46  ;;  %v591_v10 = vpack.c.bf16 %v2560_v8, %v581_v3  ;;  %v297_v12 = vld [vmem:[#allocation2 + $0x18] sm:$0xff] }
  0x21   : > { %2047 = vmatpush3.bf16.msra.mxu1 %v2312_v36  ;;  %2077 = vmatpush3.bf16.msra.mxu0 %v2313_v37  ;;  %v333_v51 = vpack.c.bf16 %v328_v49, %v327_v48  ;;  %v324_v57 = vld [vmem:[#allocation2 + $0x29] sm:$0xff]  ;;  %v2579_v14 = vld [vmem:[#allocation2 + $0x12] sm:$0xff]  ;;  %v2581_v15 = vld [vmem:[#allocation2 + $0x1a] sm:$0xff] }
  0x22   : > { %2048 = vmatprep.subr.bf16.mxu1 %v2360_v1  ;;  %2078 = vmatprep.subr.bf16.mxu0 %v2360_v1  ;;  %v331_v61 = vpack.c.bf16 %v324_v57, %v323_v56  ;;  %v296_v11 = vld [vmem:[#allocation2 + $0x10] sm:$0xff]  ;;  %v298_v18 = vld [vmem:[#allocation2 + $0x20] sm:$0xff]  ;;  %v592_v19 = vpack.c.bf16 %v2581_v15, %v2579_v14  ;;  %v299_v20 = vld [vmem:[#allocation2 + $0x28] sm:$0xff]  ;;  %v745_v42 = vpack.c.bf16 %v2579_v14, %v2560_v8 }
  0x23   : > { %2030 = vmatprep.mubr.msk.bf16.mxu0 %vm2361_vm1, %v2360_v1  ;;  %2042 = vmatprep.mubr.msk.bf16.mxu1 %vm2361_vm1, %v2360_v1  ;;  %v305_v13 = vpack.c.bf16 %v297_v12, %v296_v11  ;;  %v2605_v23 = vld [vmem:[#allocation2 + $0x22] sm:$0xff]  ;;  %v306_v24 = vpack.c.bf16 %v299_v20, %v298_v18  ;;  %v2609_v25 = vld [vmem:[#allocation2 + $0x2a] sm:$0xff]  ;;  %v301_v30 = vld [vmem:[#allocation2 + $0x38] sm:$0xff] }
  0x24   : > { %v300_v28 = vld [vmem:[#allocation2 + $0x30] sm:$0xff]  ;;  %v593_v29 = vpack.c.bf16 %v2609_v25, %v2605_v23  ;;  %v2634_v34 = vld [vmem:[#allocation2 + $0x3a] sm:$0xff]  ;;  %v303_v37 = vld [vmem:[#allocation2 + $0x48] sm:$0xff]  ;;  %v746_v49 = vpack.c.bf16 %v2605_v23, %v2581_v15 }
  0x25   : > { %2049 = vmatpush3.bf16.msra.mxu1 %v2314_v44  ;;  %2079 = vmatpush3.bf16.msra.mxu0 %v2315_v45  ;;  %v307_v32 = vpack.c.bf16 %v301_v30, %v300_v28  ;;  %v587_v33 = vld [vmem:[#allocation2 + $0x32] sm:$0xff]  ;;  %v302_v36 = vld [vmem:[#allocation2 + $0x40] sm:$0xff]  ;;  %v2646_v40 = vld [vmem:[#allocation2 + $0x4a] sm:$0xff] }
  0x26   : > { %2050 = vmatprep.subr.bf16.mxu1 %v2360_v1  ;;  %2080 = vmatprep.subr.bf16.mxu0 %v2360_v1  ;;  %v594_v35 = vpack.c.bf16 %v2634_v34, %v587_v33  ;;  %v308_v38 = vpack.c.bf16 %v303_v37, %v302_v36  ;;  %v2644_v39 = vld [vmem:[#allocation2 + $0x42] sm:$0xff]  ;;  %v889_v44 = vld [vmem:[#allocation2 + $0xb] sm:$0xff]  ;;  %v890_v45 = vld [vmem:[#allocation2 + $0x13] sm:$0xff]  ;;  %v747_v57 = vpack.c.bf16 %v587_v33, %v2609_v25 }
  0x27   : > { %v595_v41 = vpack.c.bf16 %v2646_v40, %v2644_v39  ;;  %v2332_v43 = vld [vmem:[%s2935_s3 + $0xe8] sm:$0xff]   ;;  %v899_v46 = vpack.c.bf16 %v890_v45, %v889_v44  ;;  %v2333_v47 = vld [vmem:[%s2935_s3 + $0x110] sm:$0xff]   ;;  %v2334_v48 = vld [vmem:[%s2935_s3 + $0xe0] sm:$0xff]   ;;  %v748_v0 = vpack.c.bf16 %v2644_v39, %v2634_v34 }
  0x28   : > { %2031 = vmatmul.mubr.msk.bf16.gmra.mxu0 %vm226_vm0, %v330_v50  ;;  %2043 = vmatmul.mubr.msk.bf16.gmra.mxu1 %vm226_vm0, %v333_v51  ;;  %v891_v50 = vld [vmem:[#allocation2 + $0x1b] sm:$0xff]  ;;  %v892_v51 = vld [vmem:[#allocation2 + $0x23] sm:$0xff]  ;;  %v2338_v56 = vld [vmem:[%s2935_s3 + $0xd0] sm:$0xff]  }
  0x29   : > { %2051 = vmatpush3.bf16.msra.mxu1 %v2316_v52  ;;  %2081 = vmatpush3.bf16.msra.mxu0 %v2317_v53  ;;  %v2335_v52 = vld [vmem:[%s2935_s3 + $0x108] sm:$0xff]   ;;  %v2336_v53 = vld [vmem:[%s2935_s3 + $0xd8] sm:$0xff]   ;;  %v2344_v18 = vld [vmem:[%s2935_s3 + $0x130] sm:$0xff]  }
  0x2a   : > { %2052 = vmatprep.subr.bf16.mxu1 %v2360_v1  ;;  %2082 = vmatprep.subr.bf16.mxu0 %v2360_v1  ;;  %v894_v59 = vld [vmem:[#allocation2 + $0x33] sm:$0xff]  ;;  %v897_v8 = vld [vmem:[#allocation2 + $0x4b] sm:$0xff]  ;;  %v1198_v14 = vld [vmem:[#allocation2 + $0x1c] sm:$0xff] }
  0x2b   : > { %2034 = vmatprep.mubr.msk.bf16.mxu0 %vm2361_vm1, %v2360_v1  ;;  %2056 = vmatprep.mubr.msk.bf16.mxu1 %vm2361_vm1, %v2360_v1  ;;  %v744_v7 = vld [vmem:[#allocation2 + $0x52] sm:$0xff]  ;;  %v1202_v28 = vld [vmem:[#allocation2 + $0x3c] sm:$0xff] }
  0x2c   : > { %v749_v3 = vpack.c.bf16 %v744_v7, %v2646_v40  ;;  %v1044_v11 = vld [vmem:[#allocation2 + $0x14] sm:$0xff]  ;;  %v1200_v20 = vld [vmem:[#allocation2 + $0x2c] sm:$0xff]  ;;  %v2351_v33 = vld [vmem:[%s2935_s3 + $0x140] sm:$0xff]  }
  0x2d   : > { %2053 = vmatpush3.bf16.msra.mxu1 %v2318_v54  ;;  %2083 = vmatpush3.bf16.msra.mxu0 %v2319_v55  ;;  %v900_v54 = vpack.c.bf16 %v892_v51, %v891_v50  ;;  %v2337_v55 = vld [vmem:[%s2935_s3 + $0x100] sm:$0xff]   ;;  %v1207_v15 = vpack.c.bf16 %v1198_v14, %v1044_v11  ;;  %v2347_v25 = vld [vmem:[%s2935_s3 + $0x150] sm:$0xff]   ;;  %v2350_v30 = vld [vmem:[%s2935_s3 + $0x118] sm:$0xff]  }
  0x2e   : > { %2054 = vmatprep.subr.bf16.mxu1 %v2360_v1  ;;  %2084 = vmatprep.subr.bf16.mxu0 %v2360_v1  ;;  %v1052_v37 = vld [vmem:[#allocation2 + $0x54] sm:$0xff]  ;;  %v1206_v39 = vld [vmem:[#allocation2 + $0x5c] sm:$0xff]  ;;  %v1507_v50 = vld [vmem:[#allocation2 + $0x26] sm:$0xff] }
  0x2f   : > { %v1211_v40 = vpack.c.bf16 %v1206_v39, %v1052_v37  ;;  %v1505_v44 = vld [vmem:[#allocation2 + $0x16] sm:$0xff]  ;;  %v1506_v45 = vld [vmem:[#allocation2 + $0x1e] sm:$0xff]  ;;  %v1508_v51 = vld [vmem:[#allocation2 + $0x2e] sm:$0xff] }
  0x30   : > { %2035 = vmatmul.mubr.msk.bf16.gmra.mxu0 %vm226_vm0, %v331_v61  ;;  %v2340_v61 = vld [vmem:[%s2935_s3 + $0xc8] sm:$0xff]   ;;  %v1513_v7 = vld [vmem:[#allocation2 + $0x56] sm:$0xff] }
  0x31   : > { %2055 = vmatpush3.bf16.msra.mxu1 %v2320_v58  ;;  %2085 = vmatpush3.bf16.msra.mxu0 %v2321_v62  ;;  %v893_v58 = vld [vmem:[#allocation2 + $0x2b] sm:$0xff] }
  0x32   : > { %2106 = vmatprep.subr.bf16.mxu1 %v2360_v1  ;;  %2086 = vmatprep.mubr.msk.bf16.mxu0 %vm2361_vm1, %v2360_v1  ;;  %v901_v62 = vpack.c.bf16 %v894_v59, %v893_v58  ;;  %v1357_v59 = vld [vmem:[#allocation2 + $0x45] sm:$0xff] }
  0x33   : > { %2136 = vmatprep.subr.bf16.mxu0 %v2360_v1 }
  0x34   : > { %2057 = vmatmul.mubr.msk.bf16.vlgmr.msra.gmra.mxu1 %vm226_vm0, %v304_v4  ;;  %v896_v4 = vld [vmem:[#allocation2 + $0x43] sm:$0xff] }
  0x35   : > { %2107 = vmatpush3.bf16.msra.mxu1 %v2322_v6  ;;  %2060 = vmatprep.mubr.msk.bf16.mxu1 %vm2361_vm1, %v2360_v1  ;;  %v902_v6 = vpack.c.bf16 %v896_v4, %v895_v2  ;;  %v1359_v2 = vld [vmem:[#allocation2 + $0x55] sm:$0xff]  ;;  %v1360_v4 = vld [vmem:[#allocation2 + $0x5d] sm:$0xff] }
  0x36   : > { %2108 = vmatprep.subr.bf16.mxu1 %v2360_v1 }
  0x38   : > { %2087 = vmatmul.mubr.msk.bf16.vlgmr.msra.gmra.mxu0 %vm226_vm0, %v591_v10  ;;  %v1043_v10 = vld [vmem:[#allocation2 + $0xc] sm:$0xff] }
  0x39   : > { %2137 = vmatpush3.bf16.msra.mxu0 %v2323_v5  ;;  %2109 = vmatpush3.bf16.msra.mxu1 %v2324_v9  ;;  %v898_v5 = vld [vmem:[#allocation2 + $0x53] sm:$0xff]  ;;  %v1053_v12 = vpack.c.bf16 %v1044_v11, %v1043_v10 }
  0x3a   : > { %2090 = vmatprep.mubr.msk.bf16.mxu0 %vm2361_vm1, %v2360_v1  ;;  %2138 = vmatprep.subr.bf16.mxu0 %v2360_v1  ;;  %v903_v9 = vpack.c.bf16 %v898_v5, %v897_v8 }
  0x3b   : > { %2110 = vmatprep.subr.bf16.mxu1 %v2360_v1 }
  0x3c   : > { %2061 = vmatmul.mubr.msk.bf16.gmra.mxu1 %vm226_vm0, %v305_v13  ;;  %v2342_v13 = vld [vmem:[%s2935_s3 + $0x138] sm:$0xff]  }
  0x3d   : > { %2139 = vmatpush3.bf16.msra.mxu0 %v2325_v16  ;;  %2064 = vmatprep.mubr.msk.bf16.mxu1 %vm2361_vm1, %v2360_v1  ;;  %v2343_v16 = vld [vmem:[%s2935_s3 + $0x160] sm:$0xff]  }
  0x3e   : > { %2111 = vmatpush3.bf16.msra.mxu1 %v2326_v17  ;;  %2140 = vmatprep.subr.bf16.mxu0 %v2360_v1  ;;  %v1046_v17 = vld [vmem:[#allocation2 + $0x24] sm:$0xff] }
  0x3f   : > { %2112 = vmatprep.subr.bf16.mxu1 %v2360_v1  ;;  %v1208_v23 = vpack.c.bf16 %v1200_v20, %v1046_v17 }
  0x40   : > { %2091 = vmatmul.mubr.msk.bf16.gmra.mxu0 %vm226_vm0, %v592_v19  ;;  %v1054_v19 = vpack.c.bf16 %v1046_v17, %v1198_v14 }
  0x41   : > { %2094 = vmatprep.mubr.msk.bf16.mxu0 %vm2361_vm1, %v2360_v1  ;;  %2141 = vmatpush3.bf16.msra.mxu0 %v2327_v21  ;;  %v2345_v21 = vld [vmem:[%s2935_s3 + $0x158] sm:$0xff]  }
  0x42   : > { %2113 = vmatpush3.bf16.msra.mxu1 %v2328_v22  ;;  %2142 = vmatprep.subr.bf16.mxu0 %v2360_v1  ;;  %v2346_v22 = vld [vmem:[%s2935_s3 + $0x128] sm:$0xff]  }
  0x43   : > { %2114 = vmatprep.subr.bf16.mxu1 %v2360_v1 }
  0x44   : > { %2065 = vmatmul.mubr.msk.bf16.gmra.mxu1 %vm226_vm0, %v306_v24  ;;  %v1048_v24 = vld [vmem:[#allocation2 + $0x34] sm:$0xff] }
  0x45   : > { %2068 = vmatprep.mubr.msk.bf16.mxu1 %vm2361_vm1, %v2360_v1  ;;  %2143 = vmatpush3.bf16.msra.mxu0 %v2329_v26  ;;  %v2348_v26 = vld [vmem:[%s2935_s3 + $0x120] sm:$0xff]  }
  0x46   : > { %2115 = vmatpush3.bf16.msra.mxu1 %v2330_v27  ;;  %2144 = vmatprep.subr.bf16.mxu0 %v2360_v1  ;;  %v1055_v27 = vpack.c.bf16 %v1048_v24, %v1200_v20 }
  0x47   : > { %2166 = vmatprep.subr.bf16.mxu1 %v2360_v1 }
  0x48   : > { %2095 = vmatmul.mubr.msk.bf16.gmra.mxu0 %vm226_vm0, %v593_v29  ;;  %v2349_v29 = vld [vmem:[%s2935_s3 + $0x148] sm:$0xff]  }
  0x49   : > { %2098 = vmatprep.mubr.msk.bf16.mxu0 %vm2361_vm1, %v2360_v1  ;;  %2145 = vmatpush3.bf16.msra.mxu0 %v2331_v31  ;;  %v1209_v31 = vpack.c.bf16 %v1202_v28, %v1048_v24 }
  0x4a   : > { %2196 = vmatprep.subr.bf16.mxu0 %v2360_v1 }
  0x4c   : > { %2069 = vmatmul.mubr.msk.bf16.gmra.mxu1 %vm226_vm0, %v307_v32  ;;  %v1050_v32 = vld [vmem:[#allocation2 + $0x44] sm:$0xff] }
  0x4d   : > { %2072 = vmatprep.mubr.msk.bf16.mxu1 %vm2361_vm1, %v2360_v1  ;;  %v1056_v34 = vpack.c.bf16 %v1050_v32, %v1202_v28 }
  0x50   : > { %2099 = vmatmul.mubr.msk.bf16.gmra.mxu0 %vm226_vm0, %v594_v35  ;;  %v1204_v35 = vld [vmem:[#allocation2 + $0x4c] sm:$0xff] }
  0x51   : > { %2102 = vmatprep.mubr.msk.bf16.mxu0 %vm2361_vm1, %v2360_v1  ;;  %v1210_v36 = vpack.c.bf16 %v1204_v35, %v1050_v32 }
  0x54   : > { %2073 = vmatmul.mubr.msk.bf16.gmra.mxu1 %vm226_vm0, %v308_v38  ;;  %v1057_v38 = vpack.c.bf16 %v1052_v37, %v1204_v35 }
  0x55   : > { %2116 = vmatprep.mubr.msk.bf16.mxu1 %vm2361_vm1, %v2360_v1 }
  0x58   : > { %2103 = vmatmul.mubr.msk.bf16.gmra.mxu0 %vm226_vm0, %v595_v41  ;;  %v1351_v41 = vld [vmem:[#allocation2 + $0x15] sm:$0xff] }
  0x59   : > { %2146 = vmatprep.mubr.msk.bf16.mxu0 %vm2361_vm1, %v2360_v1 }
  0x5c   : > { %2117 = vmatmul.mubr.msk.bf16.vlgmr.msra.gmra.mxu1 %vm226_vm0, %v745_v42  ;;  %v1352_v42 = vld [vmem:[#allocation2 + $0x1d] sm:$0xff] }
  0x5d   : > { %2167 = vmatpush3.bf16.msra.mxu1 %v2332_v43  ;;  %2120 = vmatprep.mubr.msk.bf16.mxu1 %vm2361_vm1, %v2360_v1  ;;  %v1361_v43 = vpack.c.bf16 %v1352_v42, %v1351_v41 }
  0x5e   : > { %2168 = vmatprep.subr.bf16.mxu1 %v2360_v1 }
  0x60   : > { %2147 = vmatmul.mubr.msk.bf16.vlgmr.msra.gmra.mxu0 %vm226_vm0, %v899_v46  ;;  %v1515_v46 = vpack.c.bf16 %v1506_v45, %v1505_v44 }
  0x61   : > { %2197 = vmatpush3.bf16.msra.mxu0 %v2333_v47  ;;  %2169 = vmatpush3.bf16.msra.mxu1 %v2334_v48  ;;  %v1353_v47 = vld [vmem:[#allocation2 + $0x25] sm:$0xff]  ;;  %v1354_v48 = vld [vmem:[#allocation2 + $0x2d] sm:$0xff] }
  0x62   : > { %2150 = vmatprep.mubr.msk.bf16.mxu0 %vm2361_vm1, %v2360_v1  ;;  %2198 = vmatprep.subr.bf16.mxu0 %v2360_v1 }
  0x63   : > { %2170 = vmatprep.subr.bf16.mxu1 %v2360_v1 }
  0x64   : > { %2121 = vmatmul.mubr.msk.bf16.gmra.mxu1 %vm226_vm0, %v746_v49  ;;  %v1362_v49 = vpack.c.bf16 %v1354_v48, %v1353_v47 }
  0x65   : > { %2199 = vmatpush3.bf16.msra.mxu0 %v2335_v52  ;;  %2124 = vmatprep.mubr.msk.bf16.mxu1 %vm2361_vm1, %v2360_v1  ;;  %v1516_v52 = vpack.c.bf16 %v1508_v51, %v1507_v50 }
  0x66   : > { %2171 = vmatpush3.bf16.msra.mxu1 %v2336_v53  ;;  %2200 = vmatprep.subr.bf16.mxu0 %v2360_v1  ;;  %v1355_v53 = vld [vmem:[#allocation2 + $0x35] sm:$0xff] }
  0x67   : > { %2172 = vmatprep.subr.bf16.mxu1 %v2360_v1 }
  0x68   : > { %2151 = vmatmul.mubr.msk.bf16.gmra.mxu0 %vm226_vm0, %v900_v54  ;;  %v1356_v54 = vld [vmem:[#allocation2 + $0x3d] sm:$0xff] }
  0x69   : > { %2154 = vmatprep.mubr.msk.bf16.mxu0 %vm2361_vm1, %v2360_v1  ;;  %2201 = vmatpush3.bf16.msra.mxu0 %v2337_v55  ;;  %v1363_v55 = vpack.c.bf16 %v1356_v54, %v1355_v53 }
  0x6a   : > { %2173 = vmatpush3.bf16.msra.mxu1 %v2338_v56  ;;  %2202 = vmatprep.subr.bf16.mxu0 %v2360_v1  ;;  %v1509_v56 = vld [vmem:[#allocation2 + $0x36] sm:$0xff] }
  0x6b   : > { %2174 = vmatprep.subr.bf16.mxu1 %v2360_v1 }
  0x6c   : > { %2125 = vmatmul.mubr.msk.bf16.gmra.mxu1 %vm226_vm0, %v747_v57  ;;  %v1510_v57 = vld [vmem:[#allocation2 + $0x3e] sm:$0xff] }
  0x6d   : > { %2128 = vmatprep.mubr.msk.bf16.mxu1 %vm2361_vm1, %v2360_v1  ;;  %2203 = vmatpush3.bf16.msra.mxu0 %v2339_v60  ;;  %v1517_v58 = vpack.c.bf16 %v1510_v57, %v1509_v56  ;;  %v1358_v60 = vld [vmem:[#allocation2 + $0x4d] sm:$0xff] }
  0x6e   : > { %2175 = vmatpush3.bf16.msra.mxu1 %v2340_v61  ;;  %2204 = vmatprep.subr.bf16.mxu0 %v2360_v1  ;;  %v1364_v61 = vpack.c.bf16 %v1358_v60, %v1357_v59 }
  0x6f   : > { %2226 = vmatprep.subr.bf16.mxu1 %v2360_v1 }
  0x70   : > { %2155 = vmatmul.mubr.msk.bf16.gmra.mxu0 %vm226_vm0, %v901_v62  ;;  %v1511_v62 = vld [vmem:[#allocation2 + $0x46] sm:$0xff] }
  0x71   : > { %2158 = vmatprep.mubr.msk.bf16.mxu0 %vm2361_vm1, %v2360_v1  ;;  %2205 = vmatpush3.bf16.msra.mxu0 %v2341_v63  ;;  %v1512_v63 = vld [vmem:[#allocation2 + $0x4e] sm:$0xff] }
  0x72   : > { %2256 = vmatprep.subr.bf16.mxu0 %v2360_v1 }
  0x74   : > { %2129 = vmatmul.mubr.msk.bf16.gmra.mxu1 %vm226_vm0, %v748_v0  ;;  %v1518_v0 = vpack.c.bf16 %v1512_v63, %v1511_v62 }
  0x75   : > { %2132 = vmatprep.mubr.msk.bf16.mxu1 %vm2361_vm1, %v2360_v1 }
  0x78   : > { %2159 = vmatmul.mubr.msk.bf16.gmra.mxu0 %vm226_vm0, %v902_v6  ;;  %v1365_v6 = vpack.c.bf16 %v1360_v4, %v1359_v2 }
  0x79   : > { %2162 = vmatprep.mubr.msk.bf16.mxu0 %vm2361_vm1, %v2360_v1 }
  0x7c   : > { %2133 = vmatmul.mubr.msk.bf16.gmra.mxu1 %vm226_vm0, %v749_v3  ;;  %v1514_v3 = vld [vmem:[#allocation2 + $0x5e] sm:$0xff] }
  0x7d   : > { %2176 = vmatprep.mubr.msk.bf16.mxu1 %vm2361_vm1, %v2360_v1  ;;  %v1519_v8 = vpack.c.bf16 %v1514_v3, %v1513_v7 }
  0x80   : > { %2163 = vmatmul.mubr.msk.bf16.gmra.mxu0 %vm226_vm0, %v903_v9 }
  0x81   : > { %2206 = vmatprep.mubr.msk.bf16.mxu0 %vm2361_vm1, %v2360_v1 }
  0x84   : > { %2177 = vmatmul.mubr.msk.bf16.vlgmr.msra.gmra.mxu1 %vm226_vm0, %v1053_v12 }
  0x85   : > { %2227 = vmatpush3.bf16.msra.mxu1 %v2342_v13  ;;  %2180 = vmatprep.mubr.msk.bf16.mxu1 %vm2361_vm1, %v2360_v1 }
  0x86   : > { %2228 = vmatprep.subr.bf16.mxu1 %v2360_v1 }
  0x88   : > { %2207 = vmatmul.mubr.msk.bf16.vlgmr.msra.gmra.mxu0 %vm226_vm0, %v1207_v15 }
  0x89   : > { %2257 = vmatpush3.bf16.msra.mxu0 %v2343_v16  ;;  %2229 = vmatpush3.bf16.msra.mxu1 %v2344_v18 }
  0x8a   : > { %2210 = vmatprep.mubr.msk.bf16.mxu0 %vm2361_vm1, %v2360_v1  ;;  %2258 = vmatprep.subr.bf16.mxu0 %v2360_v1 }
  0x8b   : > { %2230 = vmatprep.subr.bf16.mxu1 %v2360_v1 }
  0x8c   : > { %2181 = vmatmul.mubr.msk.bf16.gmra.mxu1 %vm226_vm0, %v1054_v19 }
  0x8d   : > { %2259 = vmatpush3.bf16.msra.mxu0 %v2345_v21  ;;  %2184 = vmatprep.mubr.msk.bf16.mxu1 %vm2361_vm1, %v2360_v1 }
  0x8e   : > { %2231 = vmatpush3.bf16.msra.mxu1 %v2346_v22  ;;  %2260 = vmatprep.subr.bf16.mxu0 %v2360_v1 }
  0x8f   : > { %2232 = vmatprep.subr.bf16.mxu1 %v2360_v1 }
  0x90   : > { %2211 = vmatmul.mubr.msk.bf16.gmra.mxu0 %vm226_vm0, %v1208_v23 }
  0x91   : > { %2214 = vmatprep.mubr.msk.bf16.mxu0 %vm2361_vm1, %v2360_v1  ;;  %2261 = vmatpush3.bf16.msra.mxu0 %v2347_v25 }
  0x92   : > { %2233 = vmatpush3.bf16.msra.mxu1 %v2348_v26  ;;  %2262 = vmatprep.subr.bf16.mxu0 %v2360_v1 }
  0x93   : > { %2234 = vmatprep.subr.bf16.mxu1 %v2360_v1 }
  0x94   : > { %2185 = vmatmul.mubr.msk.bf16.gmra.mxu1 %vm226_vm0, %v1055_v27 }
  0x95   : > { %2188 = vmatprep.mubr.msk.bf16.mxu1 %vm2361_vm1, %v2360_v1  ;;  %2263 = vmatpush3.bf16.msra.mxu0 %v2349_v29 }
  0x96   : > { %2235 = vmatpush3.bf16.msra.mxu1 %v2350_v30  ;;  %2264 = vmatprep.subr.bf16.mxu0 %v2360_v1 }
  0x98   : > { %2215 = vmatmul.mubr.msk.bf16.gmra.mxu0 %vm226_vm0, %v1209_v31 }
  0x99   : > { %2218 = vmatprep.mubr.msk.bf16.mxu0 %vm2361_vm1, %v2360_v1  ;;  %2265 = vmatpush3.bf16.msra.mxu0 %v2351_v33 }
  0x9c   : > { %2189 = vmatmul.mubr.msk.bf16.gmra.mxu1 %vm226_vm0, %v1056_v34 }
  0x9d   : > { %2192 = vmatprep.mubr.msk.bf16.mxu1 %vm2361_vm1, %v2360_v1 }
  0xa0   : > { %2219 = vmatmul.mubr.msk.bf16.gmra.mxu0 %vm226_vm0, %v1210_v36 }
  0xa1   : > { %2222 = vmatprep.mubr.msk.bf16.mxu0 %vm2361_vm1, %v2360_v1 }
  0xa4   : > { %2193 = vmatmul.mubr.msk.bf16.gmra.mxu1 %vm226_vm0, %v1057_v38 }
  0xa5   : > { %2236 = vmatprep.mubr.msk.bf16.mxu1 %vm2361_vm1, %v2360_v1 }
  0xa8   : > { %2223 = vmatmul.mubr.msk.bf16.gmra.mxu0 %vm226_vm0, %v1211_v40 }
  0xa9   : > { %2266 = vmatprep.mubr.msk.bf16.mxu0 %vm2361_vm1, %v2360_v1 }
  0xac   : > { %2237 = vmatmul.mubr.msk.bf16.vlgmr.msra.gmra.mxu1 %vm226_vm0, %v1361_v43 }
  0xad   : > { %2240 = vmatprep.mubr.msk.bf16.mxu1 %vm2361_vm1, %v2360_v1 }
  0xb0   : > { %2267 = vmatmul.mubr.msk.bf16.vlgmr.msra.gmra.mxu0 %vm226_vm0, %v1515_v46 }
  0xb1   : > { %2270 = vmatprep.mubr.msk.bf16.mxu0 %vm2361_vm1, %v2360_v1 }
  0xb4   : > { %2241 = vmatmul.mubr.msk.bf16.gmra.mxu1 %vm226_vm0, %v1362_v49 }
  0xb5   : > { %2244 = vmatprep.mubr.msk.bf16.mxu1 %vm2361_vm1, %v2360_v1 }
  0xb8   : > { %2271 = vmatmul.mubr.msk.bf16.gmra.mxu0 %vm226_vm0, %v1516_v52 }
  0xb9   : > { %2274 = vmatprep.mubr.msk.bf16.mxu0 %vm2361_vm1, %v2360_v1 }
  0xbc   : > { %2245 = vmatmul.mubr.msk.bf16.gmra.mxu1 %vm226_vm0, %v1363_v55 }
  0xbd   : > { %2248 = vmatprep.mubr.msk.bf16.mxu1 %vm2361_vm1, %v2360_v1 }
  0xc0   : > { %2275 = vmatmul.mubr.msk.bf16.gmra.mxu0 %vm226_vm0, %v1517_v58 }
  0xc1   : > { %2278 = vmatprep.mubr.msk.bf16.mxu0 %vm2361_vm1, %v2360_v1 }
  0xc4   : > { %2249 = vmatmul.mubr.msk.bf16.gmra.mxu1 %vm226_vm0, %v1364_v61 }
  0xc5   : > { %2252 = vmatprep.mubr.msk.bf16.mxu1 %vm2361_vm1, %v2360_v1 }
  0xc8   : > { %2279 = vmatmul.mubr.msk.bf16.gmra.mxu0 %vm226_vm0, %v1518_v0 }
  0xc9   : > { %2282 = vmatprep.mubr.msk.bf16.mxu0 %vm2361_vm1, %v2360_v1 }
  0xcc   : > { %2253 = vmatmul.mubr.msk.bf16.gmra.mxu1 %vm226_vm0, %v1365_v6 }
  0xd0   : > { %2283 = vmatmul.mubr.msk.bf16.gmra.mxu0 %vm226_vm0, %v1519_v8 }
  0xe0   : > { %v424_v5 = vpop.f32.mrf.mxu0  ;;  %v448_v9 = vpop.f32.mrf.mxu1 }
  0xe2   : > { %v2028_v10 = vpop.f32.mrf.mxu0  ;;  %v2040_v11 = vpop.f32.mrf.mxu1 }
  0xe4   : > { %v427_v12 = vpop.f32.mrf.mxu0  ;;  %v451_v13 = vpop.f32.mrf.mxu1 }
  0xe6   : > { %v2029_v14 = vpop.f32.mrf.mxu0  ;;  %v2041_v15 = vpop.f32.mrf.mxu1 }
  0xe8   : > { %v432_v16 = vpop.f32.mrf.mxu0  ;;  %v456_v17 = vpop.f32.mrf.mxu1 }
  0xea   : > { %v2032_v18 = vpop.f32.mrf.mxu0  ;;  %v2044_v19 = vpop.f32.mrf.mxu1 }
  0xec   : > { %v435_v1 = vpop.f32.mrf.mxu0  ;;  %v459_v20 = vpop.f32.mrf.mxu1 }
  0xee   : > { %v2033_v21 = vpop.f32.mrf.mxu0  ;;  %v2045_v22 = vpop.f32.mrf.mxu1 }
  0xf0   : > { %v440_v23 = vpop.f32.mrf.mxu0 }
  0xf2   : > { %v2036_v24 = vpop.f32.mrf.mxu0 }
  0xf4   : > { %v542_v25 = vpop.f32.mrf.mxu1  ;;  %v443_v26 = vpop.f32.mrf.mxu0 }
  0xf5   : > { %v543_v27 = vadd.f32 %v542_v25, %v424_v5 }
  0xf6   : > { %v2058_v28 = vpop.f32.mrf.mxu1  ;;  %v2037_v29 = vpop.f32.mrf.mxu0 }
  0xf8   : > { %v545_v30 = vpop.f32.mrf.mxu1  ;;  %v686_v31 = vpop.f32.mrf.mxu0 }
  0xf9   : > { %v546_v32 = vadd.f32 %v545_v30, %v427_v12  ;;  %v725_v33 = vadd.f32 %v686_v31, %v543_v27 }
  0xfa   : > { %v2059_v34 = vpop.f32.mrf.mxu1  ;;  %v2088_v35 = vpop.f32.mrf.mxu0 }
  0xfc   : > { %v550_v36 = vpop.f32.mrf.mxu1  ;;  %v689_v37 = vpop.f32.mrf.mxu0 }
  0xfd   : > { %v551_v38 = vadd.f32 %v550_v36, %v432_v16  ;;  %v726_v39 = vadd.f32 %v689_v37, %v546_v32 }
  0xfe   : > { %v2062_v40 = vpop.f32.mrf.mxu1  ;;  %v2089_v41 = vpop.f32.mrf.mxu0 }
 0x100   : > { %v553_v42 = vpop.f32.mrf.mxu1  ;;  %v694_v43 = vpop.f32.mrf.mxu0 }
 0x101   : > { %v554_v44 = vadd.f32 %v553_v42, %v435_v1  ;;  %v727_v45 = vadd.f32 %v694_v43, %v551_v38 }
 0x102   : > { %v2063_v46 = vpop.f32.mrf.mxu1  ;;  %v2092_v47 = vpop.f32.mrf.mxu0 }
 0x104   : > { %v558_v48 = vpop.f32.mrf.mxu1  ;;  %v697_v49 = vpop.f32.mrf.mxu0 }
 0x105   : > { %v559_v50 = vadd.f32 %v558_v48, %v440_v23  ;;  %v728_v51 = vadd.f32 %v697_v49, %v554_v44 }
 0x106   : > { %v2066_v52 = vpop.f32.mrf.mxu1  ;;  %v2093_v53 = vpop.f32.mrf.mxu0 }
 0x108   : > { %v561_v54 = vpop.f32.mrf.mxu1  ;;  %v702_v55 = vpop.f32.mrf.mxu0 }
 0x109   : > { %v562_v56 = vadd.f32 %v561_v54, %v443_v26  ;;  %v729_v57 = vadd.f32 %v702_v55, %v559_v50 }
 0x10a   : > { %v2067_v58 = vpop.f32.mrf.mxu1  ;;  %v2096_v59 = vpop.f32.mrf.mxu0 }
 0x10c   : > { %v566_v60 = vpop.f32.mrf.mxu1  ;;  %v705_v61 = vpop.f32.mrf.mxu0 }
 0x10d   : > { %v567_v62 = vadd.f32 %v566_v60, %v448_v9  ;;  %v730_v63 = vadd.f32 %v705_v61, %v562_v56 }
 0x10e   : > { %v2070_v0 = vpop.f32.mrf.mxu1  ;;  %v2097_v2 = vpop.f32.mrf.mxu0 }
 0x110   : > { %v569_v4 = vpop.f32.mrf.mxu1  ;;  %v710_v6 = vpop.f32.mrf.mxu0 }
 0x111   : > { %v570_v7 = vadd.f32 %v569_v4, %v451_v13  ;;  %v731_v3 = vadd.f32 %v710_v6, %v567_v62 }
 0x112   : > { %v2071_v8 = vpop.f32.mrf.mxu1  ;;  %v2100_v5 = vpop.f32.mrf.mxu0 }
 0x114   : > { %v574_v10 = vpop.f32.mrf.mxu1  ;;  %v713_v11 = vpop.f32.mrf.mxu0 }
 0x115   : > { %v575_v12 = vadd.f32 %v574_v10, %v456_v17  ;;  %v732_v14 = vadd.f32 %v713_v11, %v570_v7 }
 0x116   : > { %v2074_v15 = vpop.f32.mrf.mxu1  ;;  %v2101_v16 = vpop.f32.mrf.mxu0 }
 0x118   : > { %v577_v18 = vpop.f32.mrf.mxu1  ;;  %v718_v19 = vpop.f32.mrf.mxu0 }
 0x119   : > { %v578_v1 = vadd.f32 %v577_v18, %v459_v20  ;;  %v733_v21 = vadd.f32 %v718_v19, %v575_v12 }
 0x11a   : > { %v2075_v9 = vpop.f32.mrf.mxu1  ;;  %v2104_v22 = vpop.f32.mrf.mxu0 }
 0x11c   : > { %v840_v23 = vpop.f32.mrf.mxu1  ;;  %v721_v24 = vpop.f32.mrf.mxu0 }
 0x11d   : > { %v879_v25 = vadd.f32 %v840_v23, %v725_v33  ;;  %v734_v26 = vadd.f32 %v721_v24, %v578_v1 }
 0x11e   : > { %v2118_v13 = vpop.f32.mrf.mxu1  ;;  %v2105_v27 = vpop.f32.mrf.mxu0 }
 0x120   : > { %v843_v28 = vpop.f32.mrf.mxu1  ;;  %v994_v29 = vpop.f32.mrf.mxu0 }
 0x121   : > { %v880_v30 = vadd.f32 %v843_v28, %v726_v39  ;;  %v2828_v31 = vadd.f32 %v994_v29, %v879_v25 }
 0x122   : > { %v2119_v17 = vpop.f32.mrf.mxu1  ;;  %v2148_v32 = vpop.f32.mrf.mxu0 }
 0x124   : > { %v848_v34 = vpop.f32.mrf.mxu1  ;;  %v997_v35 = vpop.f32.mrf.mxu0 }
 0x125   : > { %v881_v36 = vadd.f32 %v848_v34, %v727_v45  ;;  %v2830_v20 = vadd.f32 %v997_v35, %v880_v30 }
 0x126   : > { %v2122_v37 = vpop.f32.mrf.mxu1  ;;  %v2149_v38 = vpop.f32.mrf.mxu0 }
 0x128   : > { %v851_v40 = vpop.f32.mrf.mxu1  ;;  %v1002_v41 = vpop.f32.mrf.mxu0 }
 0x129   : > { %v882_v33 = vadd.f32 %v851_v40, %v728_v51  ;;  %v2832_v42 = vadd.f32 %v1002_v41, %v881_v36 }
 0x12a   : > { %v2123_v43 = vpop.f32.mrf.mxu1  ;;  %v2152_v44 = vpop.f32.mrf.mxu0 }
 0x12c   : > { %v856_v46 = vpop.f32.mrf.mxu1  ;;  %v1005_v39 = vpop.f32.mrf.mxu0 }
 0x12d   : > { %v883_v47 = vadd.f32 %v856_v46, %v729_v57  ;;  %v2834_v48 = vadd.f32 %v1005_v39, %v882_v33 }
 0x12e   : > { %v2126_v49 = vpop.f32.mrf.mxu1  ;;  %v2153_v50 = vpop.f32.mrf.mxu0 }
 0x130   : > { %v859_v52 = vpop.f32.mrf.mxu1  ;;  %v1010_v45 = vpop.f32.mrf.mxu0 }
 0x131   : > { %v884_v53 = vadd.f32 %v859_v52, %v730_v63  ;;  %v2836_v54 = vadd.f32 %v1010_v45, %v883_v47 }
 0x132   : > { %v2127_v55 = vpop.f32.mrf.mxu1  ;;  %v2156_v56 = vpop.f32.mrf.mxu0 }
 0x134   : > { %v864_v58 = vpop.f32.mrf.mxu1  ;;  %v1013_v51 = vpop.f32.mrf.mxu0 }
 0x135   : > { %v885_v59 = vadd.f32 %v864_v58, %v731_v3  ;;  %v2838_v60 = vadd.f32 %v1013_v51, %v884_v53 }
 0x136   : > { %v2130_v61 = vpop.f32.mrf.mxu1  ;;  %v2157_v62 = vpop.f32.mrf.mxu0 }
 0x138   : > { %v867_v0 = vpop.f32.mrf.mxu1  ;;  %v1018_v57 = vpop.f32.mrf.mxu0 }
 0x139   : > { %v886_v2 = vadd.f32 %v867_v0, %v732_v14  ;;  %v2840_v4 = vadd.f32 %v1018_v57, %v885_v59 }
 0x13a   : > { %v2131_v6 = vpop.f32.mrf.mxu1  ;;  %v2160_v7 = vpop.f32.mrf.mxu0 }
 0x13c   : > { %v872_v8 = vpop.f32.mrf.mxu1  ;;  %v1021_v63 = vpop.f32.mrf.mxu0 }
 0x13d   : > { %v887_v5 = vadd.f32 %v872_v8, %v733_v21  ;;  %v2842_v10 = vadd.f32 %v1021_v63, %v886_v2 }
 0x13e   : > { %v2134_v11 = vpop.f32.mrf.mxu1  ;;  %v2161_v12 = vpop.f32.mrf.mxu0 }
 0x140   : > { %v875_v15 = vpop.f32.mrf.mxu1  ;;  %v1026_v3 = vpop.f32.mrf.mxu0 }
 0x141   : > { %v888_v16 = vadd.f32 %v875_v15, %v734_v26  ;;  %v2844_v18 = vadd.f32 %v1026_v3, %v887_v5  ;;  %v2874_v3 = vld [vmem:[%s2936_s4] ss:$0 sm:$0xff] }
 0x142   : > { %v2135_v19 = vpop.f32.mrf.mxu1  ;;  %v2164_v1 = vpop.f32.mrf.mxu0 }
 0x144   : > { %v1148_v9 = vpop.f32.mrf.mxu1  ;;  %v1029_v14 = vpop.f32.mrf.mxu0 }
 0x145   : > { %v2846_v22 = vadd.f32 %v1029_v14, %v888_v16  ;;  %v1187_v57 = vadd.f32 %v1148_v9, %v2828_v31 }
 0x146   : > { %v2178_v23 = vpop.f32.mrf.mxu1  ;;  %v2165_v24 = vpop.f32.mrf.mxu0 }
 0x148   : > { %v1151_v25 = vpop.f32.mrf.mxu1  ;;  %v1302_v13 = vpop.f32.mrf.mxu0 }
 0x149   : > { %v1341_v7 = vadd.f32 %v1302_v13, %v1187_v57  ;;  %v1188_v5 = vadd.f32 %v1151_v25, %v2830_v20 }
 0x14a   : > { %v2179_v21 = vpop.f32.mrf.mxu1  ;;  %v2208_v27 = vpop.f32.mrf.mxu0 }
 0x14c   : > { %v1156_v28 = vpop.f32.mrf.mxu1  ;;  %v1305_v29 = vpop.f32.mrf.mxu0 }
 0x14d   : > { %v1342_v16 = vadd.f32 %v1305_v29, %v1188_v5  ;;  %v1189_v20 = vadd.f32 %v1156_v28, %v2832_v42 }
 0x14e   : > { %v2182_v30 = vpop.f32.mrf.mxu1  ;;  %v2209_v17 = vpop.f32.mrf.mxu0 }
 0x150   : > { %v1159_v32 = vpop.f32.mrf.mxu1  ;;  %v1310_v26 = vpop.f32.mrf.mxu0 }
 0x151   : > { %v1343_v25 = vadd.f32 %v1310_v26, %v1189_v20  ;;  %v1190_v29 = vadd.f32 %v1159_v32, %v2834_v48 }
 0x152   : > { %v2183_v34 = vpop.f32.mrf.mxu1  ;;  %v2212_v35 = vpop.f32.mrf.mxu0 }
 0x154   : > { %v1164_v36 = vpop.f32.mrf.mxu1  ;;  %v1313_v37 = vpop.f32.mrf.mxu0 }
 0x155   : > { %v1344_v28 = vadd.f32 %v1313_v37, %v1190_v29  ;;  %v1191_v26 = vadd.f32 %v1164_v36, %v2836_v54 }
 0x156   : > { %v2186_v38 = vpop.f32.mrf.mxu1  ;;  %v2213_v40 = vpop.f32.mrf.mxu0 }
 0x158   : > { %v2848_v41 = vpop.f32.mrf.mxu1  ;;  %v1318_v33 = vpop.f32.mrf.mxu0 }
 0x159   : > { %v1345_v32 = vadd.f32 %v1318_v33, %v1191_v26  ;;  %v1192_v37 = vadd.f32 %v2848_v41, %v2838_v60 }
 0x15a   : > { %v2187_v43 = vpop.f32.mrf.mxu1  ;;  %v2216_v44 = vpop.f32.mrf.mxu0 }
 0x15c   : > { %v2850_v46 = vpop.f32.mrf.mxu1  ;;  %v2852_v39 = vpop.f32.mrf.mxu0 }
 0x15e   : > { %v2190_v47 = vpop.f32.mrf.mxu1  ;;  %v2217_v49 = vpop.f32.mrf.mxu0 }
 0x160   : > { %v2854_v50 = vpop.f32.mrf.mxu1  ;;  %v2856_v52 = vpop.f32.mrf.mxu0 }
 0x162   : > { %v2191_v45 = vpop.f32.mrf.mxu1  ;;  %v2220_v53 = vpop.f32.mrf.mxu0 }
 0x164   : > { %v2858_v55 = vpop.f32.mrf.mxu1  ;;  %v2860_v56 = vpop.f32.mrf.mxu0 }
 0x165   : > { %v1195_v20 = vadd.f32 %v2858_v55, %v2844_v18 }
 0x166   : > { %v2194_v58 = vpop.f32.mrf.mxu1  ;;  %v2221_v51 = vpop.f32.mrf.mxu0 }
 0x168   : > { %v2862_v59 = vpop.f32.mrf.mxu1  ;;  %v2864_v61 = vpop.f32.mrf.mxu0 }
 0x16a   : > { %v2195_v62 = vpop.f32.mrf.mxu1  ;;  %v2224_v0 = vpop.f32.mrf.mxu0 }
 0x16b   : > { %v1346_v62 = vadd.f32 %v2852_v39, %v1192_v37 }
 0x16c   : > { %v1456_v2 = vpop.f32.mrf.mxu1  ;;  %v2867_v6 = vpop.f32.mrf.mxu0 }
 0x16d   : > { %v1495_v11 = vadd.f32 %v1456_v2, %v1341_v7  ;;  %v1193_v2 = vadd.f32 %v2850_v46, %v2840_v4 }
 0x16e   : > { %v2238_v8 = vpop.f32.mrf.mxu1  ;;  %v2225_v63 = vpop.f32.mrf.mxu0 }
 0x16f   : > { %v1347_v63 = vadd.f32 %v2856_v52, %v1193_v2 }
 0x170   : > { %v1459_v12 = vpop.f32.mrf.mxu1  ;;  %v1610_v15 = vpop.f32.mrf.mxu0 }
 0x171   : > { %v1649_v19 = vadd.f32 %v1610_v15, %v1495_v11  ;;  %v1496_v9 = vadd.f32 %v1459_v12, %v1342_v16  ;;  %v1194_v12 = vadd.f32 %v2854_v50, %v2842_v10 }
 0x172   : > { %v2239_v31 = vpop.f32.mrf.mxu1  ;;  %v2268_v1 = vpop.f32.mrf.mxu0 }
 0x173   : > { %v1666_v14 = vadd.f32 %v2874_v3, %v1649_v19  ;;  %v1348_v19 = vadd.f32 %v2860_v56, %v1194_v12 }
 0x174   : > { %v1464_v23 = vpop.f32.mrf.mxu1  ;;  %v1613_v24 = vpop.f32.mrf.mxu0 }
 0x175   : > { %1677 = vst.msk [vmem:[%s2879_s7] sm:$0xff] %vm1676_vm2, %v1666_v14  ;;  %v1650_v13 = vadd.f32 %v1613_v24, %v1496_v9  ;;  %v1497_v30 = vadd.f32 %v1464_v23, %v1343_v25  ;;  %v1349_v23 = vadd.f32 %v2864_v61, %v1195_v20 }
 0x176   : > { %v2242_v21 = vpop.f32.mrf.mxu1  ;;  %v2269_v27 = vpop.f32.mrf.mxu0 }
 0x177   : > { %v1667_v17 = vadd.f32 %v2874_v3, %v1650_v13  ;;  %v1196_v13 = vadd.f32 %v2862_v59, %v2846_v22 }
 0x178   : > { %v1467_v34 = vpop.f32.mrf.mxu1  ;;  %v1618_v42 = vpop.f32.mrf.mxu0 }
 0x179   : > { %1678 = vst.msk [vmem:[%s2879_s7 + $0x8] sm:$0xff] %vm1676_vm2, %v1667_v17  ;;  %v1651_v35 = vadd.f32 %v1618_v42, %v1497_v30  ;;  %v1498_v43 = vadd.f32 %v1467_v34, %v1344_v28  ;;  %v1350_v29 = vadd.f32 %v2867_v6, %v1196_v13 }
 0x17a   : > { %v2243_v38 = vpop.f32.mrf.mxu1  ;;  %v2272_v40 = vpop.f32.mrf.mxu0 }
 0x17b   : > { %v1668_v44 = vadd.f32 %v2874_v3, %v1651_v35 }
 0x17c   : > { %v1472_v47 = vpop.f32.mrf.mxu1  ;;  %v1621_v48 = vpop.f32.mrf.mxu0 }
 0x17d   : > { %1679 = vst.msk [vmem:[%s2879_s7 + $0x10] sm:$0xff] %vm1676_vm2, %v1668_v44  ;;  %v1652_v49 = vadd.f32 %v1621_v48, %v1498_v43  ;;  %v1499_v58 = vadd.f32 %v1472_v47, %v1345_v32 }
 0x17e   : > { %v2246_v45 = vpop.f32.mrf.mxu1  ;;  %v2273_v53 = vpop.f32.mrf.mxu0 }
 0x17f   : > { %v1669_v51 = vadd.f32 %v2874_v3, %v1652_v49 }
 0x180   : > { %v1475_v54 = vpop.f32.mrf.mxu1  ;;  %v1626_v36 = vpop.f32.mrf.mxu0 }
 0x181   : > { %1680 = vst.msk [vmem:[%s2879_s7 + $0x18] sm:$0xff] %vm1676_vm2, %v1669_v51  ;;  %v1653_v0 = vadd.f32 %v1626_v36, %v1499_v58  ;;  %v1500_v7 = vadd.f32 %v1475_v54, %v1346_v62 }
 0x182   : > { %v2247_v33 = vpop.f32.mrf.mxu1  ;;  %v2276_v57 = vpop.f32.mrf.mxu0 }
 0x183   : > { %v1670_v60 = vadd.f32 %v2874_v3, %v1653_v0 }
 0x184   : > { %v1480_v41 = vpop.f32.mrf.mxu1  ;;  %v1629_v8 = vpop.f32.mrf.mxu0 }
 0x185   : > { %1681 = vst.msk [vmem:[%s2879_s7 + $0x20] sm:$0xff] %vm1676_vm2, %v1670_v60  ;;  %v1654_v5 = vadd.f32 %v1629_v8, %v1500_v7  ;;  %v1501_v15 = vadd.f32 %v1480_v41, %v1347_v63 }
 0x186   : > { %v2250_v39 = vpop.f32.mrf.mxu1  ;;  %v2277_v11 = vpop.f32.mrf.mxu0 }
 0x187   : > { %v1671_v4 = vadd.f32 %v2874_v3, %v1654_v5 }
 0x188   : > { %v1483_v46 = vpop.f32.mrf.mxu1  ;;  %v1634_v16 = vpop.f32.mrf.mxu0 }
 0x189   : > { %1682 = vst.msk [vmem:[%s2879_s7 + $0x28] sm:$0xff] %vm1676_vm2, %v1671_v4  ;;  %v1655_v31 = vadd.f32 %v1634_v16, %v1501_v15  ;;  %v1502_v9 = vadd.f32 %v1483_v46, %v1348_v19 }
 0x18a   : > { %v2251_v52 = vpop.f32.mrf.mxu1  ;;  %v2280_v1 = vpop.f32.mrf.mxu0 }
 0x18b   : > { %v1672_v10 = vadd.f32 %v2874_v3, %v1655_v31 }
 0x18c   : > { %v1488_v50 = vpop.f32.mrf.mxu1  ;;  %v1637_v14 = vpop.f32.mrf.mxu0 }
 0x18d   : > { %1683 = vst.msk [vmem:[%s2879_s7 + $0x30] sm:$0xff] %vm1676_vm2, %v1672_v10  ;;  %v1656_v24 = vadd.f32 %v1637_v14, %v1502_v9  ;;  %v1503_v21 = vadd.f32 %v1488_v50, %v1349_v23 }
 0x18e   : > { %v2254_v56 = vpop.f32.mrf.mxu1  ;;  %v2281_v25 = vpop.f32.mrf.mxu0 }
 0x18f   : > { %v1673_v18 = vadd.f32 %v2874_v3, %v1656_v24 }
 0x190   : > { %v1491_v55 = vpop.f32.mrf.mxu1  ;;  %v1642_v27 = vpop.f32.mrf.mxu0 }
 0x191   : > { %1684 = vst.msk [vmem:[%s2879_s7 + $0x38] sm:$0xff] %vm1676_vm2, %v1673_v18  ;;  %v1657_v61 = vadd.f32 %v1642_v27, %v1503_v21  ;;  %v1504_v34 = vadd.f32 %v1491_v55, %v1350_v29 }
 0x192   : > { %v2255_v30 = vpop.f32.mrf.mxu1  ;;  %v2284_v17 = vpop.f32.mrf.mxu0 }
 0x193   : > { %v1674_v42 = vadd.f32 %v2874_v3, %v1657_v61 }
 0x194   : > { %v1645_v28 = vpop.f32.mrf.mxu0 }
 0x195   : > { %1685 = vst.msk [vmem:[%s2879_s7 + $0x40] sm:$0xff] %vm1676_vm2, %v1674_v42  ;;  %v1658_v22 = vadd.f32 %v1645_v28, %v1504_v34 }
 0x196   : > { %v2285_v59 = vpop.f32.mrf.mxu0 }
 0x197   : > { %v1675_v35 = vadd.f32 %v2874_v3, %v1658_v22 }
 0x199   : > { %1686 = vst.msk [vmem:[%s2879_s7 + $0x48] sm:$0xff] %vm1676_vm2, %v1675_v35 }
 0x19a PF: > { %s15_s18 = sadd.s32 1, %s2358_s18  }
 0x19b   : > { %p12_p4 = scmp.ge.s32.totalorder %s15_s18, 4  }
 0x19d   :  { %14 = sbr.rel (!%p12_p4) target bundleno = 1 (0x1), region = 78 }

// kernel: densenet_forward.29
= control target key start
LH: loop header
LB: loop body
LE: loop exit
PB: predicated region body
PF: predicated region fallthrough
CT: control target
= control target key end

     0   :  { %vm14_vm0 = vcmask 385024   ;;  %vm22_vm1 = vcmask 392192   ;;  %v68_v0 = vmov 0.0   ;;  %s126_s0 = inlined_call_operand.vmem [shape: f32[32,48], index: 0, kind: input, shape index: {}]   ;;  %s127_s1 = inlined_call_operand.vmem [shape: f32[1,48], index: 1, kind: output, shape index: {0}]   ;;  %s128_s2 = inlined_call_operand.vmem [shape: f32[1,48], index: 2, kind: output, shape index: {1}]  }
   0x1   :  { %15 = vst.msk [vmem:[%s127_s1] sm:$0x1] %vm14_vm0, %v68_v0  ;;  %v17_v1 = vld [vmem:[%s126_s0] sm:$0xff]  ;;  %v18_v2 = vld [vmem:[%s126_s0 + $0x8] sm:$0xff]  ;;  %v19_v3 = vld [vmem:[%s126_s0 + $0x10] sm:$0xff] }
   0x2   :  { %16 = vst.msk [vmem:[%s128_s2] sm:$0x1] %vm14_vm0, %v68_v0  ;;  %v20_v4 = vld [vmem:[%s126_s0 + $0x18] sm:$0xff]  ;;  %v23_v5 = vsel %vm22_vm1, %v17_v1, 0.0  ;;  %v24_v6 = vsel %vm22_vm1, %v18_v2, 0.0  ;;  %v26_v7 = vsel %vm22_vm1, %v19_v3, 0.0  ;;  %v40_v8 = vmul.f32 %v17_v1, %v17_v1 }
   0x3   :  { %v25_v9 = vadd.f32 %v24_v6, %v23_v5  ;;  %v41_v10 = vmul.f32 %v18_v2, %v18_v2  ;;  %v42_v11 = vmul.f32 %v19_v3, %v19_v3  ;;  %v28_v12 = vsel %vm22_vm1, %v20_v4, 0.0 }
   0x4   :  { %v43_v13 = vmul.f32 %v20_v4, %v20_v4  ;;  %v44_v14 = vsel %vm22_vm1, %v40_v8, 0.0 }
   0x5   :  { %v27_v15 = vadd.f32 %v26_v7, %v25_v9  ;;  %v45_v16 = vsel %vm22_vm1, %v41_v10, 0.0  ;;  %v47_v17 = vsel %vm22_vm1, %v42_v11, 0.0 }
   0x6   :  { %v46_v18 = vadd.f32 %v45_v16, %v44_v14  ;;  %v49_v20 = vsel %vm22_vm1, %v43_v13, 0.0 }
   0x7   :  { %v29_v19 = vadd.f32 %v28_v12, %v27_v15 }
   0x8   :  { %v48_v21 = vadd.f32 %v47_v17, %v46_v18  ;;  %v21_v31 = vld [vmem:[%s127_s1] sm:$0x1] }
   0x9   :  { %v30_v22 = vrot.slane %v29_v19, 4  ;;  %v39_v36 = vld [vmem:[%s128_s2] sm:$0x1] }
   0xa   :  { %v50_v23 = vadd.f32 %v49_v20, %v48_v21 }
   0xb   :  { %v31_v24 = vadd.f32 %v30_v22, %v29_v19 }
   0xc   :  { %v51_v25 = vrot.slane %v50_v23, 4 }
   0xd   :  { %v32_v26 = vrot.slane %v31_v24, 2 }
   0xe   :  { %v52_v27 = vadd.f32 %v51_v25, %v50_v23 }
   0xf   :  { %v33_v28 = vadd.f32 %v32_v26, %v31_v24 }
  0x10   :  { %v53_v29 = vrot.slane %v52_v27, 2 }
  0x11   :  { %v34_v30 = vrot.slane %v33_v28, 1 }
  0x12   :  { %v54_v32 = vadd.f32 %v53_v29, %v52_v27 }
  0x13   :  { %v35_v33 = vadd.f32 %v34_v30, %v33_v28 }
  0x14   :  { %v55_v34 = vrot.slane %v54_v32, 1 }
  0x15   :  { %v36_v35 = vadd.f32 %v35_v33, %v21_v31 }
  0x16   :  { %v56_v37 = vadd.f32 %v55_v34, %v54_v32 }
  0x17   :  { %38 = vst.msk [vmem:[%s127_s1] sm:$0x1] %vm14_vm0, %v36_v35 }
  0x18   :  { %v57_v38 = vadd.f32 %v56_v37, %v39_v36 }
  0x1a   :  { %58 = vst.msk [vmem:[%s128_s2] sm:$0x1] %vm14_vm0, %v57_v38 }

// kernel: densenet_forward.31
= control target key start
LH: loop header
LB: loop body
LE: loop exit
PB: predicated region body
PF: predicated region fallthrough
CT: control target
= control target key end

     0   :  { %vm14_vm0 = vcmask 122880   ;;  %vm22_vm1 = vcmask 130048   ;;  %v68_v0 = vmov 0.0   ;;  %s126_s0 = inlined_call_operand.vmem [shape: f32[32,16], index: 0, kind: input, shape index: {}]   ;;  %s127_s1 = inlined_call_operand.vmem [shape: f32[1,16], index: 1, kind: output, shape index: {0}]   ;;  %s128_s2 = inlined_call_operand.vmem [shape: f32[1,16], index: 2, kind: output, shape index: {1}]  }
   0x1   :  { %15 = vst.msk [vmem:[%s127_s1] sm:$0x1] %vm14_vm0, %v68_v0  ;;  %v17_v1 = vld [vmem:[%s126_s0] sm:$0xff]  ;;  %v18_v2 = vld [vmem:[%s126_s0 + $0x8] sm:$0xff]  ;;  %v19_v3 = vld [vmem:[%s126_s0 + $0x10] sm:$0xff] }
   0x2   :  { %16 = vst.msk [vmem:[%s128_s2] sm:$0x1] %vm14_vm0, %v68_v0  ;;  %v20_v4 = vld [vmem:[%s126_s0 + $0x18] sm:$0xff]  ;;  %v23_v5 = vsel %vm22_vm1, %v17_v1, 0.0  ;;  %v24_v6 = vsel %vm22_vm1, %v18_v2, 0.0  ;;  %v26_v7 = vsel %vm22_vm1, %v19_v3, 0.0  ;;  %v40_v8 = vmul.f32 %v17_v1, %v17_v1 }
   0x3   :  { %v25_v9 = vadd.f32 %v24_v6, %v23_v5  ;;  %v41_v10 = vmul.f32 %v18_v2, %v18_v2  ;;  %v42_v11 = vmul.f32 %v19_v3, %v19_v3  ;;  %v28_v12 = vsel %vm22_vm1, %v20_v4, 0.0 }
   0x4   :  { %v43_v13 = vmul.f32 %v20_v4, %v20_v4  ;;  %v44_v14 = vsel %vm22_vm1, %v40_v8, 0.0 }
   0x5   :  { %v27_v15 = vadd.f32 %v26_v7, %v25_v9  ;;  %v45_v16 = vsel %vm22_vm1, %v41_v10, 0.0  ;;  %v47_v17 = vsel %vm22_vm1, %v42_v11, 0.0 }
   0x6   :  { %v46_v18 = vadd.f32 %v45_v16, %v44_v14  ;;  %v49_v20 = vsel %vm22_vm1, %v43_v13, 0.0 }
   0x7   :  { %v29_v19 = vadd.f32 %v28_v12, %v27_v15 }
   0x8   :  { %v48_v21 = vadd.f32 %v47_v17, %v46_v18  ;;  %v21_v31 = vld [vmem:[%s127_s1] sm:$0x1] }
   0x9   :  { %v30_v22 = vrot.slane %v29_v19, 4  ;;  %v39_v36 = vld [vmem:[%s128_s2] sm:$0x1] }
   0xa   :  { %v50_v23 = vadd.f32 %v49_v20, %v48_v21 }
   0xb   :  { %v31_v24 = vadd.f32 %v30_v22, %v29_v19 }
   0xc   :  { %v51_v25 = vrot.slane %v50_v23, 4 }
   0xd   :  { %v32_v26 = vrot.slane %v31_v24, 2 }
   0xe   :  { %v52_v27 = vadd.f32 %v51_v25, %v50_v23 }
   0xf   :  { %v33_v28 = vadd.f32 %v32_v26, %v31_v24 }
  0x10   :  { %v53_v29 = vrot.slane %v52_v27, 2 }
  0x11   :  { %v34_v30 = vrot.slane %v33_v28, 1 }
  0x12   :  { %v54_v32 = vadd.f32 %v53_v29, %v52_v27 }
  0x13   :  { %v35_v33 = vadd.f32 %v34_v30, %v33_v28 }
  0x14   :  { %v55_v34 = vrot.slane %v54_v32, 1 }
  0x15   :  { %v36_v35 = vadd.f32 %v35_v33, %v21_v31 }
  0x16   :  { %v56_v37 = vadd.f32 %v55_v34, %v54_v32 }
  0x17   :  { %38 = vst.msk [vmem:[%s127_s1] sm:$0x1] %vm14_vm0, %v36_v35 }
  0x18   :  { %v57_v38 = vadd.f32 %v56_v37, %v39_v36 }
  0x1a   :  { %58 = vst.msk [vmem:[%s128_s2] sm:$0x1] %vm14_vm0, %v57_v38 }

// kernel: densenet_forward.30
= control target key start
LH: loop header
LB: loop body
LE: loop exit
PB: predicated region body
PF: predicated region fallthrough
CT: control target
= control target key end

     0   :  { %s1423_s18 = smov 0   ;;  %s1566_s0 = inlined_call_operand.vmem [shape: f32[2,16,48], index: 0, kind: input, shape index: {}]   ;;  %s1567_s1 = inlined_call_operand.vmem [shape: f32[1,48], index: 1, kind: input, shape index: {}]   ;;  %s1568_s2 = inlined_call_operand.vmem [shape: f32[1,48], index: 2, kind: input, shape index: {}]   ;;  %s1569_s3 = inlined_call_operand.vmem [shape: bf16[9,48,16], index: 3, kind: input, shape index: {}]   ;;  %s1570_s4 = inlined_call_operand.vmem [shape: f32[1,16], index: 4, kind: input, shape index: {}]   ;;  %s1571_s5 = inlined_call_operand.vmem [shape: f32[2,24,16], index: 5, kind: output, shape index: {}]  }
   0x1 LB: > { %s1105_s19 = sadd.s32 4294967295, %s1390_s18   ;;  %p1109_p0 = scmp.ge.s32.totalorder %s1390_s18, 1  ;;  %s1390_s18 = sphi %s1423_s18, %s15_s18  }
   0x2   : > { %p187_p1 = scmp.lt.s32.totalorder %s1390_s18, 3 }
   0x4   : > { %p188_p2 = pnand %p1109_p0, %p187_p1 }
   0x5   : > { %p215_p3 = scmp.lt.s32.totalorder (!%p188_p2), %s1105_s19, 1 }
   0x6   : > { %191 = sbr.rel (%p188_p2) target bundleno = 286 (0x11e), region = 40 }
   0xb   : > { %v1357_v0 = vld [vmem:[%s1569_s3 + $0x28] sm:$0xff]   ;;  %v1358_v1 = vld [vmem:[%s1569_s3 + $0x10] sm:$0xff]   ;;  %vm226_vm0 = vcmask 392192   ;;  %v1359_v2 = vld [vmem:[%s1569_s3 + $0x20] sm:$0xff]   ;;  %s1573_s19 = smov (!%p215_p3, %s1105_s19), 1  ;;  %v1392_v5 = vmov 0.0  }
   0xc   : > { %1257 = vmatprep.subr.bf16.mxu0 %v1357_v0  ;;  %1267 = vmatprep.subr.bf16.mxu1 %v1358_v1  ;;  %v1360_v3 = vld [vmem:[%s1569_s3 + $0x8] sm:$0xff]   ;;  %v1361_v4 = vld [vmem:[%s1569_s3 + $0x18] sm:$0xff]   ;;  %s1211_s30 = sshll.u32 %s1573_s19, 4  ;;  %227 = vst.msk [vmem:[#allocation2] sm:$0xff] %vm226_vm0, %v1392_v5  ;;  %228 = vst.msk [vmem:[#allocation2 + $0x8] sm:$0xff] %vm226_vm0, %v1392_v5  ;;  %vm254_vm1 = vcmask 388096  }
   0xd   : > { %1258 = vmatpush3.bf16.msra.mxu0 %v1357_v0  ;;  %1268 = vmatpush3.bf16.msra.mxu1 %v1358_v1  ;;  %229 = vst.msk [vmem:[#allocation2 + $0x10] sm:$0xff] %vm226_vm0, %v1392_v5  ;;  %230 = vst.msk [vmem:[#allocation2 + $0x18] sm:$0xff] %vm226_vm0, %v1392_v5  ;;  %v1362_v6 = vld [vmem:[%s1569_s3] sm:$0xff]   ;;  %s219_s10 = scalar_lea.vmem %s1566_s0, %s1211_s30  ;;  %v1364_v15 = vld [vmem:[%s1569_s3 + $0x58] sm:$0xff]   ;;  %vm256_vm2 = vcmask 392196   ;;  %s1347_s11 = smul.u32 24, %s1573_s19 }
   0xe   : > { %1259 = vmatprep.subr.bf16.mxu0 %v1359_v2  ;;  %231 = vst.msk [vmem:[#allocation2 + $0x20] sm:$0xff] %vm226_vm0, %v1392_v5  ;;  %1269 = vmatprep.subr.bf16.mxu1 %v1360_v3  ;;  %v232_v7 = vld [vmem:[%s219_s10] sm:$0xff]  ;;  %v233_v12 = vld [vmem:[%s219_s10 + $0x8] sm:$0xff]  ;;  %v1365_v29 = vld [vmem:[%s1569_s3 + $0x38] sm:$0xff]   ;;  %vm1046_vm3 = vcmask 130048  }
   0xf   : > { %v1113_v8 = vld [vmem:[%s1567_s1] ss:$0 sm:$0xff]  ;;  %v1366_v32 = vld [vmem:[%s1569_s3 + $0x50] sm:$0xff]   ;;  %v1368_v38 = vld [vmem:[%s1569_s3 + $0x48] sm:$0xff]   ;;  %s224_s16 = scalar_lea.vmem %s1571_s5, %s1347_s11 }
  0x10   : > { %v1114_v9 = vld [vmem:[%s1568_s2] ss:$0 sm:$0xff]  ;;  %v241_v10 = vmul.f32 %v1113_v8, %v232_v7  ;;  %v242_v14 = vmul.f32 %v1113_v8, %v233_v12  ;;  %v1367_v37 = vld [vmem:[%s1569_s3 + $0x30] sm:$0xff]   ;;  %v1370_v42 = vld [vmem:[%s1569_s3 + $0x88] sm:$0xff]  }
  0x11   : > { %1260 = vmatpush3.bf16.msra.mxu0 %v1359_v2  ;;  %v1363_v11 = vld [vmem:[%s1569_s3 + $0x40] sm:$0xff]   ;;  %1270 = vmatpush3.bf16.msra.mxu1 %v1360_v3  ;;  %v1369_v41 = vld [vmem:[%s1569_s3 + $0x70] sm:$0xff]   ;;  %v1371_v47 = vld [vmem:[%s1569_s3 + $0x68] sm:$0xff]  }
  0x12   : > { %1261 = vmatprep.subr.bf16.mxu0 %v1361_v4  ;;  %1271 = vmatprep.subr.bf16.mxu1 %v1362_v6  ;;  %v250_v13 = vadd.f32 %v1114_v9, %v241_v10  ;;  %v251_v17 = vadd.f32 %v1114_v9, %v242_v14  ;;  %v1372_v48 = vld [vmem:[%s1569_s3 + $0x80] sm:$0xff]   ;;  %v1374_v52 = vld [vmem:[%s1569_s3 + $0x78] sm:$0xff]   ;;  %v1378_v0 = vld [vmem:[%s1569_s3 + $0xb0] sm:$0xff]  }
  0x13   : > { %v1373_v51 = vld [vmem:[%s1569_s3 + $0x60] sm:$0xff]   ;;  %v1376_v56 = vld [vmem:[%s1569_s3 + $0xb8] sm:$0xff]   ;;  %v1379_v3 = vld [vmem:[%s1569_s3 + $0x90] sm:$0xff]  }
  0x14   : > { %v252_v16 = vmax.f32 %v250_v13, 0.0  ;;  %v253_v18 = vmax.f32 %v251_v17, 0.0  ;;  %v1375_v55 = vld [vmem:[%s1569_s3 + $0xa0] sm:$0xff]   ;;  %v1377_v63 = vld [vmem:[%s1569_s3 + $0x98] sm:$0xff]   ;;  %v1381_v7 = vld [vmem:[%s1569_s3 + $0xd0] sm:$0xff]  }
  0x15   : > { %1262 = vmatpush3.bf16.msra.mxu0 %v1361_v4  ;;  %1272 = vmatpush3.bf16.msra.mxu1 %v1362_v6  ;;  %v1380_v4 = vld [vmem:[%s1569_s3 + $0xa8] sm:$0xff]   ;;  %v864_v6 = vld [vmem:[#allocation2 + $0x1d] sm:$0xff] }
  0x16   : > { %1277 = vmatprep.subr.bf16.mxu0 %v1363_v11  ;;  %255 = vst.msk [vmem:[#allocation2 + $0x7] sm:$0xf] %vm254_vm1, %v252_v16  ;;  %1287 = vmatprep.subr.bf16.mxu1 %v1364_v15  ;;  %258 = vst.msk [vmem:[#allocation2 + $0x13] sm:$0xf] %vm254_vm1, %v253_v18  ;;  %v866_v9 = vpack.c.bf16 %v864_v6, %v864_v6  ;;  %v1383_v12 = vld [vmem:[%s1569_s3 + $0xc0] sm:$0xff]  }
  0x17   : > { %257 = vst.msk [vmem:[#allocation2 + $0x9] sm:$0xf0] %vm256_vm2, %v252_v16  ;;  %259 = vst.msk [vmem:[#allocation2 + $0x15] sm:$0xf0] %vm256_vm2, %v253_v18  ;;  %v951_v13 = vld [vmem:[#allocation2 + $0x1e] sm:$0xff] }
  0x18   : > { %v953_v14 = vpack.c.bf16 %v951_v13, %v951_v13 }
  0x1d   : > { %v271_v19 = vld [vmem:[#allocation2 + $0x1] sm:$0xff]  ;;  %v273_v27 = vld [vmem:[#allocation2 + $0x11] sm:$0xff] }
  0x1e   : > { %v272_v20 = vld [vmem:[#allocation2 + $0x9] sm:$0xff]  ;;  %v260_v21 = vld [vmem:[#allocation2] sm:$0xff]  ;;  %v275_v30 = vpack.c.bf16 %v273_v27, %v273_v27  ;;  %v429_v39 = vld [vmem:[#allocation2 + $0x12] sm:$0xff] }
  0x1f   : > { %v274_v22 = vpack.c.bf16 %v272_v20, %v271_v19  ;;  %v261_v23 = vld [vmem:[#allocation2 + $0x8] sm:$0xff]  ;;  %v262_v28 = vld [vmem:[#allocation2 + $0x10] sm:$0xff]  ;;  %v431_v43 = vpack.c.bf16 %v429_v39, %v429_v39  ;;  %v690_v54 = vld [vmem:[#allocation2 + $0x18] sm:$0xff] }
  0x20   : > { %v427_v24 = vld [vmem:[#allocation2 + $0x2] sm:$0xff]  ;;  %v428_v25 = vld [vmem:[#allocation2 + $0xa] sm:$0xff]  ;;  %v263_v26 = vpack.c.bf16 %v261_v23, %v260_v21  ;;  %v264_v31 = vpack.c.bf16 %v262_v28, %v262_v28  ;;  %v1493_v40 = vld [vmem:[#allocation2 + $0x16] sm:$0xff]  ;;  %v691_v50 = vpack.c.bf16 %v262_v28, %v261_v23  ;;  %v692_v59 = vpack.c.bf16 %v690_v54, %v690_v54 }
  0x21   : > { %1263 = vmatprep.mubr.msk.bf16.mxu0 %vm226_vm0, %v274_v22  ;;  %v514_v33 = vld [vmem:[#allocation2 + $0x6] sm:$0xff]  ;;  %v1479_v34 = vld [vmem:[#allocation2 + $0xe] sm:$0xff]  ;;  %v430_v35 = vpack.c.bf16 %v428_v25, %v427_v24  ;;  %v518_v44 = vpack.c.bf16 %v1493_v40, %v1493_v40  ;;  %v603_v53 = vld [vmem:[#allocation2 + $0x17] sm:$0xff] }
  0x22   : > { %1273 = vmatprep.mubr.msk.bf16.mxu1 %vm226_vm0, %v263_v26  ;;  %v517_v36 = vpack.c.bf16 %v1479_v34, %v514_v33  ;;  %1264 = vmatmul.mubr.msk.bf16.vlgmr.msra.gmra.mxu0 %vm226_vm0, %v275_v30  ;;  %v601_v45 = vld [vmem:[#allocation2 + $0x7] sm:$0xff]  ;;  %v602_v46 = vld [vmem:[#allocation2 + $0xf] sm:$0xff]  ;;  %v605_v58 = vpack.c.bf16 %v603_v53, %v603_v53  ;;  %v777_v5 = vld [vmem:[#allocation2 + $0x1c] sm:$0xff]  ;;  %v952_v10 = vpack.c.bf16 %v1493_v40, %v1479_v34 }
  0x23   : > { %1274 = vmatmul.mubr.msk.bf16.vlgmr.msra.gmra.mxu1 %vm226_vm0, %v264_v31  ;;  %1278 = vmatpush3.bf16.msra.mxu0 %v1363_v11  ;;  %v604_v49 = vpack.c.bf16 %v602_v46, %v601_v45  ;;  %v775_v57 = vld [vmem:[#allocation2 + $0xc] sm:$0xff]  ;;  %v776_v60 = vld [vmem:[#allocation2 + $0x14] sm:$0xff]  ;;  %v779_v8 = vpack.c.bf16 %v777_v5, %v777_v5 }
  0x24   : > { %1288 = vmatpush3.bf16.msra.mxu1 %v1364_v15  ;;  %1279 = vmatprep.subr.bf16.mxu0 %v1365_v29  ;;  %v862_v61 = vld [vmem:[#allocation2 + $0xd] sm:$0xff]  ;;  %v863_v62 = vld [vmem:[#allocation2 + $0x15] sm:$0xff]  ;;  %v778_v1 = vpack.c.bf16 %v776_v60, %v775_v57 }
  0x25   : > { %1289 = vmatprep.subr.bf16.mxu1 %v1366_v32  ;;  %1283 = vmatprep.mubr.msk.bf16.mxu0 %vm226_vm0, %v430_v35  ;;  %v865_v2 = vpack.c.bf16 %v863_v62, %v862_v61  ;;  %v1382_v11 = vld [vmem:[%s1569_s3 + $0xc8] sm:$0xff]  }
  0x26   : > { %1293 = vmatprep.mubr.msk.bf16.mxu1 %vm226_vm0, %v517_v36 }
  0x27   : > { %1280 = vmatpush3.bf16.msra.mxu0 %v1365_v29 }
  0x28   : > { %1290 = vmatpush3.bf16.msra.mxu1 %v1366_v32  ;;  %1281 = vmatprep.subr.bf16.mxu0 %v1367_v37 }
  0x29   : > { %1291 = vmatprep.subr.bf16.mxu1 %v1368_v38 }
  0x2b   : > { %1282 = vmatpush3.bf16.msra.mxu0 %v1367_v37 }
  0x2c   : > { %1292 = vmatpush3.bf16.msra.mxu1 %v1368_v38  ;;  %1297 = vmatprep.subr.bf16.mxu0 %v1369_v41 }
  0x2d   : > { %1307 = vmatprep.subr.bf16.mxu1 %v1370_v42 }
  0x2e   : > { %1284 = vmatmul.mubr.msk.bf16.vlgmr.msra.gmra.mxu0 %vm226_vm0, %v431_v43 }
  0x2f   : > { %1294 = vmatmul.mubr.msk.bf16.vlgmr.msra.gmra.mxu1 %vm226_vm0, %v518_v44  ;;  %1298 = vmatpush3.bf16.msra.mxu0 %v1369_v41 }
  0x30   : > { %1308 = vmatpush3.bf16.msra.mxu1 %v1370_v42  ;;  %1299 = vmatprep.subr.bf16.mxu0 %v1371_v47 }
  0x31   : > { %1309 = vmatprep.subr.bf16.mxu1 %v1372_v48  ;;  %1303 = vmatprep.mubr.msk.bf16.mxu0 %vm226_vm0, %v604_v49 }
  0x32   : > { %1313 = vmatprep.mubr.msk.bf16.mxu1 %vm226_vm0, %v691_v50 }
  0x33   : > { %1300 = vmatpush3.bf16.msra.mxu0 %v1371_v47 }
  0x34   : > { %1310 = vmatpush3.bf16.msra.mxu1 %v1372_v48  ;;  %1301 = vmatprep.subr.bf16.mxu0 %v1373_v51 }
  0x35   : > { %1311 = vmatprep.subr.bf16.mxu1 %v1374_v52 }
  0x37   : > { %1302 = vmatpush3.bf16.msra.mxu0 %v1373_v51 }
  0x38   : > { %1312 = vmatpush3.bf16.msra.mxu1 %v1374_v52  ;;  %1317 = vmatprep.subr.bf16.mxu0 %v1375_v55 }
  0x39   : > { %1327 = vmatprep.subr.bf16.mxu1 %v1376_v56 }
  0x3a   : > { %1304 = vmatmul.mubr.msk.bf16.vlgmr.msra.gmra.mxu0 %vm226_vm0, %v605_v58 }
  0x3b   : > { %1314 = vmatmul.mubr.msk.bf16.vlgmr.msra.gmra.mxu1 %vm226_vm0, %v692_v59  ;;  %1318 = vmatpush3.bf16.msra.mxu0 %v1375_v55 }
  0x3c   : > { %1328 = vmatpush3.bf16.msra.mxu1 %v1376_v56  ;;  %1319 = vmatprep.subr.bf16.mxu0 %v1377_v63 }
  0x3d   : > { %1329 = vmatprep.subr.bf16.mxu1 %v1378_v0  ;;  %1323 = vmatprep.mubr.msk.bf16.mxu0 %vm226_vm0, %v778_v1  ;;  %v1208_v1 = vld [vmem:[%s1570_s4] ss:$0 sm:$0xff] }
  0x3e   : > { %1333 = vmatprep.mubr.msk.bf16.mxu1 %vm226_vm0, %v865_v2 }
  0x3f   : > { %1320 = vmatpush3.bf16.msra.mxu0 %v1377_v63 }
  0x40   : > { %1330 = vmatpush3.bf16.msra.mxu1 %v1378_v0  ;;  %1321 = vmatprep.subr.bf16.mxu0 %v1379_v3 }
  0x41   : > { %1331 = vmatprep.subr.bf16.mxu1 %v1380_v4 }
  0x43   : > { %1322 = vmatpush3.bf16.msra.mxu0 %v1379_v3 }
  0x44   : > { %1332 = vmatpush3.bf16.msra.mxu1 %v1380_v4  ;;  %1337 = vmatprep.subr.bf16.mxu0 %v1381_v7 }
  0x46   : > { %1324 = vmatmul.mubr.msk.bf16.vlgmr.msra.gmra.mxu0 %vm226_vm0, %v779_v8 }
  0x47   : > { %1334 = vmatmul.mubr.msk.bf16.vlgmr.msra.gmra.mxu1 %vm226_vm0, %v866_v9  ;;  %1338 = vmatpush3.bf16.msra.mxu0 %v1381_v7 }
  0x48   : > { %1343 = vmatprep.mubr.msk.bf16.mxu0 %vm226_vm0, %v952_v10  ;;  %1339 = vmatprep.subr.bf16.mxu0 %v1382_v11 }
  0x4b   : > { %1340 = vmatpush3.bf16.msra.mxu0 %v1382_v11 }
  0x4c   : > { %1341 = vmatprep.subr.bf16.mxu0 %v1383_v12 }
  0x4f   : > { %1342 = vmatpush3.bf16.msra.mxu0 %v1383_v12 }
  0x52   : > { %1344 = vmatmul.mubr.msk.bf16.vlgmr.msra.gmra.mxu0 %vm226_vm0, %v953_v14 }
  0xe2   : > { %v1265_v15 = vpop.f32.mrf.mxu0 }
  0xe3   : > { %v1275_v16 = vpop.f32.mrf.mxu1 }
  0xe4   : > { %v341_v17 = vpop.f32.mrf.mxu0  ;;  %v422_v37 = vadd.f32 %v1275_v16, %v1265_v15 }
  0xe5   : > { %v413_v18 = vpop.f32.mrf.mxu1 }
  0xe6   : > { %v1266_v19 = vpop.f32.mrf.mxu0  ;;  %v414_v38 = vadd.f32 %v413_v18, %v341_v17 }
  0xe7   : > { %v1276_v20 = vpop.f32.mrf.mxu1 }
  0xe8   : > { %v344_v21 = vpop.f32.mrf.mxu0 }
  0xe9   : > { %v416_v22 = vpop.f32.mrf.mxu1 }
  0xea   : > { %v417_v43 = vadd.f32 %v416_v22, %v344_v21 }
  0xee   : > { %v1285_v23 = vpop.f32.mrf.mxu0 }
  0xef   : > { %v1295_v24 = vpop.f32.mrf.mxu1  ;;  %v513_v39 = vadd.f32 %v1285_v23, %v422_v37 }
  0xf0   : > { %v497_v25 = vpop.f32.mrf.mxu0 }
  0xf1   : > { %v584_v26 = vpop.f32.mrf.mxu1  ;;  %v511_v40 = vadd.f32 %v497_v25, %v414_v38  ;;  %v600_v44 = vadd.f32 %v1295_v24, %v513_v39 }
  0xf2   : > { %v1286_v27 = vpop.f32.mrf.mxu0 }
  0xf3   : > { %v1296_v28 = vpop.f32.mrf.mxu1  ;;  %v598_v47 = vadd.f32 %v584_v26, %v511_v40 }
  0xf4   : > { %v500_v29 = vpop.f32.mrf.mxu0 }
  0xf5   : > { %v587_v30 = vpop.f32.mrf.mxu1  ;;  %v512_v48 = vadd.f32 %v500_v29, %v417_v43 }
  0xf7   : > { %v599_v55 = vadd.f32 %v587_v30, %v512_v48 }
  0xfa   : > { %v1305_v31 = vpop.f32.mrf.mxu0 }
  0xfb   : > { %v1315_v32 = vpop.f32.mrf.mxu1  ;;  %v687_v49 = vadd.f32 %v1305_v31, %v600_v44 }
  0xfc   : > { %v671_v33 = vpop.f32.mrf.mxu0 }
  0xfd   : > { %v758_v34 = vpop.f32.mrf.mxu1  ;;  %v685_v52 = vadd.f32 %v671_v33, %v598_v47  ;;  %v774_v56 = vadd.f32 %v1315_v32, %v687_v49 }
  0xfe   : > { %v1306_v35 = vpop.f32.mrf.mxu0 }
  0xff   : > { %v1316_v36 = vpop.f32.mrf.mxu1  ;;  %v772_v57 = vadd.f32 %v758_v34, %v685_v52 }
 0x100   : > { %v674_v41 = vpop.f32.mrf.mxu0 }
 0x101   : > { %v761_v42 = vpop.f32.mrf.mxu1  ;;  %v686_v58 = vadd.f32 %v674_v41, %v599_v55 }
 0x103   : > { %v773_v62 = vadd.f32 %v761_v42, %v686_v58 }
 0x106   : > { %v1325_v45 = vpop.f32.mrf.mxu0 }
 0x107   : > { %v1335_v46 = vpop.f32.mrf.mxu1  ;;  %v861_v59 = vadd.f32 %v1325_v45, %v774_v56 }
 0x108   : > { %v845_v50 = vpop.f32.mrf.mxu0 }
 0x109   : > { %v932_v51 = vpop.f32.mrf.mxu1  ;;  %v859_v60 = vadd.f32 %v845_v50, %v772_v57  ;;  %v948_v63 = vadd.f32 %v1335_v46, %v861_v59 }
 0x10a   : > { %v1326_v53 = vpop.f32.mrf.mxu0 }
 0x10b   : > { %v1336_v54 = vpop.f32.mrf.mxu1  ;;  %v946_v2 = vadd.f32 %v932_v51, %v859_v60 }
 0x10c   : > { %v848_v61 = vpop.f32.mrf.mxu0 }
 0x10d   : > { %v860_v3 = vadd.f32 %v848_v61, %v773_v62  ;;  %v935_v5 = vpop.f32.mrf.mxu1 }
 0x10f   : > { %v947_v10 = vadd.f32 %v935_v5, %v860_v3 }
 0x112   : > { %v1345_v0 = vpop.f32.mrf.mxu0 }
 0x113   : > { %v1035_v4 = vadd.f32 %v1345_v0, %v948_v63 }
 0x114   : > { %v1019_v6 = vpop.f32.mrf.mxu0 }
 0x115   : > { %v1045_v7 = vadd.f32 %v1208_v1, %v1035_v4  ;;  %v1033_v8 = vadd.f32 %v1019_v6, %v946_v2 }
 0x116   : > { %v1346_v9 = vpop.f32.mrf.mxu0 }
 0x117   : > { %1049 = vst.msk [vmem:[%s224_s16 + $0x10] sm:$0xff] %vm1046_vm3, %v1045_v7  ;;  %v1043_v11 = vadd.f32 %v1208_v1, %v1033_v8 }
 0x118   : > { %v1022_v12 = vpop.f32.mrf.mxu0 }
 0x119   : > { %1047 = vst.msk [vmem:[%s224_s16] sm:$0xff] %vm1046_vm3, %v1043_v11  ;;  %v1034_v13 = vadd.f32 %v1022_v12, %v947_v10 }
 0x11b   : > { %v1044_v14 = vadd.f32 %v1208_v1, %v1034_v13 }
 0x11d   : > { %1048 = vst.msk [vmem:[%s224_s16 + $0x8] sm:$0xff] %vm1046_vm3, %v1044_v14 }
 0x11e PF: > { %s15_s18 = sadd.s32 1, %s1390_s18  }
 0x11f   : > { %p12_p4 = scmp.ge.s32.totalorder %s15_s18, 4  }
 0x121   :  { %14 = sbr.rel (!%p12_p4) target bundleno = 1 (0x1), region = 78 }

// kernel: densenet_forward.32
= control target key start
LH: loop header
LB: loop body
LE: loop exit
PB: predicated region body
PF: predicated region fallthrough
CT: control target
= control target key end

     0   :  { %s1556_s18 = smov 0   ;;  %s1728_s0 = inlined_call_operand.vmem [shape: f32[2,16,64], index: 0, kind: input, shape index: {}]   ;;  %s1729_s1 = inlined_call_operand.vmem [shape: f32[1,64], index: 1, kind: input, shape index: {}]   ;;  %s1730_s2 = inlined_call_operand.vmem [shape: f32[1,64], index: 2, kind: input, shape index: {}]   ;;  %s1731_s3 = inlined_call_operand.vmem [shape: bf16[9,64,16], index: 3, kind: input, shape index: {}]   ;;  %s1732_s4 = inlined_call_operand.vmem [shape: f32[1,16], index: 4, kind: input, shape index: {}]   ;;  %s1733_s5 = inlined_call_operand.vmem [shape: f32[2,24,16], index: 5, kind: output, shape index: {}]  }
   0x1 LB: > { %s1177_s19 = sadd.s32 4294967295, %s1523_s18   ;;  %p1181_p0 = scmp.ge.s32.totalorder %s1523_s18, 1  ;;  %s1523_s18 = sphi %s1556_s18, %s15_s18  }
   0x2   : > { %p187_p1 = scmp.lt.s32.totalorder %s1523_s18, 3 }
   0x4   : > { %p188_p2 = pnand %p1181_p0, %p187_p1 }
   0x5   : > { %p215_p3 = scmp.lt.s32.totalorder (!%p188_p2), %s1177_s19, 1 }
   0x6   : > { %191 = sbr.rel (%p188_p2) target bundleno = 302 (0x12e), region = 40 }
   0xb   : > { %v1481_v0 = vld [vmem:[%s1731_s3 + $0x38] sm:$0xff]   ;;  %vm226_vm0 = vcmask 523264   ;;  %v1483_v2 = vld [vmem:[%s1731_s3 + $0x30] sm:$0xff]   ;;  %s1735_s19 = smov (!%p215_p3, %s1177_s19), 1  ;;  %v1485_v4 = vld [vmem:[%s1731_s3 + $0x28] sm:$0xff]   ;;  %v1525_v5 = vmov 0.0  }
   0xc   : > { %v1482_v1 = vld [vmem:[%s1731_s3 + $0x18] sm:$0xff]   ;;  %1363 = vmatprep.subr.bf16.mxu0 %v1481_v0  ;;  %v1484_v3 = vld [vmem:[%s1731_s3 + $0x10] sm:$0xff]   ;;  %s1308_s30 = sshll.u32 %s1735_s19, 4  ;;  %227 = vst.msk [vmem:[#allocation2] sm:$0xff] %vm226_vm0, %v1525_v5  ;;  %228 = vst.msk [vmem:[#allocation2 + $0x8] sm:$0xff] %vm226_vm0, %v1525_v5  ;;  %vm254_vm1 = vcmask 519168  }
   0xd   : > { %1364 = vmatpush3.bf16.msra.mxu0 %v1481_v0  ;;  %1375 = vmatprep.subr.bf16.mxu1 %v1482_v1  ;;  %229 = vst.msk [vmem:[#allocation2 + $0x10] sm:$0xff] %vm226_vm0, %v1525_v5  ;;  %230 = vst.msk [vmem:[#allocation2 + $0x18] sm:$0xff] %vm226_vm0, %v1525_v5  ;;  %v1486_v6 = vld [vmem:[%s1731_s3 + $0x8] sm:$0xff]   ;;  %s219_s10 = scalar_lea.vmem %s1728_s0, %s1308_s30  ;;  %v1487_v7 = vld [vmem:[%s1731_s3 + $0x20] sm:$0xff]   ;;  %vm256_vm2 = vcmask 523268   ;;  %s1471_s6 = smul.u32 24, %s1735_s19 }
   0xe   : > { %1376 = vmatpush3.bf16.msra.mxu1 %v1482_v1  ;;  %1365 = vmatprep.subr.bf16.mxu0 %v1483_v2  ;;  %231 = vst.msk [vmem:[#allocation2 + $0x20] sm:$0xff] %vm226_vm0, %v1525_v5  ;;  %v232_v8 = vld [vmem:[%s219_s10] sm:$0xff]  ;;  %v233_v13 = vld [vmem:[%s219_s10 + $0x8] sm:$0xff]  ;;  %v1489_v16 = vld [vmem:[%s1731_s3 + $0x58] sm:$0xff]   ;;  %vm1118_vm3 = vcmask 130048  }
   0xf   : > { %1377 = vmatprep.subr.bf16.mxu1 %v1484_v3  ;;  %v1185_v9 = vld [vmem:[%s1729_s1] ss:$0 sm:$0xff]  ;;  %v1490_v19 = vld [vmem:[%s1731_s3 + $0x78] sm:$0xff]   ;;  %v1491_v31 = vld [vmem:[%s1731_s3 + $0x50] sm:$0xff]   ;;  %s224_s11 = scalar_lea.vmem %s1733_s5, %s1471_s6 }
  0x10   : > { %v1186_v10 = vld [vmem:[%s1730_s2] ss:$0 sm:$0xff]  ;;  %v241_v12 = vmul.f32 %v1185_v9, %v232_v8  ;;  %v242_v15 = vmul.f32 %v1185_v9, %v233_v13  ;;  %v1492_v34 = vld [vmem:[%s1731_s3 + $0x70] sm:$0xff]   ;;  %v1493_v39 = vld [vmem:[%s1731_s3 + $0x48] sm:$0xff]  }
  0x11   : > { %1366 = vmatpush3.bf16.msra.mxu0 %v1483_v2  ;;  %v1488_v11 = vld [vmem:[%s1731_s3] sm:$0xff]   ;;  %v1494_v40 = vld [vmem:[%s1731_s3 + $0x68] sm:$0xff]   ;;  %v1497_v44 = vld [vmem:[%s1731_s3 + $0x98] sm:$0xff]  }
  0x12   : > { %1378 = vmatpush3.bf16.msra.mxu1 %v1484_v3  ;;  %1367 = vmatprep.subr.bf16.mxu0 %v1485_v4  ;;  %v250_v14 = vadd.f32 %v1186_v10, %v241_v12  ;;  %v251_v18 = vadd.f32 %v1186_v10, %v242_v15  ;;  %v1495_v41 = vld [vmem:[%s1731_s3 + $0x40] sm:$0xff]   ;;  %v1498_v46 = vld [vmem:[%s1731_s3 + $0xb8] sm:$0xff]   ;;  %v1499_v51 = vld [vmem:[%s1731_s3 + $0x90] sm:$0xff]  }
  0x13   : > { %1379 = vmatprep.subr.bf16.mxu1 %v1486_v6  ;;  %v1496_v42 = vld [vmem:[%s1731_s3 + $0x60] sm:$0xff]   ;;  %v1500_v52 = vld [vmem:[%s1731_s3 + $0xb0] sm:$0xff]   ;;  %v1501_v55 = vld [vmem:[%s1731_s3 + $0x88] sm:$0xff]  }
  0x14   : > { %v252_v17 = vmax.f32 %v250_v14, 0.0  ;;  %v253_v20 = vmax.f32 %v251_v18, 0.0  ;;  %v1502_v56 = vld [vmem:[%s1731_s3 + $0xa8] sm:$0xff]   ;;  %v1503_v57 = vld [vmem:[%s1731_s3 + $0x80] sm:$0xff]   ;;  %v1505_v61 = vld [vmem:[%s1731_s3 + $0xd8] sm:$0xff]  }
  0x15   : > { %1368 = vmatpush3.bf16.msra.mxu0 %v1485_v4  ;;  %v1504_v58 = vld [vmem:[%s1731_s3 + $0xa0] sm:$0xff]   ;;  %v1506_v62 = vld [vmem:[%s1731_s3 + $0xf8] sm:$0xff]   ;;  %v1507_v5 = vld [vmem:[%s1731_s3 + $0xd0] sm:$0xff]  }
  0x16   : > { %1380 = vmatpush3.bf16.msra.mxu1 %v1486_v6  ;;  %1369 = vmatprep.subr.bf16.mxu0 %v1487_v7  ;;  %255 = vst.msk [vmem:[#allocation2 + $0x7] sm:$0xf] %vm254_vm1, %v252_v17  ;;  %258 = vst.msk [vmem:[#allocation2 + $0x13] sm:$0xf] %vm254_vm1, %v253_v20  ;;  %v1508_v6 = vld [vmem:[%s1731_s3 + $0xf0] sm:$0xff]   ;;  %v1509_v9 = vld [vmem:[%s1731_s3 + $0xc8] sm:$0xff]  }
  0x17   : > { %1381 = vmatprep.subr.bf16.mxu1 %v1488_v11  ;;  %257 = vst.msk [vmem:[#allocation2 + $0x9] sm:$0xf0] %vm256_vm2, %v252_v17  ;;  %259 = vst.msk [vmem:[#allocation2 + $0x15] sm:$0xf0] %vm256_vm2, %v253_v20  ;;  %v1510_v10 = vld [vmem:[%s1731_s3 + $0xe8] sm:$0xff]   ;;  %v1512_v12 = vld [vmem:[%s1731_s3 + $0xe0] sm:$0xff]  }
  0x18   : > { %v920_v14 = vld [vmem:[#allocation2 + $0x1d] sm:$0xff]  ;;  %v1515_v20 = vld [vmem:[%s1731_s3 + $0x108] sm:$0xff]  }
  0x19   : > { %1370 = vmatpush3.bf16.msra.mxu0 %v1487_v7  ;;  %v1513_v15 = vld [vmem:[%s1731_s3 + $0x118] sm:$0xff]   ;;  %v922_v17 = vpack.c.bf16 %v920_v14, %v920_v14 }
  0x1a   : > { %1382 = vmatpush3.bf16.msra.mxu1 %v1488_v11  ;;  %1387 = vmatprep.subr.bf16.mxu0 %v1489_v16  ;;  %v1511_v11 = vld [vmem:[%s1731_s3 + $0xc0] sm:$0xff]  }
  0x1b   : > { %1399 = vmatprep.subr.bf16.mxu1 %v1490_v19 }
  0x1d   : > { %v273_v21 = vld [vmem:[#allocation2 + $0x1] sm:$0xff]  ;;  %v275_v29 = vld [vmem:[#allocation2 + $0x11] sm:$0xff] }
  0x1e   : > { %v274_v22 = vld [vmem:[#allocation2 + $0x9] sm:$0xff]  ;;  %v260_v23 = vld [vmem:[#allocation2] sm:$0xff]  ;;  %v277_v32 = vpack.c.bf16 %v275_v29, %v275_v29  ;;  %v445_v43 = vld [vmem:[#allocation2 + $0x12] sm:$0xff] }
  0x1f   : > { %v276_v24 = vpack.c.bf16 %v274_v22, %v273_v21  ;;  %v261_v25 = vld [vmem:[#allocation2 + $0x8] sm:$0xff]  ;;  %v262_v30 = vld [vmem:[#allocation2 + $0x10] sm:$0xff]  ;;  %v447_v47 = vpack.c.bf16 %v445_v43, %v445_v43  ;;  %v730_v60 = vld [vmem:[#allocation2 + $0x18] sm:$0xff] }
  0x20   : > { %v443_v26 = vld [vmem:[#allocation2 + $0x2] sm:$0xff]  ;;  %v444_v27 = vld [vmem:[#allocation2 + $0xa] sm:$0xff]  ;;  %v263_v28 = vpack.c.bf16 %v261_v25, %v260_v23  ;;  %v264_v33 = vpack.c.bf16 %v262_v30, %v262_v30  ;;  %v1643_v45 = vld [vmem:[#allocation2 + $0x16] sm:$0xff]  ;;  %v731_v54 = vpack.c.bf16 %v262_v30, %v261_v25  ;;  %v732_v1 = vpack.c.bf16 %v730_v60, %v730_v60 }
  0x21   : > { %1371 = vmatprep.mubr.msk.bf16.mxu0 %vm226_vm0, %v276_v24  ;;  %v538_v35 = vld [vmem:[#allocation2 + $0x6] sm:$0xff]  ;;  %v1620_v36 = vld [vmem:[#allocation2 + $0xe] sm:$0xff]  ;;  %v446_v37 = vpack.c.bf16 %v444_v27, %v443_v26  ;;  %v542_v48 = vpack.c.bf16 %v1643_v45, %v1643_v45  ;;  %v635_v59 = vld [vmem:[#allocation2 + $0x17] sm:$0xff] }
  0x22   : > { %1383 = vmatprep.mubr.msk.bf16.mxu1 %vm226_vm0, %v263_v28  ;;  %v541_v38 = vpack.c.bf16 %v1620_v36, %v538_v35  ;;  %1372 = vmatmul.mubr.msk.bf16.vlgmr.msra.gmra.mxu0 %vm226_vm0, %v277_v32  ;;  %v633_v49 = vld [vmem:[#allocation2 + $0x7] sm:$0xff]  ;;  %v634_v50 = vld [vmem:[#allocation2 + $0xf] sm:$0xff]  ;;  %v637_v0 = vpack.c.bf16 %v635_v59, %v635_v59  ;;  %v825_v13 = vld [vmem:[#allocation2 + $0x1c] sm:$0xff]  ;;  %v1016_v18 = vpack.c.bf16 %v1643_v45, %v1620_v36 }
  0x23   : > { %1384 = vmatmul.mubr.msk.bf16.vlgmr.msra.gmra.mxu1 %vm226_vm0, %v264_v33  ;;  %1388 = vmatpush3.bf16.msra.mxu0 %v1489_v16  ;;  %v636_v53 = vpack.c.bf16 %v634_v50, %v633_v49  ;;  %v823_v63 = vld [vmem:[#allocation2 + $0xc] sm:$0xff]  ;;  %v824_v2 = vld [vmem:[#allocation2 + $0x14] sm:$0xff]  ;;  %v827_v16 = vpack.c.bf16 %v825_v13, %v825_v13  ;;  %v1516_v21 = vld [vmem:[%s1731_s3 + $0x100] sm:$0xff]  }
  0x24   : > { %1400 = vmatpush3.bf16.msra.mxu1 %v1490_v19  ;;  %1389 = vmatprep.subr.bf16.mxu0 %v1491_v31  ;;  %v918_v3 = vld [vmem:[#allocation2 + $0xd] sm:$0xff]  ;;  %v919_v4 = vld [vmem:[#allocation2 + $0x15] sm:$0xff]  ;;  %v826_v7 = vpack.c.bf16 %v824_v2, %v823_v63  ;;  %v1015_v22 = vld [vmem:[#allocation2 + $0x1e] sm:$0xff] }
  0x25   : > { %1401 = vmatprep.subr.bf16.mxu1 %v1492_v34  ;;  %1395 = vmatprep.mubr.msk.bf16.mxu0 %vm226_vm0, %v446_v37  ;;  %v921_v8 = vpack.c.bf16 %v919_v4, %v918_v3  ;;  %v1514_v19 = vld [vmem:[%s1731_s3 + $0x110] sm:$0xff]   ;;  %v1017_v23 = vpack.c.bf16 %v1015_v22, %v1015_v22 }
  0x26   : > { %1407 = vmatprep.mubr.msk.bf16.mxu1 %vm226_vm0, %v541_v38 }
  0x27   : > { %1390 = vmatpush3.bf16.msra.mxu0 %v1491_v31 }
  0x28   : > { %1402 = vmatpush3.bf16.msra.mxu1 %v1492_v34  ;;  %1391 = vmatprep.subr.bf16.mxu0 %v1493_v39 }
  0x29   : > { %1403 = vmatprep.subr.bf16.mxu1 %v1494_v40 }
  0x2b   : > { %1392 = vmatpush3.bf16.msra.mxu0 %v1493_v39 }
  0x2c   : > { %1404 = vmatpush3.bf16.msra.mxu1 %v1494_v40  ;;  %1393 = vmatprep.subr.bf16.mxu0 %v1495_v41 }
  0x2d   : > { %1405 = vmatprep.subr.bf16.mxu1 %v1496_v42 }
  0x2f   : > { %1394 = vmatpush3.bf16.msra.mxu0 %v1495_v41 }
  0x30   : > { %1406 = vmatpush3.bf16.msra.mxu1 %v1496_v42  ;;  %1411 = vmatprep.subr.bf16.mxu0 %v1497_v44 }
  0x31   : > { %1423 = vmatprep.subr.bf16.mxu1 %v1498_v46 }
  0x32   : > { %1396 = vmatmul.mubr.msk.bf16.vlgmr.msra.gmra.mxu0 %vm226_vm0, %v447_v47 }
  0x33   : > { %1408 = vmatmul.mubr.msk.bf16.vlgmr.msra.gmra.mxu1 %vm226_vm0, %v542_v48  ;;  %1412 = vmatpush3.bf16.msra.mxu0 %v1497_v44 }
  0x34   : > { %1424 = vmatpush3.bf16.msra.mxu1 %v1498_v46  ;;  %1413 = vmatprep.subr.bf16.mxu0 %v1499_v51 }
  0x35   : > { %1425 = vmatprep.subr.bf16.mxu1 %v1500_v52  ;;  %1419 = vmatprep.mubr.msk.bf16.mxu0 %vm226_vm0, %v636_v53 }
  0x36   : > { %1431 = vmatprep.mubr.msk.bf16.mxu1 %vm226_vm0, %v731_v54 }
  0x37   : > { %1414 = vmatpush3.bf16.msra.mxu0 %v1499_v51 }
  0x38   : > { %1426 = vmatpush3.bf16.msra.mxu1 %v1500_v52  ;;  %1415 = vmatprep.subr.bf16.mxu0 %v1501_v55 }
  0x39   : > { %1427 = vmatprep.subr.bf16.mxu1 %v1502_v56 }
  0x3b   : > { %1416 = vmatpush3.bf16.msra.mxu0 %v1501_v55 }
  0x3c   : > { %1428 = vmatpush3.bf16.msra.mxu1 %v1502_v56  ;;  %1417 = vmatprep.subr.bf16.mxu0 %v1503_v57 }
  0x3d   : > { %1429 = vmatprep.subr.bf16.mxu1 %v1504_v58 }
  0x3f   : > { %1418 = vmatpush3.bf16.msra.mxu0 %v1503_v57 }
  0x40   : > { %1430 = vmatpush3.bf16.msra.mxu1 %v1504_v58  ;;  %1435 = vmatprep.subr.bf16.mxu0 %v1505_v61 }
  0x41   : > { %1447 = vmatprep.subr.bf16.mxu1 %v1506_v62 }
  0x42   : > { %1420 = vmatmul.mubr.msk.bf16.vlgmr.msra.gmra.mxu0 %vm226_vm0, %v637_v0 }
  0x43   : > { %1432 = vmatmul.mubr.msk.bf16.vlgmr.msra.gmra.mxu1 %vm226_vm0, %v732_v1  ;;  %1436 = vmatpush3.bf16.msra.mxu0 %v1505_v61 }
  0x44   : > { %1448 = vmatpush3.bf16.msra.mxu1 %v1506_v62  ;;  %1437 = vmatprep.subr.bf16.mxu0 %v1507_v5 }
  0x45   : > { %1449 = vmatprep.subr.bf16.mxu1 %v1508_v6  ;;  %1443 = vmatprep.mubr.msk.bf16.mxu0 %vm226_vm0, %v826_v7 }
  0x46   : > { %1455 = vmatprep.mubr.msk.bf16.mxu1 %vm226_vm0, %v921_v8 }
  0x47   : > { %1438 = vmatpush3.bf16.msra.mxu0 %v1507_v5 }
  0x48   : > { %1450 = vmatpush3.bf16.msra.mxu1 %v1508_v6  ;;  %1439 = vmatprep.subr.bf16.mxu0 %v1509_v9 }
  0x49   : > { %1451 = vmatprep.subr.bf16.mxu1 %v1510_v10 }
  0x4b   : > { %1440 = vmatpush3.bf16.msra.mxu0 %v1509_v9 }
  0x4c   : > { %1452 = vmatpush3.bf16.msra.mxu1 %v1510_v10  ;;  %1441 = vmatprep.subr.bf16.mxu0 %v1511_v11  ;;  %v1305_v10 = vld [vmem:[%s1732_s4] ss:$0 sm:$0xff] }
  0x4d   : > { %1453 = vmatprep.subr.bf16.mxu1 %v1512_v12 }
  0x4f   : > { %1442 = vmatpush3.bf16.msra.mxu0 %v1511_v11 }
  0x50   : > { %1454 = vmatpush3.bf16.msra.mxu1 %v1512_v12  ;;  %1459 = vmatprep.subr.bf16.mxu0 %v1513_v15 }
  0x52   : > { %1444 = vmatmul.mubr.msk.bf16.vlgmr.msra.gmra.mxu0 %vm226_vm0, %v827_v16 }
  0x53   : > { %1456 = vmatmul.mubr.msk.bf16.vlgmr.msra.gmra.mxu1 %vm226_vm0, %v922_v17  ;;  %1460 = vmatpush3.bf16.msra.mxu0 %v1513_v15 }
  0x54   : > { %1467 = vmatprep.mubr.msk.bf16.mxu0 %vm226_vm0, %v1016_v18  ;;  %1461 = vmatprep.subr.bf16.mxu0 %v1514_v19 }
  0x57   : > { %1462 = vmatpush3.bf16.msra.mxu0 %v1514_v19 }
  0x58   : > { %1463 = vmatprep.subr.bf16.mxu0 %v1515_v20 }
  0x5b   : > { %1464 = vmatpush3.bf16.msra.mxu0 %v1515_v20 }
  0x5c   : > { %1465 = vmatprep.subr.bf16.mxu0 %v1516_v21 }
  0x5f   : > { %1466 = vmatpush3.bf16.msra.mxu0 %v1516_v21 }
  0x62   : > { %1468 = vmatmul.mubr.msk.bf16.vlgmr.msra.gmra.mxu0 %vm226_vm0, %v1017_v23 }
  0xe2   : > { %v1373_v24 = vpop.f32.mrf.mxu0 }
  0xe3   : > { %v1385_v25 = vpop.f32.mrf.mxu1 }
  0xe4   : > { %v351_v26 = vpop.f32.mrf.mxu0  ;;  %v438_v46 = vadd.f32 %v1385_v25, %v1373_v24 }
  0xe5   : > { %v429_v27 = vpop.f32.mrf.mxu1 }
  0xe6   : > { %v1374_v28 = vpop.f32.mrf.mxu0  ;;  %v430_v49 = vadd.f32 %v429_v27, %v351_v26 }
  0xe7   : > { %v1386_v29 = vpop.f32.mrf.mxu1 }
  0xe8   : > { %v354_v30 = vpop.f32.mrf.mxu0 }
  0xe9   : > { %v432_v31 = vpop.f32.mrf.mxu1 }
  0xea   : > { %v433_v56 = vadd.f32 %v432_v31, %v354_v30 }
  0xf2   : > { %v1397_v32 = vpop.f32.mrf.mxu0 }
  0xf3   : > { %v1409_v33 = vpop.f32.mrf.mxu1  ;;  %v537_v50 = vadd.f32 %v1397_v32, %v438_v46 }
  0xf4   : > { %v521_v34 = vpop.f32.mrf.mxu0 }
  0xf5   : > { %v616_v35 = vpop.f32.mrf.mxu1  ;;  %v535_v53 = vadd.f32 %v521_v34, %v430_v49  ;;  %v632_v57 = vadd.f32 %v1409_v33, %v537_v50 }
  0xf6   : > { %v1398_v36 = vpop.f32.mrf.mxu0 }
  0xf7   : > { %v1410_v37 = vpop.f32.mrf.mxu1  ;;  %v630_v60 = vadd.f32 %v616_v35, %v535_v53 }
  0xf8   : > { %v524_v38 = vpop.f32.mrf.mxu0 }
  0xf9   : > { %v619_v39 = vpop.f32.mrf.mxu1  ;;  %v536_v61 = vadd.f32 %v524_v38, %v433_v56 }
  0xfb   : > { %v631_v0 = vadd.f32 %v619_v39, %v536_v61 }
 0x102   : > { %v1421_v40 = vpop.f32.mrf.mxu0 }
 0x103   : > { %v1433_v41 = vpop.f32.mrf.mxu1  ;;  %v727_v62 = vadd.f32 %v1421_v40, %v632_v57 }
 0x104   : > { %v711_v42 = vpop.f32.mrf.mxu0 }
 0x105   : > { %v806_v43 = vpop.f32.mrf.mxu1  ;;  %v725_v63 = vadd.f32 %v711_v42, %v630_v60  ;;  %v822_v1 = vadd.f32 %v1433_v41, %v727_v62 }
 0x106   : > { %v1422_v44 = vpop.f32.mrf.mxu0 }
 0x107   : > { %v1434_v45 = vpop.f32.mrf.mxu1  ;;  %v820_v2 = vadd.f32 %v806_v43, %v725_v63 }
 0x108   : > { %v714_v47 = vpop.f32.mrf.mxu0 }
 0x109   : > { %v809_v48 = vpop.f32.mrf.mxu1  ;;  %v726_v3 = vadd.f32 %v714_v47, %v631_v0 }
 0x10b   : > { %v821_v7 = vadd.f32 %v809_v48, %v726_v3 }
 0x112   : > { %v1445_v51 = vpop.f32.mrf.mxu0 }
 0x113   : > { %v1457_v52 = vpop.f32.mrf.mxu1  ;;  %v917_v4 = vadd.f32 %v1445_v51, %v822_v1 }
 0x114   : > { %v901_v54 = vpop.f32.mrf.mxu0 }
 0x115   : > { %v996_v55 = vpop.f32.mrf.mxu1  ;;  %v915_v5 = vadd.f32 %v901_v54, %v820_v2  ;;  %v1012_v8 = vadd.f32 %v1457_v52, %v917_v4 }
 0x116   : > { %v1446_v58 = vpop.f32.mrf.mxu0 }
 0x117   : > { %v1458_v59 = vpop.f32.mrf.mxu1  ;;  %v1010_v11 = vadd.f32 %v996_v55, %v915_v5 }
 0x118   : > { %v904_v6 = vpop.f32.mrf.mxu0 }
 0x119   : > { %v916_v12 = vadd.f32 %v904_v6, %v821_v7  ;;  %v999_v14 = vpop.f32.mrf.mxu1 }
 0x11b   : > { %v1011_v19 = vadd.f32 %v999_v14, %v916_v12 }
 0x122   : > { %v1469_v9 = vpop.f32.mrf.mxu0 }
 0x123   : > { %v1107_v13 = vadd.f32 %v1469_v9, %v1012_v8 }
 0x124   : > { %v1091_v15 = vpop.f32.mrf.mxu0 }
 0x125   : > { %v1117_v16 = vadd.f32 %v1305_v10, %v1107_v13  ;;  %v1105_v17 = vadd.f32 %v1091_v15, %v1010_v11 }
 0x126   : > { %v1470_v18 = vpop.f32.mrf.mxu0 }
 0x127   : > { %1121 = vst.msk [vmem:[%s224_s11 + $0x10] sm:$0xff] %vm1118_vm3, %v1117_v16  ;;  %v1115_v20 = vadd.f32 %v1305_v10, %v1105_v17 }
 0x128   : > { %v1094_v21 = vpop.f32.mrf.mxu0 }
 0x129   : > { %1119 = vst.msk [vmem:[%s224_s11] sm:$0xff] %vm1118_vm3, %v1115_v20  ;;  %v1106_v22 = vadd.f32 %v1094_v21, %v1011_v19 }
 0x12b   : > { %v1116_v23 = vadd.f32 %v1305_v10, %v1106_v22 }
 0x12d   : > { %1120 = vst.msk [vmem:[%s224_s11 + $0x8] sm:$0xff] %vm1118_vm3, %v1116_v23 }
 0x12e PF: > { %s15_s18 = sadd.s32 1, %s1523_s18  }
 0x12f   : > { %p12_p4 = scmp.ge.s32.totalorder %s15_s18, 4  }
 0x131   :  { %14 = sbr.rel (!%p12_p4) target bundleno = 1 (0x1), region = 78 }

// kernel: densenet_forward.34
= control target key start
LH: loop header
LB: loop body
LE: loop exit
PB: predicated region body
PF: predicated region fallthrough
CT: control target
= control target key end

     0   :  { %s298_s12 = smov 0   ;;  %s321_s0 = inlined_call_operand.vmem [shape: f32[2,16,80], index: 0, kind: input, shape index: {}]   ;;  %s322_s1 = inlined_call_operand.vmem [shape: f32[1,80], index: 1, kind: input, shape index: {}]   ;;  %s323_s2 = inlined_call_operand.vmem [shape: f32[1,80], index: 2, kind: input, shape index: {}]   ;;  %s324_s3 = inlined_call_operand.vmem [shape: f32[2,1,80], index: 3, kind: output, shape index: {}]  }
   0x1 LB: > { %s250_s13 = sadd.s32 4294967295, %s276_s12   ;;  %p254_p0 = scmp.ge.s32.totalorder %s276_s12, 1  ;;  %s276_s12 = sphi %s298_s12, %s13_s12  }
   0x2   : > { %p137_p1 = scmp.lt.s32.totalorder %s276_s12, 3 }
   0x4   : > { %p138_p2 = pnand %p254_p0, %p137_p1 }
   0x5   : > { %p159_p3 = scmp.lt.s32.totalorder (!%p138_p2), %s250_s13, 1 }
   0x6   : > { %141 = sbr.rel (%p138_p2) target bundleno = 39 (0x27), region = 32 }
   0xb   : > { %s326_s13 = smov (!%p159_p3, %s250_s13), 1  ;;  %v257_v0 = vld [vmem:[%s322_s1] ss:$0 sm:$0xff]  ;;  %vm189_vm0 = vcmask 654336   ;;  %vm201_vm1 = vcmask 647168  }
   0xc   : > { %s261_s14 = sshll.u32 %s326_s13, 4  ;;  %v258_v3 = vld [vmem:[%s323_s2] ss:$0 sm:$0xff]  ;;  %s166_s24 = scalar_lea.vmem %s324_s3, %s326_s13 }
   0xd   : > { %s163_s19 = scalar_lea.vmem %s321_s0, %s261_s14 }
   0xe   : > { %v167_v1 = vld [vmem:[%s163_s19] sm:$0xff]  ;;  %v168_v2 = vld [vmem:[%s163_s19 + $0x8] sm:$0xff] }
   0xf   : > { %v176_v4 = vmul.f32 %v257_v0, %v167_v1  ;;  %v177_v5 = vmul.f32 %v257_v0, %v168_v2 }
  0x11   : > { %v185_v6 = vadd.f32 %v258_v3, %v176_v4  ;;  %v186_v7 = vadd.f32 %v258_v3, %v177_v5 }
  0x13   : > { %v187_v8 = vmax.f32 %v185_v6, 0.0  ;;  %v188_v9 = vmax.f32 %v186_v7, 0.0 }
  0x15   : > { %v190_v10 = vsel %vm189_vm0, %v187_v8, 0.0  ;;  %v191_v11 = vsel %vm189_vm0, %v188_v9, 0.0 }
  0x16   : > { %v192_v12 = vadd.f32 %v191_v11, %v190_v10 }
  0x18   : > { %v193_v13 = vrot.slane %v192_v12, 4 }
  0x1a   : > { %v194_v14 = vadd.f32 %v193_v13, %v192_v12 }
  0x1c   : > { %v195_v15 = vrot.slane %v194_v14, 2 }
  0x1e   : > { %v196_v16 = vadd.f32 %v195_v15, %v194_v14 }
  0x20   : > { %v197_v17 = vrot.slane %v196_v16, 1 }
  0x22   : > { %v198_v18 = vadd.f32 %v197_v17, %v196_v16 }
  0x24   : > { %v200_v19 = vmul.f32 0.0625, %v198_v18 }
  0x26   : > { %202 = vst.msk [vmem:[%s166_s24] sm:$0x1] %vm201_vm1, %v200_v19 }
  0x27 PF: > { %s13_s12 = sadd.s32 1, %s276_s12  }
  0x28   : > { %p10_p4 = scmp.ge.s32.totalorder %s13_s12, 4  }
  0x2a   :  { %12 = sbr.rel (!%p10_p4) target bundleno = 1 (0x1), region = 62 }

// kernel: densenet_forward.35
= control target key start
LH: loop header
LB: loop body
LE: loop exit
PB: predicated region body
PF: predicated region fallthrough
CT: control target
= control target key end

     0   :  { %v182_v1 = vmov 0.0   ;;  %vm183_vm0 = vmmov 0   ;;  %s229_s0 = inlined_call_operand.vmem [shape: f32[2,80], index: 0, kind: input, shape index: {}]   ;;  %s230_s1 = inlined_call_operand.vmem [shape: bf16[80,10], index: 1, kind: input, shape index: {}]   ;;  %s231_s2 = inlined_call_operand.vmem [shape: f32[1,10], index: 2, kind: input, shape index: {}]   ;;  %s232_s3 = inlined_call_operand.hbm [shape: f32[2,10], index: 3, kind: output, shape index: {}]  }
   0x1   :  { %v155_v0 = vld [vmem:[%s230_s1 + $0x20] sm:$0xff]   ;;  %138 = vmatprep.subr.bf16.mxu0 %v182_v1  ;;  %v156_v2 = vld [vmem:[%s230_s1 + $0x18] sm:$0xff]   ;;  %148 = vmatprep.mubr.msk.bf16.mxu0 %vm183_vm0, %v182_v1 }
   0x2   :  { %139 = vmatpush3.bf16.msra.mxu0 %v155_v0 }
   0x3   :  { %140 = vmatprep.subr.bf16.mxu0 %v182_v1 }
   0x4   :  { %8 = vsyncpa [#allocation3], 0  ;;  %v157_v3 = vld [vmem:[%s230_s1 + $0x10] sm:$0xff]   ;;  %v158_v4 = vld [vmem:[%s230_s1 + $0x8] sm:$0xff]   ;;  %vm65_vm1 = vcmask 654336   ;;  %s184_s26 = smov [#allocation2]  }
   0x5   :  { %v159_v5 = vld [vmem:[%s230_s1] sm:$0xff]   ;;  %s117_s27 = sshll.u32 %s184_s26, 4  ;;  %vm109_vm2 = vcmask 74752   ;;  %s118_s27 = int_to_ptr.vmem [resolvable:$true] %s117_s27 }
   0x6   :  { %141 = vmatpush3.bf16.msra.mxu0 %v156_v2  ;;  %v16_v6 = vld [vmem:[%s229_s0] sm:$0x3]  ;;  %s160_s1 = scalar_lea.vmem %s118_s27, 32  ;;  %p165_p1 = scmp.lt.s32.totalorder %s118_s27, %s118_s27 }
   0x7   :  { %142 = vmatprep.subr.bf16.mxu0 %v182_v1  ;;  %v17_v7 = vpack.c.bf16 %v16_v6, %v16_v6  ;;  %v125_v8 = vld [vmem:[%s231_s2] ss:$0 sm:$0xff]  ;;  %p161_p0 = scmp.ne.s32.totalorder %s118_s27, %s160_s1  ;;  %p166_p2 = scmp.lt.s32.totalorder %s160_s1, %s160_s1 }
   0x9   :  { %p167_p3 = por %p166_p2, %p165_p1 }
   0xa   :  { %143 = vmatpush3.bf16.msra.mxu0 %v157_v3 }
   0xb   :  { %144 = vmatprep.subr.bf16.mxu0 %v182_v1  ;;  %p168_p4 = pnand %p167_p3, %p161_p0 }
   0xe   :  { %145 = vmatpush3.bf16.msra.mxu0 %v158_v4 }
   0xf   :  { %146 = vmatprep.subr.bf16.mxu0 %v182_v1 }
  0x12   :  { %147 = vmatpush3.bf16.msra.mxu0 %v159_v5 }
  0x15   :  { %149 = vmatmul.mubr.msk.bf16.vlgmr.msra.gmra.mxu0 %vm65_vm1, %v17_v7 }
  0xd5   :  { %v103_v9 = vpop.f32.mrf.mxu0 }
  0xd6   :  { %v104_v10 = vadd.f32 %v125_v8, %v103_v9 }
  0xd7   :  { %v150_v11 = vpop.f32.mrf.mxu0 }
  0xd8   :  { %110 = vst.msk [vmem:[#allocation2] sm:$0x3] %vm109_vm2, %v104_v10 }
  0xd9   :  { %v106_v12 = vpop.f32.mrf.mxu0 }
  0xda   :  { %171 = shalt.err (!%p168_p4)
}
  0xdb   :  { %120 = dma.vmem_to_hbm [thread:$0]  %s118_s27, 32, %s232_s3, [#allocation3]   ;;  %v151_v13 = vpop.f32.mrf.mxu0 }
  0xdc   :  { %180 = dma.done.wait [#allocation3], 32  }
  0xdd   :  { %181 = vsyncadd [#allocation3], 4294967264 }
  0xde   :  { %124 = vsyncpa [#allocation3], 1 }

</bundles_post_ra>
